<compile_context>
chip_gen: v7x
topology: tpu7x:2x2x1
jax: 0.10.0
libtpu: 0.0.40
codegen_flags: <defaults>
</compile_context>

<pallas_src>
import jax
import jax.numpy as jnp
import numpy as np
from jax.experimental import pallas as pl
from jax.experimental.pallas import tpu as pltpu

# ---------------------------------------------------------------------------
# Model hyper-parameters (constructor defaults of CrossNetDecoderV2)
# ---------------------------------------------------------------------------
NUM_CROSS_LAYERS = 3
CROSS_W = 0.9                      # the `w=0.9` weighting of the cross interaction term
PARALLEL_DNN_HIDDEN = [512, 256, 128]
BN_EPS = 1e-5

TB_MAX = 2048                      # ~15-20 MiB live f32/bf16 intermediates at 2048
TB_ALIGN = 256                     # MXU-friendly M-tile granularity


def _round_up(x, m):
    return ((x + m - 1) // m) * m


def _pick_batch_tile(B):
    """Largest aligned tile that still leaves >= 2 grid steps (keeps both v7x TCs fed)."""
    tb = _round_up(max(B // 2, 1), TB_ALIGN)
    return max(TB_ALIGN, min(TB_MAX, tb))


# ---------------------------------------------------------------------------
# Pallas kernel: one batch tile per grid step, weights resident in VMEM
# ---------------------------------------------------------------------------
def _decoder_kernel(
    x_ref,                                   # (TB, D)         f32  (streamed)
    wf_ref, bf_ref,                          # (D, H1+D) bf16, (1, H1+D) f32  fused [dnn1 | cross0]
    cw_ref, cb_ref,                          # (L-1, D, D) bf16, (L-1, 1, D) f32
    w2_ref, b2_ref,                          # (H1, H2) bf16,  (1, H2) f32   (BN folded)
    w3_ref, b3_ref,                          # (H2, H3) bf16,  (1, H3) f32
    fcw_c_ref, fcw_d_ref,                    # (1, D) f32, (1, H3) f32
    fcb_ref,                                 # (1,) f32 in SMEM
    out_ref,                                 # (TB, 1) f32
):
    H1 = PARALLEL_DNN_HIDDEN[0]

    x0 = x_ref[...]                          # f32
    wx0 = CROSS_W * x0                       # hoisted: one VPU pass, reused by all cross layers

    # ---- fused first MXU push: LHS = x0 for both cross layer 0 and DNN layer 1 ----
    z = jnp.dot(
        x0.astype(jnp.bfloat16), wf_ref[...],
        preferred_element_type=jnp.float32,
    ) + bf_ref[...]
    h = jnp.maximum(z[:, :H1], 0.0)          # DNN layer 1 (BN folded) + ReLU
    xi = x0 + wx0 * z[:, H1:]                # cross layer 0 (split at lane-aligned H1=512)

    # ---- remaining CrossNetV2 layers: x_{i+1} = x_i + w*x0*(x_i @ Wc_i + bc_i) ----
    for i in range(NUM_CROSS_LAYERS - 1):
        lin = jnp.dot(
            xi.astype(jnp.bfloat16), cw_ref[i],
            preferred_element_type=jnp.float32,
        ) + cb_ref[i]
        xi = xi + wx0 * lin                  # elementwise kept in f32

    # ---- remaining parallel-DNN layers (dropout = identity in eval) ----
    for w_r, b_r in ((w2_ref, b2_ref), (w3_ref, b3_ref)):
        h = jnp.maximum(
            jnp.dot(
                h.astype(jnp.bfloat16), w_r[...],
                preferred_element_type=jnp.float32,
            ) + b_r[...],
            0.0,
        )

    # ---- fused concat + final (final_dim -> 1) Linear, on VPU/XLU (not MXU) ----
    y = (
        jnp.sum(xi * fcw_c_ref[...], axis=-1, keepdims=True)
        + jnp.sum(h * fcw_d_ref[...], axis=-1, keepdims=True)
        + fcb_ref[0]
    )
    # sigmoid: exp on EUP + approximate reciprocal on EUP
    out_ref[...] = pl.reciprocal(1.0 + jnp.exp(-y), approx=True)


# ---------------------------------------------------------------------------
# Parameter construction (deterministic, synthetic). BatchNorm (eval, fresh
# running stats: mean=0, var=1, gamma=1, beta=0) is folded into the Linears.
# ---------------------------------------------------------------------------
def init_params(key, in_dim):
    keys = jax.random.split(key, 16)
    k = iter(keys)

    def lin(key_w, key_b, fan_in, fan_out):
        bound = 1.0 / np.sqrt(fan_in)
        w = jax.random.uniform(key_w, (fan_in, fan_out), jnp.float32, -bound, bound)
        b = jax.random.uniform(key_b, (1, fan_out), jnp.float32, -bound, bound)
        return w, b

    # CrossNetV2 layers (square D x D), weights stored bf16 for the MXU
    cw, cb = [], []
    for _ in range(NUM_CROSS_LAYERS):
        w, b = lin(next(k), next(k), in_dim, in_dim)
        cw.append(w.astype(jnp.bfloat16))
        cb.append(b)
    cw = jnp.stack(cw, axis=0)                       # (L, D, D) bf16
    cb = jnp.stack(cb, axis=0)                       # (L, 1, D) f32

    # parallel DNN layers with BN folded: W' = W*s, b' = b*s + t
    dims = [in_dim] + PARALLEL_DNN_HIDDEN
    scale = 1.0 / np.sqrt(1.0 + BN_EPS)              # gamma/sqrt(var+eps) with fresh stats
    dnn = []
    for i in range(3):
        w, b = lin(next(k), next(k), dims[i], dims[i + 1])
        dnn.append(((w * scale).astype(jnp.bfloat16), b * scale))  # shift = 0

    # fused [DNN layer-1 | cross layer-0] weight: single K=D MXU push, split at H1 (lane-aligned)
    wf = jnp.concatenate([dnn[0][0], cw[0]], axis=1)  # (D, H1+D) bf16
    bf = jnp.concatenate([dnn[0][1], cb[0]], axis=1)  # (1, H1+D) f32

    # final fc on concat([cross_out (D), dnn_out (H3)]) -> 1, split + pre-transposed to rows
    final_dim = in_dim + PARALLEL_DNN_HIDDEN[-1]
    fcw, fcb = lin(next(k), next(k), final_dim, 1)
    fcw_c = fcw[:in_dim].T                           # (1, D)  f32 (VPU operand)
    fcw_d = fcw[in_dim:].T                           # (1, H3) f32
    fcb = fcb.reshape(1)                             # (1,)    f32 (SMEM scalar)

    return dict(cw=cw, cb=cb, dnn=dnn, wf=wf, bf=bf,
                fcw_c=fcw_c, fcw_d=fcw_d, fcb=fcb)


# ---------------------------------------------------------------------------
# Wrapper
# ---------------------------------------------------------------------------
@jax.jit
def crossnet_decoder_v2(x, params):
    B = x.shape[0]
    D = int(np.prod(x.shape[1:]))
    x_flat = x.reshape(B, D).astype(jnp.float32)

    H1, H2, H3 = PARALLEL_DNN_HIDDEN
    L = NUM_CROSS_LAYERS

    TB = _pick_batch_tile(B)
    if B < TB:
        # Tiny-batch fallback only: pad up to one full tile (negligible traffic).
        # For B >= TB there is NO host-side pad: the ragged last tile is handled by
        # Pallas partial-block masking (no cross-row reductions, so pad rows are inert).
        x_flat = jnp.pad(x_flat, ((0, TB - B), (0, 0)))
    B_arr = x_flat.shape[0]
    n_tiles = pl.cdiv(B_arr, TB)

    (_, _), (w2, b2), (w3, b3) = params["dnn"]
    cw_rest = params["cw"][1:]        # cross layers 1..L-1 (layer 0 lives in the fused weight)
    cb_rest = params["cb"][1:]

    def resident(shape):
        # whole-array block, constant index_map -> stays in VMEM across grid steps
        nd = len(shape)
        return pl.BlockSpec(shape, lambda i, _nd=nd: (0,) * _nd)

    in_specs = [
        pl.BlockSpec((TB, D), lambda i: (i, 0)),                 # x tile (streamed)
        resident((D, H1 + D)), resident((1, H1 + D)),            # fused [dnn1 | cross0]
        resident((L - 1, D, D)), resident((L - 1, 1, D)),        # remaining cross layers
        resident((H1, H2)), resident((1, H2)),                   # dnn layer 2
        resident((H2, H3)), resident((1, H3)),                   # dnn layer 3
        resident((1, D)), resident((1, H3)),                     # final-fc rows (VPU)
        pl.BlockSpec(memory_space=pltpu.MemorySpace.SMEM),       # final-fc bias scalar
    ]

    out = pl.pallas_call(
        _decoder_kernel,
        out_shape=jax.ShapeDtypeStruct((B_arr, 1), jnp.float32),
        grid=(n_tiles,),
        in_specs=in_specs,
        out_specs=pl.BlockSpec((TB, 1), lambda i: (i, 0)),
        compiler_params=pltpu.CompilerParams(
            dimension_semantics=("parallel",),      # shard batch tiles across v7x's 2 TCs
            vmem_limit_bytes=48 * 1024 * 1024,      # headroom for TB=2048 on v5e's 16 MiB default
        ),
    )(
        x_flat,
        params["wf"], params["bf"],
        cw_rest, cb_rest,
        w2, b2, w3, b3,
        params["fcw_c"], params["fcw_d"], params["fcb"],
    )
    return out[:B]


# Pure-JAX reference (same folded params, same bf16 matmul operands) for checking.
def reference(x, params):
    B = x.shape[0]
    x0 = x.reshape(B, -1).astype(jnp.float32)
    xi = x0
    for i in range(NUM_CROSS_LAYERS):
        lin = jnp.dot(
            xi.astype(jnp.bfloat16), params["cw"][i],
            preferred_element_type=jnp.float32,
        ) + params["cb"][i]
        xi = xi + CROSS_W * x0 * lin
    h = x0
    for w, b in params["dnn"]:
        h = jnp.maximum(
            jnp.dot(h.astype(jnp.bfloat16), w, preferred_element_type=jnp.float32) + b,
            0.0,
        )
    y = (
        jnp.sum(xi * params["fcw_c"], axis=-1, keepdims=True)
        + jnp.sum(h * params["fcw_d"], axis=-1, keepdims=True)
        + params["fcb"][0]
    )
    return 1.0 / (1.0 + jnp.exp(-y))


if __name__ == "__main__":
    key = jax.random.PRNGKey(0)
    kx, kp = jax.random.split(key)

    # inputs.flatten(start_dim=1) -> in_dim = 4 * 8 = 32
    B, F, E = 777, 4, 8                 # non-multiple of the tile: exercises ragged last block
    in_dim = F * E

    x = jax.random.normal(kx, (B, F, E), dtype=jnp.float32)
    params = init_params(kp, in_dim)

    out = jax.block_until_ready(crossnet_decoder_v2(x, params))
    ref = reference(x, params)

    # tolerance covers the EUP approximate reciprocal + MXU accumulation order
    np.testing.assert_allclose(np.asarray(out), np.asarray(ref), rtol=5e-3, atol=5e-3)
    assert out.shape == (B, 1)

    print("KERNEL_OK")
</pallas_src>

<mosaic_0001>
module attributes {stable_mosaic.version = 11 : i64} {
  func.func @_decoder_kernel(%arg0: i32, %arg1: memref<512x32xf32, #tpu.memory_space<vmem>>, %arg2: memref<32x544xbf16, #tpu.memory_space<vmem>>, %arg3: memref<1x544xf32, #tpu.memory_space<vmem>>, %arg4: memref<2x32x32xbf16, #tpu.memory_space<vmem>>, %arg5: memref<2x1x32xf32, #tpu.memory_space<vmem>>, %arg6: memref<512x256xbf16, #tpu.memory_space<vmem>>, %arg7: memref<1x256xf32, #tpu.memory_space<vmem>>, %arg8: memref<256x128xbf16, #tpu.memory_space<vmem>>, %arg9: memref<1x128xf32, #tpu.memory_space<vmem>>, %arg10: memref<1x32xf32, #tpu.memory_space<vmem>>, %arg11: memref<1x128xf32, #tpu.memory_space<vmem>>, %arg12: memref<1xf32, #tpu.memory_space<smem>>, %arg13: memref<512x1xf32, #tpu.memory_space<vmem>>) attributes {dimension_semantics = [#tpu.dimension_semantics<parallel>], iteration_bounds = array<i64: 2>, scalar_prefetch = 0 : i64, scratch_operands = 0 : i64, tpu.core_type = #tpu.core_type<tc>, window_params = [{transform_indices = @transform_0, window_bounds = array<i64: 512, 32>}, {pipeline_mode = #tpu.pipeline_mode<synchronous>, transform_indices = @transform_1, window_bounds = array<i64: 32, 544>}, {pipeline_mode = #tpu.pipeline_mode<synchronous>, transform_indices = @transform_2, window_bounds = array<i64: 1, 544>}, {pipeline_mode = #tpu.pipeline_mode<synchronous>, transform_indices = @transform_3, window_bounds = array<i64: 2, 32, 32>}, {pipeline_mode = #tpu.pipeline_mode<synchronous>, transform_indices = @transform_4, window_bounds = array<i64: 2, 1, 32>}, {pipeline_mode = #tpu.pipeline_mode<synchronous>, transform_indices = @transform_5, window_bounds = array<i64: 512, 256>}, {pipeline_mode = #tpu.pipeline_mode<synchronous>, transform_indices = @transform_6, window_bounds = array<i64: 1, 256>}, {pipeline_mode = #tpu.pipeline_mode<synchronous>, transform_indices = @transform_7, window_bounds = array<i64: 256, 128>}, {pipeline_mode = #tpu.pipeline_mode<synchronous>, transform_indices = @transform_8, window_bounds = array<i64: 1, 128>}, {pipeline_mode = #tpu.pipeline_mode<synchronous>, transform_indices = @transform_9, window_bounds = array<i64: 1, 32>}, {pipeline_mode = #tpu.pipeline_mode<synchronous>, transform_indices = @transform_10, window_bounds = array<i64: 1, 128>}, {transform_indices = @transform_11, window_bounds = array<i64: 1>}, {transform_indices = @transform_12, window_bounds = array<i64: 512, 1>}]} {
    %c0 = arith.constant 0 : index
    %c0_0 = arith.constant 0 : index
    %0 = vector.load %arg1[%c0, %c0_0] : memref<512x32xf32, #tpu.memory_space<vmem>>, vector<512x32xf32>
    %cst = arith.constant 0.899999976 : f32
    %1 = vector.broadcast %cst : f32 to vector<512x32xf32>
    %2 = arith.mulf %1, %0 : vector<512x32xf32>
    %3 = arith.truncf %0 : vector<512x32xf32> to vector<512x32xbf16>
    %c0_1 = arith.constant 0 : index
    %c0_2 = arith.constant 0 : index
    %4 = vector.load %arg2[%c0_1, %c0_2] : memref<32x544xbf16, #tpu.memory_space<vmem>>, vector<32x544xbf16>
    %cst_3 = arith.constant dense<0.000000e+00> : vector<512x544xf32>
    %5 = tpu.matmul %3, %4, %cst_3 {dimension_numbers = #tpu.dot_dimension_numbers<[1], [0], [0], [1], [0, 0, 1, 1], [], []>} : vector<512x32xbf16>, vector<32x544xbf16>, vector<512x544xf32> -> vector<512x544xf32>
    %c0_4 = arith.constant 0 : index
    %c0_5 = arith.constant 0 : index
    %6 = vector.load %arg3[%c0_4, %c0_5] : memref<1x544xf32, #tpu.memory_space<vmem>>, vector<1x544xf32>
    %7 = vector.broadcast %6 : vector<1x544xf32> to vector<512x544xf32>
    %8 = arith.addf %5, %7 : vector<512x544xf32>
    %9 = vector.extract_strided_slice %8 {offsets = [0, 0], sizes = [512, 512], strides = [1, 1]} : vector<512x544xf32> to vector<512x512xf32>
    %cst_6 = arith.constant 0.000000e+00 : f32
    %10 = vector.broadcast %cst_6 : f32 to vector<512x512xf32>
    %11 = arith.maximumf %9, %10 : vector<512x512xf32>
    %12 = vector.extract_strided_slice %8 {offsets = [0, 512], sizes = [512, 32], strides = [1, 1]} : vector<512x544xf32> to vector<512x32xf32>
    %13 = arith.mulf %2, %12 : vector<512x32xf32>
    %14 = arith.addf %0, %13 : vector<512x32xf32>
    %15 = arith.truncf %14 : vector<512x32xf32> to vector<512x32xbf16>
    %c0_7 = arith.constant 0 : index
    %c0_8 = arith.constant 0 : index
    %c0_9 = arith.constant 0 : index
    %16 = vector.load %arg4[%c0_7, %c0_8, %c0_9] : memref<2x32x32xbf16, #tpu.memory_space<vmem>>, vector<1x32x32xbf16>
    %17 = vector.shape_cast %16 : vector<1x32x32xbf16> to vector<32x32xbf16>
    %cst_10 = arith.constant dense<0.000000e+00> : vector<512x32xf32>
    %18 = tpu.matmul %15, %17, %cst_10 {dimension_numbers = #tpu.dot_dimension_numbers<[1], [0], [0], [1], [0, 0, 1, 1], [], []>} : vector<512x32xbf16>, vector<32x32xbf16>, vector<512x32xf32> -> vector<512x32xf32>
    %c0_11 = arith.constant 0 : index
    %c0_12 = arith.constant 0 : index
    %c0_13 = arith.constant 0 : index
    %19 = vector.load %arg5[%c0_11, %c0_12, %c0_13] : memref<2x1x32xf32, #tpu.memory_space<vmem>>, vector<1x1x32xf32>
    %20 = vector.shape_cast %19 : vector<1x1x32xf32> to vector<1x32xf32>
    %21 = vector.broadcast %20 : vector<1x32xf32> to vector<512x32xf32>
    %22 = arith.addf %18, %21 : vector<512x32xf32>
    %23 = arith.mulf %2, %22 : vector<512x32xf32>
    %24 = arith.addf %14, %23 : vector<512x32xf32>
    %25 = arith.truncf %24 : vector<512x32xf32> to vector<512x32xbf16>
    %c1 = arith.constant 1 : index
    %c0_14 = arith.constant 0 : index
    %c0_15 = arith.constant 0 : index
    %26 = vector.load %arg4[%c1, %c0_14, %c0_15] : memref<2x32x32xbf16, #tpu.memory_space<vmem>>, vector<1x32x32xbf16>
    %27 = vector.shape_cast %26 : vector<1x32x32xbf16> to vector<32x32xbf16>
    %cst_16 = arith.constant dense<0.000000e+00> : vector<512x32xf32>
    %28 = tpu.matmul %25, %27, %cst_16 {dimension_numbers = #tpu.dot_dimension_numbers<[1], [0], [0], [1], [0, 0, 1, 1], [], []>} : vector<512x32xbf16>, vector<32x32xbf16>, vector<512x32xf32> -> vector<512x32xf32>
    %c1_17 = arith.constant 1 : index
    %c0_18 = arith.constant 0 : index
    %c0_19 = arith.constant 0 : index
    %29 = vector.load %arg5[%c1_17, %c0_18, %c0_19] : memref<2x1x32xf32, #tpu.memory_space<vmem>>, vector<1x1x32xf32>
    %30 = vector.shape_cast %29 : vector<1x1x32xf32> to vector<1x32xf32>
    %31 = vector.broadcast %30 : vector<1x32xf32> to vector<512x32xf32>
    %32 = arith.addf %28, %31 : vector<512x32xf32>
    %33 = arith.mulf %2, %32 : vector<512x32xf32>
    %34 = arith.addf %24, %33 : vector<512x32xf32>
    %35 = arith.truncf %11 : vector<512x512xf32> to vector<512x512xbf16>
    %c0_20 = arith.constant 0 : index
    %c0_21 = arith.constant 0 : index
    %36 = vector.load %arg6[%c0_20, %c0_21] : memref<512x256xbf16, #tpu.memory_space<vmem>>, vector<512x256xbf16>
    %cst_22 = arith.constant dense<0.000000e+00> : vector<512x256xf32>
    %37 = tpu.matmul %35, %36, %cst_22 {dimension_numbers = #tpu.dot_dimension_numbers<[1], [0], [0], [1], [0, 0, 1, 1], [], []>} : vector<512x512xbf16>, vector<512x256xbf16>, vector<512x256xf32> -> vector<512x256xf32>
    %c0_23 = arith.constant 0 : index
    %c0_24 = arith.constant 0 : index
    %38 = vector.load %arg7[%c0_23, %c0_24] : memref<1x256xf32, #tpu.memory_space<vmem>>, vector<1x256xf32>
    %39 = vector.broadcast %38 : vector<1x256xf32> to vector<512x256xf32>
    %40 = arith.addf %37, %39 : vector<512x256xf32>
    %cst_25 = arith.constant 0.000000e+00 : f32
    %41 = vector.broadcast %cst_25 : f32 to vector<512x256xf32>
    %42 = arith.maximumf %40, %41 : vector<512x256xf32>
    %43 = arith.truncf %42 : vector<512x256xf32> to vector<512x256xbf16>
    %c0_26 = arith.constant 0 : index
    %c0_27 = arith.constant 0 : index
    %44 = vector.load %arg8[%c0_26, %c0_27] : memref<256x128xbf16, #tpu.memory_space<vmem>>, vector<256x128xbf16>
    %cst_28 = arith.constant dense<0.000000e+00> : vector<512x128xf32>
    %45 = tpu.matmul %43, %44, %cst_28 {dimension_numbers = #tpu.dot_dimension_numbers<[1], [0], [0], [1], [0, 0, 1, 1], [], []>} : vector<512x256xbf16>, vector<256x128xbf16>, vector<512x128xf32> -> vector<512x128xf32>
    %c0_29 = arith.constant 0 : index
    %c0_30 = arith.constant 0 : index
    %46 = vector.load %arg9[%c0_29, %c0_30] : memref<1x128xf32, #tpu.memory_space<vmem>>, vector<1x128xf32>
    %47 = vector.broadcast %46 : vector<1x128xf32> to vector<512x128xf32>
    %48 = arith.addf %45, %47 : vector<512x128xf32>
    %cst_31 = arith.constant 0.000000e+00 : f32
    %49 = vector.broadcast %cst_31 : f32 to vector<512x128xf32>
    %50 = arith.maximumf %48, %49 : vector<512x128xf32>
    %c0_32 = arith.constant 0 : index
    %c0_33 = arith.constant 0 : index
    %51 = vector.load %arg10[%c0_32, %c0_33] : memref<1x32xf32, #tpu.memory_space<vmem>>, vector<1x32xf32>
    %52 = vector.broadcast %51 : vector<1x32xf32> to vector<512x32xf32>
    %53 = arith.mulf %34, %52 : vector<512x32xf32>
    %cst_34 = arith.constant dense<0.000000e+00> : vector<512xf32>
    %54 = vector.multi_reduction <add>, %53, %cst_34 [1] : vector<512x32xf32> to vector<512xf32>
    %55 = vector.shape_cast %54 : vector<512xf32> to vector<512x1xf32>
    %c0_35 = arith.constant 0 : index
    %c0_36 = arith.constant 0 : index
    %56 = vector.load %arg11[%c0_35, %c0_36] : memref<1x128xf32, #tpu.memory_space<vmem>>, vector<1x128xf32>
    %57 = vector.broadcast %56 : vector<1x128xf32> to vector<512x128xf32>
    %58 = arith.mulf %50, %57 : vector<512x128xf32>
    %cst_37 = arith.constant dense<0.000000e+00> : vector<512xf32>
    %59 = vector.multi_reduction <add>, %58, %cst_37 [1] : vector<512x128xf32> to vector<512xf32>
    %60 = vector.shape_cast %59 : vector<512xf32> to vector<512x1xf32>
    %61 = arith.addf %55, %60 : vector<512x1xf32>
    %c0_38 = arith.constant 0 : index
    %62 = memref.load %arg12[%c0_38] : memref<1xf32, #tpu.memory_space<smem>>
    %63 = vector.broadcast %62 : f32 to vector<512x1xf32>
    %64 = arith.addf %61, %63 : vector<512x1xf32>
    %cst_39 = arith.constant 0.000000e+00 : f32
    %65 = vector.broadcast %cst_39 : f32 to vector<512x1xf32>
    %66 = arith.subf %65, %64 : vector<512x1xf32>
    %67 = math.exp %66 : vector<512x1xf32>
    %cst_40 = arith.constant 1.000000e+00 : f32
    %68 = vector.broadcast %cst_40 : f32 to vector<512x1xf32>
    %69 = arith.addf %68, %67 : vector<512x1xf32>
    %70 = tpu.reciprocal %69 {approx = true} : vector<512x1xf32> -> vector<512x1xf32>
    %c0_41 = arith.constant 0 : index
    %c0_42 = arith.constant 0 : index
    %71 = vector.load %arg13[%c0_41, %c0_42] : memref<512x1xf32, #tpu.memory_space<vmem>>, vector<512x1xf32>
    tpu.vector_store %arg13[%c0_41, %c0_42], %70 {strides = array<i32>} : memref<512x1xf32, #tpu.memory_space<vmem>>, vector<512x1xf32>,
    return
  }
  func.func @transform_0(%arg0: i32) -> (i32, i32) {
    %c0_i32 = arith.constant 0 : i32
    %c0_i32_0 = arith.constant 0 : i32
    return %arg0, %c0_i32 : i32, i32
  }
  func.func @transform_1(%arg0: i32) -> (i32, i32) {
    %c0_i32 = arith.constant 0 : i32
    %c0_i32_0 = arith.constant 0 : i32
    %c0_i32_1 = arith.constant 0 : i32
    return %c0_i32, %c0_i32_0 : i32, i32
  }
  func.func @transform_2(%arg0: i32) -> (i32, i32) {
    %c0_i32 = arith.constant 0 : i32
    %c0_i32_0 = arith.constant 0 : i32
    %c0_i32_1 = arith.constant 0 : i32
    return %c0_i32, %c0_i32_0 : i32, i32
  }
  func.func @transform_3(%arg0: i32) -> (i32, i32, i32) {
    %c0_i32 = arith.constant 0 : i32
    %c0_i32_0 = arith.constant 0 : i32
    %c0_i32_1 = arith.constant 0 : i32
    %c0_i32_2 = arith.constant 0 : i32
    return %c0_i32, %c0_i32_0, %c0_i32_1 : i32, i32, i32
  }
  func.func @transform_4(%arg0: i32) -> (i32, i32, i32) {
    %c0_i32 = arith.constant 0 : i32
    %c0_i32_0 = arith.constant 0 : i32
    %c0_i32_1 = arith.constant 0 : i32
    %c0_i32_2 = arith.constant 0 : i32
    return %c0_i32, %c0_i32_0, %c0_i32_1 : i32, i32, i32
  }
  func.func @transform_5(%arg0: i32) -> (i32, i32) {
    %c0_i32 = arith.constant 0 : i32
    %c0_i32_0 = arith.constant 0 : i32
    %c0_i32_1 = arith.constant 0 : i32
    return %c0_i32, %c0_i32_0 : i32, i32
  }
  func.func @transform_6(%arg0: i32) -> (i32, i32) {
    %c0_i32 = arith.constant 0 : i32
    %c0_i32_0 = arith.constant 0 : i32
    %c0_i32_1 = arith.constant 0 : i32
    return %c0_i32, %c0_i32_0 : i32, i32
  }
  func.func @transform_7(%arg0: i32) -> (i32, i32) {
    %c0_i32 = arith.constant 0 : i32
    %c0_i32_0 = arith.constant 0 : i32
    %c0_i32_1 = arith.constant 0 : i32
    return %c0_i32, %c0_i32_0 : i32, i32
  }
  func.func @transform_8(%arg0: i32) -> (i32, i32) {
    %c0_i32 = arith.constant 0 : i32
    %c0_i32_0 = arith.constant 0 : i32
    %c0_i32_1 = arith.constant 0 : i32
    return %c0_i32, %c0_i32_0 : i32, i32
  }
  func.func @transform_9(%arg0: i32) -> (i32, i32) {
    %c0_i32 = arith.constant 0 : i32
    %c0_i32_0 = arith.constant 0 : i32
    %c0_i32_1 = arith.constant 0 : i32
    return %c0_i32, %c0_i32_0 : i32, i32
  }
  func.func @transform_10(%arg0: i32) -> (i32, i32) {
    %c0_i32 = arith.constant 0 : i32
    %c0_i32_0 = arith.constant 0 : i32
    %c0_i32_1 = arith.constant 0 : i32
    return %c0_i32, %c0_i32_0 : i32, i32
  }
  func.func @transform_11(%arg0: i32) -> i32 {
    %c0_i32 = arith.constant 0 : i32
    %c0_i32_0 = arith.constant 0 : i32
    return %c0_i32 : i32
  }
  func.func @transform_12(%arg0: i32) -> (i32, i32) {
    %c0_i32 = arith.constant 0 : i32
    %c0_i32_0 = arith.constant 0 : i32
    return %arg0, %c0_i32 : i32, i32
  }
}

</mosaic_0001>

<bundles_post_ra>
// kernel: crossnet_decoder_v2.1
= control target key start
LH: loop header
LB: loop body
LE: loop exit
PB: predicated region body
PF: predicated region fallthrough
CT: control target
= control target key end

     0   :  { %s11851_s0 = inlined_call_operand.vmem [shape: f32[777,32], index: 0, kind: input, shape index: {}]   ;;  %s11852_s1 = inlined_call_operand.vmem [shape: bf16[32,544], index: 1, kind: input, shape index: {}]   ;;  %s11853_s2 = inlined_call_operand.vmem [shape: f32[1,544], index: 2, kind: input, shape index: {}]   ;;  %s11854_s3 = inlined_call_operand.vmem [shape: bf16[2,32,32], index: 3, kind: input, shape index: {}]   ;;  %s11855_s4 = inlined_call_operand.vmem [shape: f32[2,1,32], index: 4, kind: input, shape index: {}]   ;;  %s11856_s5 = inlined_call_operand.vmem [shape: bf16[512,256], index: 5, kind: input, shape index: {}]   ;;  %s11857_s6 = inlined_call_operand.vmem [shape: f32[1,256], index: 6, kind: input, shape index: {}]   ;;  %s11858_s7 = inlined_call_operand.vmem [shape: bf16[256,128], index: 7, kind: input, shape index: {}]   ;;  %s11859_s8 = inlined_call_operand.vmem [shape: f32[1,128], index: 8, kind: input, shape index: {}]   ;;  %s11860_s9 = inlined_call_operand.vmem [shape: f32[1,32], index: 9, kind: input, shape index: {}]   ;;  %s11861_s10 = inlined_call_operand.vmem [shape: f32[1,128], index: 10, kind: input, shape index: {}]   ;;  %s11862_s11 = inlined_call_operand.<no memory space> [shape: f32[1], index: 11, kind: input, shape index: {}]   ;;  %s11863_s12 = inlined_call_operand.vmem [shape: f32[777,1], index: 12, kind: output, shape index: {}]  }
   0x1   :  { %17 = sst [smem:[#allocation2]] %s11862_s11 }
   0x2   :  { %s8212_s23 = smov 0   ;;  %s8214_s24 = smov 0  }
   0x3   :  { %s8216_s25 = smov 0  }
   0x4 LB: > { %s8225_s11 = sadd.s32 4294967295, %s8109_s25   ;;  %s8227_s26 = sadd.s32 1, %s8109_s25   ;;  %s8109_s25 = sphi %s8216_s25, %s12648_s25   ;;  %s8105_s24 = sphi %s8214_s24, %s12647_s24   ;;  %s8101_s23 = sphi %s8212_s23, %s12646_s23  }
   0x5   : > { %s284_s27 = ssub.s32 %s8109_s25, %s8227_s26  ;;  %s287_s28 = sadd.s32 1, %s8105_s24 }
   0x6   : > { %p285_p0 = scmp.eq.s32.totalorder %s284_s27, 0  ;;  %p297_p1 = scmp.ne.s32.totalorder %s8105_s24, %s8101_s23 }
   0x7   : > { %p298_p2 = scmp.eq.s32.totalorder %s8225_s11, 1  ;;  %p6659_p3 = scmp.ge.s32.totalorder %s8109_s25, 1 }
   0x8   : > { %s8235_s29 = scalar_select %p285_p0, %s8105_s24, %s287_s28  }
   0x9   : > { %p8237_p4 = por %p298_p2, %p297_p1  ;;  %p372_p5 = scmp.lt.s32.totalorder %s8109_s25, 3 }
   0xb   : > { %p373_p6 = pnand %p6659_p3, %p372_p5 }
   0xd   : > { %376 = sbr.rel (%p373_p6) target bundleno = 1895 (0x767), region = 68 }
  0x14   : > { %v7602_v0 = vld [vmem:[%s11852_s1 + $0x4] ss:$20 sps:$4 sm:$0xff]   ;;  %s8245_s15 = sshll.u32 %s8225_s11, 6  ;;  %v7604_v1 = vld [vmem:[%s11852_s1] ss:$20 sps:$4 sm:$0xff]   ;;  %v11866_v2 = vmov 0  }
  0x15   : > { %817 = vmatprep.mubr.bf16.mxu0 %v11866_v2  ;;  %p422_p7 = scmp.lt.s32.totalorder %s8245_s15, 97  ;;  %1250 = vmatprep.mubr.bf16.mxu1 %v11866_v2  ;;  %v7605_v3 = vld [vmem:[%s11852_s1 + $0x2c] ss:$20 sps:$4 sm:$0xff]   ;;  %v7607_v4 = vld [vmem:[%s11852_s1 + $0x28] ss:$20 sps:$4 sm:$0xff]   ;;  %vm688_vm0 = vcmask 261120  }
  0x16   : > { %785 = vmatprep.subr.bf16.mxu0 %v7602_v0  ;;  %v7608_v5 = vld [vmem:[%s11852_s1 + $0x8] ss:$20 sps:$4 sm:$0xff]   ;;  %v7610_v6 = vld [vmem:[%s11852_s1 + $0xc] ss:$20 sps:$4 sm:$0xff]   ;;  %v7611_v14 = vld [vmem:[%s11852_s1 + $0x30] ss:$20 sps:$4 sm:$0xff]  }
  0x17   : > { %786 = vmatpush1.bf16.msra.mxu0 %v7604_v1  ;;  %s423_s22 = scalar_select %p422_p7, %s8245_s15, 97  ;;  %7253 = vmatprep.subr.bf16.mxu1 %v7610_v6  ;;  %v7613_v15 = vld [vmem:[%s11852_s1 + $0x34] ss:$20 sps:$4 sm:$0xff]   ;;  %vm6124_vm1 = vcmask 7168  }
  0x18   : > { %787 = vmatprep.subr.bf16.mxu0 %v7605_v3  ;;  %7255 = vmatpush1.bf16.msra.mxu1 %v7608_v5  ;;  %s5738_s13 = sld [smem:[#allocation2]]  ;;  %s6197_s21 = ssub.s32 (%p8237_p4), 98, %s8245_s15 }
  0x19   : > { %s6662_s14 = sshll.u32 %s423_s22, 3  ;;  %7254 = vmatprep.subr.bf16.mxu1 %v7613_v15  ;;  %s6944_s22 = sshll.u32 (%p8237_p4), %s8225_s11, 9 }
  0x1a   : > { %s8269_s18 = scalar_lea.vmem %s11851_s0, %s6662_s14  ;;  %s414_s14 = sand.u32 1, %s8101_s23  }
  0x1b   : > { %788 = vmatpush1.bf16.msra.mxu0 %v7607_v4  ;;  %v437_v7 = vld [vmem:[%s8269_s18] sm:$0xff]  ;;  %v438_v8 = vld [vmem:[%s8269_s18 + $0x8] sm:$0xff]  ;;  %v439_v10 = vld [vmem:[%s8269_s18 + $0x10] sm:$0xff]  ;;  %p6198_p8 = scmp.lt.s32.totalorder (%p8237_p4), %s6197_s21, 64  ;;  %s11652_s28 = scalar_lea.vmem (%p8237_p4), %s11863_s12, %s6944_s22  }
  0x1c   : > { %v8273_v9 = vpack.c.bf16 %v438_v8, %v437_v7  ;;  %1138 = vmatprep.subr.bf16.mxu0 %v7610_v6  ;;  %v440_v11 = vld [vmem:[%s8269_s18 + $0x18] sm:$0xff]  ;;  %v441_v13 = vld [vmem:[%s8269_s18 + $0x20] sm:$0xff]  ;;  %v442_v16 = vld [vmem:[%s8269_s18 + $0x28] sm:$0xff]  ;;  %7256 = vmatpush1.bf16.msra.mxu1 %v7611_v14 }
  0x1d   : > { %v8280_v12 = vpack.c.bf16 %v440_v11, %v439_v10  ;;  %v453_v17 = vld [vmem:[%s8269_s18 + $0x80] sm:$0xff]  ;;  %v454_v18 = vld [vmem:[%s8269_s18 + $0x88] sm:$0xff]  ;;  %v8295_v19 = vpack.c.bf16 %v442_v16, %v441_v13  ;;  %v443_v21 = vld [vmem:[%s8269_s18 + $0x30] sm:$0xff] }
  0x1e   : > { %6673 = vmatmul.mubr.msk.bf16.vlgmr.msra.gmra.mrb[0].mxu0 %vm688_vm0, %v8273_v9  ;;  %v8297_v20 = vpack.c.bf16 %v454_v18, %v453_v17  ;;  %v444_v22 = vld [vmem:[%s8269_s18 + $0x38] sm:$0xff]  ;;  %v455_v23 = vld [vmem:[%s8269_s18 + $0x90] sm:$0xff]  ;;  %v445_v27 = vld [vmem:[%s8269_s18 + $0x40] sm:$0xff] }
  0x1f   : > { %1139 = vmatpush1.bf16.msra.mxu0 %v7608_v5  ;;  %827 = vmatprep.mubr.bf16.mxu0 %v11866_v2  ;;  %v456_v24 = vld [vmem:[%s8269_s18 + $0x98] sm:$0xff]  ;;  %v8309_v25 = vpack.c.bf16 %v444_v22, %v443_v21  ;;  %v446_v28 = vld [vmem:[%s8269_s18 + $0x48] sm:$0xff]  ;;  %v457_v29 = vld [vmem:[%s8269_s18 + $0xa0] sm:$0xff] }
  0x20   : > { %1140 = vmatprep.subr.bf16.mxu0 %v7613_v15  ;;  %6713 = vmatmul.mubr.msk.bf16.vlgmr.msra.gmra.mrb[0].mxu1 %vm688_vm0, %v8297_v20  ;;  %v8311_v26 = vpack.c.bf16 %v456_v24, %v455_v23  ;;  %v458_v30 = vld [vmem:[%s8269_s18 + $0xa8] sm:$0xff]  ;;  %v8323_v31 = vpack.c.bf16 %v446_v28, %v445_v27  ;;  %v447_v33 = vld [vmem:[%s8269_s18 + $0x50] sm:$0xff]  ;;  %v448_v34 = vld [vmem:[%s8269_s18 + $0x58] sm:$0xff] }
  0x21   : > { %1260 = vmatprep.mubr.bf16.mxu1 %v11866_v2  ;;  %v8325_v32 = vpack.c.bf16 %v458_v30, %v457_v29  ;;  %v459_v35 = vld [vmem:[%s8269_s18 + $0xb0] sm:$0xff]  ;;  %v460_v36 = vld [vmem:[%s8269_s18 + $0xb8] sm:$0xff]  ;;  %v8337_v37 = vpack.c.bf16 %v448_v34, %v447_v33  ;;  %v449_v39 = vld [vmem:[%s8269_s18 + $0x60] sm:$0xff] }
  0x22   : > { %v8339_v38 = vpack.c.bf16 %v460_v36, %v459_v35  ;;  %v450_v40 = vld [vmem:[%s8269_s18 + $0x68] sm:$0xff]  ;;  %v461_v41 = vld [vmem:[%s8269_s18 + $0xc0] sm:$0xff]  ;;  %v451_v45 = vld [vmem:[%s8269_s18 + $0x70] sm:$0xff] }
  0x23   : > { %1141 = vmatpush1.bf16.msra.mxu0 %v7611_v14  ;;  %v462_v42 = vld [vmem:[%s8269_s18 + $0xc8] sm:$0xff]  ;;  %v8351_v43 = vpack.c.bf16 %v450_v40, %v449_v39  ;;  %v452_v46 = vld [vmem:[%s8269_s18 + $0x78] sm:$0xff]  ;;  %v463_v47 = vld [vmem:[%s8269_s18 + $0xd0] sm:$0xff] }
  0x24   : > { %v8353_v44 = vpack.c.bf16 %v462_v42, %v461_v41  ;;  %v464_v48 = vld [vmem:[%s8269_s18 + $0xd8] sm:$0xff]  ;;  %v8365_v49 = vpack.c.bf16 %v452_v46, %v451_v45  ;;  %v465_v51 = vld [vmem:[%s8269_s18 + $0xe0] sm:$0xff]  ;;  %v466_v52 = vld [vmem:[%s8269_s18 + $0xe8] sm:$0xff] }
  0x25   : > { %v8367_v50 = vpack.c.bf16 %v464_v48, %v463_v47  ;;  %v8377_v53 = vpack.c.bf16 %v466_v52, %v465_v51  ;;  %v467_v54 = vld [vmem:[%s8269_s18 + $0xf0] sm:$0xff]  ;;  %v468_v55 = vld [vmem:[%s8269_s18 + $0xf8] sm:$0xff]  ;;  %v469_v57 = vld [vmem:[%s8269_s18 + $0x100] sm:$0xff] }
  0x26   : > { %6674 = vmatmul.mubr.msk.bf16.gmra.mrb[4].mxu0 %vm688_vm0, %v8280_v12  ;;  %v8387_v56 = vpack.c.bf16 %v468_v55, %v467_v54  ;;  %v470_v58 = vld [vmem:[%s8269_s18 + $0x108] sm:$0xff]  ;;  %v471_v60 = vld [vmem:[%s8269_s18 + $0x110] sm:$0xff]  ;;  %v472_v61 = vld [vmem:[%s8269_s18 + $0x118] sm:$0xff] }
  0x27   : > { %837 = vmatprep.mubr.bf16.mxu0 %v11866_v2  ;;  %v8397_v59 = vpack.c.bf16 %v470_v58, %v469_v57  ;;  %v8407_v62 = vpack.c.bf16 %v472_v61, %v471_v60  ;;  %v473_v63 = vld [vmem:[%s8269_s18 + $0x120] sm:$0xff]  ;;  %v474_v0 = vld [vmem:[%s8269_s18 + $0x128] sm:$0xff]  ;;  %v475_v3 = vld [vmem:[%s8269_s18 + $0x130] sm:$0xff]  ;;  %v611_v58 = vlaneseq }
  0x28   : > { %6714 = vmatmul.mubr.msk.bf16.gmra.mrb[4].mxu1 %vm688_vm0, %v8311_v26  ;;  %v8417_v1 = vpack.c.bf16 %v474_v0, %v473_v63  ;;  %v476_v4 = vld [vmem:[%s8269_s18 + $0x138] sm:$0xff]  ;;  %v477_v6 = vld [vmem:[%s8269_s18 + $0x140] sm:$0xff]  ;;  %v478_v7 = vld [vmem:[%s8269_s18 + $0x148] sm:$0xff] }
  0x29   : > { %1270 = vmatprep.mubr.bf16.mxu1 %v11866_v2  ;;  %v8427_v5 = vpack.c.bf16 %v476_v4, %v475_v3  ;;  %v8437_v8 = vpack.c.bf16 %v478_v7, %v477_v6  ;;  %v479_v10 = vld [vmem:[%s8269_s18 + $0x150] sm:$0xff]  ;;  %v480_v11 = vld [vmem:[%s8269_s18 + $0x158] sm:$0xff]  ;;  %v481_v14 = vld [vmem:[%s8269_s18 + $0x160] sm:$0xff]  ;;  %v8559_v61 = vshrl.u32 %v611_v58, 7 }
  0x2a   : > { %v8447_v13 = vpack.c.bf16 %v480_v11, %v479_v10  ;;  %v482_v15 = vld [vmem:[%s8269_s18 + $0x168] sm:$0xff]  ;;  %v483_v17 = vld [vmem:[%s8269_s18 + $0x170] sm:$0xff]  ;;  %v484_v18 = vld [vmem:[%s8269_s18 + $0x178] sm:$0xff] }
  0x2b   : > { %v8457_v16 = vpack.c.bf16 %v482_v15, %v481_v14  ;;  %v8470_v21 = vld [vmem:[%s11852_s1 + $0x10] ss:$20 sps:$4 sm:$0xff]   ;;  %v8473_v22 = vpack.c.bf16 %v484_v18, %v483_v17  ;;  %v486_v24 = vld [vmem:[%s8269_s18 + $0x188] sm:$0xff]  ;;  %v488_v29 = vld [vmem:[%s8269_s18 + $0x198] sm:$0xff]  ;;  %12057 = vst [vmem:[#allocation4_spill] sm:$0xff] %v8559_v61  ;;  %v11865_v63 = vsub.s32 0, %v8559_v61 }
  0x2c   : > { %7049 = vmatprep.subr.bf16.mxu0 %v8470_v21  ;;  %v485_v23 = vld [vmem:[%s8269_s18 + $0x180] sm:$0xff]  ;;  %v487_v28 = vld [vmem:[%s8269_s18 + $0x190] sm:$0xff]  ;;  %v490_v34 = vld [vmem:[%s8269_s18 + $0x1a8] sm:$0xff]  ;;  %v11864_v3 = vsub.s32 1, %v8559_v61 }
  0x2d   : > { %v8483_v27 = vpack.c.bf16 %v486_v24, %v485_v23  ;;  %v8493_v30 = vpack.c.bf16 %v488_v29, %v487_v28  ;;  %v489_v33 = vld [vmem:[%s8269_s18 + $0x1a0] sm:$0xff]  ;;  %v491_v36 = vld [vmem:[%s8269_s18 + $0x1b0] sm:$0xff]  ;;  %v492_v39 = vld [vmem:[%s8269_s18 + $0x1b8] sm:$0xff] }
  0x2e   : > { %6675 = vmatmul.mubr.msk.bf16.gmra.mrb[8].mxu0 %vm688_vm0, %v8295_v19  ;;  %v8503_v35 = vpack.c.bf16 %v490_v34, %v489_v33  ;;  %v8513_v40 = vpack.c.bf16 %v492_v39, %v491_v36  ;;  %v493_v41 = vld [vmem:[%s8269_s18 + $0x1c0] sm:$0xff]  ;;  %v494_v42 = vld [vmem:[%s8269_s18 + $0x1c8] sm:$0xff]  ;;  %v495_v46 = vld [vmem:[%s8269_s18 + $0x1d0] sm:$0xff] }
  0x2f   : > { %847 = vmatprep.mubr.bf16.mxu0 %v11866_v2  ;;  %v8523_v45 = vpack.c.bf16 %v494_v42, %v493_v41  ;;  %v496_v47 = vld [vmem:[%s8269_s18 + $0x1d8] sm:$0xff]  ;;  %v497_v51 = vld [vmem:[%s8269_s18 + $0x1e0] sm:$0xff]  ;;  %v498_v52 = vld [vmem:[%s8269_s18 + $0x1e8] sm:$0xff] }
  0x30   : > { %6715 = vmatmul.mubr.msk.bf16.gmra.mrb[8].mxu1 %vm688_vm0, %v8325_v32  ;;  %v8533_v48 = vpack.c.bf16 %v496_v47, %v495_v46  ;;  %v8543_v54 = vpack.c.bf16 %v498_v52, %v497_v51  ;;  %v499_v55 = vld [vmem:[%s8269_s18 + $0x1f0] sm:$0xff]  ;;  %v500_v57 = vld [vmem:[%s8269_s18 + $0x1f8] sm:$0xff]  ;;  %v8566_v0 = vld [vmem:[%s11853_s2] sm:$0x1f] }
  0x31   : > { %1280 = vmatprep.mubr.bf16.mxu1 %v11866_v2  ;;  %v8553_v60 = vpack.c.bf16 %v500_v57, %v499_v55  ;;  %v8574_v4 = vrot.slane %v8566_v0, %v11865_v63  ;;  %v8579_v6 = vrot.slane %v8566_v0, %v11864_v3 }
  0x36   : > { %6676 = vmatmul.mubr.msk.bf16.gmra.mrb[12].mxu0 %vm688_vm0, %v8309_v25 }
  0x37   : > { %857 = vmatprep.mubr.bf16.mxu0 %v11866_v2 }
  0x38   : > { %6716 = vmatmul.mubr.msk.bf16.gmra.mrb[12].mxu1 %vm688_vm0, %v8339_v38 }
  0x39   : > { %1290 = vmatprep.mubr.bf16.mxu1 %v11866_v2 }
  0x3e   : > { %6677 = vmatmul.mubr.msk.bf16.gmra.mrb[16].mxu0 %vm688_vm0, %v8323_v31 }
  0x3f   : > { %867 = vmatprep.mubr.bf16.mxu0 %v11866_v2 }
  0x40   : > { %6717 = vmatmul.mubr.msk.bf16.gmra.mrb[16].mxu1 %vm688_vm0, %v8353_v44 }
  0x41   : > { %1300 = vmatprep.mubr.bf16.mxu1 %v11866_v2 }
  0x46   : > { %6678 = vmatmul.mubr.msk.bf16.gmra.mrb[20].mxu0 %vm688_vm0, %v8337_v37 }
  0x47   : > { %877 = vmatprep.mubr.bf16.mxu0 %v11866_v2 }
  0x48   : > { %6718 = vmatmul.mubr.msk.bf16.gmra.mrb[20].mxu1 %vm688_vm0, %v8367_v50 }
  0x49   : > { %1310 = vmatprep.mubr.bf16.mxu1 %v11866_v2 }
  0x4e   : > { %6679 = vmatmul.mubr.msk.bf16.gmra.mrb[24].mxu0 %vm688_vm0, %v8351_v43 }
  0x4f   : > { %887 = vmatprep.mubr.bf16.mxu0 %v11866_v2 }
  0x50   : > { %6719 = vmatmul.mubr.msk.bf16.gmra.mrb[24].mxu1 %vm688_vm0, %v8377_v53 }
  0x51   : > { %1320 = vmatprep.mubr.bf16.mxu1 %v11866_v2 }
  0x56   : > { %6680 = vmatmul.mubr.msk.bf16.gmra.mrb[28].mxu0 %vm688_vm0, %v8365_v49 }
  0x57   : > { %897 = vmatprep.mubr.bf16.mxu0 %v11866_v2 }
  0x58   : > { %6720 = vmatmul.mubr.msk.bf16.gmra.mrb[28].mxu1 %vm688_vm0, %v8387_v56 }
  0x59   : > { %1330 = vmatprep.mubr.bf16.mxu1 %v11866_v2 }
  0x5e   : > { %6681 = vmatmul.mubr.msk.bf16.gmra.mrb[32].mxu0 %vm688_vm0, %v8297_v20 }
  0x5f   : > { %907 = vmatprep.mubr.bf16.mxu0 %v11866_v2 }
  0x60   : > { %6721 = vmatmul.mubr.msk.bf16.gmra.mrb[32].mxu1 %vm688_vm0, %v8397_v59 }
  0x61   : > { %1340 = vmatprep.mubr.bf16.mxu1 %v11866_v2 }
  0x66   : > { %6682 = vmatmul.mubr.msk.bf16.gmra.mrb[36].mxu0 %vm688_vm0, %v8311_v26 }
  0x67   : > { %917 = vmatprep.mubr.bf16.mxu0 %v11866_v2 }
  0x68   : > { %6722 = vmatmul.mubr.msk.bf16.gmra.mrb[36].mxu1 %vm688_vm0, %v8407_v62 }
  0x69   : > { %1350 = vmatprep.mubr.bf16.mxu1 %v11866_v2 }
  0x6e   : > { %6683 = vmatmul.mubr.msk.bf16.gmra.mrb[40].mxu0 %vm688_vm0, %v8325_v32 }
  0x6f   : > { %927 = vmatprep.mubr.bf16.mxu0 %v11866_v2 }
  0x70   : > { %6723 = vmatmul.mubr.msk.bf16.gmra.mrb[40].mxu1 %vm688_vm0, %v8417_v1 }
  0x71   : > { %1360 = vmatprep.mubr.bf16.mxu1 %v11866_v2 }
  0x76   : > { %6684 = vmatmul.mubr.msk.bf16.gmra.mrb[44].mxu0 %vm688_vm0, %v8339_v38 }
  0x77   : > { %937 = vmatprep.mubr.bf16.mxu0 %v11866_v2 }
  0x78   : > { %6724 = vmatmul.mubr.msk.bf16.gmra.mrb[44].mxu1 %vm688_vm0, %v8427_v5 }
  0x79   : > { %1370 = vmatprep.mubr.bf16.mxu1 %v11866_v2 }
  0x7e   : > { %6685 = vmatmul.mubr.msk.bf16.gmra.mrb[48].mxu0 %vm688_vm0, %v8353_v44 }
  0x7f   : > { %947 = vmatprep.mubr.bf16.mxu0 %v11866_v2 }
  0x80   : > { %6725 = vmatmul.mubr.msk.bf16.gmra.mrb[48].mxu1 %vm688_vm0, %v8437_v8 }
  0x81   : > { %1380 = vmatprep.mubr.bf16.mxu1 %v11866_v2 }
  0x86   : > { %6686 = vmatmul.mubr.msk.bf16.gmra.mrb[52].mxu0 %vm688_vm0, %v8367_v50 }
  0x87   : > { %957 = vmatprep.mubr.bf16.mxu0 %v11866_v2 }
  0x88   : > { %6726 = vmatmul.mubr.msk.bf16.gmra.mrb[52].mxu1 %vm688_vm0, %v8447_v13 }
  0x89   : > { %1390 = vmatprep.mubr.bf16.mxu1 %v11866_v2 }
  0x8e   : > { %6687 = vmatmul.mubr.msk.bf16.gmra.mrb[56].mxu0 %vm688_vm0, %v8377_v53 }
  0x8f   : > { %967 = vmatprep.mubr.bf16.mxu0 %v11866_v2 }
  0x90   : > { %6727 = vmatmul.mubr.msk.bf16.gmra.mrb[56].mxu1 %vm688_vm0, %v8457_v16 }
  0x91   : > { %1400 = vmatprep.mubr.bf16.mxu1 %v11866_v2 }
  0x96   : > { %6688 = vmatmul.mubr.msk.bf16.gmra.mrb[60].mxu0 %vm688_vm0, %v8387_v56 }
  0x97   : > { %977 = vmatprep.mubr.bf16.mxu0 %v11866_v2 }
  0x98   : > { %6728 = vmatmul.mubr.msk.bf16.gmra.mrb[60].mxu1 %vm688_vm0, %v8473_v22 }
  0x99   : > { %1410 = vmatprep.mubr.bf16.mxu1 %v11866_v2 }
  0x9e   : > { %6689 = vmatmul.mubr.msk.bf16.gmra.mrb[64].mxu0 %vm688_vm0, %v8397_v59 }
  0x9f   : > { %987 = vmatprep.mubr.bf16.mxu0 %v11866_v2 }
  0xa0   : > { %6729 = vmatmul.mubr.msk.bf16.gmra.mrb[64].mxu1 %vm688_vm0, %v8483_v27 }
  0xa1   : > { %1420 = vmatprep.mubr.bf16.mxu1 %v11866_v2 }
  0xa6   : > { %6690 = vmatmul.mubr.msk.bf16.gmra.mrb[68].mxu0 %vm688_vm0, %v8407_v62 }
  0xa7   : > { %997 = vmatprep.mubr.bf16.mxu0 %v11866_v2 }
  0xa8   : > { %6730 = vmatmul.mubr.msk.bf16.gmra.mrb[68].mxu1 %vm688_vm0, %v8493_v30 }
  0xa9   : > { %1430 = vmatprep.mubr.bf16.mxu1 %v11866_v2 }
  0xae   : > { %6691 = vmatmul.mubr.msk.bf16.gmra.mrb[72].mxu0 %vm688_vm0, %v8417_v1 }
  0xaf   : > { %1007 = vmatprep.mubr.bf16.mxu0 %v11866_v2 }
  0xb0   : > { %6731 = vmatmul.mubr.msk.bf16.gmra.mrb[72].mxu1 %vm688_vm0, %v8503_v35 }
  0xb1   : > { %1440 = vmatprep.mubr.bf16.mxu1 %v11866_v2 }
  0xb6   : > { %6692 = vmatmul.mubr.msk.bf16.gmra.mrb[76].mxu0 %vm688_vm0, %v8427_v5 }
  0xb7   : > { %1017 = vmatprep.mubr.bf16.mxu0 %v11866_v2 }
  0xb8   : > { %6732 = vmatmul.mubr.msk.bf16.gmra.mrb[76].mxu1 %vm688_vm0, %v8513_v40 }
  0xb9   : > { %1450 = vmatprep.mubr.bf16.mxu1 %v11866_v2 }
  0xbe   : > { %6693 = vmatmul.mubr.msk.bf16.gmra.mrb[80].mxu0 %vm688_vm0, %v8437_v8 }
  0xbf   : > { %1027 = vmatprep.mubr.bf16.mxu0 %v11866_v2 }
  0xc0   : > { %6733 = vmatmul.mubr.msk.bf16.gmra.mrb[80].mxu1 %vm688_vm0, %v8523_v45 }
  0xc1   : > { %1460 = vmatprep.mubr.bf16.mxu1 %v11866_v2 }
  0xc6   : > { %6694 = vmatmul.mubr.msk.bf16.gmra.mrb[84].mxu0 %vm688_vm0, %v8447_v13 }
  0xc7   : > { %1037 = vmatprep.mubr.bf16.mxu0 %v11866_v2 }
  0xc8   : > { %6734 = vmatmul.mubr.msk.bf16.gmra.mrb[84].mxu1 %vm688_vm0, %v8533_v48 }
  0xc9   : > { %1470 = vmatprep.mubr.bf16.mxu1 %v11866_v2 }
  0xce   : > { %6695 = vmatmul.mubr.msk.bf16.gmra.mrb[88].mxu0 %vm688_vm0, %v8457_v16 }
  0xcf   : > { %1047 = vmatprep.mubr.bf16.mxu0 %v11866_v2 }
  0xd0   : > { %6735 = vmatmul.mubr.msk.bf16.gmra.mrb[88].mxu1 %vm688_vm0, %v8543_v54 }
  0xd1   : > { %1480 = vmatprep.mubr.bf16.mxu1 %v11866_v2 }
  0xd6   : > { %6696 = vmatmul.mubr.msk.bf16.gmra.mrb[92].mxu0 %vm688_vm0, %v8473_v22 }
  0xd7   : > { %1057 = vmatprep.mubr.bf16.mxu0 %v11866_v2 }
  0xd8   : > { %6736 = vmatmul.mubr.msk.bf16.gmra.mrb[92].mxu1 %vm688_vm0, %v8553_v60 }
  0xde   : > { %6697 = vmatmul.mubr.msk.bf16.gmra.mrb[96].mxu0 %vm688_vm0, %v8483_v27 }
  0xdf   : > { %1067 = vmatprep.mubr.bf16.mxu0 %v11866_v2 }
  0xe6   : > { %6698 = vmatmul.mubr.msk.bf16.gmra.mrb[100].mxu0 %vm688_vm0, %v8493_v30 }
  0xe7   : > { %1077 = vmatprep.mubr.bf16.mxu0 %v11866_v2 }
  0xee   : > { %6699 = vmatmul.mubr.msk.bf16.gmra.mrb[104].mxu0 %vm688_vm0, %v8503_v35 }
  0xef   : > { %1087 = vmatprep.mubr.bf16.mxu0 %v11866_v2 }
  0xf1   : > { %v819_v7 = vpop.f32.mrb[0].mxu0 }
  0xf2   : > { %v820_v10 = vadd.f32 %v819_v7, %v8574_v4  ;;  %v821_v11 = vpop.f32.mrb[1].mxu0 }
  0xf3   : > { %v822_v14 = vadd.f32 %v821_v11, %v8579_v6  ;;  %v823_v15 = vpop.f32.mrb[2].mxu0  ;;  %v7616_v11 = vld [vmem:[%s11854_s3] sm:$0xff]  }
  0xf4   : > { %v824_v17 = vadd.f32 %v823_v15, %v8574_v4  ;;  %v825_v18 = vpop.f32.mrb[3].mxu0  ;;  %v1780_v24 = vmax.f32 %v820_v10, 0.0  ;;  %7117 = vmatprep.subr.bf16.mxu1 %v7616_v11 }
  0xf5   : > { %v826_v23 = vadd.f32 %v825_v18, %v8579_v6  ;;  %v1781_v29 = vmax.f32 %v822_v14, 0.0  ;;  %7118 = vmatpush3.bf16.msra.mxu1 %v7616_v11 }
  0xf6   : > { %v1784_v28 = vmax.f32 %v824_v17, 0.0  ;;  %6700 = vmatmul.mubr.msk.bf16.gmra.mrb[108].mxu0 %vm688_vm0, %v8513_v40 }
  0xf7   : > { %v1785_v33 = vmax.f32 %v826_v23, 0.0  ;;  %1097 = vmatprep.mubr.bf16.mxu0 %v11866_v2 }
  0xf8   : > { %v8589_v34 = vpack.c.bf16 %v1784_v28, %v1780_v24 }
  0xf9   : > { %v829_v36 = vpop.f32.mrb[4].mxu0  ;;  %v8591_v39 = vpack.c.bf16 %v1785_v33, %v1781_v29 }
  0xfa   : > { %v830_v41 = vadd.f32 %v829_v36, %v8574_v4  ;;  %v831_v42 = vpop.f32.mrb[5].mxu0 }
  0xfb   : > { %v832_v46 = vadd.f32 %v831_v42, %v8579_v6  ;;  %v833_v47 = vpop.f32.mrb[6].mxu0 }
  0xfc   : > { %v834_v51 = vadd.f32 %v833_v47, %v8574_v4  ;;  %v835_v52 = vpop.f32.mrb[7].mxu0  ;;  %v1788_v57 = vmax.f32 %v830_v41, 0.0 }
  0xfd   : > { %v836_v55 = vadd.f32 %v835_v52, %v8579_v6  ;;  %v1789_v7 = vmax.f32 %v832_v46, 0.0 }
  0xfe   : > { %v1792_v58 = vmax.f32 %v834_v51, 0.0  ;;  %6701 = vmatmul.mubr.msk.bf16.gmra.mrb[112].mxu0 %vm688_vm0, %v8523_v45 }
  0xff   : > { %v1793_v10 = vmax.f32 %v836_v55, 0.0  ;;  %1107 = vmatprep.mubr.bf16.mxu0 %v11866_v2 }
 0x100   : > { %v8603_v14 = vpack.c.bf16 %v1792_v58, %v1788_v57 }
 0x101   : > { %v839_v15 = vpop.f32.mrb[8].mxu0  ;;  %v8605_v17 = vpack.c.bf16 %v1793_v10, %v1789_v7 }
 0x102   : > { %v840_v18 = vadd.f32 %v839_v15, %v8574_v4  ;;  %v841_v23 = vpop.f32.mrb[9].mxu0 }
 0x103   : > { %v842_v24 = vadd.f32 %v841_v23, %v8579_v6  ;;  %v843_v28 = vpop.f32.mrb[10].mxu0 }
 0x104   : > { %v844_v29 = vadd.f32 %v843_v28, %v8574_v4  ;;  %v845_v33 = vpop.f32.mrb[11].mxu0  ;;  %v1796_v41 = vmax.f32 %v840_v18, 0.0 }
 0x105   : > { %v846_v36 = vadd.f32 %v845_v33, %v8579_v6  ;;  %v1797_v46 = vmax.f32 %v842_v24, 0.0 }
 0x106   : > { %v1800_v42 = vmax.f32 %v844_v29, 0.0  ;;  %6702 = vmatmul.mubr.msk.bf16.gmra.mrb[116].mxu0 %vm688_vm0, %v8533_v48 }
 0x107   : > { %v1801_v47 = vmax.f32 %v846_v36, 0.0  ;;  %1117 = vmatprep.mubr.bf16.mxu0 %v11866_v2 }
 0x108   : > { %v8614_v51 = vpack.c.bf16 %v1800_v42, %v1796_v41 }
 0x109   : > { %v849_v52 = vpop.f32.mrb[12].mxu0  ;;  %v8616_v55 = vpack.c.bf16 %v1801_v47, %v1797_v46 }
 0x10a   : > { %v850_v57 = vadd.f32 %v849_v52, %v8574_v4  ;;  %v851_v58 = vpop.f32.mrb[13].mxu0 }
 0x10b   : > { %v852_v7 = vadd.f32 %v851_v58, %v8579_v6  ;;  %v853_v10 = vpop.f32.mrb[14].mxu0 }
 0x10c   : > { %v854_v11 = vadd.f32 %v853_v10, %v8574_v4  ;;  %v855_v15 = vpop.f32.mrb[15].mxu0  ;;  %v1804_v23 = vmax.f32 %v850_v57, 0.0 }
 0x10d   : > { %v856_v18 = vadd.f32 %v855_v15, %v8579_v6  ;;  %v1805_v28 = vmax.f32 %v852_v7, 0.0 }
 0x10e   : > { %v1808_v24 = vmax.f32 %v854_v11, 0.0  ;;  %6703 = vmatmul.mubr.msk.bf16.gmra.mrb[120].mxu0 %vm688_vm0, %v8543_v54 }
 0x10f   : > { %v1809_v29 = vmax.f32 %v856_v18, 0.0  ;;  %1127 = vmatprep.mubr.bf16.mxu0 %v11866_v2 }
 0x110   : > { %v8625_v33 = vpack.c.bf16 %v1808_v24, %v1804_v23 }
 0x111   : > { %v859_v36 = vpop.f32.mrb[16].mxu0  ;;  %v8627_v41 = vpack.c.bf16 %v1809_v29, %v1805_v28 }
 0x112   : > { %v860_v42 = vadd.f32 %v859_v36, %v8574_v4  ;;  %v861_v46 = vpop.f32.mrb[17].mxu0 }
 0x113   : > { %v862_v47 = vadd.f32 %v861_v46, %v8579_v6  ;;  %v863_v52 = vpop.f32.mrb[18].mxu0 }
 0x114   : > { %v864_v57 = vadd.f32 %v863_v52, %v8574_v4  ;;  %v865_v58 = vpop.f32.mrb[19].mxu0  ;;  %v1812_v7 = vmax.f32 %v860_v42, 0.0 }
 0x115   : > { %v866_v10 = vadd.f32 %v865_v58, %v8579_v6  ;;  %v1813_v15 = vmax.f32 %v862_v47, 0.0  ;;  %v7615_v47 = vld [vmem:[%s11852_s1 + $0x38] ss:$20 sps:$4 sm:$0xff]  }
 0x116   : > { %v1816_v11 = vmax.f32 %v864_v57, 0.0  ;;  %6704 = vmatmul.mubr.msk.bf16.gmra.mrb[124].mxu0 %vm688_vm0, %v8553_v60 }
 0x117   : > { %v1817_v18 = vmax.f32 %v866_v10, 0.0  ;;  %1170 = vmatprep.mubr.bf16.mxu0 %v11866_v2 }
 0x118   : > { %v8636_v23 = vpack.c.bf16 %v1816_v11, %v1812_v7 }
 0x119   : > { %v869_v24 = vpop.f32.mrb[20].mxu0  ;;  %v8638_v28 = vpack.c.bf16 %v1817_v18, %v1813_v15 }
 0x11a   : > { %v870_v29 = vadd.f32 %v869_v24, %v8574_v4  ;;  %v871_v36 = vpop.f32.mrb[21].mxu0 }
 0x11b   : > { %v872_v46 = vadd.f32 %v871_v36, %v8579_v6  ;;  %v873_v52 = vpop.f32.mrb[22].mxu0 }
 0x11c   : > { %v874_v42 = vadd.f32 %v873_v52, %v8574_v4  ;;  %v875_v57 = vpop.f32.mrb[23].mxu0  ;;  %v1820_v10 = vmax.f32 %v870_v29, 0.0 }
 0x11d   : > { %v876_v58 = vadd.f32 %v875_v57, %v8579_v6  ;;  %v1821_v11 = vmax.f32 %v872_v46, 0.0 }
 0x11e   : > { %v1824_v7 = vmax.f32 %v874_v42, 0.0  ;;  %6705 = vmatmul.mubr.msk.bf16.vlgmr.msra.gmra.mrb[128].mxu0 %vm688_vm0, %v8273_v9 }
 0x11f   : > { %v1825_v15 = vmax.f32 %v876_v58, 0.0  ;;  %7050 = vmatpush3.bf16.msra.mxu0 %v8470_v21  ;;  %1180 = vmatprep.mubr.bf16.mxu0 %v11866_v2 }
 0x120   : > { %7051 = vmatprep.subr.bf16.mxu0 %v7615_v47  ;;  %v8651_v18 = vpack.c.bf16 %v1824_v7, %v1820_v10 }
 0x121   : > { %v879_v24 = vpop.f32.mrb[24].mxu0  ;;  %v8653_v36 = vpack.c.bf16 %v1825_v15, %v1821_v11 }
 0x122   : > { %12058 = vst [vmem:[#allocation5_spill] sm:$0xff] %v8651_v18  ;;  %v880_v52 = vadd.f32 %v879_v24, %v8574_v4  ;;  %v881_v57 = vpop.f32.mrb[25].mxu0 }
 0x123   : > { %v882_v29 = vadd.f32 %v881_v57, %v8579_v6  ;;  %v883_v42 = vpop.f32.mrb[26].mxu0  ;;  %7052 = vmatpush3.bf16.msra.mxu0 %v7615_v47 }
 0x124   : > { %v884_v46 = vadd.f32 %v883_v42, %v8574_v4  ;;  %v885_v58 = vpop.f32.mrb[27].mxu0  ;;  %v1828_v3 = vmax.f32 %v880_v52, 0.0 }
 0x125   : > { %v886_v21 = vadd.f32 %v885_v58, %v8579_v6  ;;  %v1829_v10 = vmax.f32 %v882_v29, 0.0 }
 0x126   : > { %v1832_v63 = vmax.f32 %v884_v46, 0.0  ;;  %6706 = vmatmul.mubr.msk.bf16.gmra.mrb[132].mxu0 %vm688_vm0, %v8280_v12 }
 0x127   : > { %v1833_v7 = vmax.f32 %v886_v21, 0.0  ;;  %1190 = vmatprep.mubr.bf16.mxu0 %v11866_v2 }
 0x128   : > { %v8662_v11 = vpack.c.bf16 %v1832_v63, %v1828_v3 }
 0x129   : > { %v889_v15 = vpop.f32.mrb[28].mxu0  ;;  %v8664_v24 = vpack.c.bf16 %v1833_v7, %v1829_v10 }
 0x12a   : > { %12059 = vst [vmem:[#allocation6_spill] sm:$0xff] %v8662_v11  ;;  %v890_v47 = vadd.f32 %v889_v15, %v8574_v4  ;;  %v891_v57 = vpop.f32.mrb[29].mxu0 }
 0x12b   : > { %12060 = vst [vmem:[#allocation7_spill] sm:$0xff] %v8664_v24  ;;  %v892_v42 = vadd.f32 %v891_v57, %v8579_v6  ;;  %v893_v58 = vpop.f32.mrb[30].mxu0 }
 0x12c   : > { %v894_v52 = vadd.f32 %v893_v58, %v8574_v4  ;;  %v895_v46 = vpop.f32.mrb[31].mxu0  ;;  %v1836_v29 = vmax.f32 %v890_v47, 0.0 }
 0x12d   : > { %v896_v18 = vadd.f32 %v895_v46, %v8579_v6  ;;  %v1837_v63 = vmax.f32 %v892_v42, 0.0 }
 0x12e   : > { %v1840_v21 = vmax.f32 %v894_v52, 0.0  ;;  %6707 = vmatmul.mubr.msk.bf16.gmra.mrb[136].mxu0 %vm688_vm0, %v8295_v19 }
 0x12f   : > { %v1841_v3 = vmax.f32 %v896_v18, 0.0  ;;  %1200 = vmatprep.mubr.bf16.mxu0 %v11866_v2 }
 0x130   : > { %v8673_v10 = vpack.c.bf16 %v1840_v21, %v1836_v29 }
 0x131   : > { %v899_v7 = vpop.f32.mrb[32].mxu0  ;;  %v8675_v15 = vpack.c.bf16 %v1841_v3, %v1837_v63 }
 0x132   : > { %12061 = vst [vmem:[#allocation8_spill] sm:$0xff] %v8673_v10  ;;  %v900_v57 = vadd.f32 %v899_v7, %v8574_v4  ;;  %v901_v58 = vpop.f32.mrb[33].mxu0 }
 0x133   : > { %12062 = vst [vmem:[#allocation9_spill] sm:$0xff] %v8675_v15  ;;  %v902_v11 = vadd.f32 %v901_v58, %v8579_v6  ;;  %v903_v46 = vpop.f32.mrb[34].mxu0 }
 0x134   : > { %v904_v47 = vadd.f32 %v903_v46, %v8574_v4  ;;  %v905_v52 = vpop.f32.mrb[35].mxu0  ;;  %v1844_v42 = vmax.f32 %v900_v57, 0.0 }
 0x135   : > { %v906_v24 = vadd.f32 %v905_v52, %v8579_v6  ;;  %v1845_v29 = vmax.f32 %v902_v11, 0.0 }
 0x136   : > { %v1848_v18 = vmax.f32 %v904_v47, 0.0  ;;  %6708 = vmatmul.mubr.msk.bf16.gmra.mrb[140].mxu0 %vm688_vm0, %v8309_v25 }
 0x137   : > { %v1849_v21 = vmax.f32 %v906_v24, 0.0  ;;  %1210 = vmatprep.mubr.bf16.mxu0 %v11866_v2 }
 0x138   : > { %v8684_v63 = vpack.c.bf16 %v1848_v18, %v1844_v42 }
 0x139   : > { %v909_v3 = vpop.f32.mrb[36].mxu0  ;;  %v8686_v7 = vpack.c.bf16 %v1849_v21, %v1845_v29 }
 0x13a   : > { %12063 = vst [vmem:[#allocation10_spill] sm:$0xff] %v8684_v63  ;;  %v910_v58 = vadd.f32 %v909_v3, %v8574_v4  ;;  %v911_v46 = vpop.f32.mrb[37].mxu0 }
 0x13b   : > { %12064 = vst [vmem:[#allocation11_spill] sm:$0xff] %v8686_v7  ;;  %v912_v10 = vadd.f32 %v911_v46, %v8579_v6  ;;  %v913_v52 = vpop.f32.mrb[38].mxu0 }
 0x13c   : > { %v914_v57 = vadd.f32 %v913_v52, %v8574_v4  ;;  %v915_v47 = vpop.f32.mrb[39].mxu0  ;;  %v1852_v11 = vmax.f32 %v910_v58, 0.0 }
 0x13d   : > { %v916_v15 = vadd.f32 %v915_v47, %v8579_v6  ;;  %v1853_v42 = vmax.f32 %v912_v10, 0.0 }
 0x13e   : > { %v1856_v24 = vmax.f32 %v914_v57, 0.0  ;;  %6709 = vmatmul.mubr.msk.bf16.gmra.mrb[144].mxu0 %vm688_vm0, %v8323_v31 }
 0x13f   : > { %v1857_v18 = vmax.f32 %v916_v15, 0.0  ;;  %1220 = vmatprep.mubr.bf16.mxu0 %v11866_v2 }
 0x140   : > { %v8695_v29 = vpack.c.bf16 %v1856_v24, %v1852_v11 }
 0x141   : > { %v919_v21 = vpop.f32.mrb[40].mxu0  ;;  %v8697_v3 = vpack.c.bf16 %v1857_v18, %v1853_v42 }
 0x142   : > { %12065 = vst [vmem:[#allocation12_spill] sm:$0xff] %v8695_v29  ;;  %v920_v46 = vadd.f32 %v919_v21, %v8574_v4  ;;  %v921_v52 = vpop.f32.mrb[41].mxu0 }
 0x143   : > { %12066 = vst [vmem:[#allocation13_spill] sm:$0xff] %v8697_v3  ;;  %v922_v63 = vadd.f32 %v921_v52, %v8579_v6  ;;  %v923_v47 = vpop.f32.mrb[42].mxu0 }
 0x144   : > { %v924_v58 = vadd.f32 %v923_v47, %v8574_v4  ;;  %v925_v57 = vpop.f32.mrb[43].mxu0  ;;  %v1860_v10 = vmax.f32 %v920_v46, 0.0 }
 0x145   : > { %v926_v7 = vadd.f32 %v925_v57, %v8579_v6  ;;  %v1861_v11 = vmax.f32 %v922_v63, 0.0 }
 0x146   : > { %v1864_v15 = vmax.f32 %v924_v58, 0.0  ;;  %6710 = vmatmul.mubr.msk.bf16.gmra.mrb[148].mxu0 %vm688_vm0, %v8337_v37 }
 0x147   : > { %v1865_v24 = vmax.f32 %v926_v7, 0.0  ;;  %1230 = vmatprep.mubr.bf16.mxu0 %v11866_v2 }
 0x148   : > { %v8706_v42 = vpack.c.bf16 %v1864_v15, %v1860_v10 }
 0x149   : > { %v929_v18 = vpop.f32.mrb[44].mxu0  ;;  %v8708_v21 = vpack.c.bf16 %v1865_v24, %v1861_v11 }
 0x14a   : > { %12067 = vst [vmem:[#allocation14_spill] sm:$0xff] %v8706_v42  ;;  %v930_v52 = vadd.f32 %v929_v18, %v8574_v4  ;;  %v931_v47 = vpop.f32.mrb[45].mxu0 }
 0x14b   : > { %12068 = vst [vmem:[#allocation15_spill] sm:$0xff] %v8708_v21  ;;  %v932_v29 = vadd.f32 %v931_v47, %v8579_v6  ;;  %v933_v57 = vpop.f32.mrb[46].mxu0 }
 0x14c   : > { %v934_v46 = vadd.f32 %v933_v57, %v8574_v4  ;;  %v935_v58 = vpop.f32.mrb[47].mxu0  ;;  %v1868_v63 = vmax.f32 %v930_v52, 0.0 }
 0x14d   : > { %v936_v3 = vadd.f32 %v935_v58, %v8579_v6  ;;  %v1869_v10 = vmax.f32 %v932_v29, 0.0 }
 0x14e   : > { %v1872_v7 = vmax.f32 %v934_v46, 0.0  ;;  %6711 = vmatmul.mubr.msk.bf16.gmra.mrb[152].mxu0 %vm688_vm0, %v8351_v43 }
 0x14f   : > { %v1873_v15 = vmax.f32 %v936_v3, 0.0  ;;  %1240 = vmatprep.mubr.bf16.mxu0 %v11866_v2 }
 0x150   : > { %v8717_v11 = vpack.c.bf16 %v1872_v7, %v1868_v63 }
 0x151   : > { %v939_v24 = vpop.f32.mrb[48].mxu0  ;;  %v8719_v18 = vpack.c.bf16 %v1873_v15, %v1869_v10 }
 0x152   : > { %12069 = vst [vmem:[#allocation16_spill] sm:$0xff] %v8717_v11  ;;  %v940_v47 = vadd.f32 %v939_v24, %v8574_v4  ;;  %v941_v57 = vpop.f32.mrb[49].mxu0 }
 0x153   : > { %v942_v42 = vadd.f32 %v941_v57, %v8579_v6  ;;  %v943_v58 = vpop.f32.mrb[50].mxu0 }
 0x154   : > { %v944_v52 = vadd.f32 %v943_v58, %v8574_v4  ;;  %v945_v46 = vpop.f32.mrb[51].mxu0  ;;  %v1876_v29 = vmax.f32 %v940_v47, 0.0 }
 0x155   : > { %v946_v21 = vadd.f32 %v945_v46, %v8579_v6  ;;  %v1877_v63 = vmax.f32 %v942_v42, 0.0 }
 0x156   : > { %v1880_v3 = vmax.f32 %v944_v52, 0.0  ;;  %6712 = vmatmul.mubr.msk.bf16.gmra.mrb[156].mxu0 %vm688_vm0, %v8365_v49 }
 0x157   : > { %v1881_v7 = vmax.f32 %v946_v21, 0.0  ;;  %7053 = vmatprep.mubr.msk.bf16.mxu0 %vm688_vm0, %v8273_v9 }
 0x158   : > { %v8729_v10 = vpack.c.bf16 %v1880_v3, %v1876_v29  ;;  %v7617_v3 = vld [vmem:[%s11854_s3 + $0x8] sm:$0xff]  }
 0x159   : > { %v949_v15 = vpop.f32.mrb[52].mxu0  ;;  %v8731_v24 = vpack.c.bf16 %v1881_v7, %v1877_v63  ;;  %7119 = vmatprep.subr.bf16.mxu1 %v7617_v3 }
 0x15a   : > { %v950_v57 = vadd.f32 %v949_v15, %v8574_v4  ;;  %v951_v58 = vpop.f32.mrb[53].mxu0  ;;  %7120 = vmatpush3.bf16.msra.mxu1 %v7617_v3 }
 0x15b   : > { %v952_v46 = vadd.f32 %v951_v58, %v8579_v6  ;;  %v953_v47 = vpop.f32.mrb[54].mxu0 }
 0x15c   : > { %v954_v52 = vadd.f32 %v953_v47, %v8574_v4  ;;  %v955_v2 = vpop.f32.mrb[55].mxu0  ;;  %v1884_v21 = vmax.f32 %v950_v57, 0.0 }
 0x15d   : > { %v956_v42 = vadd.f32 %v955_v2, %v8579_v6  ;;  %v1885_v9 = vmax.f32 %v952_v46, 0.0 }
 0x15e   : > { %v1888_v11 = vmax.f32 %v954_v52, 0.0  ;;  %7054 = vmatmul.mubr.msk.bf16.vlgmr.msra.gmra.mrb[160].mxu0 %vm688_vm0, %v8280_v12 }
 0x15f   : > { %v1889_v29 = vmax.f32 %v956_v42, 0.0  ;;  %7057 = vmatprep.mubr.msk.bf16.mxu0 %vm688_vm0, %v8295_v19 }
 0x160   : > { %v8744_v63 = vpack.c.bf16 %v1888_v11, %v1884_v21 }
 0x161   : > { %v959_v7 = vpop.f32.mrb[56].mxu0  ;;  %v8746_v15 = vpack.c.bf16 %v1889_v29, %v1885_v9 }
 0x162   : > { %12070 = vst [vmem:[#allocation17_spill] sm:$0xff] %v8744_v63  ;;  %v960_v2 = vadd.f32 %v959_v7, %v8574_v4  ;;  %v961_v57 = vpop.f32.mrb[57].mxu0 }
 0x163   : > { %v962_v12 = vadd.f32 %v961_v57, %v8579_v6  ;;  %v963_v58 = vpop.f32.mrb[58].mxu0 }
 0x164   : > { %v964_v46 = vadd.f32 %v963_v58, %v8574_v4  ;;  %v965_v19 = vpop.f32.mrb[59].mxu0  ;;  %v1892_v52 = vmax.f32 %v960_v2, 0.0 }
 0x165   : > { %v966_v47 = vadd.f32 %v965_v19, %v8579_v6  ;;  %v1893_v11 = vmax.f32 %v962_v12, 0.0 }
 0x166   : > { %v1896_v42 = vmax.f32 %v964_v46, 0.0  ;;  %7058 = vmatmul.mubr.msk.bf16.gmra.mrb[164].mxu0 %vm688_vm0, %v8309_v25 }
 0x167   : > { %v1897_v21 = vmax.f32 %v966_v47, 0.0  ;;  %7061 = vmatprep.mubr.msk.bf16.mxu0 %vm688_vm0, %v8323_v31 }
 0x168   : > { %v8756_v9 = vpack.c.bf16 %v1896_v42, %v1892_v52 }
 0x169   : > { %v969_v29 = vpop.f32.mrb[60].mxu0  ;;  %v8758_v7 = vpack.c.bf16 %v1897_v21, %v1893_v11 }
 0x16a   : > { %12071 = vst [vmem:[#allocation18_spill] sm:$0xff] %v8756_v9  ;;  %v970_v3 = vadd.f32 %v969_v29, %v8574_v4  ;;  %v971_v57 = vpop.f32.mrb[61].mxu0 }
 0x16b   : > { %12072 = vst [vmem:[#allocation19_spill] sm:$0xff] %v8758_v7  ;;  %v972_v58 = vadd.f32 %v971_v57, %v8579_v6  ;;  %v973_v2 = vpop.f32.mrb[62].mxu0 }
 0x16c   : > { %v974_v46 = vadd.f32 %v973_v2, %v8574_v4  ;;  %v975_v19 = vpop.f32.mrb[63].mxu0  ;;  %v1900_v12 = vmax.f32 %v970_v3, 0.0 }
 0x16d   : > { %v976_v25 = vadd.f32 %v975_v19, %v8579_v6  ;;  %v1901_v31 = vmax.f32 %v972_v58, 0.0 }
 0x16e   : > { %v1904_v47 = vmax.f32 %v974_v46, 0.0  ;;  %7062 = vmatmul.mubr.msk.bf16.gmra.mrb[168].mxu0 %vm688_vm0, %v8337_v37 }
 0x16f   : > { %v1905_v52 = vmax.f32 %v976_v25, 0.0  ;;  %7065 = vmatprep.mubr.msk.bf16.mxu0 %vm688_vm0, %v8351_v43 }
 0x170   : > { %v8768_v42 = vpack.c.bf16 %v1904_v47, %v1900_v12 }
 0x171   : > { %v979_v11 = vpop.f32.mrb[64].mxu0  ;;  %v8770_v21 = vpack.c.bf16 %v1905_v52, %v1901_v31 }
 0x172   : > { %12073 = vst [vmem:[#allocation20_spill] sm:$0xff] %v8768_v42  ;;  %v980_v29 = vadd.f32 %v979_v11, %v8574_v4  ;;  %v981_v57 = vpop.f32.mrb[65].mxu0 }
 0x173   : > { %12074 = vst [vmem:[#allocation21_spill] sm:$0xff] %v8770_v21  ;;  %v982_v2 = vadd.f32 %v981_v57, %v8579_v6  ;;  %v983_v3 = vpop.f32.mrb[66].mxu0 }
 0x174   : > { %v984_v46 = vadd.f32 %v983_v3, %v8574_v4  ;;  %v985_v19 = vpop.f32.mrb[67].mxu0  ;;  %v1908_v58 = vmax.f32 %v980_v29, 0.0 }
 0x175   : > { %v986_v37 = vadd.f32 %v985_v19, %v8579_v6  ;;  %v1909_v43 = vmax.f32 %v982_v2, 0.0 }
 0x176   : > { %v1912_v25 = vmax.f32 %v984_v46, 0.0  ;;  %7066 = vmatmul.mubr.msk.bf16.gmra.mrb[172].mxu0 %vm688_vm0, %v8365_v49 }
 0x177   : > { %v1913_v12 = vmax.f32 %v986_v37, 0.0  ;;  %7069 = vmatprep.mubr.msk.bf16.mxu0 %vm688_vm0, %v8297_v20 }
 0x178   : > { %v8780_v47 = vpack.c.bf16 %v1912_v25, %v1908_v58 }
 0x179   : > { %v989_v31 = vpop.f32.mrb[68].mxu0  ;;  %v8782_v52 = vpack.c.bf16 %v1913_v12, %v1909_v43 }
 0x17a   : > { %12075 = vst [vmem:[#allocation22_spill] sm:$0xff] %v8780_v47  ;;  %v990_v11 = vadd.f32 %v989_v31, %v8574_v4  ;;  %v991_v57 = vpop.f32.mrb[69].mxu0 }
 0x17b   : > { %12076 = vst [vmem:[#allocation23_spill] sm:$0xff] %v8782_v52  ;;  %v992_v3 = vadd.f32 %v991_v57, %v8579_v6  ;;  %v993_v29 = vpop.f32.mrb[70].mxu0 }
 0x17c   : > { %v994_v46 = vadd.f32 %v993_v29, %v8574_v4  ;;  %v995_v19 = vpop.f32.mrb[71].mxu0  ;;  %v1916_v2 = vmax.f32 %v990_v11, 0.0 }
 0x17d   : > { %v996_v49 = vadd.f32 %v995_v19, %v8579_v6  ;;  %v1917_v20 = vmax.f32 %v992_v3, 0.0 }
 0x17e   : > { %v1920_v37 = vmax.f32 %v994_v46, 0.0  ;;  %7070 = vmatmul.mubr.msk.bf16.gmra.mrb[176].mxu0 %vm688_vm0, %v8311_v26 }
 0x17f   : > { %v1921_v58 = vmax.f32 %v996_v49, 0.0  ;;  %7073 = vmatprep.mubr.msk.bf16.mxu0 %vm688_vm0, %v8325_v32 }
 0x180   : > { %v8792_v25 = vpack.c.bf16 %v1920_v37, %v1916_v2 }
 0x181   : > { %v999_v43 = vpop.f32.mrb[72].mxu0  ;;  %v8794_v12 = vpack.c.bf16 %v1921_v58, %v1917_v20 }
 0x182   : > { %12077 = vst [vmem:[#allocation24_spill] sm:$0xff] %v8792_v25  ;;  %v1000_v31 = vadd.f32 %v999_v43, %v8574_v4  ;;  %v1001_v57 = vpop.f32.mrb[73].mxu0 }
 0x183   : > { %12078 = vst [vmem:[#allocation25_spill] sm:$0xff] %v8794_v12  ;;  %v1002_v29 = vadd.f32 %v1001_v57, %v8579_v6  ;;  %v1003_v11 = vpop.f32.mrb[74].mxu0 }
 0x184   : > { %v1004_v46 = vadd.f32 %v1003_v11, %v8574_v4  ;;  %v1005_v19 = vpop.f32.mrb[75].mxu0  ;;  %v1924_v3 = vmax.f32 %v1000_v31, 0.0 }
 0x185   : > { %v1006_v26 = vadd.f32 %v1005_v19, %v8579_v6  ;;  %v1925_v32 = vmax.f32 %v1002_v29, 0.0 }
 0x186   : > { %v1928_v49 = vmax.f32 %v1004_v46, 0.0  ;;  %7074 = vmatmul.mubr.msk.bf16.gmra.mrb[180].mxu0 %vm688_vm0, %v8339_v38 }
 0x187   : > { %v1929_v2 = vmax.f32 %v1006_v26, 0.0  ;;  %7077 = vmatprep.mubr.msk.bf16.mxu0 %vm688_vm0, %v8353_v44 }
 0x188   : > { %v8804_v37 = vpack.c.bf16 %v1928_v49, %v1924_v3 }
 0x189   : > { %v1009_v20 = vpop.f32.mrb[76].mxu0  ;;  %v8806_v58 = vpack.c.bf16 %v1929_v2, %v1925_v32 }
 0x18a   : > { %12079 = vst [vmem:[#allocation26_spill] sm:$0xff] %v8804_v37  ;;  %v1010_v43 = vadd.f32 %v1009_v20, %v8574_v4  ;;  %v1011_v57 = vpop.f32.mrb[77].mxu0 }
 0x18b   : > { %12080 = vst [vmem:[#allocation27_spill] sm:$0xff] %v8806_v58  ;;  %v1012_v11 = vadd.f32 %v1011_v57, %v8579_v6  ;;  %v1013_v31 = vpop.f32.mrb[78].mxu0 }
 0x18c   : > { %v1014_v46 = vadd.f32 %v1013_v31, %v8574_v4  ;;  %v1015_v19 = vpop.f32.mrb[79].mxu0  ;;  %v1932_v29 = vmax.f32 %v1010_v43, 0.0 }
 0x18d   : > { %v1016_v38 = vadd.f32 %v1015_v19, %v8579_v6  ;;  %v1933_v44 = vmax.f32 %v1012_v11, 0.0 }
 0x18e   : > { %v1936_v26 = vmax.f32 %v1014_v46, 0.0  ;;  %7078 = vmatmul.mubr.msk.bf16.gmra.mrb[184].mxu0 %vm688_vm0, %v8367_v50 }
 0x18f   : > { %v1937_v3 = vmax.f32 %v1016_v38, 0.0  ;;  %7081 = vmatprep.mubr.msk.bf16.mxu0 %vm688_vm0, %v8377_v53 }
 0x190   : > { %v8816_v49 = vpack.c.bf16 %v1936_v26, %v1932_v29 }
 0x191   : > { %v1019_v32 = vpop.f32.mrb[80].mxu0  ;;  %v8818_v2 = vpack.c.bf16 %v1937_v3, %v1933_v44 }
 0x192   : > { %12081 = vst [vmem:[#allocation28_spill] sm:$0xff] %v8816_v49  ;;  %v1020_v20 = vadd.f32 %v1019_v32, %v8574_v4  ;;  %v1021_v57 = vpop.f32.mrb[81].mxu0 }
 0x193   : > { %12082 = vst [vmem:[#allocation29_spill] sm:$0xff] %v8818_v2  ;;  %v1022_v31 = vadd.f32 %v1021_v57, %v8579_v6  ;;  %v1023_v43 = vpop.f32.mrb[82].mxu0  ;;  %v9204_v2 = vld [vmem:[%s8269_s18 + $0x50] sm:$0xff] }
 0x194   : > { %v1024_v46 = vadd.f32 %v1023_v43, %v8574_v4  ;;  %v1025_v19 = vpop.f32.mrb[83].mxu0  ;;  %v1940_v11 = vmax.f32 %v1020_v20, 0.0  ;;  %v9207_v37 = vmul.f32 0.9, %v9204_v2 }
 0x195   : > { %v1026_v50 = vadd.f32 %v1025_v19, %v8579_v6  ;;  %v1941_v53 = vmax.f32 %v1022_v31, 0.0 }
 0x196   : > { %v1944_v38 = vmax.f32 %v1024_v46, 0.0  ;;  %7082 = vmatmul.mubr.msk.bf16.gmra.mrb[188].mxu0 %vm688_vm0, %v8387_v56  ;;  %12150 = vst [vmem:[#allocation97_spill] sm:$0xff] %v9207_v37 }
 0x197   : > { %v1945_v29 = vmax.f32 %v1026_v50, 0.0  ;;  %7085 = vmatprep.mubr.msk.bf16.mxu0 %vm688_vm0, %v8397_v59 }
 0x198   : > { %v8828_v26 = vpack.c.bf16 %v1944_v38, %v1940_v11 }
 0x199   : > { %v1029_v44 = vpop.f32.mrb[84].mxu0  ;;  %v8830_v3 = vpack.c.bf16 %v1945_v29, %v1941_v53 }
 0x19a   : > { %12083 = vst [vmem:[#allocation30_spill] sm:$0xff] %v8828_v26  ;;  %v1030_v32 = vadd.f32 %v1029_v44, %v8574_v4  ;;  %v1031_v57 = vpop.f32.mrb[85].mxu0 }
 0x19b   : > { %12084 = vst [vmem:[#allocation31_spill] sm:$0xff] %v8830_v3  ;;  %v1032_v43 = vadd.f32 %v1031_v57, %v8579_v6  ;;  %v1033_v20 = vpop.f32.mrb[86].mxu0 }
 0x19c   : > { %v1034_v46 = vadd.f32 %v1033_v20, %v8574_v4  ;;  %v1035_v19 = vpop.f32.mrb[87].mxu0  ;;  %v1948_v31 = vmax.f32 %v1030_v32, 0.0 }
 0x19d   : > { %v1036_v56 = vadd.f32 %v1035_v19, %v8579_v6  ;;  %v1949_v59 = vmax.f32 %v1032_v43, 0.0 }
 0x19e   : > { %v1952_v50 = vmax.f32 %v1034_v46, 0.0  ;;  %7086 = vmatmul.mubr.msk.bf16.gmra.mrb[192].mxu0 %vm688_vm0, %v8407_v62 }
 0x19f   : > { %v1953_v11 = vmax.f32 %v1036_v56, 0.0  ;;  %7089 = vmatprep.mubr.msk.bf16.mxu0 %vm688_vm0, %v8417_v1 }
 0x1a0   : > { %v8840_v38 = vpack.c.bf16 %v1952_v50, %v1948_v31 }
 0x1a1   : > { %v1039_v53 = vpop.f32.mrb[88].mxu0  ;;  %v8842_v29 = vpack.c.bf16 %v1953_v11, %v1949_v59 }
 0x1a2   : > { %12085 = vst [vmem:[#allocation32_spill] sm:$0xff] %v8840_v38  ;;  %v1040_v44 = vadd.f32 %v1039_v53, %v8574_v4  ;;  %v1041_v57 = vpop.f32.mrb[89].mxu0 }
 0x1a3   : > { %12086 = vst [vmem:[#allocation33_spill] sm:$0xff] %v8842_v29  ;;  %v1042_v20 = vadd.f32 %v1041_v57, %v8579_v6  ;;  %v1043_v32 = vpop.f32.mrb[90].mxu0 }
 0x1a4   : > { %v1044_v46 = vadd.f32 %v1043_v32, %v8574_v4  ;;  %v1045_v19 = vpop.f32.mrb[91].mxu0  ;;  %v1956_v43 = vmax.f32 %v1040_v44, 0.0 }
 0x1a5   : > { %v1046_v62 = vadd.f32 %v1045_v19, %v8579_v6  ;;  %v1957_v1 = vmax.f32 %v1042_v20, 0.0 }
 0x1a6   : > { %v1960_v56 = vmax.f32 %v1044_v46, 0.0  ;;  %7090 = vmatmul.mubr.msk.bf16.gmra.mrb[196].mxu0 %vm688_vm0, %v8427_v5 }
 0x1a7   : > { %v1961_v31 = vmax.f32 %v1046_v62, 0.0  ;;  %7093 = vmatprep.mubr.msk.bf16.mxu0 %vm688_vm0, %v8437_v8 }
 0x1a8   : > { %v8852_v50 = vpack.c.bf16 %v1960_v56, %v1956_v43 }
 0x1a9   : > { %v1049_v59 = vpop.f32.mrb[92].mxu0  ;;  %v8854_v11 = vpack.c.bf16 %v1961_v31, %v1957_v1 }
 0x1aa   : > { %12087 = vst [vmem:[#allocation34_spill] sm:$0xff] %v8852_v50  ;;  %v1050_v53 = vadd.f32 %v1049_v59, %v8574_v4  ;;  %v1051_v57 = vpop.f32.mrb[93].mxu0 }
 0x1ab   : > { %12088 = vst [vmem:[#allocation35_spill] sm:$0xff] %v8854_v11  ;;  %v1052_v32 = vadd.f32 %v1051_v57, %v8579_v6  ;;  %v1053_v44 = vpop.f32.mrb[94].mxu0 }
 0x1ac   : > { %v1054_v46 = vadd.f32 %v1053_v44, %v8574_v4  ;;  %v1055_v19 = vpop.f32.mrb[95].mxu0  ;;  %v1964_v20 = vmax.f32 %v1050_v53, 0.0 }
 0x1ad   : > { %v1056_v5 = vadd.f32 %v1055_v19, %v8579_v6  ;;  %v1965_v8 = vmax.f32 %v1052_v32, 0.0 }
 0x1ae   : > { %v1968_v62 = vmax.f32 %v1054_v46, 0.0  ;;  %7094 = vmatmul.mubr.msk.bf16.gmra.mrb[200].mxu0 %vm688_vm0, %v8447_v13 }
 0x1af   : > { %v1969_v43 = vmax.f32 %v1056_v5, 0.0  ;;  %7097 = vmatprep.mubr.msk.bf16.mxu0 %vm688_vm0, %v8457_v16 }
 0x1b0   : > { %v8864_v56 = vpack.c.bf16 %v1968_v62, %v1964_v20 }
 0x1b1   : > { %v1059_v1 = vpop.f32.mrb[96].mxu0  ;;  %v8866_v31 = vpack.c.bf16 %v1969_v43, %v1965_v8 }
 0x1b2   : > { %12089 = vst [vmem:[#allocation36_spill] sm:$0xff] %v8864_v56  ;;  %v1060_v59 = vadd.f32 %v1059_v1, %v8574_v4  ;;  %v1061_v57 = vpop.f32.mrb[97].mxu0 }
 0x1b3   : > { %12090 = vst [vmem:[#allocation37_spill] sm:$0xff] %v8866_v31  ;;  %v1062_v44 = vadd.f32 %v1061_v57, %v8579_v6  ;;  %v1063_v53 = vpop.f32.mrb[98].mxu0 }
 0x1b4   : > { %v1064_v46 = vadd.f32 %v1063_v53, %v8574_v4  ;;  %v1065_v19 = vpop.f32.mrb[99].mxu0  ;;  %v1972_v32 = vmax.f32 %v1060_v59, 0.0 }
 0x1b5   : > { %v1066_v13 = vadd.f32 %v1065_v19, %v8579_v6  ;;  %v1973_v16 = vmax.f32 %v1062_v44, 0.0 }
 0x1b6   : > { %v1976_v5 = vmax.f32 %v1064_v46, 0.0  ;;  %7098 = vmatmul.mubr.msk.bf16.gmra.mrb[204].mxu0 %vm688_vm0, %v8473_v22 }
 0x1b7   : > { %v1977_v20 = vmax.f32 %v1066_v13, 0.0  ;;  %7101 = vmatprep.mubr.msk.bf16.mxu0 %vm688_vm0, %v8483_v27 }
 0x1b8   : > { %v8876_v62 = vpack.c.bf16 %v1976_v5, %v1972_v32 }
 0x1b9   : > { %v1069_v8 = vpop.f32.mrb[100].mxu0  ;;  %v8878_v43 = vpack.c.bf16 %v1977_v20, %v1973_v16 }
 0x1ba   : > { %12091 = vst [vmem:[#allocation38_spill] sm:$0xff] %v8876_v62  ;;  %v1070_v1 = vadd.f32 %v1069_v8, %v8574_v4  ;;  %v1071_v57 = vpop.f32.mrb[101].mxu0 }
 0x1bb   : > { %12092 = vst [vmem:[#allocation39_spill] sm:$0xff] %v8878_v43  ;;  %v1072_v53 = vadd.f32 %v1071_v57, %v8579_v6  ;;  %v1073_v59 = vpop.f32.mrb[102].mxu0 }
 0x1bc   : > { %v1074_v46 = vadd.f32 %v1073_v59, %v8574_v4  ;;  %v1075_v19 = vpop.f32.mrb[103].mxu0  ;;  %v1980_v44 = vmax.f32 %v1070_v1, 0.0 }
 0x1bd   : > { %v1076_v22 = vadd.f32 %v1075_v19, %v8579_v6  ;;  %v1981_v27 = vmax.f32 %v1072_v53, 0.0 }
 0x1be   : > { %v1984_v13 = vmax.f32 %v1074_v46, 0.0  ;;  %7102 = vmatmul.mubr.msk.bf16.gmra.mrb[208].mxu0 %vm688_vm0, %v8493_v30  ;;  %v7620_v30 = vld [vmem:[%s11856_s5 + $0x4] ss:$8 sps:$4 sm:$0xff]  }
 0x1bf   : > { %v1985_v32 = vmax.f32 %v1076_v22, 0.0  ;;  %7105 = vmatprep.mubr.msk.bf16.mxu0 %vm688_vm0, %v8503_v35  ;;  %3826 = vmatprep.subr.bf16.mxu1 %v7620_v30 }
 0x1c0   : > { %v8888_v5 = vpack.c.bf16 %v1984_v13, %v1980_v44 }
 0x1c1   : > { %v1079_v16 = vpop.f32.mrb[104].mxu0  ;;  %v8890_v20 = vpack.c.bf16 %v1985_v32, %v1981_v27 }
 0x1c2   : > { %12093 = vst [vmem:[#allocation40_spill] sm:$0xff] %v8888_v5  ;;  %v1080_v8 = vadd.f32 %v1079_v16, %v8574_v4  ;;  %v1081_v57 = vpop.f32.mrb[105].mxu0 }
 0x1c3   : > { %12094 = vst [vmem:[#allocation41_spill] sm:$0xff] %v8890_v20  ;;  %v1082_v59 = vadd.f32 %v1081_v57, %v8579_v6  ;;  %v1083_v1 = vpop.f32.mrb[106].mxu0 }
 0x1c4   : > { %v1084_v53 = vadd.f32 %v1083_v1, %v8574_v4  ;;  %v1085_v46 = vpop.f32.mrb[107].mxu0  ;;  %v1988_v19 = vmax.f32 %v1080_v8, 0.0 }
 0x1c5   : > { %v1086_v35 = vadd.f32 %v1085_v46, %v8579_v6  ;;  %v1989_v44 = vmax.f32 %v1082_v59, 0.0  ;;  %v625_v59 = vsub.s32 3, %v8559_v61 }
 0x1c6   : > { %v1992_v22 = vmax.f32 %v1084_v53, 0.0  ;;  %7106 = vmatmul.mubr.msk.bf16.gmra.mrb[212].mxu0 %vm688_vm0, %v8513_v40  ;;  %v621_v40 = vsub.s32 2, %v8559_v61 }
 0x1c7   : > { %v1993_v13 = vmax.f32 %v1086_v35, 0.0  ;;  %7109 = vmatprep.mubr.msk.bf16.mxu0 %vm688_vm0, %v8523_v45 }
 0x1c8   : > { %v8903_v27 = vpack.c.bf16 %v1992_v22, %v1988_v19  ;;  %v1252_v22 = vpop.f32.mrb[0].mxu1 }
 0x1c9   : > { %v1089_v32 = vpop.f32.mrb[108].mxu0  ;;  %v8905_v16 = vpack.c.bf16 %v1993_v13, %v1989_v44 }
 0x1ca   : > { %12095 = vst [vmem:[#allocation42_spill] sm:$0xff] %v8903_v27  ;;  %v1090_v57 = vadd.f32 %v1089_v32, %v8574_v4  ;;  %v1091_v1 = vpop.f32.mrb[109].mxu0  ;;  %v1254_v32 = vpop.f32.mrb[1].mxu1  ;;  %v8923_v27 = vrot.slane %v8566_v0, %v625_v59 }
 0x1cb   : > { %12096 = vst [vmem:[#allocation43_spill] sm:$0xff] %v8905_v16  ;;  %v1092_v30 = vadd.f32 %v1091_v1, %v8579_v6  ;;  %v1093_v8 = vpop.f32.mrb[110].mxu0 }
 0x1cc   : > { %v1094_v53 = vadd.f32 %v1093_v8, %v8574_v4  ;;  %v1095_v46 = vpop.f32.mrb[111].mxu0  ;;  %v1996_v35 = vmax.f32 %v1090_v57, 0.0  ;;  %v8920_v8 = vrot.slane %v8566_v0, %v621_v40  ;;  %v1256_v57 = vpop.f32.mrb[2].mxu1 }
 0x1cd   : > { %v1096_v45 = vadd.f32 %v1095_v46, %v8579_v6  ;;  %v1997_v44 = vmax.f32 %v1092_v30, 0.0  ;;  %v1258_v46 = vpop.f32.mrb[3].mxu1 }
 0x1ce   : > { %v2000_v19 = vmax.f32 %v1094_v53, 0.0  ;;  %7110 = vmatmul.mubr.msk.bf16.gmra.mrb[216].mxu0 %vm688_vm0, %v8533_v48  ;;  %v1257_v40 = vadd.f32 %v1256_v57, %v8920_v8  ;;  %v1259_v0 = vadd.f32 %v1258_v46, %v8923_v27 }
 0x1cf   : > { %v2001_v13 = vmax.f32 %v1096_v45, 0.0  ;;  %7113 = vmatprep.mubr.msk.bf16.mxu0 %vm688_vm0, %v8543_v54  ;;  %v1253_v45 = vadd.f32 %v1252_v22, %v8920_v8  ;;  %v1255_v54 = vadd.f32 %v1254_v32, %v8923_v27  ;;  %v1262_v22 = vpop.f32.mrb[4].mxu1 }
 0x1d0   : > { %v8917_v1 = vpack.c.bf16 %v2000_v19, %v1996_v35  ;;  %v1851_v32 = vmax.f32 %v1259_v0, 0.0  ;;  %v1264_v62 = vpop.f32.mrb[5].mxu1  ;;  %v1850_v57 = vmax.f32 %v1257_v40, 0.0 }
 0x1d1   : > { %v1099_v53 = vpop.f32.mrb[112].mxu0  ;;  %v8925_v16 = vpack.c.bf16 %v2001_v13, %v1997_v44  ;;  %v1266_v46 = vpop.f32.mrb[6].mxu1 }
 0x1d2   : > { %12097 = vst [vmem:[#allocation44_spill] sm:$0xff] %v8917_v1  ;;  %v1100_v48 = vadd.f32 %v1099_v53, %v8574_v4  ;;  %v1101_v30 = vpop.f32.mrb[113].mxu0  ;;  %v1847_v53 = vmax.f32 %v1255_v54, 0.0  ;;  %v1268_v56 = vpop.f32.mrb[7].mxu1  ;;  %v1267_v0 = vadd.f32 %v1266_v46, %v8920_v8 }
 0x1d3   : > { %12098 = vst [vmem:[#allocation45_spill] sm:$0xff] %v8925_v16  ;;  %v1102_v35 = vadd.f32 %v1101_v30, %v8579_v6  ;;  %v1103_v19 = vpop.f32.mrb[114].mxu0  ;;  %v1846_v16 = vmax.f32 %v1253_v45, 0.0  ;;  %v1263_v45 = vadd.f32 %v1262_v22, %v8920_v8 }
 0x1d4   : > { %v1104_v59 = vadd.f32 %v1103_v19, %v8574_v4  ;;  %v1105_v1 = vpop.f32.mrb[115].mxu0  ;;  %v2004_v5 = vmax.f32 %v1100_v48, 0.0  ;;  %v8939_v19 = vpack.c.bf16 %v1851_v32, %v1847_v53 }
 0x1d5   : > { %v1106_v44 = vadd.f32 %v1105_v1, %v8579_v6  ;;  %v2005_v30 = vmax.f32 %v1102_v35, 0.0  ;;  %v1265_v35 = vadd.f32 %v1264_v62, %v8923_v27  ;;  %v1854_v22 = vmax.f32 %v1263_v45, 0.0 }
 0x1d6   : > { %v2008_v13 = vmax.f32 %v1104_v59, 0.0  ;;  %7114 = vmatmul.mubr.msk.bf16.gmra.mrb[220].mxu0 %vm688_vm0, %v8553_v60  ;;  %12100 = vst [vmem:[#allocation47_spill] sm:$0xff] %v8939_v19  ;;  %v8943_v59 = vpack.c.bf16 %v1850_v57, %v1846_v16 }
 0x1d7   : > { %v2009_v20 = vmax.f32 %v1106_v44, 0.0  ;;  %v1269_v44 = vadd.f32 %v1268_v56, %v8923_v27  ;;  %v1855_v57 = vmax.f32 %v1265_v35, 0.0 }
 0x1d8   : > { %v8937_v43 = vpack.c.bf16 %v2008_v13, %v2004_v5  ;;  %12102 = vst [vmem:[#allocation49_spill] sm:$0xff] %v8943_v59 }
 0x1d9   : > { %v1109_v48 = vpop.f32.mrb[116].mxu0  ;;  %v8941_v1 = vpack.c.bf16 %v2009_v20, %v2005_v30  ;;  %v1272_v30 = vpop.f32.mrb[8].mxu1 }
 0x1da   : > { %12099 = vst [vmem:[#allocation46_spill] sm:$0xff] %v8937_v43  ;;  %v1110_v60 = vadd.f32 %v1109_v48, %v8574_v4  ;;  %v1111_v54 = vpop.f32.mrb[117].mxu0  ;;  %v1859_v48 = vmax.f32 %v1269_v44, 0.0  ;;  %v1274_v19 = vpop.f32.mrb[9].mxu1  ;;  %v1273_v45 = vadd.f32 %v1272_v30, %v8920_v8 }
 0x1db   : > { %12101 = vst [vmem:[#allocation48_spill] sm:$0xff] %v8941_v1  ;;  %v1112_v40 = vadd.f32 %v1111_v54, %v8579_v6  ;;  %v1113_v5 = vpop.f32.mrb[118].mxu0  ;;  %v1858_v54 = vmax.f32 %v1267_v0, 0.0  ;;  %v1276_v46 = vpop.f32.mrb[10].mxu1 }
 0x1dc   : > { %v1114_v13 = vadd.f32 %v1113_v5, %v8574_v4  ;;  %v1115_v20 = vpop.f32.mrb[119].mxu0  ;;  %v2012_v53 = vmax.f32 %v1110_v60, 0.0  ;;  %v8955_v1 = vpack.c.bf16 %v1859_v48, %v1855_v57  ;;  %v1278_v5 = vpop.f32.mrb[11].mxu1  ;;  %v1862_v30 = vmax.f32 %v1273_v45, 0.0 }
 0x1dd   : > { %v1116_v16 = vadd.f32 %v1115_v20, %v8579_v6  ;;  %v2013_v59 = vmax.f32 %v1112_v40, 0.0  ;;  %v8959_v60 = vpack.c.bf16 %v1858_v54, %v1854_v22  ;;  %v1275_v40 = vadd.f32 %v1274_v19, %v8923_v27  ;;  %v1282_v22 = vpop.f32.mrb[12].mxu1 }
 0x1de   : > { %v2016_v32 = vmax.f32 %v1114_v13, 0.0  ;;  %12104 = vst [vmem:[#allocation51_spill] sm:$0xff] %v8955_v1  ;;  %v1277_v20 = vadd.f32 %v1276_v46, %v8920_v8  ;;  %v1283_v45 = vadd.f32 %v1282_v22, %v8920_v8 }
 0x1df   : > { %v2017_v62 = vmax.f32 %v1116_v16, 0.0  ;;  %12106 = vst [vmem:[#allocation53_spill] sm:$0xff] %v8959_v60  ;;  %v1284_v60 = vpop.f32.mrb[13].mxu1 }
 0x1e0   : > { %v8953_v43 = vpack.c.bf16 %v2016_v32, %v2012_v53  ;;  %v1279_v53 = vadd.f32 %v1278_v5, %v8923_v27  ;;  %v1286_v46 = vpop.f32.mrb[14].mxu1  ;;  %v1870_v22 = vmax.f32 %v1283_v45, 0.0 }
 0x1e1   : > { %v1119_v56 = vpop.f32.mrb[120].mxu0  ;;  %v8957_v31 = vpack.c.bf16 %v2017_v62, %v2013_v59  ;;  %v1863_v62 = vmax.f32 %v1275_v40, 0.0 }
 0x1e2   : > { %12103 = vst [vmem:[#allocation50_spill] sm:$0xff] %v8953_v43  ;;  %v1120_v13 = vadd.f32 %v1119_v56, %v8574_v4  ;;  %v1121_v35 = vpop.f32.mrb[121].mxu0  ;;  %v1867_v54 = vmax.f32 %v1279_v53, 0.0 }
 0x1e3   : > { %12105 = vst [vmem:[#allocation52_spill] sm:$0xff] %v8957_v31  ;;  %v1122_v0 = vadd.f32 %v1121_v35, %v8579_v6  ;;  %v1123_v44 = vpop.f32.mrb[122].mxu0  ;;  %v1866_v35 = vmax.f32 %v1277_v20, 0.0 }
 0x1e4   : > { %v1124_v16 = vadd.f32 %v1123_v44, %v8574_v4  ;;  %v1125_v59 = vpop.f32.mrb[123].mxu0  ;;  %v2020_v32 = vmax.f32 %v1120_v13, 0.0  ;;  %v8971_v43 = vpack.c.bf16 %v1867_v54, %v1863_v62  ;;  %v1288_v44 = vpop.f32.mrb[15].mxu1 }
 0x1e5   : > { %v1126_v57 = vadd.f32 %v1125_v59, %v8579_v6  ;;  %v2021_v56 = vmax.f32 %v1122_v0, 0.0  ;;  %v8975_v13 = vpack.c.bf16 %v1866_v35, %v1862_v30  ;;  %v1285_v0 = vadd.f32 %v1284_v60, %v8923_v27 }
 0x1e6   : > { %v2024_v48 = vmax.f32 %v1124_v16, 0.0  ;;  %12108 = vst [vmem:[#allocation55_spill] sm:$0xff] %v8971_v43  ;;  %v1287_v59 = vadd.f32 %v1286_v46, %v8920_v8 }
 0x1e7   : > { %v2025_v19 = vmax.f32 %v1126_v57, 0.0  ;;  %12110 = vst [vmem:[#allocation57_spill] sm:$0xff] %v8975_v13 }
 0x1e8   : > { %v8969_v1 = vpack.c.bf16 %v2024_v48, %v2020_v32  ;;  %v1289_v32 = vadd.f32 %v1288_v44, %v8923_v27 }
 0x1e9   : > { %v1129_v5 = vpop.f32.mrb[124].mxu0  ;;  %v8973_v31 = vpack.c.bf16 %v2025_v19, %v2021_v56  ;;  %v1292_v56 = vpop.f32.mrb[16].mxu1  ;;  %v1871_v19 = vmax.f32 %v1285_v0, 0.0 }
 0x1ea   : > { %12107 = vst [vmem:[#allocation54_spill] sm:$0xff] %v8969_v1  ;;  %v1130_v16 = vadd.f32 %v1129_v5, %v8574_v4  ;;  %v1131_v40 = vpop.f32.mrb[125].mxu0  ;;  %v1875_v35 = vmax.f32 %v1289_v32, 0.0  ;;  %v1294_v13 = vpop.f32.mrb[17].mxu1  ;;  %v1293_v45 = vadd.f32 %v1292_v56, %v8920_v8 }
 0x1eb   : > { %12109 = vst [vmem:[#allocation56_spill] sm:$0xff] %v8973_v31  ;;  %v1132_v20 = vadd.f32 %v1131_v40, %v8579_v6  ;;  %v1133_v53 = vpop.f32.mrb[126].mxu0  ;;  %v1874_v40 = vmax.f32 %v1287_v59, 0.0  ;;  %v1296_v46 = vpop.f32.mrb[18].mxu1  ;;  %v9151_v31 = vld [vmem:[%s8269_s18 + $0x30] sm:$0xff] }
 0x1ec   : > { %v1134_v57 = vadd.f32 %v1133_v53, %v8574_v4  ;;  %v1135_v48 = vpop.f32.mrb[127].mxu0  ;;  %v2028_v62 = vmax.f32 %v1130_v16, 0.0  ;;  %v8987_v1 = vpack.c.bf16 %v1875_v35, %v1871_v19  ;;  %v1298_v4 = vpop.f32.mrb[19].mxu1  ;;  %v1878_v56 = vmax.f32 %v1293_v45, 0.0 }
 0x1ed   : > { %v1136_v54 = vadd.f32 %v1135_v48, %v8579_v6  ;;  %v2029_v5 = vmax.f32 %v1132_v20, 0.0  ;;  %v8991_v16 = vpack.c.bf16 %v1874_v40, %v1870_v22  ;;  %v1295_v20 = vadd.f32 %v1294_v13, %v8923_v27  ;;  %v1302_v22 = vpop.f32.mrb[20].mxu1 }
 0x1ee   : > { %v2032_v30 = vmax.f32 %v1134_v57, 0.0  ;;  %12112 = vst [vmem:[#allocation59_spill] sm:$0xff] %v8987_v1  ;;  %v1297_v57 = vadd.f32 %v1296_v46, %v8920_v8  ;;  %v1299_v48 = vadd.f32 %v1298_v4, %v8923_v27  ;;  %v1303_v45 = vadd.f32 %v1302_v22, %v8920_v8 }
 0x1ef   : > { %v2033_v60 = vmax.f32 %v1136_v54, 0.0  ;;  %12114 = vst [vmem:[#allocation61_spill] sm:$0xff] %v8991_v16 }
 0x1f0   : > { %v8985_v43 = vpack.c.bf16 %v2032_v30, %v2028_v62  ;;  %v1886_v22 = vmax.f32 %v1303_v45, 0.0 }
 0x1f1   : > { %v1172_v44 = vpop.f32.mrb[128].mxu0  ;;  %v8989_v53 = vpack.c.bf16 %v2033_v60, %v2029_v5  ;;  %v1879_v5 = vmax.f32 %v1295_v20, 0.0  ;;  %v1883_v60 = vmax.f32 %v1299_v48, 0.0 }
 0x1f2   : > { %12111 = vst [vmem:[#allocation58_spill] sm:$0xff] %v8985_v43  ;;  %v1173_v6 = vadd.f32 %v1172_v44, %v8920_v8  ;;  %v1174_v0 = vpop.f32.mrb[129].mxu0  ;;  %v1304_v44 = vpop.f32.mrb[21].mxu1 }
 0x1f3   : > { %12113 = vst [vmem:[#allocation60_spill] sm:$0xff] %v8989_v53  ;;  %v1175_v59 = vadd.f32 %v1174_v0, %v8923_v27  ;;  %v1176_v32 = vpop.f32.mrb[130].mxu0  ;;  %v1882_v0 = vmax.f32 %v1297_v57, 0.0  ;;  %v1306_v46 = vpop.f32.mrb[22].mxu1  ;;  %v9003_v1 = vpack.c.bf16 %v1883_v60, %v1879_v5 }
 0x1f4   : > { %v1177_v62 = vadd.f32 %v1176_v32, %v8920_v8  ;;  %v1178_v54 = vpop.f32.mrb[131].mxu0  ;;  %v1782_v30 = vmax.f32 %v1173_v6, 0.0  ;;  %v1308_v32 = vpop.f32.mrb[23].mxu1 }
 0x1f5   : > { %v1179_v19 = vadd.f32 %v1178_v54, %v8923_v27  ;;  %v1783_v40 = vmax.f32 %v1175_v59, 0.0  ;;  %12116 = vst [vmem:[#allocation63_spill] sm:$0xff] %v9003_v1  ;;  %v9007_v6 = vpack.c.bf16 %v1882_v0, %v1878_v56  ;;  %v1305_v59 = vadd.f32 %v1304_v44, %v8923_v27 }
 0x1f6   : > { %v1786_v35 = vmax.f32 %v1177_v62, 0.0  ;;  %v1307_v54 = vadd.f32 %v1306_v46, %v8920_v8 }
 0x1f7   : > { %v1787_v13 = vmax.f32 %v1179_v19, 0.0  ;;  %12118 = vst [vmem:[#allocation65_spill] sm:$0xff] %v9007_v6 }
 0x1f8   : > { %v9001_v16 = vpack.c.bf16 %v1786_v35, %v1782_v30  ;;  %v1309_v30 = vadd.f32 %v1308_v32, %v8923_v27 }
 0x1f9   : > { %v1182_v4 = vpop.f32.mrb[132].mxu0  ;;  %v9005_v43 = vpack.c.bf16 %v1787_v13, %v1783_v40  ;;  %v1312_v40 = vpop.f32.mrb[24].mxu1  ;;  %v1887_v13 = vmax.f32 %v1305_v59, 0.0 }
 0x1fa   : > { %12115 = vst [vmem:[#allocation62_spill] sm:$0xff] %v9001_v16  ;;  %v1183_v62 = vadd.f32 %v1182_v4, %v8920_v8  ;;  %v1184_v20 = vpop.f32.mrb[133].mxu0  ;;  %v1891_v0 = vmax.f32 %v1309_v30, 0.0  ;;  %v1314_v6 = vpop.f32.mrb[25].mxu1  ;;  %v1313_v45 = vadd.f32 %v1312_v40, %v8920_v8 }
 0x1fb   : > { %12117 = vst [vmem:[#allocation64_spill] sm:$0xff] %v9005_v43  ;;  %v1185_v57 = vadd.f32 %v1184_v20, %v8923_v27  ;;  %v1186_v48 = vpop.f32.mrb[134].mxu0  ;;  %v1890_v20 = vmax.f32 %v1307_v54, 0.0  ;;  %v1316_v1 = vpop.f32.mrb[26].mxu1 }
 0x1fc   : > { %v1187_v19 = vadd.f32 %v1186_v48, %v8920_v8  ;;  %v1188_v35 = vpop.f32.mrb[135].mxu0  ;;  %v1790_v5 = vmax.f32 %v1183_v62, 0.0  ;;  %v9019_v46 = vpack.c.bf16 %v1891_v0, %v1887_v13  ;;  %v1318_v48 = vpop.f32.mrb[27].mxu1  ;;  %v1894_v40 = vmax.f32 %v1313_v45, 0.0 }
 0x1fd   : > { %v1189_v60 = vadd.f32 %v1188_v35, %v8923_v27  ;;  %v1791_v4 = vmax.f32 %v1185_v57, 0.0  ;;  %v9023_v62 = vpack.c.bf16 %v1890_v20, %v1886_v22  ;;  %v1315_v57 = vadd.f32 %v1314_v6, %v8923_v27 }
 0x1fe   : > { %v1794_v56 = vmax.f32 %v1187_v19, 0.0  ;;  %12120 = vst [vmem:[#allocation67_spill] sm:$0xff] %v9019_v46  ;;  %v1317_v35 = vadd.f32 %v1316_v1, %v8920_v8 }
 0x1ff   : > { %v1795_v44 = vmax.f32 %v1189_v60, 0.0  ;;  %12122 = vst [vmem:[#allocation69_spill] sm:$0xff] %v9023_v62 }
 0x200   : > { %v9017_v16 = vpack.c.bf16 %v1794_v56, %v1790_v5  ;;  %v1319_v5 = vadd.f32 %v1318_v48, %v8923_v27 }
 0x201   : > { %v1192_v32 = vpop.f32.mrb[136].mxu0  ;;  %v9021_v43 = vpack.c.bf16 %v1795_v44, %v1791_v4  ;;  %v1322_v4 = vpop.f32.mrb[28].mxu1  ;;  %v1895_v44 = vmax.f32 %v1315_v57, 0.0 }
 0x202   : > { %12119 = vst [vmem:[#allocation66_spill] sm:$0xff] %v9017_v16  ;;  %v1193_v19 = vadd.f32 %v1192_v32, %v8920_v8  ;;  %v1194_v59 = vpop.f32.mrb[137].mxu0  ;;  %v1899_v20 = vmax.f32 %v1319_v5, 0.0  ;;  %v1324_v62 = vpop.f32.mrb[29].mxu1  ;;  %v1323_v45 = vadd.f32 %v1322_v4, %v8920_v8 }
 0x203   : > { %12121 = vst [vmem:[#allocation68_spill] sm:$0xff] %v9021_v43  ;;  %v1195_v54 = vadd.f32 %v1194_v59, %v8923_v27  ;;  %v1196_v30 = vpop.f32.mrb[138].mxu0  ;;  %v1898_v59 = vmax.f32 %v1317_v35, 0.0  ;;  %v1326_v46 = vpop.f32.mrb[30].mxu1 }
 0x204   : > { %v1197_v60 = vadd.f32 %v1196_v30, %v8920_v8  ;;  %v1198_v56 = vpop.f32.mrb[139].mxu0  ;;  %v1798_v13 = vmax.f32 %v1193_v19, 0.0  ;;  %v9035_v1 = vpack.c.bf16 %v1899_v20, %v1895_v44  ;;  %v1328_v30 = vpop.f32.mrb[31].mxu1  ;;  %v1902_v4 = vmax.f32 %v1323_v45, 0.0 }
 0x205   : > { %v1199_v0 = vadd.f32 %v1198_v56, %v8923_v27  ;;  %v1799_v32 = vmax.f32 %v1195_v54, 0.0  ;;  %v9039_v19 = vpack.c.bf16 %v1898_v59, %v1894_v40  ;;  %v1325_v54 = vadd.f32 %v1324_v62, %v8923_v27 }
 0x206   : > { %v1802_v22 = vmax.f32 %v1197_v60, 0.0  ;;  %12124 = vst [vmem:[#allocation71_spill] sm:$0xff] %v9035_v1  ;;  %v1327_v56 = vadd.f32 %v1326_v46, %v8920_v8 }
 0x207   : > { %v1803_v6 = vmax.f32 %v1199_v0, 0.0  ;;  %12126 = vst [vmem:[#allocation73_spill] sm:$0xff] %v9039_v19 }
 0x208   : > { %v9033_v16 = vpack.c.bf16 %v1802_v22, %v1798_v13  ;;  %v1329_v13 = vadd.f32 %v1328_v30, %v8923_v27 }
 0x209   : > { %v1202_v48 = vpop.f32.mrb[140].mxu0  ;;  %v9037_v43 = vpack.c.bf16 %v1803_v6, %v1799_v32  ;;  %v1332_v32 = vpop.f32.mrb[32].mxu1  ;;  %v1903_v6 = vmax.f32 %v1325_v54, 0.0 }
 0x20a   : > { %12123 = vst [vmem:[#allocation70_spill] sm:$0xff] %v9033_v16  ;;  %v1203_v60 = vadd.f32 %v1202_v48, %v8920_v8  ;;  %v1204_v57 = vpop.f32.mrb[141].mxu0  ;;  %v1907_v59 = vmax.f32 %v1329_v13, 0.0  ;;  %v1334_v19 = vpop.f32.mrb[33].mxu1  ;;  %v1333_v45 = vadd.f32 %v1332_v32, %v8920_v8 }
 0x20b   : > { %12125 = vst [vmem:[#allocation72_spill] sm:$0xff] %v9037_v43  ;;  %v1205_v35 = vadd.f32 %v1204_v57, %v8923_v27  ;;  %v1206_v5 = vpop.f32.mrb[142].mxu0  ;;  %v1906_v57 = vmax.f32 %v1327_v56, 0.0  ;;  %v1336_v1 = vpop.f32.mrb[34].mxu1 }
 0x20c   : > { %v1207_v0 = vadd.f32 %v1206_v5, %v8920_v8  ;;  %v1208_v22 = vpop.f32.mrb[143].mxu0  ;;  %v1806_v44 = vmax.f32 %v1203_v60, 0.0  ;;  %v9051_v46 = vpack.c.bf16 %v1907_v59, %v1903_v6  ;;  %v1338_v5 = vpop.f32.mrb[35].mxu1  ;;  %v1337_v56 = vadd.f32 %v1336_v1, %v8920_v8 }
 0x20d   : > { %v1209_v20 = vadd.f32 %v1208_v22, %v8923_v27  ;;  %v1807_v48 = vmax.f32 %v1205_v35, 0.0  ;;  %v9055_v60 = vpack.c.bf16 %v1906_v57, %v1902_v4  ;;  %v1335_v35 = vadd.f32 %v1334_v19, %v8923_v27  ;;  %v1342_v1 = vpop.f32.mrb[36].mxu1 }
 0x20e   : > { %v1810_v40 = vmax.f32 %v1207_v0, 0.0  ;;  %12128 = vst [vmem:[#allocation75_spill] sm:$0xff] %v9051_v46  ;;  %v1910_v6 = vmax.f32 %v1333_v45, 0.0  ;;  %v1344_v46 = vpop.f32.mrb[37].mxu1 }
 0x20f   : > { %v1811_v62 = vmax.f32 %v1209_v20, 0.0  ;;  %12130 = vst [vmem:[#allocation77_spill] sm:$0xff] %v9055_v60  ;;  %v1911_v59 = vmax.f32 %v1335_v35, 0.0 }
 0x210   : > { %v9049_v16 = vpack.c.bf16 %v1810_v40, %v1806_v44  ;;  %v1339_v44 = vadd.f32 %v1338_v5, %v8923_v27 }
 0x211   : > { %v1212_v30 = vpop.f32.mrb[144].mxu0  ;;  %v9053_v43 = vpack.c.bf16 %v1811_v62, %v1807_v48  ;;  %v1914_v48 = vmax.f32 %v1337_v56, 0.0 }
 0x212   : > { %12127 = vst [vmem:[#allocation74_spill] sm:$0xff] %v9049_v16  ;;  %v1213_v0 = vadd.f32 %v1212_v30, %v8920_v8  ;;  %v1214_v54 = vpop.f32.mrb[145].mxu0  ;;  %v1915_v32 = vmax.f32 %v1339_v44, 0.0  ;;  %v1346_v16 = vpop.f32.mrb[38].mxu1 }
 0x213   : > { %12129 = vst [vmem:[#allocation76_spill] sm:$0xff] %v9053_v43  ;;  %v1215_v13 = vadd.f32 %v1214_v54, %v8923_v27  ;;  %v1216_v22 = vpop.f32.mrb[146].mxu0  ;;  %v9065_v60 = vpack.c.bf16 %v1914_v48, %v1910_v6  ;;  %v1347_v44 = vadd.f32 %v1346_v16, %v8920_v8 }
 0x214   : > { %v1217_v20 = vadd.f32 %v1216_v22, %v8920_v8  ;;  %v1218_v40 = vpop.f32.mrb[147].mxu0  ;;  %v1814_v62 = vmax.f32 %v1213_v0, 0.0  ;;  %v9067_v54 = vpack.c.bf16 %v1915_v32, %v1911_v59  ;;  %v1343_v0 = vadd.f32 %v1342_v1, %v8920_v8 }
 0x215   : > { %v1219_v4 = vadd.f32 %v1218_v40, %v8923_v27  ;;  %v1815_v30 = vmax.f32 %v1215_v13, 0.0  ;;  %12131 = vst [vmem:[#allocation78_spill] sm:$0xff] %v9065_v60  ;;  %v1345_v13 = vadd.f32 %v1344_v46, %v8923_v27 }
 0x216   : > { %v1818_v57 = vmax.f32 %v1217_v20, 0.0  ;;  %12132 = vst [vmem:[#allocation79_spill] sm:$0xff] %v9067_v54  ;;  %v1348_v20 = vpop.f32.mrb[39].mxu1 }
 0x217   : > { %v1819_v19 = vmax.f32 %v1219_v4, 0.0  ;;  %v1349_v59 = vadd.f32 %v1348_v20, %v8923_v27  ;;  %v1352_v54 = vpop.f32.mrb[40].mxu1 }
 0x218   : > { %v9069_v5 = vpack.c.bf16 %v1818_v57, %v1814_v62  ;;  %v1918_v62 = vmax.f32 %v1343_v0, 0.0  ;;  %v1919_v57 = vmax.f32 %v1345_v13, 0.0 }
 0x219   : > { %v1222_v22 = vpop.f32.mrb[148].mxu0  ;;  %v9071_v45 = vpack.c.bf16 %v1819_v19, %v1815_v30  ;;  %v1922_v30 = vmax.f32 %v1347_v44, 0.0 }
 0x21a   : > { %12133 = vst [vmem:[#allocation80_spill] sm:$0xff] %v9069_v5  ;;  %v1223_v35 = vadd.f32 %v1222_v22, %v8920_v8  ;;  %v1224_v56 = vpop.f32.mrb[149].mxu0  ;;  %v1923_v22 = vmax.f32 %v1349_v59, 0.0  ;;  %v1354_v5 = vpop.f32.mrb[41].mxu1 }
 0x21b   : > { %12134 = vst [vmem:[#allocation81_spill] sm:$0xff] %v9071_v45  ;;  %v1225_v40 = vadd.f32 %v1224_v56, %v8923_v27  ;;  %v1226_v6 = vpop.f32.mrb[150].mxu0  ;;  %v9081_v16 = vpack.c.bf16 %v1922_v30, %v1918_v62  ;;  %v1356_v45 = vpop.f32.mrb[42].mxu1 }
 0x21c   : > { %v1227_v4 = vadd.f32 %v1226_v6, %v8920_v8  ;;  %v1228_v48 = vpop.f32.mrb[151].mxu0  ;;  %v1822_v19 = vmax.f32 %v1223_v35, 0.0  ;;  %v9083_v56 = vpack.c.bf16 %v1923_v22, %v1919_v57  ;;  %v1353_v35 = vadd.f32 %v1352_v54, %v8920_v8 }
 0x21d   : > { %v1229_v32 = vadd.f32 %v1228_v48, %v8923_v27  ;;  %v1823_v46 = vmax.f32 %v1225_v40, 0.0  ;;  %12135 = vst [vmem:[#allocation82_spill] sm:$0xff] %v9081_v16  ;;  %v1355_v40 = vadd.f32 %v1354_v5, %v8923_v27  ;;  %v1357_v59 = vadd.f32 %v1356_v45, %v8920_v8 }
 0x21e   : > { %v1826_v1 = vmax.f32 %v1227_v4, 0.0  ;;  %12136 = vst [vmem:[#allocation83_spill] sm:$0xff] %v9083_v56  ;;  %v1358_v4 = vpop.f32.mrb[43].mxu1 }
 0x21f   : > { %v1827_v60 = vmax.f32 %v1229_v32, 0.0  ;;  %v1359_v57 = vadd.f32 %v1358_v4, %v8923_v27  ;;  %v1930_v22 = vmax.f32 %v1357_v59, 0.0  ;;  %v1362_v56 = vpop.f32.mrb[44].mxu1 }
 0x220   : > { %v9085_v20 = vpack.c.bf16 %v1826_v1, %v1822_v19  ;;  %v1927_v19 = vmax.f32 %v1355_v40, 0.0 }
 0x221   : > { %v1232_v6 = vpop.f32.mrb[152].mxu0  ;;  %v9087_v0 = vpack.c.bf16 %v1827_v60, %v1823_v46  ;;  %v1926_v60 = vmax.f32 %v1353_v35, 0.0  ;;  %v629_v35 = vsub.s32 4, %v8559_v61 }
 0x222   : > { %12137 = vst [vmem:[#allocation84_spill] sm:$0xff] %v9085_v20  ;;  %v1233_v13 = vadd.f32 %v1232_v6, %v8920_v8  ;;  %v1234_v44 = vpop.f32.mrb[153].mxu0  ;;  %v1931_v6 = vmax.f32 %v1359_v57, 0.0  ;;  %v1364_v20 = vpop.f32.mrb[45].mxu1 }
 0x223   : > { %12138 = vst [vmem:[#allocation85_spill] sm:$0xff] %v9087_v0  ;;  %v1235_v48 = vadd.f32 %v1234_v44, %v8923_v27  ;;  %v1236_v62 = vpop.f32.mrb[154].mxu0  ;;  %v9097_v45 = vpack.c.bf16 %v1930_v22, %v1926_v60  ;;  %v1366_v40 = vpop.f32.mrb[46].mxu1  ;;  %v1365_v57 = vadd.f32 %v1364_v20, %v8923_v27 }
 0x224   : > { %v1237_v32 = vadd.f32 %v1236_v62, %v8920_v8  ;;  %v1238_v30 = vpop.f32.mrb[155].mxu0  ;;  %v1830_v46 = vmax.f32 %v1233_v13, 0.0  ;;  %v9099_v44 = vpack.c.bf16 %v1931_v6, %v1927_v19 }
 0x225   : > { %v1239_v1 = vadd.f32 %v1238_v30, %v8923_v27  ;;  %v1831_v5 = vmax.f32 %v1235_v48, 0.0  ;;  %12139 = vst [vmem:[#allocation86_spill] sm:$0xff] %v9097_v45  ;;  %v1363_v48 = vadd.f32 %v1362_v56, %v8920_v8  ;;  %v1368_v30 = vpop.f32.mrb[47].mxu1 }
 0x226   : > { %v1834_v54 = vmax.f32 %v1237_v32, 0.0  ;;  %12140 = vst [vmem:[#allocation87_spill] sm:$0xff] %v9099_v44  ;;  %v1367_v32 = vadd.f32 %v1366_v40, %v8920_v8  ;;  %v7990_v44 = vld [vmem:[%s8269_s18] sm:$0xff] }
 0x227   : > { %v1835_v16 = vmax.f32 %v1239_v1, 0.0  ;;  %v1369_v1 = vadd.f32 %v1368_v30, %v8923_v27 }
 0x228   : > { %v9101_v4 = vpack.c.bf16 %v1834_v54, %v1830_v46  ;;  %v1934_v46 = vmax.f32 %v1363_v48, 0.0  ;;  %v1935_v54 = vmax.f32 %v1365_v57, 0.0  ;;  %v1372_v48 = vpop.f32.mrb[48].mxu1  ;;  %v7989_v57 = vld [vmem:[%s8269_s18 + $0x10] sm:$0xff] }
 0x229   : > { %v1242_v62 = vpop.f32.mrb[156].mxu0  ;;  %v9104_v0 = vpack.c.bf16 %v1835_v16, %v1831_v5  ;;  %v1938_v5 = vmax.f32 %v1367_v32, 0.0  ;;  %v9122_v45 = vmul.f32 0.9, %v7989_v57 }
 0x22a   : > { %12141 = vst [vmem:[#allocation88_spill] sm:$0xff] %v9101_v4  ;;  %v1243_v13 = vadd.f32 %v1242_v62, %v8920_v8  ;;  %v1244_v59 = vpop.f32.mrb[157].mxu0  ;;  %v7988_v62 = vld [vmem:[%s11853_s2] sm:$0x1f]  ;;  %v9129_v4 = vmul.f32 0.9, %v7990_v44 }
 0x22b   : > { %12142 = vst [vmem:[#allocation89_spill] sm:$0xff] %v9104_v0  ;;  %v1245_v60 = vadd.f32 %v1244_v59, %v8923_v27  ;;  %v1246_v19 = vpop.f32.mrb[158].mxu0  ;;  %v9117_v40 = vrot.slane %v7988_v62, %v629_v35  ;;  %v1939_v59 = vmax.f32 %v1369_v1, 0.0  ;;  %v7991_v35 = vld [vmem:[%s8269_s18 + $0x18] sm:$0xff] }
 0x22c   : > { %v1247_v22 = vadd.f32 %v1246_v19, %v8920_v8  ;;  %v1248_v16 = vpop.f32.mrb[159].mxu0  ;;  %v1838_v56 = vmax.f32 %v1243_v13, 0.0  ;;  %v9119_v19 = vpack.c.bf16 %v1938_v5, %v1934_v46  ;;  %v1374_v13 = vpop.f32.mrb[49].mxu1  ;;  %v9132_v1 = vmul.f32 0.9, %v7991_v35 }
 0x22d   : > { %v1249_v6 = vadd.f32 %v1248_v16, %v8923_v27  ;;  %v1839_v30 = vmax.f32 %v1245_v60, 0.0  ;;  %v9124_v32 = vpack.c.bf16 %v1939_v59, %v1935_v54  ;;  %v1376_v60 = vpop.f32.mrb[50].mxu1  ;;  %v1373_v54 = vadd.f32 %v1372_v48, %v8920_v8 }
 0x22e   : > { %v1842_v20 = vmax.f32 %v1247_v22, 0.0  ;;  %12143 = vst [vmem:[#allocation90_spill] sm:$0xff] %v9119_v19  ;;  %v1375_v62 = vadd.f32 %v1374_v13, %v8923_v27 }
 0x22f   : > { %v1843_v61 = vmax.f32 %v1249_v6, 0.0  ;;  %12144 = vst [vmem:[#allocation91_spill] sm:$0xff] %v9124_v32  ;;  %v7992_v32 = vld [vmem:[%s8269_s18 + $0x8] sm:$0xff] }
 0x230   : > { %v9126_v22 = vpack.c.bf16 %v1842_v20, %v1838_v56  ;;  %v1377_v56 = vadd.f32 %v1376_v60, %v8920_v8  ;;  %v1378_v20 = vpop.f32.mrb[51].mxu1  ;;  %v1943_v48 = vmax.f32 %v1375_v62, 0.0  ;;  %v7994_v62 = vld [vmem:[%s8269_s18 + $0x20] sm:$0xff] }
 0x231   : > { %v7055_v16 = vpop.f32.mrb[160].mxu0  ;;  %v9134_v46 = vpack.c.bf16 %v1843_v61, %v1839_v30  ;;  %v1379_v61 = vadd.f32 %v1378_v20, %v8923_v27  ;;  %v9154_v20 = vmul.f32 0.9, %v9151_v31 }
 0x232   : > { %12145 = vst [vmem:[#allocation92_spill] sm:$0xff] %v9126_v22  ;;  %v1534_v6 = vadd.f32 %v7055_v16, %v9117_v40  ;;  %v1525_v5 = vpop.f32.mrb[161].mxu0  ;;  %v9142_v22 = vmul.f32 0.9, %v7992_v32  ;;  %v1946_v0 = vmax.f32 %v1377_v56, 0.0 }
 0x233   : > { %12146 = vst [vmem:[#allocation93_spill] sm:$0xff] %v9134_v46  ;;  %v1526_v59 = vadd.f32 %v1525_v5, %v9117_v40  ;;  %v7056_v19 = vpop.f32.mrb[162].mxu0  ;;  %v1942_v46 = vmax.f32 %v1373_v54, 0.0  ;;  %v1947_v43 = vmax.f32 %v1379_v61, 0.0 }
 0x234   : > { %v1537_v30 = vadd.f32 %v7056_v19, %v9117_v40  ;;  %v1528_v16 = vpop.f32.mrb[163].mxu0  ;;  %v2038_v5 = vmul.f32 %v1534_v6, %v9122_v45  ;;  %v1382_v19 = vpop.f32.mrb[52].mxu1 }
 0x235   : > { %v2036_v13 = vmul.f32 %v1526_v59, %v9129_v4  ;;  %v1529_v60 = vadd.f32 %v1528_v16, %v9117_v40  ;;  %v9158_v59 = vmul.f32 0.9, %v7994_v62  ;;  %v9160_v50 = vpack.c.bf16 %v1946_v0, %v1942_v46  ;;  %v1384_v61 = vpop.f32.mrb[53].mxu1  ;;  %v7996_v0 = vld [vmem:[%s8269_s18 + $0x28] sm:$0xff] }
 0x236   : > { %v2039_v53 = vmul.f32 %v1537_v30, %v9132_v1  ;;  %v9162_v56 = vpack.c.bf16 %v1947_v43, %v1943_v48  ;;  %v7995_v30 = vld [vmem:[%s8269_s18 + $0x38] sm:$0xff]  ;;  %v1383_v11 = vadd.f32 %v1382_v19, %v8920_v8  ;;  %v1385_v38 = vadd.f32 %v1384_v61, %v8923_v27  ;;  %v1386_v29 = vpop.f32.mrb[54].mxu1 }
 0x237   : > { %v2037_v54 = vmul.f32 %v1529_v60, %v9142_v22  ;;  %12147 = vst [vmem:[#allocation94_spill] sm:$0xff] %v9160_v50  ;;  %v9167_v16 = vmul.f32 0.9, %v7995_v30  ;;  %v9171_v26 = vadd.f32 %v7990_v44, %v2036_v13  ;;  %v9176_v46 = vmul.f32 0.9, %v7996_v0 }
 0x238   : > { %12148 = vst [vmem:[#allocation95_spill] sm:$0xff] %v9162_v56  ;;  %v9164_v6 = vadd.f32 %v7991_v35, %v2039_v53  ;;  %v1387_v43 = vadd.f32 %v1386_v29, %v8920_v8  ;;  %v1388_v53 = vpop.f32.mrb[55].mxu1  ;;  %v9179_v35 = vadd.f32 %v7989_v57, %v2038_v5  ;;  %v1950_v19 = vmax.f32 %v1383_v11, 0.0 }
 0x239   : > { %v9173_v60 = vadd.f32 %v7992_v32, %v2037_v54  ;;  %v7059_v3 = vpop.f32.mrb[164].mxu0  ;;  %v1951_v56 = vmax.f32 %v1385_v38, 0.0  ;;  %v7618_v54 = vld [vmem:[%s11856_s5] ss:$8 sps:$4 sm:$0xff]   ;;  %v1389_v57 = vadd.f32 %v1388_v53, %v8923_v27 }
 0x23a   : > { %v1550_v48 = vadd.f32 %v7059_v3, %v9117_v40  ;;  %v1541_v50 = vpop.f32.mrb[165].mxu0  ;;  %v1954_v29 = vmax.f32 %v1387_v43, 0.0  ;;  %v2165_v3 = vpack.c.bf16 %v9164_v6, %v9179_v35 }
 0x23b   : > { %v2164_v44 = vpack.c.bf16 %v9173_v60, %v9171_v26  ;;  %v1542_v32 = vadd.f32 %v1541_v50, %v9117_v40  ;;  %v7060_v13 = vpop.f32.mrb[166].mxu0  ;;  %v7623_v50 = vld [vmem:[%s11856_s5 + $0x14] ss:$8 sps:$4 sm:$0xff]   ;;  %v1955_v53 = vmax.f32 %v1389_v57, 0.0 }
 0x23c   : > { %v1553_v11 = vadd.f32 %v7060_v13, %v9117_v40  ;;  %v1544_v38 = vpop.f32.mrb[167].mxu0  ;;  %v9198_v43 = vpack.c.bf16 %v1954_v29, %v1950_v19  ;;  %v2042_v49 = vmul.f32 %v1550_v48, %v9154_v20  ;;  %v7621_v48 = vld [vmem:[%s11856_s5 + $0x10] ss:$8 sps:$4 sm:$0xff]  }
 0x23d   : > { %v2040_v5 = vmul.f32 %v1542_v32, %v9158_v59  ;;  %v1545_v61 = vadd.f32 %v1544_v38, %v9117_v40  ;;  %7121 = vmatprep.mubr.msk.bf16.mxu1 %vm688_vm0, %v2164_v44  ;;  %v1392_v32 = vpop.f32.mrb[56].mxu1  ;;  %v9211_v44 = vld [vmem:[%s8269_s18 + $0x40] sm:$0xff]  ;;  %v9219_v29 = vpack.c.bf16 %v1955_v53, %v1951_v56 }
 0x23e   : > { %12149 = vst [vmem:[#allocation96_spill] sm:$0xff] %v9198_v43  ;;  %v2043_v13 = vmul.f32 %v1553_v11, %v9167_v16  ;;  %7122 = vmatmul.mubr.msk.bf16.vlgmr.msra.gmra.mrb[96].mxu1 %vm688_vm0, %v2165_v3  ;;  %v9214_v19 = vmul.f32 0.9, %v9211_v44  ;;  %v1393_v57 = vadd.f32 %v1392_v32, %v8920_v8  ;;  %v1394_v3 = vpop.f32.mrb[57].mxu1  ;;  %v7999_v43 = vld [vmem:[%s8269_s18 + $0x58] sm:$0xff] }
 0x23f   : > { %v2041_v38 = vmul.f32 %v1545_v61, %v9176_v46  ;;  %3827 = vmatpush1.bf16.msra.mxu1 %v7618_v54  ;;  %12151 = vst [vmem:[#allocation98_spill] sm:$0xff] %v9219_v29  ;;  %v9225_v58 = vmul.f32 0.9, %v7999_v43  ;;  %v7626_v54 = vld [vmem:[%s11856_s5 + $0x24] ss:$8 sps:$4 sm:$0xff]   ;;  %v1395_v61 = vadd.f32 %v1394_v3, %v8923_v27  ;;  %v1396_v25 = vpop.f32.mrb[58].mxu1  ;;  %v9231_v12 = vadd.f32 %v7994_v62, %v2040_v5 }
 0x240   : > { %v9222_v11 = vadd.f32 %v7995_v30, %v2043_v13  ;;  %3828 = vmatprep.subr.bf16.mxu1 %v7623_v50  ;;  %v1958_v32 = vmax.f32 %v1393_v57, 0.0  ;;  %v1397_v30 = vadd.f32 %v1396_v25, %v8920_v8  ;;  %v1398_v13 = vpop.f32.mrb[59].mxu1  ;;  %v9237_v29 = vadd.f32 %v9151_v31, %v2042_v49  ;;  %v7624_v25 = vld [vmem:[%s11856_s5 + $0x20] ss:$8 sps:$4 sm:$0xff]  }
 0x241   : > { %12152 = vst [vmem:[#allocation99_spill] sm:$0xff] %v9225_v58  ;;  %v9233_v56 = vadd.f32 %v7996_v0, %v2041_v38  ;;  %v7063_v53 = vpop.f32.mrb[168].mxu0  ;;  %v1959_v52 = vmax.f32 %v1395_v61, 0.0  ;;  %v1399_v3 = vadd.f32 %v1398_v13, %v8923_v27  ;;  %v8000_v38 = vld [vmem:[%s8269_s18 + $0x48] sm:$0xff] }
 0x242   : > { %v1566_v50 = vadd.f32 %v7063_v53, %v9117_v40  ;;  %v1557_v47 = vpop.f32.mrb[169].mxu0  ;;  %v9245_v57 = vmul.f32 0.9, %v8000_v38  ;;  %v1962_v49 = vmax.f32 %v1397_v30, 0.0  ;;  %v2167_v31 = vpack.c.bf16 %v9222_v11, %v9237_v29 }
 0x243   : > { %v2166_v62 = vpack.c.bf16 %v9233_v56, %v9231_v12  ;;  %v1558_v0 = vadd.f32 %v1557_v47, %v9117_v40  ;;  %v7064_v5 = vpop.f32.mrb[170].mxu0  ;;  %3829 = vmatpush1.bf16.msra.mxu1 %v7621_v48  ;;  %v7629_v47 = vld [vmem:[%s11856_s5 + $0x34] ss:$8 sps:$4 sm:$0xff]   ;;  %v1963_v13 = vmax.f32 %v1399_v3, 0.0 }
 0x244   : > { %12153 = vst [vmem:[#allocation100_spill] sm:$0xff] %v9245_v57  ;;  %v1569_v61 = vadd.f32 %v7064_v5, %v9117_v40  ;;  %v1560_v53 = vpop.f32.mrb[171].mxu0  ;;  %3830 = vmatprep.subr.bf16.mxu1 %v7626_v54  ;;  %v9259_v30 = vpack.c.bf16 %v1962_v49, %v1958_v32  ;;  %v2046_v21 = vmul.f32 %v1566_v50, %v9207_v37  ;;  %v9265_v54 = vld [vmem:[%s8269_s18 + $0x70] sm:$0xff] }
 0x245   : > { %v2044_v48 = vmul.f32 %v1558_v0, %v9214_v19  ;;  %v1561_v42 = vadd.f32 %v1560_v53, %v9117_v40  ;;  %7125 = vmatprep.mubr.msk.bf16.mxu1 %vm688_vm0, %v2166_v62  ;;  %v9268_v9 = vmul.f32 0.9, %v9265_v54  ;;  %v9270_v3 = vpack.c.bf16 %v1963_v13, %v1959_v52  ;;  %v1402_v0 = vpop.f32.mrb[60].mxu1  ;;  %v9274_v62 = vld [vmem:[%s8269_s18 + $0x60] sm:$0xff]  ;;  %v7627_v50 = vld [vmem:[%s11856_s5 + $0x30] ss:$8 sps:$4 sm:$0xff]  }
 0x246   : > { %12154 = vst [vmem:[#allocation101_spill] sm:$0xff] %v9259_v30  ;;  %v2047_v5 = vmul.f32 %v1569_v61, %v9225_v58  ;;  %7126 = vmatmul.mubr.msk.bf16.gmra.mrb[100].mxu1 %vm688_vm0, %v2167_v31  ;;  %v9277_v32 = vmul.f32 0.9, %v9274_v62  ;;  %v1403_v49 = vadd.f32 %v1402_v0, %v8920_v8  ;;  %v1404_v31 = vpop.f32.mrb[61].mxu1  ;;  %v8003_v52 = vld [vmem:[%s8269_s18 + $0x78] sm:$0xff] }
 0x247   : > { %12155 = vst [vmem:[#allocation102_spill] sm:$0xff] %v9268_v9  ;;  %12156 = vst [vmem:[#allocation103_spill] sm:$0xff] %v9270_v3  ;;  %v2045_v53 = vmul.f32 %v1561_v42, %v9245_v57  ;;  %3831 = vmatpush1.bf16.msra.mxu1 %v7624_v25  ;;  %v9286_v13 = vmul.f32 0.9, %v8003_v52  ;;  %v7632_v42 = vld [vmem:[%s11856_s5 + $0x44] ss:$8 sps:$4 sm:$0xff]   ;;  %v1405_v30 = vadd.f32 %v1404_v31, %v8923_v27 }
 0x248   : > { %12157 = vst [vmem:[#allocation104_spill] sm:$0xff] %v9277_v32  ;;  %v9283_v61 = vadd.f32 %v7999_v43, %v2047_v5  ;;  %3832 = vmatprep.subr.bf16.mxu1 %v7629_v47  ;;  %v1406_v25 = vpop.f32.mrb[62].mxu1  ;;  %v9293_v3 = vadd.f32 %v9211_v44, %v2044_v48  ;;  %v1966_v43 = vmax.f32 %v1403_v49, 0.0  ;;  %v9299_v47 = vadd.f32 %v9204_v2, %v2046_v21  ;;  %v7630_v21 = vld [vmem:[%s11856_s5 + $0x40] ss:$8 sps:$4 sm:$0xff]  }
 0x249   : > { %12159 = vst [vmem:[#allocation106_spill] sm:$0xff] %v9286_v13  ;;  %v9295_v7 = vadd.f32 %v8000_v38, %v2045_v53  ;;  %v7067_v0 = vpop.f32.mrb[172].mxu0  ;;  %v1407_v5 = vadd.f32 %v1406_v25, %v8920_v8  ;;  %v1408_v57 = vpop.f32.mrb[63].mxu1  ;;  %v1967_v37 = vmax.f32 %v1405_v30, 0.0  ;;  %v8004_v53 = vld [vmem:[%s8269_s18 + $0x68] sm:$0xff] }
 0x24a   : > { %12158 = vst [vmem:[#allocation105_spill] sm:$0xff] %v9283_v61  ;;  %12160 = vst [vmem:[#allocation107_spill] sm:$0xff] %v9293_v3  ;;  %v1582_v63 = vadd.f32 %v7067_v0, %v9117_v40  ;;  %v1573_v58 = vpop.f32.mrb[173].mxu0  ;;  %v1409_v31 = vadd.f32 %v1408_v57, %v8923_v27  ;;  %v9307_v49 = vmul.f32 0.9, %v8004_v53  ;;  %v2169_v30 = vpack.c.bf16 %v9283_v61, %v9299_v47 }
 0x24b   : > { %12161 = vst [vmem:[#allocation108_spill] sm:$0xff] %v9295_v7  ;;  %12162 = vst [vmem:[#allocation109_spill] sm:$0xff] %v9299_v47  ;;  %v2168_v44 = vpack.c.bf16 %v9295_v7, %v9293_v3  ;;  %v1574_v38 = vadd.f32 %v1573_v58, %v9117_v40  ;;  %v7068_v48 = vpop.f32.mrb[174].mxu0  ;;  %3833 = vmatpush1.bf16.msra.mxu1 %v7627_v50  ;;  %v1970_v2 = vmax.f32 %v1407_v5, 0.0  ;;  %v7635_v58 = vld [vmem:[%s11856_s5 + $0x54] ss:$8 sps:$4 sm:$0xff]  }
 0x24c   : > { %12163 = vst [vmem:[#allocation110_spill] sm:$0xff] %v9307_v49  ;;  %v1585_v57 = vadd.f32 %v7068_v48, %v9117_v40  ;;  %v1576_v25 = vpop.f32.mrb[175].mxu0  ;;  %3834 = vmatprep.subr.bf16.mxu1 %v7632_v42  ;;  %v1971_v0 = vmax.f32 %v1409_v31, 0.0  ;;  %v2050_v47 = vmul.f32 %v1582_v63, %v9268_v9  ;;  %v9327_v42 = vld [vmem:[%s8269_s18 + $0x90] sm:$0xff] }
 0x24d   : > { %v2048_v50 = vmul.f32 %v1574_v38, %v9277_v32  ;;  %v1577_v7 = vadd.f32 %v1576_v25, %v9117_v40  ;;  %7129 = vmatprep.mubr.msk.bf16.mxu1 %vm688_vm0, %v2168_v44  ;;  %v9321_v5 = vpack.c.bf16 %v1970_v2, %v1966_v43  ;;  %v9330_v3 = vmul.f32 0.9, %v9327_v42  ;;  %v1412_v38 = vpop.f32.mrb[64].mxu1  ;;  %v9336_v44 = vld [vmem:[%s8269_s18 + $0x80] sm:$0xff]  ;;  %v7633_v63 = vld [vmem:[%s11856_s5 + $0x50] ss:$8 sps:$4 sm:$0xff]  }
 0x24e   : > { %v2051_v48 = vmul.f32 %v1585_v57, %v9286_v13  ;;  %7130 = vmatmul.mubr.msk.bf16.gmra.mrb[104].mxu1 %vm688_vm0, %v2169_v30  ;;  %v9332_v31 = vpack.c.bf16 %v1971_v0, %v1967_v37  ;;  %v9339_v43 = vmul.f32 0.9, %v9336_v44  ;;  %v1413_v2 = vadd.f32 %v1412_v38, %v8920_v8  ;;  %v1414_v30 = vpop.f32.mrb[65].mxu1  ;;  %v8007_v37 = vld [vmem:[%s8269_s18 + $0x98] sm:$0xff] }
 0x24f   : > { %12164 = vst [vmem:[#allocation111_spill] sm:$0xff] %v9321_v5  ;;  %12165 = vst [vmem:[#allocation112_spill] sm:$0xff] %v9330_v3  ;;  %v2049_v25 = vmul.f32 %v1577_v7, %v9307_v49  ;;  %3835 = vmatpush1.bf16.msra.mxu1 %v7630_v21  ;;  %v9348_v0 = vmul.f32 0.9, %v8007_v37  ;;  %v7638_v7 = vld [vmem:[%s11856_s5 + $0x64] ss:$8 sps:$4 sm:$0xff]   ;;  %v1415_v5 = vadd.f32 %v1414_v30, %v8923_v27 }
 0x250   : > { %12166 = vst [vmem:[#allocation113_spill] sm:$0xff] %v9332_v31  ;;  %12167 = vst [vmem:[#allocation114_spill] sm:$0xff] %v9339_v43  ;;  %v9345_v57 = vadd.f32 %v8003_v52, %v2051_v48  ;;  %3836 = vmatprep.subr.bf16.mxu1 %v7635_v58  ;;  %v1416_v21 = vpop.f32.mrb[66].mxu1  ;;  %v9355_v31 = vadd.f32 %v9274_v62, %v2048_v50  ;;  %v1974_v52 = vmax.f32 %v1413_v2, 0.0 }
 0x251   : > { %12169 = vst [vmem:[#allocation116_spill] sm:$0xff] %v9348_v0  ;;  %v9357_v49 = vadd.f32 %v8004_v53, %v2049_v25  ;;  %v7071_v38 = vpop.f32.mrb[176].mxu0  ;;  %v1417_v48 = vadd.f32 %v1416_v21, %v8920_v8  ;;  %v1418_v13 = vpop.f32.mrb[67].mxu1  ;;  %v9361_v58 = vadd.f32 %v9265_v54, %v2050_v47  ;;  %v1975_v61 = vmax.f32 %v1415_v5, 0.0  ;;  %v8008_v25 = vld [vmem:[%s8269_s18 + $0x88] sm:$0xff] }
 0x252   : > { %12168 = vst [vmem:[#allocation115_spill] sm:$0xff] %v9345_v57  ;;  %12170 = vst [vmem:[#allocation117_spill] sm:$0xff] %v9355_v31  ;;  %v1598_v9 = vadd.f32 %v7071_v38, %v9117_v40  ;;  %v1589_v32 = vpop.f32.mrb[177].mxu0  ;;  %v1419_v30 = vadd.f32 %v1418_v13, %v8923_v27  ;;  %v9369_v2 = vmul.f32 0.9, %v8008_v25 }
 0x253   : > { %12171 = vst [vmem:[#allocation118_spill] sm:$0xff] %v9357_v49  ;;  %12172 = vst [vmem:[#allocation119_spill] sm:$0xff] %v9361_v58  ;;  %v2170_v62 = vpack.c.bf16 %v9357_v49, %v9355_v31  ;;  %v1590_v53 = vadd.f32 %v1589_v32, %v9117_v40  ;;  %v7072_v50 = vpop.f32.mrb[178].mxu0  ;;  %3837 = vmatpush1.bf16.msra.mxu1 %v7633_v63  ;;  %v7636_v54 = vld [vmem:[%s11856_s5 + $0x60] ss:$8 sps:$4 sm:$0xff]   ;;  %v1978_v47 = vmax.f32 %v1417_v48, 0.0 }
 0x254   : > { %12173 = vst [vmem:[#allocation120_spill] sm:$0xff] %v9369_v2  ;;  %v2171_v5 = vpack.c.bf16 %v9345_v57, %v9361_v58  ;;  %v1601_v13 = vadd.f32 %v7072_v50, %v9117_v40  ;;  %v1592_v21 = vpop.f32.mrb[179].mxu0  ;;  %3838 = vmatprep.subr.bf16.mxu1 %v7638_v7  ;;  %v7641_v32 = vld [vmem:[%s11856_s5 + $0x74] ss:$8 sps:$4 sm:$0xff]   ;;  %v1979_v38 = vmax.f32 %v1419_v30, 0.0  ;;  %v2054_v58 = vmul.f32 %v1598_v9, %v9330_v3 }
 0x255   : > { %v2052_v63 = vmul.f32 %v1590_v53, %v9339_v43  ;;  %v1593_v49 = vadd.f32 %v1592_v21, %v9117_v40  ;;  %7133 = vmatprep.mubr.msk.bf16.mxu1 %vm688_vm0, %v2170_v62  ;;  %v9383_v48 = vpack.c.bf16 %v1978_v47, %v1974_v52  ;;  %v9389_v7 = vld [vmem:[%s8269_s18 + $0xb0] sm:$0xff]  ;;  %v1422_v53 = vpop.f32.mrb[68].mxu1  ;;  %v9398_v62 = vld [vmem:[%s8269_s18 + $0xa0] sm:$0xff] }
 0x256   : > { %v2055_v50 = vmul.f32 %v1601_v13, %v9348_v0  ;;  %7134 = vmatmul.mubr.msk.bf16.gmra.mrb[108].mxu1 %vm688_vm0, %v2171_v5  ;;  %v9392_v31 = vmul.f32 0.9, %v9389_v7  ;;  %v9394_v30 = vpack.c.bf16 %v1979_v38, %v1975_v61  ;;  %v9401_v52 = vmul.f32 0.9, %v9398_v62  ;;  %v7639_v9 = vld [vmem:[%s11856_s5 + $0x70] ss:$8 sps:$4 sm:$0xff]  }
 0x257   : > { %12174 = vst [vmem:[#allocation121_spill] sm:$0xff] %v9383_v48  ;;  %v2053_v21 = vmul.f32 %v1593_v49, %v9369_v2  ;;  %3839 = vmatpush1.bf16.msra.mxu1 %v7636_v54  ;;  %v1423_v47 = vadd.f32 %v1422_v53, %v8920_v8  ;;  %v1424_v5 = vpop.f32.mrb[69].mxu1  ;;  %v8011_v61 = vld [vmem:[%s8269_s18 + $0xb8] sm:$0xff]  ;;  %v7644_v49 = vld [vmem:[%s11856_s5 + $0x84] ss:$8 sps:$4 sm:$0xff]  }
 0x258   : > { %12175 = vst [vmem:[#allocation122_spill] sm:$0xff] %v9392_v31  ;;  %12176 = vst [vmem:[#allocation123_spill] sm:$0xff] %v9394_v30  ;;  %v9407_v13 = vadd.f32 %v8007_v37, %v2055_v50  ;;  %v9410_v38 = vmul.f32 0.9, %v8011_v61  ;;  %3840 = vmatprep.subr.bf16.mxu1 %v7641_v32  ;;  %v1425_v48 = vadd.f32 %v1424_v5, %v8923_v27  ;;  %v1426_v54 = vpop.f32.mrb[70].mxu1 }
 0x259   : > { %12177 = vst [vmem:[#allocation124_spill] sm:$0xff] %v9401_v52  ;;  %v9417_v30 = vadd.f32 %v9336_v44, %v2052_v63  ;;  %v9419_v2 = vadd.f32 %v8008_v25, %v2053_v21  ;;  %v7075_v53 = vpop.f32.mrb[180].mxu0  ;;  %v1982_v37 = vmax.f32 %v1423_v47, 0.0  ;;  %v1427_v50 = vadd.f32 %v1426_v54, %v8920_v8  ;;  %v1428_v0 = vpop.f32.mrb[71].mxu1  ;;  %v8012_v21 = vld [vmem:[%s8269_s18 + $0xa8] sm:$0xff] }
 0x25a   : > { %12178 = vst [vmem:[#allocation125_spill] sm:$0xff] %v9407_v13  ;;  %12179 = vst [vmem:[#allocation126_spill] sm:$0xff] %v9410_v38  ;;  %v9423_v32 = vadd.f32 %v9327_v42, %v2054_v58  ;;  %v1614_v3 = vadd.f32 %v7075_v53, %v9117_v40  ;;  %v1605_v43 = vpop.f32.mrb[181].mxu0  ;;  %v1983_v57 = vmax.f32 %v1425_v48, 0.0  ;;  %v1429_v5 = vadd.f32 %v1428_v0, %v8923_v27  ;;  %v7642_v42 = vld [vmem:[%s11856_s5 + $0x80] ss:$8 sps:$4 sm:$0xff]  }
 0x25b   : > { %12180 = vst [vmem:[#allocation127_spill] sm:$0xff] %v9417_v30  ;;  %12181 = vst [vmem:[#allocation128_spill] sm:$0xff] %v9419_v2  ;;  %v2172_v44 = vpack.c.bf16 %v9419_v2, %v9417_v30  ;;  %v1606_v25 = vadd.f32 %v1605_v43, %v9117_v40  ;;  %v7076_v63 = vpop.f32.mrb[182].mxu0  ;;  %v9431_v47 = vmul.f32 0.9, %v8012_v21  ;;  %3841 = vmatpush1.bf16.msra.mxu1 %v7639_v9  ;;  %v1986_v58 = vmax.f32 %v1427_v50, 0.0 }
 0x25c   : > { %12182 = vst [vmem:[#allocation129_spill] sm:$0xff] %v9423_v32  ;;  %v2173_v48 = vpack.c.bf16 %v9407_v13, %v9423_v32  ;;  %v1617_v0 = vadd.f32 %v7076_v63, %v9117_v40  ;;  %v1608_v54 = vpop.f32.mrb[183].mxu0  ;;  %3842 = vmatprep.subr.bf16.mxu1 %v7644_v49  ;;  %v7647_v43 = vld [vmem:[%s11856_s5 + $0x94] ss:$8 sps:$4 sm:$0xff]   ;;  %v1987_v53 = vmax.f32 %v1429_v5, 0.0  ;;  %v2058_v32 = vmul.f32 %v1614_v3, %v9392_v31 }
 0x25d   : > { %12183 = vst [vmem:[#allocation130_spill] sm:$0xff] %v9431_v47  ;;  %v2056_v9 = vmul.f32 %v1606_v25, %v9401_v52  ;;  %v1609_v2 = vadd.f32 %v1608_v54, %v9117_v40  ;;  %7137 = vmatprep.mubr.msk.bf16.mxu1 %vm688_vm0, %v2172_v44  ;;  %v9445_v50 = vpack.c.bf16 %v1986_v58, %v1982_v37  ;;  %v9451_v49 = vld [vmem:[%s8269_s18 + $0xd0] sm:$0xff]  ;;  %v1432_v25 = vpop.f32.mrb[72].mxu1  ;;  %v9460_v44 = vld [vmem:[%s8269_s18 + $0xc0] sm:$0xff] }
 0x25e   : > { %v2059_v63 = vmul.f32 %v1617_v0, %v9410_v38  ;;  %7138 = vmatmul.mubr.msk.bf16.gmra.mrb[112].mxu1 %vm688_vm0, %v2173_v48  ;;  %v9454_v30 = vmul.f32 0.9, %v9451_v49  ;;  %v9456_v5 = vpack.c.bf16 %v1987_v53, %v1983_v57  ;;  %v9463_v37 = vmul.f32 0.9, %v9460_v44  ;;  %v7645_v3 = vld [vmem:[%s11856_s5 + $0x90] ss:$8 sps:$4 sm:$0xff]  }
 0x25f   : > { %12184 = vst [vmem:[#allocation131_spill] sm:$0xff] %v9445_v50  ;;  %v2057_v54 = vmul.f32 %v1609_v2, %v9431_v47  ;;  %3843 = vmatpush1.bf16.msra.mxu1 %v7642_v42  ;;  %v1433_v58 = vadd.f32 %v1432_v25, %v8920_v8  ;;  %v1434_v48 = vpop.f32.mrb[73].mxu1  ;;  %v8015_v57 = vld [vmem:[%s8269_s18 + $0xd8] sm:$0xff]  ;;  %v7650_v2 = vld [vmem:[%s11856_s5 + $0xa4] ss:$8 sps:$4 sm:$0xff]  }
 0x260   : > { %12185 = vst [vmem:[#allocation132_spill] sm:$0xff] %v9454_v30  ;;  %12186 = vst [vmem:[#allocation133_spill] sm:$0xff] %v9456_v5  ;;  %v9469_v0 = vadd.f32 %v8011_v61, %v2059_v63  ;;  %v9472_v53 = vmul.f32 0.9, %v8015_v57  ;;  %3844 = vmatprep.subr.bf16.mxu1 %v7647_v43  ;;  %v1435_v50 = vadd.f32 %v1434_v48, %v8923_v27  ;;  %v1436_v42 = vpop.f32.mrb[74].mxu1 }
 0x261   : > { %12187 = vst [vmem:[#allocation134_spill] sm:$0xff] %v9463_v37  ;;  %v9479_v5 = vadd.f32 %v9398_v62, %v2056_v9  ;;  %v9481_v47 = vadd.f32 %v8012_v21, %v2057_v54  ;;  %v7079_v25 = vpop.f32.mrb[184].mxu0  ;;  %v1990_v61 = vmax.f32 %v1433_v58, 0.0  ;;  %v1437_v63 = vadd.f32 %v1436_v42, %v8920_v8  ;;  %v1438_v38 = vpop.f32.mrb[75].mxu1  ;;  %v8016_v54 = vld [vmem:[%s8269_s18 + $0xc8] sm:$0xff] }
 0x262   : > { %12188 = vst [vmem:[#allocation135_spill] sm:$0xff] %v9469_v0  ;;  %12189 = vst [vmem:[#allocation136_spill] sm:$0xff] %v9472_v53  ;;  %v9485_v43 = vadd.f32 %v9389_v7, %v2058_v32  ;;  %v1630_v31 = vadd.f32 %v7079_v25, %v9117_v40  ;;  %v1621_v52 = vpop.f32.mrb[185].mxu0  ;;  %v1991_v13 = vmax.f32 %v1435_v50, 0.0  ;;  %v1439_v48 = vadd.f32 %v1438_v38, %v8923_v27  ;;  %v7648_v7 = vld [vmem:[%s11856_s5 + $0xa0] ss:$8 sps:$4 sm:$0xff]  }
 0x263   : > { %12190 = vst [vmem:[#allocation137_spill] sm:$0xff] %v9479_v5  ;;  %12191 = vst [vmem:[#allocation138_spill] sm:$0xff] %v9481_v47  ;;  %v2174_v62 = vpack.c.bf16 %v9481_v47, %v9479_v5  ;;  %v1622_v21 = vadd.f32 %v1621_v52, %v9117_v40  ;;  %v7080_v9 = vpop.f32.mrb[186].mxu0  ;;  %v9493_v58 = vmul.f32 0.9, %v8016_v54  ;;  %3845 = vmatpush1.bf16.msra.mxu1 %v7645_v3  ;;  %v1994_v32 = vmax.f32 %v1437_v63, 0.0 }
 0x264   : > { %12192 = vst [vmem:[#allocation139_spill] sm:$0xff] %v9485_v43  ;;  %v2175_v50 = vpack.c.bf16 %v9469_v0, %v9485_v43  ;;  %v1633_v38 = vadd.f32 %v7080_v9, %v9117_v40  ;;  %v1624_v42 = vpop.f32.mrb[187].mxu0  ;;  %3846 = vmatprep.subr.bf16.mxu1 %v7650_v2  ;;  %v7653_v52 = vld [vmem:[%s11856_s5 + $0xb4] ss:$8 sps:$4 sm:$0xff]   ;;  %v1995_v25 = vmax.f32 %v1439_v48, 0.0  ;;  %v2062_v43 = vmul.f32 %v1630_v31, %v9454_v30 }
 0x265   : > { %12193 = vst [vmem:[#allocation140_spill] sm:$0xff] %v9493_v58  ;;  %v2060_v3 = vmul.f32 %v1622_v21, %v9463_v37  ;;  %v1625_v47 = vadd.f32 %v1624_v42, %v9117_v40  ;;  %7141 = vmatprep.mubr.msk.bf16.mxu1 %vm688_vm0, %v2174_v62  ;;  %v9507_v63 = vpack.c.bf16 %v1994_v32, %v1990_v61  ;;  %v9513_v2 = vld [vmem:[%s8269_s18 + $0xf0] sm:$0xff]  ;;  %v1442_v21 = vpop.f32.mrb[76].mxu1  ;;  %v9522_v62 = vld [vmem:[%s8269_s18 + $0xe0] sm:$0xff] }
 0x266   : > { %v2063_v9 = vmul.f32 %v1633_v38, %v9472_v53  ;;  %7142 = vmatmul.mubr.msk.bf16.gmra.mrb[116].mxu1 %vm688_vm0, %v2175_v50  ;;  %v9516_v5 = vmul.f32 0.9, %v9513_v2  ;;  %v9518_v48 = vpack.c.bf16 %v1995_v25, %v1991_v13  ;;  %v9525_v61 = vmul.f32 0.9, %v9522_v62  ;;  %v7651_v31 = vld [vmem:[%s11856_s5 + $0xb0] ss:$8 sps:$4 sm:$0xff]  }
 0x267   : > { %12194 = vst [vmem:[#allocation141_spill] sm:$0xff] %v9507_v63  ;;  %v2061_v42 = vmul.f32 %v1625_v47, %v9493_v58  ;;  %3847 = vmatpush1.bf16.msra.mxu1 %v7648_v7  ;;  %v1443_v32 = vadd.f32 %v1442_v21, %v8920_v8  ;;  %v1444_v50 = vpop.f32.mrb[77].mxu1  ;;  %v8019_v13 = vld [vmem:[%s8269_s18 + $0xf8] sm:$0xff]  ;;  %v7656_v47 = vld [vmem:[%s11856_s5 + $0xc4] ss:$8 sps:$4 sm:$0xff]  }
 0x268   : > { %12195 = vst [vmem:[#allocation142_spill] sm:$0xff] %v9516_v5  ;;  %12196 = vst [vmem:[#allocation143_spill] sm:$0xff] %v9518_v48  ;;  %v9531_v38 = vadd.f32 %v8015_v57, %v2063_v9  ;;  %v9534_v25 = vmul.f32 0.9, %v8019_v13  ;;  %3848 = vmatprep.subr.bf16.mxu1 %v7653_v52  ;;  %v1445_v63 = vadd.f32 %v1444_v50, %v8923_v27  ;;  %v1446_v7 = vpop.f32.mrb[78].mxu1 }
 0x269   : > { %12197 = vst [vmem:[#allocation144_spill] sm:$0xff] %v9525_v61  ;;  %v9541_v48 = vadd.f32 %v9460_v44, %v2060_v3  ;;  %v9543_v58 = vadd.f32 %v8016_v54, %v2061_v42  ;;  %v7083_v21 = vpop.f32.mrb[188].mxu0  ;;  %v1998_v57 = vmax.f32 %v1443_v32, 0.0  ;;  %v1447_v9 = vadd.f32 %v1446_v7, %v8920_v8  ;;  %v1448_v53 = vpop.f32.mrb[79].mxu1  ;;  %v8020_v42 = vld [vmem:[%s8269_s18 + $0xe8] sm:$0xff] }
 0x26a   : > { %12198 = vst [vmem:[#allocation145_spill] sm:$0xff] %v9531_v38  ;;  %12199 = vst [vmem:[#allocation146_spill] sm:$0xff] %v9534_v25  ;;  %v9547_v52 = vadd.f32 %v9451_v49, %v2062_v43  ;;  %v1646_v30 = vadd.f32 %v7083_v21, %v9117_v40  ;;  %v1637_v37 = vpop.f32.mrb[189].mxu0  ;;  %v1999_v0 = vmax.f32 %v1445_v63, 0.0  ;;  %v1449_v50 = vadd.f32 %v1448_v53, %v8923_v27  ;;  %v7654_v49 = vld [vmem:[%s11856_s5 + $0xc0] ss:$8 sps:$4 sm:$0xff]  }
 0x26b   : > { %12200 = vst [vmem:[#allocation147_spill] sm:$0xff] %v9541_v48  ;;  %12201 = vst [vmem:[#allocation148_spill] sm:$0xff] %v9543_v58  ;;  %v2176_v44 = vpack.c.bf16 %v9543_v58, %v9541_v48  ;;  %v1638_v54 = vadd.f32 %v1637_v37, %v9117_v40  ;;  %v7084_v3 = vpop.f32.mrb[190].mxu0  ;;  %v9555_v32 = vmul.f32 0.9, %v8020_v42  ;;  %3849 = vmatpush1.bf16.msra.mxu1 %v7651_v31  ;;  %v2002_v43 = vmax.f32 %v1447_v9, 0.0 }
 0x26c   : > { %12202 = vst [vmem:[#allocation149_spill] sm:$0xff] %v9547_v52  ;;  %v2177_v63 = vpack.c.bf16 %v9531_v38, %v9547_v52  ;;  %v1649_v53 = vadd.f32 %v7084_v3, %v9117_v40  ;;  %v1640_v7 = vpop.f32.mrb[191].mxu0  ;;  %3850 = vmatprep.subr.bf16.mxu1 %v7656_v47  ;;  %v7659_v37 = vld [vmem:[%s11856_s5 + $0xd4] ss:$8 sps:$4 sm:$0xff]   ;;  %v2003_v21 = vmax.f32 %v1449_v50, 0.0  ;;  %v2066_v52 = vmul.f32 %v1646_v30, %v9516_v5 }
 0x26d   : > { %12203 = vst [vmem:[#allocation150_spill] sm:$0xff] %v9555_v32  ;;  %v2064_v31 = vmul.f32 %v1638_v54, %v9525_v61  ;;  %v1641_v58 = vadd.f32 %v1640_v7, %v9117_v40  ;;  %7145 = vmatprep.mubr.msk.bf16.mxu1 %vm688_vm0, %v2176_v44  ;;  %v9569_v9 = vpack.c.bf16 %v2002_v43, %v1998_v57  ;;  %v9575_v47 = vld [vmem:[%s8269_s18 + $0x110] sm:$0xff]  ;;  %v1452_v54 = vpop.f32.mrb[80].mxu1  ;;  %v9584_v44 = vld [vmem:[%s8269_s18 + $0x100] sm:$0xff] }
 0x26e   : > { %v2067_v3 = vmul.f32 %v1649_v53, %v9534_v25  ;;  %7146 = vmatmul.mubr.msk.bf16.gmra.mrb[120].mxu1 %vm688_vm0, %v2177_v63  ;;  %v9578_v48 = vmul.f32 0.9, %v9575_v47  ;;  %v9580_v50 = vpack.c.bf16 %v2003_v21, %v1999_v0  ;;  %v9587_v57 = vmul.f32 0.9, %v9584_v44  ;;  %v7657_v30 = vld [vmem:[%s11856_s5 + $0xd0] ss:$8 sps:$4 sm:$0xff]  }
 0x26f   : > { %12204 = vst [vmem:[#allocation151_spill] sm:$0xff] %v9569_v9  ;;  %v2065_v7 = vmul.f32 %v1641_v58, %v9555_v32  ;;  %3851 = vmatpush1.bf16.msra.mxu1 %v7654_v49  ;;  %v1453_v43 = vadd.f32 %v1452_v54, %v8920_v8  ;;  %v1454_v63 = vpop.f32.mrb[81].mxu1  ;;  %v8023_v0 = vld [vmem:[%s8269_s18 + $0x118] sm:$0xff]  ;;  %v7662_v58 = vld [vmem:[%s11856_s5 + $0xe4] ss:$8 sps:$4 sm:$0xff]  }
 0x270   : > { %12205 = vst [vmem:[#allocation152_spill] sm:$0xff] %v9578_v48  ;;  %12206 = vst [vmem:[#allocation153_spill] sm:$0xff] %v9580_v50  ;;  %v9593_v53 = vadd.f32 %v8019_v13, %v2067_v3  ;;  %v9596_v21 = vmul.f32 0.9, %v8023_v0  ;;  %3852 = vmatprep.subr.bf16.mxu1 %v7659_v37  ;;  %v1455_v9 = vadd.f32 %v1454_v63, %v8923_v27  ;;  %v1456_v49 = vpop.f32.mrb[82].mxu1 }
 0x271   : > { %12207 = vst [vmem:[#allocation154_spill] sm:$0xff] %v9587_v57  ;;  %v9603_v50 = vadd.f32 %v9522_v62, %v2064_v31  ;;  %v9605_v32 = vadd.f32 %v8020_v42, %v2065_v7  ;;  %v7087_v54 = vpop.f32.mrb[192].mxu0  ;;  %v2006_v13 = vmax.f32 %v1453_v43, 0.0  ;;  %v1457_v3 = vadd.f32 %v1456_v49, %v8920_v8  ;;  %v1458_v25 = vpop.f32.mrb[83].mxu1  ;;  %v8024_v7 = vld [vmem:[%s8269_s18 + $0x108] sm:$0xff] }
 0x272   : > { %12208 = vst [vmem:[#allocation155_spill] sm:$0xff] %v9593_v53  ;;  %12209 = vst [vmem:[#allocation156_spill] sm:$0xff] %v9596_v21  ;;  %v9609_v37 = vadd.f32 %v9513_v2, %v2066_v52  ;;  %v1662_v5 = vadd.f32 %v7087_v54, %v9117_v40  ;;  %v1653_v61 = vpop.f32.mrb[193].mxu0  ;;  %v2007_v38 = vmax.f32 %v1455_v9, 0.0  ;;  %v1459_v63 = vadd.f32 %v1458_v25, %v8923_v27  ;;  %v7660_v2 = vld [vmem:[%s11856_s5 + $0xe0] ss:$8 sps:$4 sm:$0xff]  }
 0x273   : > { %12210 = vst [vmem:[#allocation157_spill] sm:$0xff] %v9603_v50  ;;  %12211 = vst [vmem:[#allocation158_spill] sm:$0xff] %v9605_v32  ;;  %v2178_v62 = vpack.c.bf16 %v9605_v32, %v9603_v50  ;;  %v1654_v42 = vadd.f32 %v1653_v61, %v9117_v40  ;;  %v7088_v31 = vpop.f32.mrb[194].mxu0  ;;  %v9617_v43 = vmul.f32 0.9, %v8024_v7  ;;  %3853 = vmatpush1.bf16.msra.mxu1 %v7657_v30  ;;  %v2010_v52 = vmax.f32 %v1457_v3, 0.0 }
 0x274   : > { %12212 = vst [vmem:[#allocation159_spill] sm:$0xff] %v9609_v37  ;;  %v2179_v9 = vpack.c.bf16 %v9593_v53, %v9609_v37  ;;  %v1665_v25 = vadd.f32 %v7088_v31, %v9117_v40  ;;  %v1656_v49 = vpop.f32.mrb[195].mxu0  ;;  %3854 = vmatprep.subr.bf16.mxu1 %v7662_v58  ;;  %v7665_v61 = vld [vmem:[%s11856_s5 + $0xf4] ss:$8 sps:$4 sm:$0xff]   ;;  %v2011_v54 = vmax.f32 %v1459_v63, 0.0  ;;  %v2070_v37 = vmul.f32 %v1662_v5, %v9578_v48 }
 0x275   : > { %12213 = vst [vmem:[#allocation160_spill] sm:$0xff] %v9617_v43  ;;  %v2068_v30 = vmul.f32 %v1654_v42, %v9587_v57  ;;  %v1657_v32 = vadd.f32 %v1656_v49, %v9117_v40  ;;  %7149 = vmatprep.mubr.msk.bf16.mxu1 %vm688_vm0, %v2178_v62  ;;  %v9631_v3 = vpack.c.bf16 %v2010_v52, %v2006_v13  ;;  %v9637_v58 = vld [vmem:[%s8269_s18 + $0x130] sm:$0xff]  ;;  %v1462_v42 = vpop.f32.mrb[84].mxu1  ;;  %v8026_v62 = vld [vmem:[%s8269_s18 + $0x120] sm:$0xff] }
 0x276   : > { %v2071_v31 = vmul.f32 %v1665_v25, %v9596_v21  ;;  %7150 = vmatmul.mubr.msk.bf16.gmra.mrb[124].mxu1 %vm688_vm0, %v2179_v9  ;;  %v9640_v50 = vmul.f32 0.9, %v9637_v58  ;;  %v9642_v63 = vpack.c.bf16 %v2011_v54, %v2007_v38  ;;  %v9646_v13 = vmul.f32 0.9, %v8026_v62  ;;  %v7663_v5 = vld [vmem:[%s11856_s5 + $0xf0] ss:$8 sps:$4 sm:$0xff]  }
 0x277   : > { %12214 = vst [vmem:[#allocation161_spill] sm:$0xff] %v9631_v3  ;;  %v2069_v49 = vmul.f32 %v1657_v32, %v9617_v43  ;;  %3855 = vmatpush1.bf16.msra.mxu1 %v7660_v2  ;;  %v1463_v52 = vadd.f32 %v1462_v42, %v8920_v8  ;;  %v1464_v9 = vpop.f32.mrb[85].mxu1  ;;  %v8027_v3 = vld [vmem:[%s8269_s18 + $0x138] sm:$0xff]  ;;  %v7668_v38 = vld [vmem:[%s11856_s5 + $0x104] ss:$8 sps:$4 sm:$0xff]   ;;  %v9662_v54 = vadd.f32 %v9584_v44, %v2068_v30 }
 0x278   : > { %12215 = vst [vmem:[#allocation162_spill] sm:$0xff] %v9640_v50  ;;  %12216 = vst [vmem:[#allocation163_spill] sm:$0xff] %v9642_v63  ;;  %v9652_v25 = vadd.f32 %v8023_v0, %v2071_v31  ;;  %v9655_v21 = vmul.f32 0.9, %v8027_v3  ;;  %3856 = vmatprep.subr.bf16.mxu1 %v7665_v61  ;;  %v1465_v32 = vadd.f32 %v1464_v9, %v8923_v27  ;;  %v1466_v2 = vpop.f32.mrb[86].mxu1 }
 0x279   : > { %12217 = vst [vmem:[#allocation164_spill] sm:$0xff] %v9646_v13  ;;  %12219 = vst [vmem:[#allocation166_spill] sm:$0xff] %v9662_v54  ;;  %v9664_v63 = vadd.f32 %v8024_v7, %v2069_v49  ;;  %v7091_v42 = vpop.f32.mrb[196].mxu0  ;;  %v2014_v0 = vmax.f32 %v1463_v52, 0.0  ;;  %v1467_v31 = vadd.f32 %v1466_v2, %v8920_v8  ;;  %v1468_v43 = vpop.f32.mrb[87].mxu1  ;;  %v9668_v61 = vadd.f32 %v9575_v47, %v2070_v37  ;;  %v8028_v49 = vld [vmem:[%s8269_s18 + $0x128] sm:$0xff] }
 0x27a   : > { %12218 = vst [vmem:[#allocation165_spill] sm:$0xff] %v9655_v21  ;;  %v1678_v48 = vadd.f32 %v7091_v42, %v9117_v40  ;;  %v1669_v57 = vpop.f32.mrb[197].mxu0  ;;  %v2015_v53 = vmax.f32 %v1465_v32, 0.0  ;;  %v1469_v9 = vadd.f32 %v1468_v43, %v8923_v27  ;;  %v9676_v52 = vmul.f32 0.9, %v8028_v49 }
 0x27b   : > { %12220 = vst [vmem:[#allocation167_spill] sm:$0xff] %v9664_v63  ;;  %12221 = vst [vmem:[#allocation168_spill] sm:$0xff] %v9668_v61  ;;  %v2180_v44 = vpack.c.bf16 %v9664_v63, %v9662_v54  ;;  %v1670_v7 = vadd.f32 %v1669_v57, %v9117_v40  ;;  %v7092_v30 = vpop.f32.mrb[198].mxu0  ;;  %3857 = vmatpush1.bf16.msra.mxu1 %v7663_v5  ;;  %v2018_v2 = vmax.f32 %v1467_v31, 0.0 }
 0x27c   : > { %12222 = vst [vmem:[#allocation169_spill] sm:$0xff] %v9676_v52  ;;  %v2181_v47 = vpack.c.bf16 %v9652_v25, %v9668_v61  ;;  %v1681_v37 = vadd.f32 %v7092_v30, %v9117_v40  ;;  %v1672_v32 = vpop.f32.mrb[199].mxu0  ;;  %4179 = vmatprep.subr.bf16.mxu1 %v7668_v38  ;;  %v2019_v43 = vmax.f32 %v1469_v9, 0.0  ;;  %v2074_v5 = vmul.f32 %v1678_v48, %v9640_v50  ;;  %v1472_v38 = vpop.f32.mrb[88].mxu1  ;;  %v8029_v61 = vld [vmem:[%s8269_s18 + $0x150] sm:$0xff]  ;;  %v8031_v48 = vld [vmem:[%s8269_s18 + $0x158] sm:$0xff] }
 0x27d   : > { %v2072_v42 = vmul.f32 %v1670_v7, %v9646_v13  ;;  %v1673_v57 = vadd.f32 %v1672_v32, %v9117_v40  ;;  %7153 = vmatprep.mubr.msk.bf16.mxu1 %vm688_vm0, %v2180_v44  ;;  %v9684_v63 = vpack.c.bf16 %v2018_v2, %v2014_v0  ;;  %v9693_v7 = vmul.f32 0.9, %v8029_v61  ;;  %v1474_v13 = vpop.f32.mrb[89].mxu1  ;;  %v8030_v0 = vld [vmem:[%s8269_s18 + $0x140] sm:$0xff] }
 0x27e   : > { %v2075_v31 = vmul.f32 %v1681_v37, %v9655_v21  ;;  %7154 = vmatmul.mubr.msk.bf16.gmra.mrb[128].mxu1 %vm688_vm0, %v2181_v47  ;;  %v9689_v30 = vpack.c.bf16 %v2019_v43, %v2015_v53  ;;  %v1473_v32 = vadd.f32 %v1472_v38, %v8920_v8  ;;  %v9699_v2 = vmul.f32 0.9, %v8030_v0  ;;  %v1476_v47 = vpop.f32.mrb[90].mxu1 }
 0x27f   : > { %12223 = vst [vmem:[#allocation170_spill] sm:$0xff] %v9684_v63  ;;  %v2073_v9 = vmul.f32 %v1673_v57, %v9676_v52  ;;  %12225 = vst [vmem:[#allocation172_spill] sm:$0xff] %v9693_v7  ;;  %v9702_v37 = vmul.f32 0.9, %v8031_v48  ;;  %v1475_v53 = vadd.f32 %v1474_v13, %v8923_v27  ;;  %v9705_v43 = vadd.f32 %v8026_v62, %v2072_v42 }
 0x280   : > { %12224 = vst [vmem:[#allocation171_spill] sm:$0xff] %v9689_v30  ;;  %v9696_v44 = vadd.f32 %v8027_v3, %v2075_v31  ;;  %12227 = vst [vmem:[#allocation174_spill] sm:$0xff] %v9699_v2  ;;  %v2022_v30 = vmax.f32 %v1473_v32, 0.0  ;;  %v1477_v38 = vadd.f32 %v1476_v47, %v8920_v8  ;;  %v1478_v3 = vpop.f32.mrb[91].mxu1  ;;  %v9711_v31 = vadd.f32 %v9637_v58, %v2074_v5 }
 0x281   : > { %12228 = vst [vmem:[#allocation175_spill] sm:$0xff] %v9702_v37  ;;  %12229 = vst [vmem:[#allocation176_spill] sm:$0xff] %v9705_v43  ;;  %v9707_v57 = vadd.f32 %v8028_v49, %v2073_v9  ;;  %v7095_v63 = vpop.f32.mrb[200].mxu0  ;;  %v2023_v50 = vmax.f32 %v1475_v53, 0.0  ;;  %v1479_v13 = vadd.f32 %v1478_v3, %v8923_v27  ;;  %v8032_v9 = vld [vmem:[%s8269_s18 + $0x148] sm:$0xff] }
 0x282   : > { %12226 = vst [vmem:[#allocation173_spill] sm:$0xff] %v9696_v44  ;;  %12231 = vst [vmem:[#allocation178_spill] sm:$0xff] %v9711_v31  ;;  %v1694_v52 = vadd.f32 %v7095_v63, %v9117_v40  ;;  %v1685_v21 = vpop.f32.mrb[201].mxu0  ;;  %v9719_v32 = vmul.f32 0.9, %v8032_v9  ;;  %v2026_v47 = vmax.f32 %v1477_v38, 0.0  ;;  %v2183_v58 = vpack.c.bf16 %v9696_v44, %v9711_v31 }
 0x283   : > { %12230 = vst [vmem:[#allocation177_spill] sm:$0xff] %v9707_v57  ;;  %v2182_v62 = vpack.c.bf16 %v9707_v57, %v9705_v43  ;;  %v1686_v49 = vadd.f32 %v1685_v21, %v9117_v40  ;;  %v7096_v42 = vpop.f32.mrb[202].mxu0  ;;  %v2027_v53 = vmax.f32 %v1479_v13, 0.0  ;;  %v8033_v44 = vld [vmem:[%s8269_s18 + $0x170] sm:$0xff] }
 0x284   : > { %12232 = vst [vmem:[#allocation179_spill] sm:$0xff] %v9719_v32  ;;  %v1697_v63 = vadd.f32 %v7096_v42, %v9117_v40  ;;  %v1688_v5 = vpop.f32.mrb[203].mxu0  ;;  %v9727_v21 = vpack.c.bf16 %v2026_v47, %v2022_v30  ;;  %v2078_v43 = vmul.f32 %v1694_v52, %v9693_v7  ;;  %v1482_v42 = vpop.f32.mrb[92].mxu1  ;;  %v8034_v30 = vld [vmem:[%s8269_s18 + $0x160] sm:$0xff]  ;;  %v8035_v52 = vld [vmem:[%s8269_s18 + $0x178] sm:$0xff] }
 0x285   : > { %v2076_v3 = vmul.f32 %v1686_v49, %v9699_v2  ;;  %v1689_v57 = vadd.f32 %v1688_v5, %v9117_v40  ;;  %7157 = vmatprep.mubr.msk.bf16.mxu1 %vm688_vm0, %v2182_v62  ;;  %v9732_v31 = vpack.c.bf16 %v2027_v53, %v2023_v50  ;;  %v9736_v49 = vmul.f32 0.9, %v8033_v44  ;;  %v1484_v2 = vpop.f32.mrb[93].mxu1 }
 0x286   : > { %12233 = vst [vmem:[#allocation180_spill] sm:$0xff] %v9727_v21  ;;  %v2079_v38 = vmul.f32 %v1697_v63, %v9702_v37  ;;  %7158 = vmatmul.mubr.msk.bf16.gmra.mrb[132].mxu1 %vm688_vm0, %v2183_v58  ;;  %v1483_v5 = vadd.f32 %v1482_v42, %v8920_v8  ;;  %v9742_v47 = vmul.f32 0.9, %v8034_v30  ;;  %v9745_v63 = vmul.f32 0.9, %v8035_v52  ;;  %v1486_v58 = vpop.f32.mrb[94].mxu1 }
 0x287   : > { %12234 = vst [vmem:[#allocation181_spill] sm:$0xff] %v9732_v31  ;;  %v2077_v13 = vmul.f32 %v1689_v57, %v9719_v32  ;;  %12235 = vst [vmem:[#allocation182_spill] sm:$0xff] %v9736_v49  ;;  %v1485_v50 = vadd.f32 %v1484_v2, %v8923_v27  ;;  %v9748_v53 = vadd.f32 %v8030_v0, %v2076_v3  ;;  %v8036_v3 = vld [vmem:[%s8269_s18 + $0x168] sm:$0xff] }
 0x288   : > { %v9739_v62 = vadd.f32 %v8031_v48, %v2079_v38  ;;  %12236 = vst [vmem:[#allocation183_spill] sm:$0xff] %v9742_v47  ;;  %12237 = vst [vmem:[#allocation184_spill] sm:$0xff] %v9745_v63  ;;  %v2030_v31 = vmax.f32 %v1483_v5, 0.0  ;;  %v1487_v42 = vadd.f32 %v1486_v58, %v8920_v8  ;;  %v1488_v48 = vpop.f32.mrb[95].mxu1  ;;  %v9753_v38 = vadd.f32 %v8029_v61, %v2078_v43 }
 0x289   : > { %v9750_v57 = vadd.f32 %v8032_v9, %v2077_v13  ;;  %v7099_v21 = vpop.f32.mrb[204].mxu0  ;;  %v2031_v7 = vmax.f32 %v1485_v50, 0.0  ;;  %v1489_v54 = vadd.f32 %v1488_v48, %v8923_v27  ;;  %v9761_v13 = vmul.f32 0.9, %v8036_v3 }
 0x28a   : > { %v1710_v32 = vadd.f32 %v7099_v21, %v9117_v40  ;;  %v1701_v37 = vpop.f32.mrb[205].mxu0  ;;  %v2034_v5 = vmax.f32 %v1487_v42, 0.0  ;;  %v2185_v8 = vpack.c.bf16 %v9739_v62, %v9753_v38 }
 0x28b   : > { %v2184_v2 = vpack.c.bf16 %v9750_v57, %v9748_v53  ;;  %v1702_v0 = vadd.f32 %v1701_v37, %v9117_v40  ;;  %v7100_v9 = vpop.f32.mrb[206].mxu0  ;;  %12238 = vst [vmem:[#allocation185_spill] sm:$0xff] %v9761_v13  ;;  %v2035_v21 = vmax.f32 %v1489_v54, 0.0 }
 0x28c   : > { %v1713_v61 = vadd.f32 %v7100_v9, %v9117_v40  ;;  %v1704_v43 = vpop.f32.mrb[207].mxu0  ;;  %v9769_v37 = vpack.c.bf16 %v2034_v5, %v2030_v31  ;;  %v2082_v58 = vmul.f32 %v1710_v32, %v9736_v49 }
 0x28d   : > { %v2080_v27 = vmul.f32 %v1702_v0, %v9742_v47  ;;  %v1705_v50 = vadd.f32 %v1704_v43, %v9117_v40  ;;  %7161 = vmatprep.mubr.msk.bf16.mxu1 %vm688_vm0, %v2184_v2  ;;  %v9774_v48 = vpack.c.bf16 %v2035_v21, %v2031_v7  ;;  %v8037_v2 = vld [vmem:[%s8269_s18 + $0x180] sm:$0xff]  ;;  %v8039_v21 = vld [vmem:[%s8269_s18 + $0x198] sm:$0xff] }
 0x28e   : > { %12239 = vst [vmem:[#allocation186_spill] sm:$0xff] %v9769_v37  ;;  %v2083_v42 = vmul.f32 %v1713_v61, %v9745_v63  ;;  %7162 = vmatmul.mubr.msk.bf16.gmra.mrb[136].mxu1 %vm688_vm0, %v2185_v8  ;;  %v9784_v5 = vmul.f32 0.9, %v8037_v2  ;;  %v9786_v32 = vadd.f32 %v8033_v44, %v2082_v58  ;;  %v8038_v61 = vld [vmem:[%s8269_s18 + $0x190] sm:$0xff] }
 0x28f   : > { %12240 = vst [vmem:[#allocation187_spill] sm:$0xff] %v9774_v48  ;;  %v2081_v54 = vmul.f32 %v1705_v50, %v9761_v13  ;;  %v9779_v0 = vadd.f32 %v8034_v30, %v2080_v27  ;;  %v9789_v37 = vmul.f32 0.9, %v8038_v61  ;;  %v8040_v50 = vld [vmem:[%s8269_s18 + $0x188] sm:$0xff] }
 0x290   : > { %v9777_v9 = vadd.f32 %v8035_v52, %v2083_v42  ;;  %12244 = vst [vmem:[#allocation191_spill] sm:$0xff] %v9784_v5  ;;  %12245 = vst [vmem:[#allocation192_spill] sm:$0xff] %v9786_v32  ;;  %v9793_v52 = vmul.f32 0.9, %v8039_v21  ;;  %v9799_v42 = vmul.f32 0.9, %v8040_v50 }
 0x291   : > { %12242 = vst [vmem:[#allocation189_spill] sm:$0xff] %v9779_v0  ;;  %v9781_v43 = vadd.f32 %v8036_v3, %v2081_v54  ;;  %v7103_v31 = vpop.f32.mrb[208].mxu0  ;;  %12246 = vst [vmem:[#allocation193_spill] sm:$0xff] %v9789_v37 }
 0x292   : > { %12241 = vst [vmem:[#allocation188_spill] sm:$0xff] %v9777_v9  ;;  %v1726_v7 = vadd.f32 %v7103_v31, %v9117_v40  ;;  %v1717_v8 = vpop.f32.mrb[209].mxu0  ;;  %12247 = vst [vmem:[#allocation194_spill] sm:$0xff] %v9793_v52  ;;  %v2187_v44 = vpack.c.bf16 %v9777_v9, %v9786_v32  ;;  %v7684_v31 = vld [vmem:[%s11854_s3 + $0x10] sm:$0xff]   ;;  %v12257_v9 = vmov 0  }
 0x293   : > { %12243 = vst [vmem:[#allocation190_spill] sm:$0xff] %v9781_v43  ;;  %v2186_v30 = vpack.c.bf16 %v9781_v43, %v9779_v0  ;;  %v1718_v3 = vadd.f32 %v1717_v8, %v9117_v40  ;;  %v7104_v27 = vpop.f32.mrb[210].mxu0  ;;  %12248 = vst [vmem:[#allocation195_spill] sm:$0xff] %v9799_v42  ;;  %7185 = vmatprep.subr.bf16.mxu0 %v7684_v31 }
 0x294   : > { %v1729_v58 = vadd.f32 %v7104_v27, %v9117_v40  ;;  %v1720_v54 = vpop.f32.mrb[211].mxu0  ;;  %v2086_v8 = vmul.f32 %v1726_v7, %v9789_v37  ;;  %7186 = vmatpush3.bf16.msra.mxu0 %v7684_v31  ;;  %v8042_v37 = vld [vmem:[%s8269_s18 + $0x1b0] sm:$0xff]  ;;  %v8043_v31 = vld [vmem:[%s8269_s18 + $0x1b8] sm:$0xff] }
 0x295   : > { %v2084_v48 = vmul.f32 %v1718_v3, %v9784_v5  ;;  %v1721_v43 = vadd.f32 %v1720_v54, %v9117_v40  ;;  %7165 = vmatprep.mubr.msk.bf16.mxu1 %vm688_vm0, %v2186_v30  ;;  %v7685_v3 = vld [vmem:[%s11854_s3 + $0x18] sm:$0xff]  }
 0x296   : > { %v2087_v0 = vmul.f32 %v1729_v58, %v9793_v52  ;;  %7166 = vmatmul.mubr.msk.bf16.gmra.mrb[140].mxu1 %vm688_vm0, %v2187_v44  ;;  %v8041_v58 = vld [vmem:[%s8269_s18 + $0x1a0] sm:$0xff]  ;;  %v9826_v44 = vadd.f32 %v8038_v61, %v2086_v8  ;;  %7187 = vmatprep.subr.bf16.mxu0 %v7685_v3 }
 0x297   : > { %v2085_v27 = vmul.f32 %v1721_v43, %v9799_v42  ;;  %v9819_v54 = vadd.f32 %v8037_v2, %v2084_v48  ;;  %v9824_v52 = vmul.f32 0.9, %v8041_v58  ;;  %v9829_v43 = vmul.f32 0.9, %v8042_v37 }
 0x298   : > { %v9814_v32 = vadd.f32 %v8039_v21, %v2087_v0  ;;  %12253 = vst [vmem:[#allocation200_spill] sm:$0xff] %v9826_v44  ;;  %v9833_v42 = vmul.f32 0.9, %v8043_v31  ;;  %7188 = vmatpush3.bf16.msra.mxu0 %v7685_v3 }
 0x299   : > { %12250 = vst [vmem:[#allocation197_spill] sm:$0xff] %v9819_v54  ;;  %v9821_v30 = vadd.f32 %v8040_v50, %v2085_v27  ;;  %v7107_v7 = vpop.f32.mrb[212].mxu0  ;;  %12252 = vst [vmem:[#allocation199_spill] sm:$0xff] %v9824_v52  ;;  %v8044_v27 = vld [vmem:[%s8269_s18 + $0x1a8] sm:$0xff]  ;;  %4859 = vmatprep.subr.bf16.mxu0 %v12257_v9 }
 0x29a   : > { %12249 = vst [vmem:[#allocation196_spill] sm:$0xff] %v9814_v32  ;;  %12254 = vst [vmem:[#allocation201_spill] sm:$0xff] %v9829_v43  ;;  %v1742_v0 = vadd.f32 %v7107_v7, %v9117_v40  ;;  %v1733_v21 = vpop.f32.mrb[213].mxu0  ;;  %v9839_v5 = vmul.f32 0.9, %v8044_v27  ;;  %v2189_v61 = vpack.c.bf16 %v9814_v32, %v9826_v44 }
 0x29b   : > { %12251 = vst [vmem:[#allocation198_spill] sm:$0xff] %v9821_v30  ;;  %12255 = vst [vmem:[#allocation202_spill] sm:$0xff] %v9833_v42  ;;  %v2188_v48 = vpack.c.bf16 %v9821_v30, %v9819_v54  ;;  %v1734_v2 = vadd.f32 %v1733_v21, %v9117_v40  ;;  %v7108_v50 = vpop.f32.mrb[214].mxu0 }
 0x29c   : > { %12256 = vst [vmem:[#allocation203_spill] sm:$0xff] %v9839_v5  ;;  %v1745_v8 = vadd.f32 %v7108_v50, %v9117_v40  ;;  %v1736_v7 = vpop.f32.mrb[215].mxu0  ;;  %v2090_v21 = vmul.f32 %v1742_v0, %v9829_v43  ;;  %v8046_v0 = vld [vmem:[%s8269_s18 + $0x1d0] sm:$0xff] }
 0x29d   : > { %v2088_v13 = vmul.f32 %v1734_v2, %v9824_v52  ;;  %v1737_v30 = vadd.f32 %v1736_v7, %v9117_v40  ;;  %7169 = vmatprep.mubr.msk.bf16.mxu1 %vm688_vm0, %v2188_v48  ;;  %v8045_v7 = vld [vmem:[%s8269_s18 + $0x1c0] sm:$0xff]  ;;  %v9864_v43 = vmul.f32 0.9, %v8046_v0 }
 0x29e   : > { %v2091_v3 = vmul.f32 %v1745_v8, %v9833_v42  ;;  %7170 = vmatmul.mubr.msk.bf16.gmra.mrb[144].mxu1 %vm688_vm0, %v2189_v61  ;;  %v9859_v52 = vmul.f32 0.9, %v8045_v7  ;;  %v9861_v48 = vadd.f32 %v8042_v37, %v2090_v21 }
 0x29f   : > { %v2089_v44 = vmul.f32 %v1737_v30, %v9839_v5  ;;  %v9854_v54 = vadd.f32 %v8041_v58, %v2088_v13  ;;  %12263 = vst [vmem:[#allocation209_spill] sm:$0xff] %v9864_v43  ;;  %v8047_v30 = vld [vmem:[%s8269_s18 + $0x1d8] sm:$0xff] }
 0x2a0   : > { %v9852_v50 = vadd.f32 %v8043_v31, %v2091_v3  ;;  %12261 = vst [vmem:[#allocation207_spill] sm:$0xff] %v9859_v52  ;;  %12262 = vst [vmem:[#allocation208_spill] sm:$0xff] %v9861_v48  ;;  %v9868_v31 = vmul.f32 0.9, %v8047_v30 }
 0x2a1   : > { %12259 = vst [vmem:[#allocation205_spill] sm:$0xff] %v9854_v54  ;;  %v9856_v9 = vadd.f32 %v8044_v27, %v2089_v44  ;;  %v7111_v2 = vpop.f32.mrb[216].mxu0  ;;  %v8048_v27 = vld [vmem:[%s8269_s18 + $0x1c8] sm:$0xff] }
 0x2a2   : > { %12258 = vst [vmem:[#allocation204_spill] sm:$0xff] %v9852_v50  ;;  %v1758_v61 = vadd.f32 %v7111_v2, %v9117_v40  ;;  %v1749_v8 = vpop.f32.mrb[217].mxu0  ;;  %12264 = vst [vmem:[#allocation210_spill] sm:$0xff] %v9868_v31  ;;  %v9874_v3 = vmul.f32 0.9, %v8048_v27  ;;  %v2191_v37 = vpack.c.bf16 %v9852_v50, %v9861_v48 }
 0x2a3   : > { %12260 = vst [vmem:[#allocation206_spill] sm:$0xff] %v9856_v9  ;;  %v2190_v13 = vpack.c.bf16 %v9856_v9, %v9854_v54  ;;  %v1750_v58 = vadd.f32 %v1749_v8, %v9117_v40  ;;  %v7112_v44 = vpop.f32.mrb[218].mxu0 }
 0x2a4   : > { %12265 = vst [vmem:[#allocation211_spill] sm:$0xff] %v9874_v3  ;;  %v1761_v21 = vadd.f32 %v7112_v44, %v9117_v40  ;;  %v1752_v2 = vpop.f32.mrb[219].mxu0  ;;  %v2094_v8 = vmul.f32 %v1758_v61, %v9864_v43  ;;  %v8050_v61 = vld [vmem:[%s8269_s18 + $0x1f0] sm:$0xff] }
 0x2a5   : > { %v2092_v5 = vmul.f32 %v1750_v58, %v9859_v52  ;;  %v1753_v42 = vadd.f32 %v1752_v2, %v9117_v40  ;;  %7173 = vmatprep.mubr.msk.bf16.mxu1 %vm688_vm0, %v2190_v13  ;;  %v8049_v2 = vld [vmem:[%s8269_s18 + $0x1e0] sm:$0xff]  ;;  %v9898_v43 = vmul.f32 0.9, %v8050_v61 }
 0x2a6   : > { %v2095_v9 = vmul.f32 %v1761_v21, %v9868_v31  ;;  %7174 = vmatmul.mubr.msk.bf16.gmra.mrb[148].mxu1 %vm688_vm0, %v2191_v37  ;;  %v9893_v52 = vmul.f32 0.9, %v8049_v2  ;;  %v9895_v13 = vadd.f32 %v8046_v0, %v2094_v8 }
 0x2a7   : > { %v2093_v54 = vmul.f32 %v1753_v42, %v9874_v3  ;;  %v9888_v44 = vadd.f32 %v8045_v7, %v2092_v5  ;;  %v8051_v42 = vld [vmem:[%s8269_s18 + $0x1f8] sm:$0xff] }
 0x2a8   : > { %v9886_v48 = vadd.f32 %v8047_v30, %v2095_v9  ;;  %12269 = vst [vmem:[#allocation215_spill] sm:$0xff] %v9895_v13  ;;  %v9902_v9 = vmul.f32 0.9, %v8051_v42  ;;  %v8052_v30 = vld [vmem:[%s8269_s18 + $0x1e8] sm:$0xff]  ;;  %s6660_s18 = sshll.u32 %s414_s14, 9 }
 0x2a9   : > { %12267 = vst [vmem:[#allocation213_spill] sm:$0xff] %v9888_v44  ;;  %v9890_v50 = vadd.f32 %v8048_v27, %v2093_v54  ;;  %v7115_v58 = vpop.f32.mrb[220].mxu0  ;;  %v9908_v27 = vmul.f32 0.9, %v8052_v30  ;;  %s11355_s23 = scalar_lea.vmem [#allocation3], %s6660_s18  }
 0x2aa   : > { %12266 = vst [vmem:[#allocation212_spill] sm:$0xff] %v9886_v48  ;;  %v1774_v37 = vadd.f32 %v7115_v58, %v9117_v40  ;;  %v1765_v21 = vpop.f32.mrb[221].mxu0  ;;  %v2193_v0 = vpack.c.bf16 %v9886_v48, %v9895_v13 }
 0x2ab   : > { %12268 = vst [vmem:[#allocation214_spill] sm:$0xff] %v9890_v50  ;;  %v2192_v5 = vpack.c.bf16 %v9890_v50, %v9888_v44  ;;  %v1766_v54 = vadd.f32 %v1765_v21, %v9117_v40  ;;  %v7116_v7 = vpop.f32.mrb[222].mxu0 }
 0x2ac   : > { %v1777_v8 = vadd.f32 %v7116_v7, %v9117_v40  ;;  %v1768_v3 = vpop.f32.mrb[223].mxu0  ;;  %v2098_v50 = vmul.f32 %v1774_v37, %v9898_v43  ;;  %v7678_v37 = vld [vmem:[%s11856_s5 + $0x140] ss:$8 sps:$4 sm:$0xff]  }
 0x2ad   : > { %v2096_v58 = vmul.f32 %v1766_v54, %v9893_v52  ;;  %v1769_v31 = vadd.f32 %v1768_v3, %v9117_v40  ;;  %7177 = vmatprep.mubr.msk.bf16.mxu1 %vm688_vm0, %v2192_v5  ;;  %v7686_v5 = vld [vmem:[%s11856_s5 + $0x160] ss:$8 sps:$4 sm:$0xff]   ;;  %v7694_v54 = vld [vmem:[%s11856_s5 + $0x184] ss:$8 sps:$4 sm:$0xff]  }
 0x2ae   : > { %v2099_v21 = vmul.f32 %v1777_v8, %v9902_v9  ;;  %7178 = vmatmul.mubr.msk.bf16.gmra.mrb[152].mxu1 %vm688_vm0, %v2193_v0  ;;  %v9926_v48 = vadd.f32 %v8050_v61, %v2098_v50  ;;  %v7671_v50 = vld [vmem:[%s11856_s5 + $0x114] ss:$8 sps:$4 sm:$0xff]   ;;  %v7680_v61 = vld [vmem:[%s11856_s5 + $0x144] ss:$8 sps:$4 sm:$0xff]   ;;  %v7698_v0 = vld [vmem:[%s11856_s5 + $0x1a0] ss:$8 sps:$4 sm:$0xff]  }
 0x2af   : > { %v2097_v44 = vmul.f32 %v1769_v31, %v9908_v27  ;;  %v9922_v13 = vadd.f32 %v8049_v2, %v2096_v58  ;;  %v7666_v31 = vld [vmem:[%s11856_s5 + $0x100] ss:$8 sps:$4 sm:$0xff]   ;;  %v7700_v8 = vld [vmem:[%s11856_s5 + $0x1a4] ss:$8 sps:$4 sm:$0xff]  }
 0x2b0   : > { %v9920_v32 = vadd.f32 %v8051_v42, %v2099_v21  ;;  %v7672_v2 = vld [vmem:[%s11856_s5 + $0x120] ss:$8 sps:$4 sm:$0xff]   ;;  %v7688_v42 = vld [vmem:[%s11856_s5 + $0x164] ss:$8 sps:$4 sm:$0xff]  }
 0x2b1   : > { %v9924_v7 = vadd.f32 %v8052_v30, %v2097_v44  ;;  %v7669_v44 = vld [vmem:[%s11856_s5 + $0x110] ss:$8 sps:$4 sm:$0xff]   ;;  %v7692_v30 = vld [vmem:[%s11856_s5 + $0x180] ss:$8 sps:$4 sm:$0xff]  }
 0x2b2   : > { %v2195_v3 = vpack.c.bf16 %v9920_v32, %v9926_v48  ;;  %v12270_v58 = vld [vmem:[#allocation5_spill] sm:$0xff] }
 0x2b3   : > { %v2194_v40 = vpack.c.bf16 %v9924_v7, %v9922_v13  ;;  %v12273_v21 = vld [vmem:[#allocation9_spill] sm:$0xff] }
 0x2b5   : > { %7181 = vmatprep.mubr.msk.bf16.mxu1 %vm688_vm0, %v2194_v40  ;;  %v7701_v40 = vld [vmem:[%s11856_s5 + $0x1b0] ss:$8 sps:$4 sm:$0xff]  }
 0x2b6   : > { %7182 = vmatmul.mubr.msk.bf16.gmra.mrb[156].mxu1 %vm688_vm0, %v2195_v3  ;;  %v7703_v3 = vld [vmem:[%s11856_s5 + $0x1b4] ss:$8 sps:$4 sm:$0xff]  }
 0x2b7   : > { %3858 = vmatprep.mubr.bf16.mxu1 %v8591_v39  ;;  %v7674_v39 = vld [vmem:[%s11856_s5 + $0x124] ss:$8 sps:$4 sm:$0xff]  }
 0x2be   : > { %3859 = vmatmul.mubr.bf16.vlgmr.msra.gmra.mrb[160].mxu1 %v8589_v34  ;;  %v7677_v34 = vld [vmem:[%s11856_s5 + $0x134] ss:$8 sps:$4 sm:$0xff]  }
 0x2bf   : > { %3868 = vmatprep.mubr.bf16.mxu1 %v8605_v17  ;;  %4180 = vmatpush1.bf16.msra.mxu1 %v7666_v31  ;;  %v7675_v17 = vld [vmem:[%s11856_s5 + $0x130] ss:$8 sps:$4 sm:$0xff]   ;;  %v12274_v31 = vld [vmem:[#allocation8_spill] sm:$0xff] }
 0x2c0   : > { %4181 = vmatprep.subr.bf16.mxu1 %v7671_v50  ;;  %v12275_v50 = vld [vmem:[#allocation11_spill] sm:$0xff] }
 0x2c3   : > { %4182 = vmatpush1.bf16.msra.mxu1 %v7669_v44  ;;  %v12276_v44 = vld [vmem:[#allocation10_spill] sm:$0xff] }
 0x2c4   : > { %4183 = vmatprep.subr.bf16.mxu1 %v7674_v39  ;;  %v12277_v39 = vld [vmem:[#allocation13_spill] sm:$0xff] }
 0x2c6   : > { %3869 = vmatmul.mubr.bf16.gmra.mrb[164].mxu1 %v8603_v14  ;;  %v7683_v14 = vld [vmem:[%s11856_s5 + $0x154] ss:$8 sps:$4 sm:$0xff]  }
 0x2c7   : > { %3878 = vmatprep.mubr.bf16.mxu1 %v8616_v55  ;;  %4184 = vmatpush1.bf16.msra.mxu1 %v7672_v2  ;;  %v7681_v55 = vld [vmem:[%s11856_s5 + $0x150] ss:$8 sps:$4 sm:$0xff]   ;;  %v7704_v2 = vld [vmem:[%s11856_s5 + $0x1c0] ss:$8 sps:$4 sm:$0xff]  }
 0x2c8   : > { %4185 = vmatprep.subr.bf16.mxu1 %v7677_v34  ;;  %v7706_v34 = vld [vmem:[%s11856_s5 + $0x1c4] ss:$8 sps:$4 sm:$0xff]  }
 0x2cb   : > { %4186 = vmatpush1.bf16.msra.mxu1 %v7675_v17  ;;  %v12278_v17 = vld [vmem:[#allocation12_spill] sm:$0xff] }
 0x2cc   : > { %4187 = vmatprep.subr.bf16.mxu1 %v7680_v61  ;;  %v12279_v61 = vld [vmem:[#allocation15_spill] sm:$0xff] }
 0x2ce   : > { %3879 = vmatmul.mubr.bf16.gmra.mrb[168].mxu1 %v8614_v51  ;;  %v7691_v51 = vld [vmem:[%s11856_s5 + $0x174] ss:$8 sps:$4 sm:$0xff]  }
 0x2cf   : > { %3888 = vmatprep.mubr.bf16.mxu1 %v8627_v41  ;;  %4188 = vmatpush1.bf16.msra.mxu1 %v7678_v37  ;;  %v7689_v41 = vld [vmem:[%s11856_s5 + $0x170] ss:$8 sps:$4 sm:$0xff]  }
 0x2d0   : > { %4189 = vmatprep.subr.bf16.mxu1 %v7683_v14  ;;  %v12280_v37 = vld [vmem:[#allocation14_spill] sm:$0xff]  ;;  %v10035_v14 = vld [vmem:[%s11855_s4] ss:$0 sm:$0xff] }
 0x2d3   : > { %4190 = vmatpush1.bf16.msra.mxu1 %v7681_v55 }
 0x2d4   : > { %4191 = vmatprep.subr.bf16.mxu1 %v7688_v42 }
 0x2d6   : > { %3889 = vmatmul.mubr.bf16.gmra.mrb[172].mxu1 %v8625_v33  ;;  %v7697_v33 = vld [vmem:[%s11856_s5 + $0x194] ss:$8 sps:$4 sm:$0xff]  }
 0x2d7   : > { %3898 = vmatprep.mubr.bf16.mxu1 %v8638_v28  ;;  %4192 = vmatpush1.bf16.msra.mxu1 %v7686_v5  ;;  %v7695_v28 = vld [vmem:[%s11856_s5 + $0x190] ss:$8 sps:$4 sm:$0xff]  }
 0x2d8   : > { %4193 = vmatprep.subr.bf16.mxu1 %v7691_v51 }
 0x2db   : > { %4194 = vmatpush1.bf16.msra.mxu1 %v7689_v41 }
 0x2dc   : > { %4195 = vmatprep.subr.bf16.mxu1 %v7694_v54  ;;  %v7707_v54 = vld [vmem:[%s11856_s5 + $0x1d0] ss:$8 sps:$4 sm:$0xff]  }
 0x2de   : > { %3899 = vmatmul.mubr.bf16.gmra.mrb[176].mxu1 %v8636_v23  ;;  %v12271_v23 = vld [vmem:[#allocation7_spill] sm:$0xff] }
 0x2df   : > { %3908 = vmatprep.mubr.bf16.mxu1 %v8653_v36  ;;  %4196 = vmatpush1.bf16.msra.mxu1 %v7692_v30  ;;  %v12272_v36 = vld [vmem:[#allocation6_spill] sm:$0xff] }
 0x2e0   : > { %4197 = vmatprep.subr.bf16.mxu1 %v7697_v33 }
 0x2e3   : > { %4198 = vmatpush1.bf16.msra.mxu1 %v7695_v28 }
 0x2e4   : > { %4199 = vmatprep.subr.bf16.mxu1 %v7700_v8 }
 0x2e6   : > { %3909 = vmatmul.mubr.bf16.gmra.mrb[180].mxu1 %v12270_v58 }
 0x2e7   : > { %3918 = vmatprep.mubr.bf16.mxu1 %v12271_v23  ;;  %4200 = vmatpush1.bf16.msra.mxu1 %v7698_v0  ;;  %v12281_v23 = vld [vmem:[#allocation16_spill] sm:$0xff] }
 0x2e8   : > { %4201 = vmatprep.subr.bf16.mxu1 %v7703_v3 }
 0x2eb   : > { %4202 = vmatpush1.bf16.msra.mxu1 %v7701_v40 }
 0x2ec   : > { %4203 = vmatprep.subr.bf16.mxu1 %v7706_v34 }
 0x2ee   : > { %3919 = vmatmul.mubr.bf16.gmra.mrb[184].mxu1 %v12272_v36 }
 0x2ef   : > { %3928 = vmatprep.mubr.bf16.mxu1 %v12273_v21  ;;  %4204 = vmatpush1.bf16.msra.mxu1 %v7704_v2 }
 0x2f6   : > { %3929 = vmatmul.mubr.bf16.gmra.mrb[188].mxu1 %v12274_v31 }
 0x2f7   : > { %3938 = vmatprep.mubr.bf16.mxu1 %v12275_v50 }
 0x2fe   : > { %3939 = vmatmul.mubr.bf16.gmra.mrb[192].mxu1 %v12276_v44 }
 0x2ff   : > { %3948 = vmatprep.mubr.bf16.mxu1 %v12277_v39 }
 0x306   : > { %3949 = vmatmul.mubr.bf16.gmra.mrb[196].mxu1 %v12278_v17 }
 0x307   : > { %3958 = vmatprep.mubr.bf16.mxu1 %v12279_v61 }
 0x30e   : > { %3959 = vmatmul.mubr.bf16.gmra.mrb[200].mxu1 %v12280_v37 }
 0x30f   : > { %3968 = vmatprep.mubr.bf16.mxu1 %v8719_v18  ;;  %v7709_v18 = vld [vmem:[%s11856_s5 + $0x1d4] ss:$8 sps:$4 sm:$0xff]  }
 0x310   : > { %4205 = vmatprep.subr.bf16.mxu1 %v7709_v18 }
 0x311   : > { %v7123_v55 = vpop.f32.mrb[96].mxu1  ;;  %4206 = vmatpush1.bf16.msra.mxu1 %v7707_v54 }
 0x312   : > { %v2358_v42 = vadd.f32 %v7123_v55, %v10035_v14  ;;  %v2349_v5 = vpop.f32.mrb[97].mxu1  ;;  %v7710_v55 = vld [vmem:[%s11856_s5 + $0x1e0] ss:$8 sps:$4 sm:$0xff]  }
 0x313   : > { %v2350_v51 = vadd.f32 %v10035_v14, %v2349_v5  ;;  %v7124_v41 = vpop.f32.mrb[98].mxu1 }
 0x314   : > { %v2361_v30 = vadd.f32 %v7124_v41, %v10035_v14  ;;  %v2352_v33 = vpop.f32.mrb[99].mxu1  ;;  %v2606_v8 = vmul.f32 %v2358_v42, %v9122_v45  ;;  %v7712_v42 = vld [vmem:[%s11856_s5 + $0x1e4] ss:$8 sps:$4 sm:$0xff]  }
 0x315   : > { %v2604_v28 = vmul.f32 %v2350_v51, %v9129_v4  ;;  %v2353_v0 = vadd.f32 %v10035_v14, %v2352_v33  ;;  %4207 = vmatprep.subr.bf16.mxu1 %v7712_v42 }
 0x316   : > { %v2607_v58 = vmul.f32 %v2361_v30, %v9132_v1  ;;  %3969 = vmatmul.mubr.bf16.gmra.mrb[204].mxu1 %v12281_v23  ;;  %v10063_v50 = vadd.f32 %v2606_v8, %v9179_v35 }
 0x317   : > { %v2605_v36 = vmul.f32 %v2353_v0, %v9142_v22  ;;  %3978 = vmatprep.mubr.bf16.mxu1 %v8731_v24  ;;  %v10057_v40 = vadd.f32 %v2604_v28, %v9171_v26  ;;  %4208 = vmatpush1.bf16.msra.mxu1 %v7710_v55 }
 0x318   : > { %v10054_v21 = vadd.f32 %v2607_v58, %v9164_v6  ;;  %v12282_v58 = vld [vmem:[#allocation97_spill] sm:$0xff] }
 0x319   : > { %v10060_v3 = vadd.f32 %v2605_v36, %v9173_v60  ;;  %v7127_v31 = vpop.f32.mrb[100].mxu1  ;;  %v12283_v36 = vld [vmem:[#allocation99_spill] sm:$0xff] }
 0x31a   : > { %v2374_v44 = vadd.f32 %v7127_v31, %v10035_v14  ;;  %v2365_v39 = vpop.f32.mrb[101].mxu1  ;;  %v2733_v26 = vpack.c.bf16 %v10054_v21, %v10063_v50 }
 0x31b   : > { %v2732_v24 = vpack.c.bf16 %v10060_v3, %v10057_v40  ;;  %v2366_v2 = vadd.f32 %v10035_v14, %v2365_v39  ;;  %v7128_v6 = vpop.f32.mrb[102].mxu1  ;;  %v12285_v39 = vld [vmem:[#allocation100_spill] sm:$0xff] }
 0x31c   : > { %v2377_v34 = vadd.f32 %v7128_v6, %v10035_v14  ;;  %v2368_v60 = vpop.f32.mrb[103].mxu1  ;;  %v2610_v61 = vmul.f32 %v2374_v44, %v9154_v20  ;;  %v12284_v44 = vld [vmem:[#allocation17_spill] sm:$0xff] }
 0x31d   : > { %v2608_v17 = vmul.f32 %v2366_v2, %v9158_v59  ;;  %v2369_v35 = vadd.f32 %v10035_v14, %v2368_v60  ;;  %7189 = vmatprep.mubr.msk.bf16.mxu0 %vm688_vm0, %v2732_v24  ;;  %v12286_v2 = vld [vmem:[#allocation19_spill] sm:$0xff]  ;;  %v12287_v6 = vld [vmem:[#allocation105_spill] sm:$0xff] }
 0x31e   : > { %v2611_v37 = vmul.f32 %v2377_v34, %v9167_v16  ;;  %7190 = vmatmul.mubr.msk.bf16.vlgmr.msra.gmra.mrb[224].mxu0 %vm688_vm0, %v2733_v26  ;;  %3979 = vmatmul.mubr.bf16.gmra.mrb[208].mxu1 %v8729_v10  ;;  %v10097_v18 = vadd.f32 %v2610_v61, %v9237_v29  ;;  %v12288_v34 = vld [vmem:[#allocation107_spill] sm:$0xff] }
 0x31f   : > { %v2609_v5 = vmul.f32 %v2369_v35, %v9176_v46  ;;  %3988 = vmatprep.mubr.bf16.mxu1 %v8746_v15  ;;  %v10091_v41 = vadd.f32 %v2608_v17, %v9231_v12  ;;  %v12289_v17 = vld [vmem:[#allocation108_spill] sm:$0xff] }
 0x320   : > { %v10088_v51 = vadd.f32 %v2611_v37, %v9222_v11  ;;  %v12290_v37 = vld [vmem:[#allocation109_spill] sm:$0xff] }
 0x321   : > { %v10094_v10 = vadd.f32 %v2609_v5, %v9233_v56  ;;  %v7131_v54 = vpop.f32.mrb[104].mxu1 }
 0x322   : > { %v2390_v30 = vadd.f32 %v7131_v54, %v10035_v14  ;;  %v2381_v33 = vpop.f32.mrb[105].mxu1  ;;  %v2735_v12 = vpack.c.bf16 %v10088_v51, %v10097_v18 }
 0x323   : > { %v2734_v15 = vpack.c.bf16 %v10094_v10, %v10091_v41  ;;  %v2382_v11 = vadd.f32 %v10035_v14, %v2381_v33  ;;  %v7132_v28 = vpop.f32.mrb[106].mxu1 }
 0x324   : > { %v2393_v56 = vadd.f32 %v7132_v28, %v10035_v14  ;;  %v2384_v0 = vpop.f32.mrb[107].mxu1  ;;  %v2614_v23 = vmul.f32 %v2390_v30, %v12282_v58 }
 0x325   : > { %v2612_v8 = vmul.f32 %v2382_v11, %v9214_v19  ;;  %v2385_v29 = vadd.f32 %v10035_v14, %v2384_v0  ;;  %7193 = vmatprep.mubr.msk.bf16.mxu0 %vm688_vm0, %v2734_v15 }
 0x326   : > { %v2615_v31 = vmul.f32 %v2393_v56, %v12283_v36  ;;  %7194 = vmatmul.mubr.msk.bf16.gmra.mrb[228].mxu0 %vm688_vm0, %v2735_v12  ;;  %3989 = vmatmul.mubr.bf16.gmra.mrb[212].mxu1 %v12284_v44  ;;  %v10125_v55 = vadd.f32 %v2614_v23, %v12290_v37  ;;  %v12291_v12 = vld [vmem:[#allocation104_spill] sm:$0xff]  ;;  %v12293_v23 = vld [vmem:[#allocation106_spill] sm:$0xff] }
 0x327   : > { %v2613_v24 = vmul.f32 %v2385_v29, %v12285_v39  ;;  %3998 = vmatprep.mubr.bf16.mxu1 %v12286_v2  ;;  %v10119_v60 = vadd.f32 %v2612_v8, %v12288_v34  ;;  %v12292_v8 = vld [vmem:[#allocation102_spill] sm:$0xff] }
 0x328   : > { %v10116_v26 = vadd.f32 %v2615_v31, %v12287_v6  ;;  %v12294_v44 = vld [vmem:[#allocation18_spill] sm:$0xff] }
 0x329   : > { %v10122_v35 = vadd.f32 %v2613_v24, %v12289_v17  ;;  %v7135_v61 = vpop.f32.mrb[108].mxu1  ;;  %v7713_v24 = vld [vmem:[%s11856_s5 + $0x1f0] ss:$8 sps:$4 sm:$0xff]   ;;  %v7715_v2 = vld [vmem:[%s11856_s5 + $0x1f4] ss:$8 sps:$4 sm:$0xff]   ;;  %v12296_v17 = vld [vmem:[#allocation21_spill] sm:$0xff] }
 0x32a   : > { %v2406_v42 = vadd.f32 %v7135_v61, %v10035_v14  ;;  %v2397_v5 = vpop.f32.mrb[109].mxu1  ;;  %v2737_v15 = vpack.c.bf16 %v10116_v26, %v10125_v55  ;;  %v12295_v6 = vld [vmem:[#allocation110_spill] sm:$0xff]  ;;  %v12297_v61 = vld [vmem:[#allocation115_spill] sm:$0xff]  ;;  %4209 = vmatprep.subr.bf16.mxu1 %v7715_v2 }
 0x32b   : > { %v2736_v54 = vpack.c.bf16 %v10122_v35, %v10119_v60  ;;  %v2398_v30 = vadd.f32 %v10035_v14, %v2397_v5  ;;  %v7136_v33 = vpop.f32.mrb[110].mxu1  ;;  %4210 = vmatpush1.bf16.msra.mxu1 %v7713_v24 }
 0x32c   : > { %v2409_v11 = vadd.f32 %v7136_v33, %v10035_v14  ;;  %v2400_v28 = vpop.f32.mrb[111].mxu1  ;;  %v2618_v29 = vmul.f32 %v2406_v42, %v12292_v8  ;;  %v12299_v42 = vld [vmem:[#allocation117_spill] sm:$0xff] }
 0x32d   : > { %v2616_v56 = vmul.f32 %v2398_v30, %v12291_v12  ;;  %v2401_v0 = vadd.f32 %v10035_v14, %v2400_v28  ;;  %7197 = vmatprep.mubr.msk.bf16.mxu0 %vm688_vm0, %v2736_v54  ;;  %v12301_v54 = vld [vmem:[#allocation118_spill] sm:$0xff] }
 0x32e   : > { %v2619_v31 = vmul.f32 %v2409_v11, %v12293_v23  ;;  %7198 = vmatmul.mubr.msk.bf16.gmra.mrb[232].mxu0 %vm688_vm0, %v2737_v15  ;;  %3999 = vmatmul.mubr.bf16.gmra.mrb[216].mxu1 %v12294_v44  ;;  %v12303_v15 = vld [vmem:[#allocation119_spill] sm:$0xff] }
 0x32f   : > { %v2617_v34 = vmul.f32 %v2401_v0, %v12295_v6  ;;  %4008 = vmatprep.mubr.bf16.mxu1 %v12296_v17  ;;  %v10153_v5 = vadd.f32 %v2616_v56, %v12299_v42  ;;  %v10159_v11 = vadd.f32 %v2618_v29, %v12303_v15  ;;  %v12305_v42 = vld [vmem:[#allocation112_spill] sm:$0xff] }
 0x330   : > { %v10150_v37 = vadd.f32 %v2619_v31, %v12297_v61  ;;  %v12304_v61 = vld [vmem:[#allocation114_spill] sm:$0xff] }
 0x331   : > { %12300 = vst [vmem:[#allocation7_spill] sm:$0xff] %v10153_v5  ;;  %v10156_v30 = vadd.f32 %v2617_v34, %v12301_v54  ;;  %v7139_v33 = vpop.f32.mrb[112].mxu1 }
 0x332   : > { %12298 = vst [vmem:[#allocation5_spill] sm:$0xff] %v10150_v37  ;;  %v2422_v28 = vadd.f32 %v7139_v33, %v10035_v14  ;;  %v2413_v0 = vpop.f32.mrb[113].mxu1  ;;  %v2739_v56 = vpack.c.bf16 %v10150_v37, %v10159_v11  ;;  %v12306_v33 = vld [vmem:[#allocation116_spill] sm:$0xff]  ;;  %v12309_v37 = vld [vmem:[#allocation23_spill] sm:$0xff] }
 0x333   : > { %12302 = vst [vmem:[#allocation6_spill] sm:$0xff] %v10156_v30  ;;  %v2738_v44 = vpack.c.bf16 %v10156_v30, %v10153_v5  ;;  %v2414_v31 = vadd.f32 %v10035_v14, %v2413_v0  ;;  %v7140_v2 = vpop.f32.mrb[114].mxu1  ;;  %v12307_v0 = vld [vmem:[#allocation20_spill] sm:$0xff] }
 0x334   : > { %v2425_v34 = vadd.f32 %v7140_v2, %v10035_v14  ;;  %v2416_v17 = vpop.f32.mrb[115].mxu1  ;;  %v2622_v54 = vmul.f32 %v2422_v28, %v12305_v42  ;;  %v12308_v30 = vld [vmem:[#allocation120_spill] sm:$0xff]  ;;  %v12310_v2 = vld [vmem:[#allocation125_spill] sm:$0xff] }
 0x335   : > { %v2620_v24 = vmul.f32 %v2414_v31, %v12304_v61  ;;  %v2417_v29 = vadd.f32 %v10035_v14, %v2416_v17  ;;  %7201 = vmatprep.mubr.msk.bf16.mxu0 %vm688_vm0, %v2738_v44  ;;  %v12312_v31 = vld [vmem:[#allocation127_spill] sm:$0xff]  ;;  %v12314_v17 = vld [vmem:[#allocation128_spill] sm:$0xff]  ;;  %v12316_v42 = vld [vmem:[#allocation129_spill] sm:$0xff] }
 0x336   : > { %v2623_v15 = vmul.f32 %v2425_v34, %v12306_v33  ;;  %7202 = vmatmul.mubr.msk.bf16.gmra.mrb[236].mxu0 %vm688_vm0, %v2739_v56  ;;  %4009 = vmatmul.mubr.bf16.gmra.mrb[220].mxu1 %v12307_v0  ;;  %v10187_v34 = vadd.f32 %v2622_v54, %v12316_v42  ;;  %v12319_v54 = vld [vmem:[#allocation122_spill] sm:$0xff] }
 0x337   : > { %v2621_v5 = vmul.f32 %v2417_v29, %v12308_v30  ;;  %4018 = vmatprep.mubr.bf16.mxu1 %v12309_v37  ;;  %v10181_v61 = vadd.f32 %v2620_v24, %v12312_v31  ;;  %v12318_v31 = vld [vmem:[#allocation124_spill] sm:$0xff]  ;;  %v12320_v30 = vld [vmem:[#allocation126_spill] sm:$0xff] }
 0x338   : > { %v10178_v6 = vadd.f32 %v2623_v15, %v12310_v2  ;;  %12317 = vst [vmem:[#allocation10_spill] sm:$0xff] %v10187_v34 }
 0x339   : > { %12313 = vst [vmem:[#allocation8_spill] sm:$0xff] %v10181_v61  ;;  %v10184_v44 = vadd.f32 %v2621_v5, %v12314_v17  ;;  %v7143_v28 = vpop.f32.mrb[116].mxu1 }
 0x33a   : > { %12311 = vst [vmem:[#allocation9_spill] sm:$0xff] %v10178_v6  ;;  %v2438_v56 = vadd.f32 %v7143_v28, %v10035_v14  ;;  %v2429_v0 = vpop.f32.mrb[117].mxu1  ;;  %v2741_v24 = vpack.c.bf16 %v10178_v6, %v10187_v34  ;;  %v12323_v6 = vld [vmem:[#allocation25_spill] sm:$0xff] }
 0x33b   : > { %12315 = vst [vmem:[#allocation11_spill] sm:$0xff] %v10184_v44  ;;  %v2740_v29 = vpack.c.bf16 %v10184_v44, %v10181_v61  ;;  %v2430_v37 = vadd.f32 %v10035_v14, %v2429_v0  ;;  %v7144_v15 = vpop.f32.mrb[118].mxu1  ;;  %v12321_v0 = vld [vmem:[#allocation22_spill] sm:$0xff] }
 0x33c   : > { %v2441_v2 = vadd.f32 %v7144_v15, %v10035_v14  ;;  %v2432_v5 = vpop.f32.mrb[119].mxu1  ;;  %v2626_v28 = vmul.f32 %v2438_v56, %v12319_v54  ;;  %v12322_v44 = vld [vmem:[#allocation130_spill] sm:$0xff]  ;;  %v12324_v15 = vld [vmem:[#allocation135_spill] sm:$0xff] }
 0x33d   : > { %v2624_v17 = vmul.f32 %v2430_v37, %v12318_v31  ;;  %v2433_v42 = vadd.f32 %v10035_v14, %v2432_v5  ;;  %7205 = vmatprep.mubr.msk.bf16.mxu0 %vm688_vm0, %v2740_v29  ;;  %v12326_v37 = vld [vmem:[#allocation137_spill] sm:$0xff]  ;;  %v12328_v5 = vld [vmem:[#allocation138_spill] sm:$0xff]  ;;  %v12330_v54 = vld [vmem:[#allocation139_spill] sm:$0xff] }
 0x33e   : > { %v2627_v33 = vmul.f32 %v2441_v2, %v12320_v30  ;;  %7206 = vmatmul.mubr.msk.bf16.gmra.mrb[240].mxu0 %vm688_vm0, %v2741_v24  ;;  %4019 = vmatmul.mubr.bf16.gmra.mrb[224].mxu1 %v12321_v0  ;;  %v10215_v2 = vadd.f32 %v2626_v28, %v12330_v54  ;;  %v12333_v28 = vld [vmem:[#allocation132_spill] sm:$0xff] }
 0x33f   : > { %v2625_v61 = vmul.f32 %v2433_v42, %v12322_v44  ;;  %4028 = vmatprep.mubr.bf16.mxu1 %v12323_v6  ;;  %v10209_v31 = vadd.f32 %v2624_v17, %v12326_v37  ;;  %v12332_v37 = vld [vmem:[#allocation134_spill] sm:$0xff]  ;;  %v12334_v44 = vld [vmem:[#allocation136_spill] sm:$0xff] }
 0x340   : > { %v10206_v34 = vadd.f32 %v2627_v33, %v12324_v15  ;;  %12331 = vst [vmem:[#allocation14_spill] sm:$0xff] %v10215_v2 }
 0x341   : > { %12327 = vst [vmem:[#allocation12_spill] sm:$0xff] %v10209_v31  ;;  %v10212_v29 = vadd.f32 %v2625_v61, %v12328_v5  ;;  %v7147_v56 = vpop.f32.mrb[120].mxu1 }
 0x342   : > { %12325 = vst [vmem:[#allocation13_spill] sm:$0xff] %v10206_v34  ;;  %v2454_v24 = vadd.f32 %v7147_v56, %v10035_v14  ;;  %v2445_v0 = vpop.f32.mrb[121].mxu1  ;;  %v2743_v17 = vpack.c.bf16 %v10206_v34, %v10215_v2  ;;  %v12337_v34 = vld [vmem:[#allocation27_spill] sm:$0xff] }
 0x343   : > { %12329 = vst [vmem:[#allocation15_spill] sm:$0xff] %v10212_v29  ;;  %v2742_v42 = vpack.c.bf16 %v10212_v29, %v10209_v31  ;;  %v2446_v6 = vadd.f32 %v10035_v14, %v2445_v0  ;;  %v7148_v33 = vpop.f32.mrb[122].mxu1  ;;  %v12335_v0 = vld [vmem:[#allocation24_spill] sm:$0xff] }
 0x344   : > { %v2457_v15 = vadd.f32 %v7148_v33, %v10035_v14  ;;  %v2448_v61 = vpop.f32.mrb[123].mxu1  ;;  %v2630_v56 = vmul.f32 %v2454_v24, %v12333_v28  ;;  %v12336_v29 = vld [vmem:[#allocation140_spill] sm:$0xff]  ;;  %v12338_v33 = vld [vmem:[#allocation145_spill] sm:$0xff] }
 0x345   : > { %v2628_v5 = vmul.f32 %v2446_v6, %v12332_v37  ;;  %v2449_v54 = vadd.f32 %v10035_v14, %v2448_v61  ;;  %7209 = vmatprep.mubr.msk.bf16.mxu0 %vm688_vm0, %v2742_v42  ;;  %v12340_v6 = vld [vmem:[#allocation147_spill] sm:$0xff]  ;;  %v12342_v61 = vld [vmem:[#allocation148_spill] sm:$0xff]  ;;  %v12344_v28 = vld [vmem:[#allocation149_spill] sm:$0xff] }
 0x346   : > { %v2631_v30 = vmul.f32 %v2457_v15, %v12334_v44  ;;  %7210 = vmatmul.mubr.msk.bf16.gmra.mrb[244].mxu0 %vm688_vm0, %v2743_v17  ;;  %4029 = vmatmul.mubr.bf16.gmra.mrb[228].mxu1 %v12335_v0  ;;  %v10243_v15 = vadd.f32 %v2630_v56, %v12344_v28  ;;  %v12347_v56 = vld [vmem:[#allocation142_spill] sm:$0xff] }
 0x347   : > { %v2629_v31 = vmul.f32 %v2449_v54, %v12336_v29  ;;  %4038 = vmatprep.mubr.bf16.mxu1 %v12337_v34  ;;  %v10237_v37 = vadd.f32 %v2628_v5, %v12340_v6  ;;  %v12346_v6 = vld [vmem:[#allocation144_spill] sm:$0xff]  ;;  %v12348_v29 = vld [vmem:[#allocation146_spill] sm:$0xff] }
 0x348   : > { %v10234_v2 = vadd.f32 %v2631_v30, %v12338_v33  ;;  %12345 = vst [vmem:[#allocation17_spill] sm:$0xff] %v10243_v15 }
 0x349   : > { %12341 = vst [vmem:[#allocation97_spill] sm:$0xff] %v10237_v37  ;;  %v10240_v42 = vadd.f32 %v2629_v31, %v12342_v61  ;;  %v7151_v24 = vpop.f32.mrb[124].mxu1 }
 0x34a   : > { %12339 = vst [vmem:[#allocation16_spill] sm:$0xff] %v10234_v2  ;;  %v2470_v17 = vadd.f32 %v7151_v24, %v10035_v14  ;;  %v2461_v0 = vpop.f32.mrb[125].mxu1  ;;  %v2745_v5 = vpack.c.bf16 %v10234_v2, %v10243_v15  ;;  %v12351_v2 = vld [vmem:[#allocation29_spill] sm:$0xff] }
 0x34b   : > { %12343 = vst [vmem:[#allocation99_spill] sm:$0xff] %v10240_v42  ;;  %v2744_v54 = vpack.c.bf16 %v10240_v42, %v10237_v37  ;;  %v2462_v34 = vadd.f32 %v10035_v14, %v2461_v0  ;;  %v7152_v30 = vpop.f32.mrb[126].mxu1  ;;  %v12349_v0 = vld [vmem:[#allocation26_spill] sm:$0xff] }
 0x34c   : > { %v2473_v33 = vadd.f32 %v7152_v30, %v10035_v14  ;;  %v2464_v31 = vpop.f32.mrb[127].mxu1  ;;  %v2634_v24 = vmul.f32 %v2470_v17, %v12347_v56  ;;  %v12350_v42 = vld [vmem:[#allocation150_spill] sm:$0xff]  ;;  %v12352_v30 = vld [vmem:[#allocation155_spill] sm:$0xff] }
 0x34d   : > { %v2632_v61 = vmul.f32 %v2462_v34, %v12346_v6  ;;  %v2465_v28 = vadd.f32 %v10035_v14, %v2464_v31  ;;  %7213 = vmatprep.mubr.msk.bf16.mxu0 %vm688_vm0, %v2744_v54  ;;  %v12354_v34 = vld [vmem:[#allocation157_spill] sm:$0xff]  ;;  %v12356_v31 = vld [vmem:[#allocation158_spill] sm:$0xff]  ;;  %v12358_v56 = vld [vmem:[#allocation159_spill] sm:$0xff] }
 0x34e   : > { %v2635_v44 = vmul.f32 %v2473_v33, %v12348_v29  ;;  %7214 = vmatmul.mubr.msk.bf16.gmra.mrb[248].mxu0 %vm688_vm0, %v2745_v5  ;;  %4039 = vmatmul.mubr.bf16.gmra.mrb[232].mxu1 %v12349_v0  ;;  %v10271_v33 = vadd.f32 %v2634_v24, %v12358_v56  ;;  %v12360_v24 = vld [vmem:[#allocation152_spill] sm:$0xff] }
 0x34f   : > { %v2633_v37 = vmul.f32 %v2465_v28, %v12350_v42  ;;  %4048 = vmatprep.mubr.bf16.mxu1 %v12351_v2  ;;  %v10265_v6 = vadd.f32 %v2632_v61, %v12354_v34  ;;  %v12359_v34 = vld [vmem:[#allocation154_spill] sm:$0xff]  ;;  %v12361_v42 = vld [vmem:[#allocation156_spill] sm:$0xff] }
 0x350   : > { %v10262_v15 = vadd.f32 %v2635_v44, %v12352_v30 }
 0x351   : > { %12355 = vst [vmem:[#allocation19_spill] sm:$0xff] %v10265_v6  ;;  %v10268_v54 = vadd.f32 %v2633_v37, %v12356_v31  ;;  %v7155_v17 = vpop.f32.mrb[128].mxu1 }
 0x352   : > { %12353 = vst [vmem:[#allocation100_spill] sm:$0xff] %v10262_v15  ;;  %v2486_v5 = vadd.f32 %v7155_v17, %v10035_v14  ;;  %v2477_v0 = vpop.f32.mrb[129].mxu1  ;;  %v2747_v61 = vpack.c.bf16 %v10262_v15, %v10271_v33  ;;  %v12364_v15 = vld [vmem:[#allocation31_spill] sm:$0xff] }
 0x353   : > { %12357 = vst [vmem:[#allocation105_spill] sm:$0xff] %v10268_v54  ;;  %v2746_v28 = vpack.c.bf16 %v10268_v54, %v10265_v6  ;;  %v2478_v2 = vadd.f32 %v10035_v14, %v2477_v0  ;;  %v7156_v44 = vpop.f32.mrb[130].mxu1  ;;  %v12362_v0 = vld [vmem:[#allocation28_spill] sm:$0xff] }
 0x354   : > { %v2489_v30 = vadd.f32 %v7156_v44, %v10035_v14  ;;  %v2480_v37 = vpop.f32.mrb[131].mxu1  ;;  %v2638_v17 = vmul.f32 %v2486_v5, %v12360_v24  ;;  %v12363_v54 = vld [vmem:[#allocation160_spill] sm:$0xff] }
 0x355   : > { %v2636_v31 = vmul.f32 %v2478_v2, %v12359_v34  ;;  %v2481_v56 = vadd.f32 %v10035_v14, %v2480_v37  ;;  %7217 = vmatprep.mubr.msk.bf16.mxu0 %vm688_vm0, %v2746_v28  ;;  %v12366_v2 = vld [vmem:[#allocation166_spill] sm:$0xff]  ;;  %v12368_v37 = vld [vmem:[#allocation167_spill] sm:$0xff]  ;;  %v12370_v24 = vld [vmem:[#allocation168_spill] sm:$0xff] }
 0x356   : > { %v2639_v29 = vmul.f32 %v2489_v30, %v12361_v42  ;;  %7218 = vmatmul.mubr.msk.bf16.gmra.mrb[252].mxu0 %vm688_vm0, %v2747_v61  ;;  %4049 = vmatmul.mubr.bf16.gmra.mrb[236].mxu1 %v12362_v0  ;;  %v10299_v30 = vadd.f32 %v2638_v17, %v12370_v24  ;;  %v12373_v17 = vld [vmem:[#allocation162_spill] sm:$0xff] }
 0x357   : > { %v2637_v6 = vmul.f32 %v2481_v56, %v12363_v54  ;;  %4058 = vmatprep.mubr.bf16.mxu1 %v12364_v15  ;;  %v10293_v34 = vadd.f32 %v2636_v31, %v12366_v2  ;;  %v12372_v2 = vld [vmem:[#allocation164_spill] sm:$0xff]  ;;  %v12374_v54 = vld [vmem:[#allocation165_spill] sm:$0xff] }
 0x358   : > { %v10290_v44 = vadd.f32 %v2639_v29, %v9652_v25  ;;  %12371 = vst [vmem:[#allocation104_spill] sm:$0xff] %v10299_v30 }
 0x359   : > { %12367 = vst [vmem:[#allocation108_spill] sm:$0xff] %v10293_v34  ;;  %v10296_v28 = vadd.f32 %v2637_v6, %v12368_v37  ;;  %v7159_v5 = vpop.f32.mrb[132].mxu1 }
 0x35a   : > { %12365 = vst [vmem:[#allocation107_spill] sm:$0xff] %v10290_v44  ;;  %v2502_v61 = vadd.f32 %v7159_v5, %v10035_v14  ;;  %v2493_v0 = vpop.f32.mrb[133].mxu1  ;;  %v2749_v29 = vpack.c.bf16 %v10290_v44, %v10299_v30  ;;  %v12377_v44 = vld [vmem:[#allocation33_spill] sm:$0xff] }
 0x35b   : > { %12369 = vst [vmem:[#allocation109_spill] sm:$0xff] %v10296_v28  ;;  %v2748_v56 = vpack.c.bf16 %v10296_v28, %v10293_v34  ;;  %v2494_v15 = vadd.f32 %v10035_v14, %v2493_v0  ;;  %v7160_v25 = vpop.f32.mrb[134].mxu1  ;;  %v12375_v0 = vld [vmem:[#allocation30_spill] sm:$0xff]  ;;  %v12376_v28 = vld [vmem:[#allocation169_spill] sm:$0xff] }
 0x35c   : > { %v2505_v31 = vadd.f32 %v7160_v25, %v10035_v14  ;;  %v2496_v6 = vpop.f32.mrb[135].mxu1  ;;  %v2642_v5 = vmul.f32 %v2502_v61, %v12373_v17  ;;  %v12378_v25 = vld [vmem:[#allocation173_spill] sm:$0xff]  ;;  %v12384_v17 = vld [vmem:[#allocation178_spill] sm:$0xff] }
 0x35d   : > { %v2640_v37 = vmul.f32 %v2494_v15, %v12372_v2  ;;  %v2497_v24 = vadd.f32 %v10035_v14, %v2496_v6  ;;  %7221 = vmatprep.mubr.msk.bf16.mxu0 %vm688_vm0, %v2748_v56  ;;  %v12380_v15 = vld [vmem:[#allocation176_spill] sm:$0xff]  ;;  %v12382_v6 = vld [vmem:[#allocation177_spill] sm:$0xff] }
 0x35e   : > { %v2643_v42 = vmul.f32 %v2505_v31, %v12374_v54  ;;  %7222 = vmatmul.mubr.msk.bf16.gmra.mrb[0].mxu0 %vm688_vm0, %v2749_v29  ;;  %4059 = vmatmul.mubr.bf16.gmra.mrb[240].mxu1 %v12375_v0  ;;  %v10327_v31 = vadd.f32 %v2642_v5, %v12384_v17  ;;  %v12386_v5 = vld [vmem:[#allocation172_spill] sm:$0xff] }
 0x35f   : > { %v2641_v34 = vmul.f32 %v2497_v24, %v12376_v28  ;;  %4068 = vmatprep.mubr.bf16.mxu1 %v12377_v44  ;;  %v10321_v2 = vadd.f32 %v2640_v37, %v12380_v15  ;;  %v12385_v15 = vld [vmem:[#allocation174_spill] sm:$0xff]  ;;  %v12387_v28 = vld [vmem:[#allocation175_spill] sm:$0xff] }
 0x360   : > { %v10318_v30 = vadd.f32 %v2643_v42, %v12378_v25 }
 0x361   : > { %12381 = vst [vmem:[#allocation106_spill] sm:$0xff] %v10321_v2  ;;  %v10324_v56 = vadd.f32 %v2641_v34, %v12382_v6  ;;  %v7163_v61 = vpop.f32.mrb[136].mxu1 }
 0x362   : > { %12379 = vst [vmem:[#allocation102_spill] sm:$0xff] %v10318_v30  ;;  %v2518_v29 = vadd.f32 %v7163_v61, %v10035_v14  ;;  %v2509_v0 = vpop.f32.mrb[137].mxu1  ;;  %v2751_v37 = vpack.c.bf16 %v10318_v30, %v10327_v31  ;;  %v12390_v30 = vld [vmem:[#allocation35_spill] sm:$0xff] }
 0x363   : > { %12383 = vst [vmem:[#allocation18_spill] sm:$0xff] %v10324_v56  ;;  %v2750_v24 = vpack.c.bf16 %v10324_v56, %v10321_v2  ;;  %v2510_v44 = vadd.f32 %v10035_v14, %v2509_v0  ;;  %v7164_v42 = vpop.f32.mrb[138].mxu1  ;;  %v12388_v0 = vld [vmem:[#allocation32_spill] sm:$0xff]  ;;  %v12389_v56 = vld [vmem:[#allocation179_spill] sm:$0xff] }
 0x364   : > { %v2521_v25 = vadd.f32 %v7164_v42, %v10035_v14  ;;  %v2512_v34 = vpop.f32.mrb[139].mxu1  ;;  %v2646_v61 = vmul.f32 %v2518_v29, %v12386_v5 }
 0x365   : > { %v2644_v6 = vmul.f32 %v2510_v44, %v12385_v15  ;;  %v2513_v17 = vadd.f32 %v10035_v14, %v2512_v34  ;;  %7225 = vmatprep.mubr.msk.bf16.mxu0 %vm688_vm0, %v2750_v24 }
 0x366   : > { %v2647_v54 = vmul.f32 %v2521_v25, %v12387_v28  ;;  %7226 = vmatmul.mubr.msk.bf16.gmra.mrb[4].mxu0 %vm688_vm0, %v2751_v37  ;;  %4069 = vmatmul.mubr.bf16.gmra.mrb[244].mxu1 %v12388_v0  ;;  %v10355_v25 = vadd.f32 %v2646_v61, %v9753_v38  ;;  %v12393_v0 = vld [vmem:[#allocation34_spill] sm:$0xff] }
 0x367   : > { %v2645_v2 = vmul.f32 %v2513_v17, %v12389_v56  ;;  %4078 = vmatprep.mubr.bf16.mxu1 %v12390_v30  ;;  %v10349_v44 = vadd.f32 %v2644_v6, %v9748_v53 }
 0x368   : > { %v10346_v42 = vadd.f32 %v2647_v54, %v9739_v62 }
 0x369   : > { %v10352_v24 = vadd.f32 %v2645_v2, %v9750_v57  ;;  %v7167_v29 = vpop.f32.mrb[140].mxu1 }
 0x36a   : > { %12391 = vst [vmem:[#allocation21_spill] sm:$0xff] %v10346_v42  ;;  %v2534_v37 = vadd.f32 %v7167_v29, %v10035_v14  ;;  %v2525_v34 = vpop.f32.mrb[141].mxu1  ;;  %v2753_v53 = vpack.c.bf16 %v10346_v42, %v10355_v25  ;;  %v12394_v29 = vld [vmem:[#allocation185_spill] sm:$0xff] }
 0x36b   : > { %12392 = vst [vmem:[#allocation115_spill] sm:$0xff] %v10352_v24  ;;  %v2752_v17 = vpack.c.bf16 %v10352_v24, %v10349_v44  ;;  %v2526_v30 = vadd.f32 %v10035_v14, %v2525_v34  ;;  %v7168_v62 = vpop.f32.mrb[142].mxu1  ;;  %v12395_v24 = vld [vmem:[#allocation37_spill] sm:$0xff] }
 0x36c   : > { %v2537_v54 = vadd.f32 %v7168_v62, %v10035_v14  ;;  %v2528_v57 = vpop.f32.mrb[143].mxu1  ;;  %v2650_v6 = vmul.f32 %v2534_v37, %v9736_v49  ;;  %v12396_v62 = vld [vmem:[#allocation188_spill] sm:$0xff] }
 0x36d   : > { %v2648_v2 = vmul.f32 %v2526_v30, %v9742_v47  ;;  %v2529_v38 = vadd.f32 %v10035_v14, %v2528_v57  ;;  %7229 = vmatprep.mubr.msk.bf16.mxu0 %vm688_vm0, %v2752_v17  ;;  %v12398_v30 = vld [vmem:[#allocation189_spill] sm:$0xff]  ;;  %v12400_v57 = vld [vmem:[#allocation190_spill] sm:$0xff]  ;;  %v12402_v49 = vld [vmem:[#allocation192_spill] sm:$0xff] }
 0x36e   : > { %v2651_v61 = vmul.f32 %v2537_v54, %v9745_v63  ;;  %7230 = vmatmul.mubr.msk.bf16.gmra.mrb[8].mxu0 %vm688_vm0, %v2753_v53  ;;  %4079 = vmatmul.mubr.bf16.gmra.mrb[248].mxu1 %v12393_v0  ;;  %v10383_v54 = vadd.f32 %v2650_v6, %v12402_v49  ;;  %v12405_v6 = vld [vmem:[#allocation193_spill] sm:$0xff] }
 0x36f   : > { %v2649_v34 = vmul.f32 %v2529_v38, %v12394_v29  ;;  %4088 = vmatprep.mubr.bf16.mxu1 %v12395_v24  ;;  %v10377_v47 = vadd.f32 %v2648_v2, %v12398_v30  ;;  %v12404_v30 = vld [vmem:[#allocation191_spill] sm:$0xff]  ;;  %v12406_v29 = vld [vmem:[#allocation194_spill] sm:$0xff] }
 0x370   : > { %v10374_v42 = vadd.f32 %v2651_v61, %v12396_v62  ;;  %12403 = vst [vmem:[#allocation20_spill] sm:$0xff] %v10383_v54 }
 0x371   : > { %12399 = vst [vmem:[#allocation118_spill] sm:$0xff] %v10377_v47  ;;  %v10380_v17 = vadd.f32 %v2649_v34, %v12400_v57  ;;  %v7171_v37 = vpop.f32.mrb[144].mxu1 }
 0x372   : > { %12397 = vst [vmem:[#allocation117_spill] sm:$0xff] %v10374_v42  ;;  %v2550_v53 = vadd.f32 %v7171_v37, %v10035_v14  ;;  %v2541_v0 = vpop.f32.mrb[145].mxu1  ;;  %v2755_v2 = vpack.c.bf16 %v10374_v42, %v10383_v54  ;;  %v12409_v42 = vld [vmem:[#allocation39_spill] sm:$0xff] }
 0x373   : > { %12401 = vst [vmem:[#allocation119_spill] sm:$0xff] %v10380_v17  ;;  %v2754_v38 = vpack.c.bf16 %v10380_v17, %v10377_v47  ;;  %v2542_v24 = vadd.f32 %v10035_v14, %v2541_v0  ;;  %v7172_v61 = vpop.f32.mrb[146].mxu1  ;;  %v12407_v0 = vld [vmem:[#allocation36_spill] sm:$0xff]  ;;  %v12408_v17 = vld [vmem:[#allocation195_spill] sm:$0xff] }
 0x374   : > { %v2553_v62 = vadd.f32 %v7172_v61, %v10035_v14  ;;  %v2544_v34 = vpop.f32.mrb[147].mxu1  ;;  %v2654_v37 = vmul.f32 %v2550_v53, %v12405_v6  ;;  %v12410_v61 = vld [vmem:[#allocation196_spill] sm:$0xff] }
 0x375   : > { %v2652_v57 = vmul.f32 %v2542_v24, %v12404_v30  ;;  %v2545_v49 = vadd.f32 %v10035_v14, %v2544_v34  ;;  %7233 = vmatprep.mubr.msk.bf16.mxu0 %vm688_vm0, %v2754_v38  ;;  %v12412_v24 = vld [vmem:[#allocation197_spill] sm:$0xff]  ;;  %v12414_v34 = vld [vmem:[#allocation198_spill] sm:$0xff]  ;;  %v12416_v6 = vld [vmem:[#allocation200_spill] sm:$0xff] }
 0x376   : > { %v2655_v63 = vmul.f32 %v2553_v62, %v12406_v29  ;;  %7234 = vmatmul.mubr.msk.bf16.gmra.mrb[12].mxu0 %vm688_vm0, %v2755_v2  ;;  %4089 = vmatmul.mubr.bf16.gmra.mrb[252].mxu1 %v12407_v0  ;;  %v10411_v62 = vadd.f32 %v2654_v37, %v12416_v6  ;;  %v12419_v37 = vld [vmem:[#allocation201_spill] sm:$0xff] }
 0x377   : > { %v2653_v47 = vmul.f32 %v2545_v49, %v12408_v17  ;;  %4098 = vmatprep.mubr.bf16.mxu1 %v12409_v42  ;;  %v10405_v30 = vadd.f32 %v2652_v57, %v12412_v24  ;;  %v12418_v24 = vld [vmem:[#allocation199_spill] sm:$0xff]  ;;  %v12420_v17 = vld [vmem:[#allocation202_spill] sm:$0xff] }
 0x378   : > { %v10402_v54 = vadd.f32 %v2655_v63, %v12410_v61  ;;  %12417 = vst [vmem:[#allocation128_spill] sm:$0xff] %v10411_v62 }
 0x379   : > { %12413 = vst [vmem:[#allocation125_spill] sm:$0xff] %v10405_v30  ;;  %v10408_v38 = vadd.f32 %v2653_v47, %v12414_v34  ;;  %v7175_v53 = vpop.f32.mrb[148].mxu1 }
 0x37a   : > { %12411 = vst [vmem:[#allocation23_spill] sm:$0xff] %v10402_v54  ;;  %v2566_v2 = vadd.f32 %v7175_v53, %v10035_v14  ;;  %v2557_v0 = vpop.f32.mrb[149].mxu1  ;;  %v2757_v57 = vpack.c.bf16 %v10402_v54, %v10411_v62  ;;  %v12423_v54 = vld [vmem:[#allocation41_spill] sm:$0xff] }
 0x37b   : > { %12415 = vst [vmem:[#allocation127_spill] sm:$0xff] %v10408_v38  ;;  %v2756_v49 = vpack.c.bf16 %v10408_v38, %v10405_v30  ;;  %v2558_v42 = vadd.f32 %v10035_v14, %v2557_v0  ;;  %v7176_v63 = vpop.f32.mrb[150].mxu1  ;;  %v12421_v0 = vld [vmem:[#allocation38_spill] sm:$0xff]  ;;  %v12422_v38 = vld [vmem:[#allocation203_spill] sm:$0xff] }
 0x37c   : > { %v2569_v61 = vadd.f32 %v7176_v63, %v10035_v14  ;;  %v2560_v47 = vpop.f32.mrb[151].mxu1  ;;  %v2658_v53 = vmul.f32 %v2566_v2, %v12419_v37  ;;  %v12424_v63 = vld [vmem:[#allocation204_spill] sm:$0xff] }
 0x37d   : > { %v2656_v34 = vmul.f32 %v2558_v42, %v12418_v24  ;;  %v2561_v6 = vadd.f32 %v10035_v14, %v2560_v47  ;;  %7237 = vmatprep.mubr.msk.bf16.mxu0 %vm688_vm0, %v2756_v49  ;;  %v12426_v42 = vld [vmem:[#allocation205_spill] sm:$0xff]  ;;  %v12428_v47 = vld [vmem:[#allocation206_spill] sm:$0xff]  ;;  %v12430_v37 = vld [vmem:[#allocation208_spill] sm:$0xff] }
 0x37e   : > { %v2659_v29 = vmul.f32 %v2569_v61, %v12420_v17  ;;  %7238 = vmatmul.mubr.msk.bf16.gmra.mrb[16].mxu0 %vm688_vm0, %v2757_v57  ;;  %4099 = vmatmul.mubr.bf16.gmra.mrb[0].mxu1 %v12421_v0  ;;  %v10439_v61 = vadd.f32 %v2658_v53, %v12430_v37  ;;  %v12433_v53 = vld [vmem:[#allocation209_spill] sm:$0xff] }
 0x37f   : > { %v2657_v30 = vmul.f32 %v2561_v6, %v12422_v38  ;;  %4108 = vmatprep.mubr.bf16.mxu1 %v12423_v54  ;;  %v10433_v24 = vadd.f32 %v2656_v34, %v12426_v42  ;;  %v12432_v42 = vld [vmem:[#allocation207_spill] sm:$0xff]  ;;  %v12434_v38 = vld [vmem:[#allocation210_spill] sm:$0xff] }
 0x380   : > { %v10430_v62 = vadd.f32 %v2659_v29, %v12424_v63  ;;  %12431 = vst [vmem:[#allocation135_spill] sm:$0xff] %v10439_v61 }
 0x381   : > { %12427 = vst [vmem:[#allocation22_spill] sm:$0xff] %v10433_v24  ;;  %v10436_v49 = vadd.f32 %v2657_v30, %v12428_v47  ;;  %v7179_v2 = vpop.f32.mrb[152].mxu1 }
 0x382   : > { %12425 = vst [vmem:[#allocation129_spill] sm:$0xff] %v10430_v62  ;;  %v2582_v57 = vadd.f32 %v7179_v2, %v10035_v14  ;;  %v2573_v0 = vpop.f32.mrb[153].mxu1  ;;  %v2759_v34 = vpack.c.bf16 %v10430_v62, %v10439_v61  ;;  %v12437_v62 = vld [vmem:[#allocation43_spill] sm:$0xff] }
 0x383   : > { %12429 = vst [vmem:[#allocation25_spill] sm:$0xff] %v10436_v49  ;;  %v2758_v6 = vpack.c.bf16 %v10436_v49, %v10433_v24  ;;  %v2574_v54 = vadd.f32 %v10035_v14, %v2573_v0  ;;  %v7180_v29 = vpop.f32.mrb[154].mxu1  ;;  %v12435_v0 = vld [vmem:[#allocation40_spill] sm:$0xff]  ;;  %v12436_v49 = vld [vmem:[#allocation211_spill] sm:$0xff] }
 0x384   : > { %v2585_v63 = vadd.f32 %v7180_v29, %v10035_v14  ;;  %v2576_v30 = vpop.f32.mrb[155].mxu1  ;;  %v2662_v2 = vmul.f32 %v2582_v57, %v12433_v53  ;;  %v12438_v29 = vld [vmem:[#allocation212_spill] sm:$0xff]  ;;  %v12442_v53 = vld [vmem:[#allocation215_spill] sm:$0xff] }
 0x385   : > { %v2660_v47 = vmul.f32 %v2574_v54, %v12432_v42  ;;  %v2577_v37 = vadd.f32 %v10035_v14, %v2576_v30  ;;  %7241 = vmatprep.mubr.msk.bf16.mxu0 %vm688_vm0, %v2758_v6  ;;  %v12439_v54 = vld [vmem:[#allocation213_spill] sm:$0xff]  ;;  %v12440_v30 = vld [vmem:[#allocation214_spill] sm:$0xff] }
 0x386   : > { %v2663_v17 = vmul.f32 %v2585_v63, %v12434_v38  ;;  %7242 = vmatmul.mubr.msk.bf16.gmra.mrb[20].mxu0 %vm688_vm0, %v2759_v34  ;;  %4109 = vmatmul.mubr.bf16.gmra.mrb[4].mxu1 %v12435_v0  ;;  %v10467_v63 = vadd.f32 %v2662_v2, %v12442_v53 }
 0x387   : > { %v2661_v24 = vmul.f32 %v2577_v37, %v12436_v49  ;;  %4118 = vmatprep.mubr.bf16.mxu1 %v12437_v62  ;;  %v10461_v42 = vadd.f32 %v2660_v47, %v12439_v54 }
 0x388   : > { %v10458_v61 = vadd.f32 %v2663_v17, %v12438_v29 }
 0x389   : > { %v10464_v6 = vadd.f32 %v2661_v24, %v12440_v30  ;;  %v7183_v57 = vpop.f32.mrb[156].mxu1 }
 0x38a   : > { %v2598_v34 = vadd.f32 %v7183_v57, %v10035_v14  ;;  %v2589_v0 = vpop.f32.mrb[157].mxu1  ;;  %v2761_v47 = vpack.c.bf16 %v10458_v61, %v10467_v63  ;;  %v12443_v57 = vld [vmem:[#allocation42_spill] sm:$0xff] }
 0x38b   : > { %12441 = vst [vmem:[#allocation137_spill] sm:$0xff] %v10464_v6  ;;  %v2760_v37 = vpack.c.bf16 %v10464_v6, %v10461_v42  ;;  %v2590_v62 = vadd.f32 %v10035_v14, %v2589_v0  ;;  %v7184_v17 = vpop.f32.mrb[158].mxu1  ;;  %v12444_v6 = vld [vmem:[#allocation45_spill] sm:$0xff] }
 0x38c   : > { %v2601_v29 = vadd.f32 %v7184_v17, %v10035_v14  ;;  %v2592_v24 = vpop.f32.mrb[159].mxu1  ;;  %v2666_v2 = vmul.f32 %v2598_v34, %v9898_v43 }
 0x38d   : > { %v2664_v54 = vmul.f32 %v2590_v62, %v9893_v52  ;;  %v2593_v53 = vadd.f32 %v10035_v14, %v2592_v24  ;;  %7245 = vmatprep.mubr.msk.bf16.mxu0 %vm688_vm0, %v2760_v37  ;;  %v12450_v24 = vld [vmem:[#allocation50_spill] sm:$0xff] }
 0x38e   : > { %v2667_v30 = vmul.f32 %v2601_v29, %v9902_v9  ;;  %7246 = vmatmul.mubr.msk.bf16.gmra.mrb[24].mxu0 %vm688_vm0, %v2761_v47  ;;  %4119 = vmatmul.mubr.bf16.gmra.mrb[8].mxu1 %v12443_v57  ;;  %v10495_v34 = vadd.f32 %v2666_v2, %v9926_v48  ;;  %v7716_v48 = vld [vmem:[%s11858_s7] sm:$0xff]   ;;  %v12449_v29 = vmov 0   ;;  %v12452_v2 = vld [vmem:[#allocation54_spill] sm:$0xff] }
 0x38f   : > { %v2665_v0 = vmul.f32 %v2593_v53, %v9908_v27  ;;  %4128 = vmatprep.mubr.bf16.mxu1 %v12444_v6  ;;  %v10489_v62 = vadd.f32 %v2664_v54, %v9922_v13  ;;  %v12446_v13 = vld [vmem:[#allocation48_spill] sm:$0xff]  ;;  %v12447_v6 = vld [vmem:[#allocation46_spill] sm:$0xff]  ;;  %4860 = vmatpush1.bf16.msra.mxu0 %v7716_v48  ;;  %v7717_v53 = vld [vmem:[%s11858_s7 + $0x8] sm:$0xff]  }
 0x390   : > { %v10486_v17 = vadd.f32 %v2667_v30, %v9920_v32  ;;  %v12445_v32 = vld [vmem:[#allocation44_spill] sm:$0xff]  ;;  %4861 = vmatprep.subr.bf16.mxu0 %v12449_v29  ;;  %v7718_v57 = vld [vmem:[%s11858_s7 + $0x10] sm:$0xff]  }
 0x391   : > { %v10492_v14 = vadd.f32 %v2665_v0, %v9924_v7  ;;  %v12448_v7 = vld [vmem:[#allocation52_spill] sm:$0xff]  ;;  %v12454_v0 = vld [vmem:[#allocation58_spill] sm:$0xff] }
 0x392   : > { %v2763_v47 = vpack.c.bf16 %v10486_v17, %v10495_v34  ;;  %v12451_v54 = vld [vmem:[#allocation56_spill] sm:$0xff] }
 0x393   : > { %v2762_v37 = vpack.c.bf16 %v10492_v14, %v10489_v62  ;;  %4862 = vmatpush1.bf16.msra.mxu0 %v7717_v53  ;;  %v12453_v30 = vld [vmem:[#allocation60_spill] sm:$0xff] }
 0x394   : > { %4863 = vmatprep.subr.bf16.mxu0 %v12449_v29  ;;  %v12459_v48 = vld [vmem:[#allocation72_spill] sm:$0xff] }
 0x395   : > { %7249 = vmatprep.mubr.msk.bf16.mxu0 %vm688_vm0, %v2762_v37  ;;  %v12455_v37 = vld [vmem:[#allocation64_spill] sm:$0xff] }
 0x396   : > { %7250 = vmatmul.mubr.msk.bf16.gmra.mrb[28].mxu0 %vm688_vm0, %v2763_v47  ;;  %4129 = vmatmul.mubr.bf16.gmra.mrb[12].mxu1 %v12445_v32  ;;  %v7719_v47 = vld [vmem:[%s11858_s7 + $0x18] sm:$0xff]   ;;  %v12456_v32 = vld [vmem:[#allocation62_spill] sm:$0xff]  ;;  %v12461_v53 = vld [vmem:[#allocation76_spill] sm:$0xff] }
 0x397   : > { %4138 = vmatprep.mubr.bf16.mxu1 %v12446_v13  ;;  %4864 = vmatpush1.bf16.msra.mxu0 %v7718_v57  ;;  %v12457_v13 = vld [vmem:[#allocation68_spill] sm:$0xff]  ;;  %v12463_v57 = vld [vmem:[#allocation81_spill] sm:$0xff] }
 0x398   : > { %4865 = vmatprep.subr.bf16.mxu0 %v12449_v29 }
 0x39b   : > { %4866 = vmatpush1.bf16.msra.mxu0 %v7719_v47  ;;  %v12465_v47 = vld [vmem:[#allocation85_spill] sm:$0xff] }
 0x39c   : > { %4867 = vmatprep.subr.bf16.mxu0 %v12449_v29 }
 0x39e   : > { %4139 = vmatmul.mubr.bf16.gmra.mrb[16].mxu1 %v12447_v6  ;;  %v7720_v6 = vld [vmem:[%s11858_s7 + $0x20] sm:$0xff]  }
 0x39f   : > { %4148 = vmatprep.mubr.bf16.mxu1 %v12448_v7  ;;  %4868 = vmatpush1.bf16.msra.mxu0 %v7720_v6  ;;  %v12458_v7 = vld [vmem:[#allocation66_spill] sm:$0xff]  ;;  %v12467_v6 = vld [vmem:[#allocation89_spill] sm:$0xff] }
 0x3a0   : > { %4869 = vmatprep.subr.bf16.mxu0 %v12449_v29 }
 0x3a6   : > { %4149 = vmatmul.mubr.bf16.gmra.mrb[20].mxu1 %v12450_v24  ;;  %v7721_v24 = vld [vmem:[%s11858_s7 + $0x28] sm:$0xff]  }
 0x3a7   : > { %4158 = vmatprep.mubr.bf16.mxu1 %v12451_v54  ;;  %4870 = vmatpush1.bf16.msra.mxu0 %v7721_v24  ;;  %v12460_v54 = vld [vmem:[#allocation70_spill] sm:$0xff]  ;;  %v12469_v24 = vld [vmem:[#allocation93_spill] sm:$0xff] }
 0x3a8   : > { %4871 = vmatprep.subr.bf16.mxu0 %v12449_v29 }
 0x3ae   : > { %4159 = vmatmul.mubr.bf16.gmra.mrb[24].mxu1 %v12452_v2  ;;  %v7722_v2 = vld [vmem:[%s11858_s7 + $0x30] sm:$0xff]  }
 0x3af   : > { %4168 = vmatprep.mubr.bf16.mxu1 %v12453_v30  ;;  %4872 = vmatpush1.bf16.msra.mxu0 %v7722_v2  ;;  %v12462_v30 = vld [vmem:[#allocation74_spill] sm:$0xff] }
 0x3b0   : > { %4873 = vmatprep.subr.bf16.mxu0 %v12449_v29 }
 0x3b6   : > { %4169 = vmatmul.mubr.bf16.gmra.mrb[28].mxu1 %v12454_v0  ;;  %v7723_v0 = vld [vmem:[%s11858_s7 + $0x38] sm:$0xff]  }
 0x3b7   : > { %4211 = vmatprep.mubr.bf16.mxu1 %v12455_v37  ;;  %4874 = vmatpush1.bf16.msra.mxu0 %v7723_v0  ;;  %v12464_v37 = vld [vmem:[#allocation80_spill] sm:$0xff] }
 0x3b8   : > { %4875 = vmatprep.subr.bf16.mxu0 %v12449_v29 }
 0x3be   : > { %4212 = vmatmul.mubr.bf16.vlgmr.msra.gmra.mrb[160].mxu1 %v12456_v32  ;;  %v7724_v32 = vld [vmem:[%s11858_s7 + $0x40] sm:$0xff]  }
 0x3bf   : > { %4221 = vmatprep.mubr.bf16.mxu1 %v12457_v13  ;;  %4876 = vmatpush1.bf16.msra.mxu0 %v7724_v32  ;;  %v12466_v13 = vld [vmem:[#allocation84_spill] sm:$0xff] }
 0x3c0   : > { %4877 = vmatprep.subr.bf16.mxu0 %v12449_v29 }
 0x3c6   : > { %4222 = vmatmul.mubr.bf16.gmra.mrb[164].mxu1 %v12458_v7  ;;  %v7725_v7 = vld [vmem:[%s11858_s7 + $0x48] sm:$0xff]  }
 0x3c7   : > { %4231 = vmatprep.mubr.bf16.mxu1 %v12459_v48  ;;  %4878 = vmatpush1.bf16.msra.mxu0 %v7725_v7  ;;  %v12468_v48 = vld [vmem:[#allocation88_spill] sm:$0xff] }
 0x3c8   : > { %4879 = vmatprep.subr.bf16.mxu0 %v12449_v29 }
 0x3ce   : > { %4232 = vmatmul.mubr.bf16.gmra.mrb[168].mxu1 %v12460_v54  ;;  %v10570_v54 = vld [vmem:[%s11855_s4 + $0x1] ss:$0 sm:$0xff] }
 0x3cf   : > { %4241 = vmatprep.mubr.bf16.mxu1 %v12461_v53  ;;  %v7726_v53 = vld [vmem:[%s11858_s7 + $0x50] sm:$0xff]  }
 0x3d0   : > { %4880 = vmatpush1.bf16.msra.mxu0 %v7726_v53 }
 0x3d1   : > { %4881 = vmatprep.subr.bf16.mxu0 %v12449_v29 }
 0x3d6   : > { %4242 = vmatmul.mubr.bf16.gmra.mrb[172].mxu1 %v12462_v30 }
 0x3d7   : > { %4251 = vmatprep.mubr.bf16.mxu1 %v12463_v57 }
 0x3de   : > { %4252 = vmatmul.mubr.bf16.gmra.mrb[176].mxu1 %v12464_v37 }
 0x3df   : > { %4261 = vmatprep.mubr.bf16.mxu1 %v12465_v47 }
 0x3e6   : > { %4262 = vmatmul.mubr.bf16.gmra.mrb[180].mxu1 %v12466_v13 }
 0x3e7   : > { %4271 = vmatprep.mubr.bf16.mxu1 %v12467_v6  ;;  %v7727_v6 = vld [vmem:[%s11858_s7 + $0x58] sm:$0xff]  }
 0x3e8   : > { %4882 = vmatpush1.bf16.msra.mxu0 %v7727_v6 }
 0x3e9   : > { %4883 = vmatprep.subr.bf16.mxu0 %v12449_v29 }
 0x3ee   : > { %4272 = vmatmul.mubr.bf16.gmra.mrb[184].mxu1 %v12468_v48 }
 0x3ef   : > { %4281 = vmatprep.mubr.bf16.mxu1 %v12469_v24  ;;  %v10588_v24 = vld [vmem:[%s11860_s9] ss:$0 sm:$0xff] }
 0x3f1   : > { %v7191_v2 = vpop.f32.mrb[224].mxu0 }
 0x3f2   : > { %v2928_v30 = vadd.f32 %v7191_v2, %v10570_v54  ;;  %v2919_v57 = vpop.f32.mrb[225].mxu0  ;;  %v12470_v2 = vld [vmem:[#allocation92_spill] sm:$0xff] }
 0x3f3   : > { %v2920_v0 = vadd.f32 %v10570_v54, %v2919_v57  ;;  %v7192_v37 = vpop.f32.mrb[226].mxu0  ;;  %v12471_v57 = vld [vmem:[#allocation47_spill] sm:$0xff] }
 0x3f4   : > { %v3176_v47 = vmul.f32 %v2928_v30, %v9122_v45  ;;  %v2931_v32 = vadd.f32 %v7192_v37, %v10570_v54  ;;  %v2922_v13 = vpop.f32.mrb[227].mxu0 }
 0x3f5   : > { %v3174_v7 = vmul.f32 %v2920_v0, %v9129_v4  ;;  %v2923_v48 = vadd.f32 %v10570_v54, %v2922_v13 }
 0x3f6   : > { %v3177_v53 = vmul.f32 %v2931_v32, %v9132_v1  ;;  %4282 = vmatmul.mubr.bf16.gmra.mrb[188].mxu1 %v12470_v2  ;;  %v3240_v45 = vadd.f32 %v3176_v47, %v10063_v50  ;;  %v7728_v50 = vld [vmem:[%s11858_s7 + $0x60] sm:$0xff]  }
 0x3f7   : > { %v3175_v30 = vmul.f32 %v2923_v48, %v9142_v22  ;;  %4291 = vmatprep.mubr.bf16.mxu1 %v12471_v57  ;;  %v3238_v4 = vadd.f32 %v3174_v7, %v10057_v40  ;;  %4884 = vmatpush1.bf16.msra.mxu0 %v7728_v50 }
 0x3f8   : > { %v5221_v0 = vmul.f32 %v10588_v24, %v3240_v45  ;;  %v3241_v37 = vadd.f32 %v3177_v53, %v10054_v21  ;;  %4885 = vmatprep.subr.bf16.mxu0 %v12449_v29 }
 0x3f9   : > { %v7195_v13 = vpop.f32.mrb[228].mxu0  ;;  %v5219_v1 = vmul.f32 %v10588_v24, %v3238_v4  ;;  %v3239_v32 = vadd.f32 %v3175_v30, %v10060_v3 }
 0x3fa   : > { %v2944_v22 = vadd.f32 %v7195_v13, %v10570_v54  ;;  %v2935_v47 = vpop.f32.mrb[229].mxu0  ;;  %v5289_v40 = vsel %vm688_vm0, %v5221_v0, 0.0  ;;  %v5222_v6 = vmul.f32 %v10588_v24, %v3241_v37  ;;  %v12472_v0 = vld [vmem:[#allocation49_spill] sm:$0xff] }
 0x3fb   : > { %v2936_v7 = vadd.f32 %v10570_v54, %v2935_v47  ;;  %5290 = vadd.xlane.f32.xlu1 %v5289_v40  ;;  %v7196_v21 = vpop.f32.mrb[230].mxu0  ;;  %v5283_v48 = vsel %vm688_vm0, %v5219_v1, 0.0  ;;  %v5220_v53 = vmul.f32 %v10588_v24, %v3239_v32  ;;  %v12473_v1 = vld [vmem:[#allocation51_spill] sm:$0xff] }
 0x3fc   : > { %v3180_v3 = vmul.f32 %v2944_v22, %v9154_v20  ;;  %v2947_v2 = vadd.f32 %v7196_v21, %v10570_v54  ;;  %v2938_v45 = vpop.f32.mrb[231].mxu0  ;;  %5284 = vadd.xlane.f32.xlu0 %v5283_v48  ;;  %v5292_v37 = vsel %vm688_vm0, %v5222_v6, 0.0 }
 0x3fd   : > { %v3178_v30 = vmul.f32 %v2936_v7, %v9158_v59  ;;  %v2939_v57 = vadd.f32 %v10570_v54, %v2938_v45  ;;  %v5286_v32 = vsel %vm688_vm0, %v5220_v53, 0.0  ;;  %v7729_v59 = vld [vmem:[%s11858_s7 + $0x68] sm:$0xff]  }
 0x3fe   : > { %v3181_v4 = vmul.f32 %v2947_v2, %v9167_v16  ;;  %4292 = vmatmul.mubr.bf16.gmra.mrb[192].mxu1 %v12472_v0  ;;  %v3244_v13 = vadd.f32 %v3180_v3, %v10097_v18  ;;  %4886 = vmatpush1.bf16.msra.mxu0 %v7729_v59 }
 0x3ff   : > { %v3179_v20 = vmul.f32 %v2939_v57, %v9176_v46  ;;  %4301 = vmatprep.mubr.bf16.mxu1 %v12473_v1  ;;  %5293 = vadd.xlane.f32.xlu1 %v5292_v37  ;;  %v3242_v50 = vadd.f32 %v3178_v30, %v10091_v41  ;;  %v12475_v37 = vld [vmem:[#allocation55_spill] sm:$0xff] }
 0x400   : > { %5287 = vadd.xlane.f32.xlu0 %v5286_v32  ;;  %v5225_v16 = vmul.f32 %v10588_v24, %v3244_v13  ;;  %v3245_v22 = vadd.f32 %v3181_v4, %v10088_v51  ;;  %4887 = vmatprep.subr.bf16.mxu0 %v12449_v29  ;;  %v12474_v4 = vld [vmem:[#allocation53_spill] sm:$0xff] }
 0x401   : > { %v7199_v47 = vpop.f32.mrb[232].mxu0  ;;  %v3243_v18 = vadd.f32 %v3179_v20, %v10094_v10  ;;  %v5223_v48 = vmul.f32 %v10588_v24, %v3242_v50 }
 0x402   : > { %v2960_v46 = vadd.f32 %v7199_v47, %v10570_v54  ;;  %v2951_v40 = vpop.f32.mrb[233].mxu0  ;;  %v5301_v6 = vsel %vm688_vm0, %v5225_v16, 0.0  ;;  %v5226_v41 = vmul.f32 %v10588_v24, %v3245_v22 }
 0x403   : > { %v2952_v7 = vadd.f32 %v10570_v54, %v2951_v40  ;;  %v7200_v21 = vpop.f32.mrb[234].mxu0  ;;  %v5224_v2 = vmul.f32 %v10588_v24, %v3243_v18  ;;  %v5295_v13 = vsel %vm688_vm0, %v5223_v48, 0.0 }
 0x404   : > { %v3184_v51 = vmul.f32 %v2960_v46, %v12282_v58  ;;  %v2963_v53 = vadd.f32 %v7200_v21, %v10570_v54  ;;  %v2954_v10 = vpop.f32.mrb[235].mxu0  ;;  %5302 = vadd.xlane.f32.xlu0 %v5301_v6  ;;  %v5304_v3 = vsel %vm688_vm0, %v5226_v41, 0.0  ;;  %v7730_v6 = vld [vmem:[%s11858_s7 + $0x70] sm:$0xff]  }
 0x405   : > { %v3182_v45 = vmul.f32 %v2952_v7, %v9214_v19  ;;  %v2955_v30 = vadd.f32 %v10570_v54, %v2954_v10  ;;  %5305 = vadd.xlane.f32.xlu1 %v5304_v3  ;;  %v5298_v19 = vsel %vm688_vm0, %v5224_v2, 0.0  ;;  %4888 = vmatpush1.bf16.msra.mxu0 %v7730_v6  ;;  %v12478_v10 = vld [vmem:[#allocation59_spill] sm:$0xff] }
 0x406   : > { %v3185_v57 = vmul.f32 %v2963_v53, %v12283_v36  ;;  %4302 = vmatmul.mubr.bf16.gmra.mrb[196].mxu1 %v12474_v4  ;;  %v3248_v0 = vadd.f32 %v3184_v51, %v10125_v55  ;;  %v12477_v51 = vld [vmem:[#allocation110_spill] sm:$0xff]  ;;  %v12479_v2 = vld [vmem:[#allocation7_spill] sm:$0xff]  ;;  %4889 = vmatprep.subr.bf16.mxu0 %v12449_v29 }
 0x407   : > { %v3183_v58 = vmul.f32 %v2955_v30, %v12285_v39  ;;  %4311 = vmatprep.mubr.bf16.mxu1 %v12475_v37  ;;  %v3246_v20 = vadd.f32 %v3182_v45, %v10119_v60  ;;  %v12480_v30 = vld [vmem:[#allocation5_spill] sm:$0xff] }
 0x408   : > { %5296 = vadd.xlane.f32.xlu0 %v5295_v13  ;;  %v5229_v1 = vmul.f32 %v10588_v24, %v3248_v0  ;;  %v3249_v32 = vadd.f32 %v3185_v57, %v10116_v26 }
 0x409   : > { %v7203_v36 = vpop.f32.mrb[236].mxu0  ;;  %5299 = vadd.xlane.f32.xlu1 %v5298_v19  ;;  %v3247_v50 = vadd.f32 %v3183_v58, %v10122_v35  ;;  %v5227_v47 = vmul.f32 %v10588_v24, %v3246_v20 }
 0x40a   : > { %v2976_v55 = vadd.f32 %v7203_v36, %v10570_v54  ;;  %v2967_v39 = vpop.f32.mrb[237].mxu0  ;;  %v5313_v59 = vsel %vm688_vm0, %v5229_v1, 0.0  ;;  %v5230_v16 = vmul.f32 %v10588_v24, %v3249_v32  ;;  %v12482_v32 = vld [vmem:[#allocation112_spill] sm:$0xff] }
 0x40b   : > { %v2968_v60 = vadd.f32 %v10570_v54, %v2967_v39  ;;  %v7204_v22 = vpop.f32.mrb[238].mxu0  ;;  %v5228_v40 = vmul.f32 %v10588_v24, %v3247_v50  ;;  %v5307_v3 = vsel %vm688_vm0, %v5227_v47, 0.0  ;;  %v12484_v47 = vld [vmem:[#allocation116_spill] sm:$0xff] }
 0x40c   : > { %v3188_v18 = vmul.f32 %v2976_v55, %v12292_v8  ;;  %v2979_v26 = vadd.f32 %v7204_v22, %v10570_v54  ;;  %v2970_v46 = vpop.f32.mrb[239].mxu0  ;;  %5314 = vadd.xlane.f32.xlu0 %v5313_v59  ;;  %v5316_v35 = vsel %vm688_vm0, %v5230_v16, 0.0  ;;  %v12476_v8 = vld [vmem:[#allocation57_spill] sm:$0xff]  ;;  %v12483_v16 = vld [vmem:[#allocation114_spill] sm:$0xff] }
 0x40d   : > { %v3186_v41 = vmul.f32 %v2968_v60, %v12291_v12  ;;  %v2971_v7 = vadd.f32 %v10570_v54, %v2970_v46  ;;  %5317 = vadd.xlane.f32.xlu1 %v5316_v35  ;;  %v5310_v12 = vsel %vm688_vm0, %v5228_v40, 0.0  ;;  %v12486_v46 = vld [vmem:[#allocation10_spill] sm:$0xff]  ;;  %v12487_v40 = vld [vmem:[#allocation120_spill] sm:$0xff] }
 0x40e   : > { %v3189_v21 = vmul.f32 %v2979_v26, %v12293_v23  ;;  %4312 = vmatmul.mubr.bf16.gmra.mrb[200].mxu1 %v12476_v8  ;;  %v3252_v48 = vadd.f32 %v3188_v18, %v10159_v11  ;;  %v12481_v11 = vld [vmem:[#allocation6_spill] sm:$0xff]  ;;  %v12485_v26 = vld [vmem:[#allocation61_spill] sm:$0xff] }
 0x40f   : > { %v3187_v53 = vmul.f32 %v2971_v7, %v12477_v51  ;;  %4321 = vmatprep.mubr.bf16.mxu1 %v12478_v10  ;;  %v3250_v45 = vadd.f32 %v3186_v41, %v12479_v2  ;;  %v12488_v41 = vld [vmem:[#allocation63_spill] sm:$0xff]  ;;  %v12490_v10 = vld [vmem:[#allocation9_spill] sm:$0xff] }
 0x410   : > { %5308 = vadd.xlane.f32.xlu0 %v5307_v3  ;;  %v5233_v23 = vmul.f32 %v10588_v24, %v3252_v48  ;;  %v3253_v57 = vadd.f32 %v3189_v21, %v12480_v30  ;;  %v12489_v21 = vld [vmem:[#allocation8_spill] sm:$0xff]  ;;  %v7731_v48 = vld [vmem:[%s11858_s7 + $0x78] sm:$0xff]  }
 0x411   : > { %v7207_v4 = vpop.f32.mrb[240].mxu0  ;;  %5311 = vadd.xlane.f32.xlu1 %v5310_v12  ;;  %v3251_v0 = vadd.f32 %v3187_v53, %v12481_v11  ;;  %v5231_v1 = vmul.f32 %v10588_v24, %v3250_v45  ;;  %v12491_v45 = vld [vmem:[#allocation11_spill] sm:$0xff]  ;;  %4890 = vmatpush1.bf16.msra.mxu0 %v7731_v48 }
 0x412   : > { %v2992_v58 = vadd.f32 %v7207_v4, %v10570_v54  ;;  %v2983_v37 = vpop.f32.mrb[241].mxu0  ;;  %v5325_v13 = vsel %vm688_vm0, %v5233_v23, 0.0  ;;  %v5234_v20 = vmul.f32 %v10588_v24, %v3253_v57 }
 0x413   : > { %v2984_v29 = vadd.f32 %v10570_v54, %v2983_v37  ;;  %v7208_v19 = vpop.f32.mrb[242].mxu0  ;;  %v5232_v59 = vmul.f32 %v10588_v24, %v3251_v0  ;;  %v5319_v7 = vsel %vm688_vm0, %v5231_v1, 0.0  ;;  %v12492_v37 = vld [vmem:[#allocation122_spill] sm:$0xff] }
 0x414   : > { %v3192_v36 = vmul.f32 %v2992_v58, %v12482_v32  ;;  %v2995_v50 = vadd.f32 %v7208_v19, %v10570_v54  ;;  %v2986_v55 = vpop.f32.mrb[243].mxu0  ;;  %5326 = vadd.xlane.f32.xlu0 %v5325_v13  ;;  %v5328_v39 = vsel %vm688_vm0, %v5234_v20, 0.0  ;;  %v12493_v32 = vld [vmem:[#allocation124_spill] sm:$0xff] }
 0x415   : > { %v3190_v60 = vmul.f32 %v2984_v29, %v12483_v16  ;;  %v2987_v22 = vadd.f32 %v10570_v54, %v2986_v55  ;;  %5329 = vadd.xlane.f32.xlu1 %v5328_v39  ;;  %v5322_v51 = vsel %vm688_vm0, %v5232_v59, 0.0  ;;  %v12494_v55 = vld [vmem:[#allocation126_spill] sm:$0xff]  ;;  %v12495_v59 = vld [vmem:[#allocation65_spill] sm:$0xff] }
 0x416   : > { %v3193_v18 = vmul.f32 %v2995_v50, %v12484_v47  ;;  %4322 = vmatmul.mubr.bf16.gmra.mrb[204].mxu1 %v12485_v26  ;;  %v3256_v35 = vadd.f32 %v3192_v36, %v12486_v46  ;;  %v12496_v16 = vld [vmem:[#allocation14_spill] sm:$0xff]  ;;  %v12499_v46 = vld [vmem:[#allocation12_spill] sm:$0xff] }
 0x417   : > { %v3191_v6 = vmul.f32 %v2987_v22, %v12487_v40  ;;  %4331 = vmatprep.mubr.bf16.mxu1 %v12488_v41  ;;  %v3254_v8 = vadd.f32 %v3190_v60, %v12489_v21  ;;  %v12497_v22 = vld [vmem:[#allocation130_spill] sm:$0xff]  ;;  %v12500_v41 = vld [vmem:[#allocation13_spill] sm:$0xff] }
 0x418   : > { %5320 = vadd.xlane.f32.xlu0 %v5319_v7  ;;  %v5237_v53 = vmul.f32 %v10588_v24, %v3256_v35  ;;  %v3257_v3 = vadd.f32 %v3193_v18, %v12490_v10  ;;  %v12498_v18 = vld [vmem:[#allocation67_spill] sm:$0xff] }
 0x419   : > { %v7211_v2 = vpop.f32.mrb[244].mxu0  ;;  %5323 = vadd.xlane.f32.xlu1 %v5322_v51  ;;  %v3255_v12 = vadd.f32 %v3191_v6, %v12491_v45  ;;  %v5235_v58 = vmul.f32 %v10588_v24, %v3254_v8  ;;  %v12501_v8 = vld [vmem:[#allocation15_spill] sm:$0xff] }
 0x41a   : > { %v3008_v23 = vadd.f32 %v7211_v2, %v10570_v54  ;;  %v2999_v30 = vpop.f32.mrb[245].mxu0  ;;  %v5337_v57 = vsel %vm688_vm0, %v5237_v53, 0.0  ;;  %v5238_v4 = vmul.f32 %v10588_v24, %v3257_v3 }
 0x41b   : > { %v3000_v11 = vadd.f32 %v10570_v54, %v2999_v30  ;;  %v7212_v0 = vpop.f32.mrb[246].mxu0  ;;  %v5236_v1 = vmul.f32 %v10588_v24, %v3255_v12  ;;  %v5331_v26 = vsel %vm688_vm0, %v5235_v58, 0.0  ;;  %v12503_v58 = vld [vmem:[#allocation134_spill] sm:$0xff] }
 0x41c   : > { %v3196_v13 = vmul.f32 %v3008_v23, %v12492_v37  ;;  %v3011_v20 = vadd.f32 %v7212_v0, %v10570_v54  ;;  %v3002_v29 = vpop.f32.mrb[247].mxu0  ;;  %5338 = vadd.xlane.f32.xlu0 %v5337_v57  ;;  %v5340_v19 = vsel %vm688_vm0, %v5238_v4, 0.0  ;;  %v12502_v23 = vld [vmem:[#allocation132_spill] sm:$0xff] }
 0x41d   : > { %v3194_v36 = vmul.f32 %v3000_v11, %v12493_v32  ;;  %v3003_v50 = vadd.f32 %v10570_v54, %v3002_v29  ;;  %5341 = vadd.xlane.f32.xlu1 %v5340_v19  ;;  %v5334_v40 = vsel %vm688_vm0, %v5236_v1, 0.0  ;;  %v12505_v19 = vld [vmem:[#allocation69_spill] sm:$0xff] }
 0x41e   : > { %v3197_v39 = vmul.f32 %v3011_v20, %v12494_v55  ;;  %4332 = vmatmul.mubr.bf16.gmra.mrb[208].mxu1 %v12495_v59  ;;  %v3260_v60 = vadd.f32 %v3196_v13, %v12496_v16  ;;  %v12504_v20 = vld [vmem:[#allocation136_spill] sm:$0xff]  ;;  %v12506_v1 = vld [vmem:[#allocation17_spill] sm:$0xff]  ;;  %v12508_v55 = vld [vmem:[#allocation71_spill] sm:$0xff] }
 0x41f   : > { %v3195_v47 = vmul.f32 %v3003_v50, %v12497_v22  ;;  %4341 = vmatprep.mubr.bf16.mxu1 %v12498_v18  ;;  %v3258_v35 = vadd.f32 %v3194_v36, %v12499_v46  ;;  %v12507_v36 = vld [vmem:[#allocation140_spill] sm:$0xff]  ;;  %v12509_v59 = vld [vmem:[#allocation97_spill] sm:$0xff]  ;;  %v12511_v46 = vld [vmem:[#allocation99_spill] sm:$0xff] }
 0x420   : > { %5332 = vadd.xlane.f32.xlu0 %v5331_v26  ;;  %v5241_v6 = vmul.f32 %v10588_v24, %v3260_v60  ;;  %v3261_v7 = vadd.f32 %v3197_v39, %v12500_v41 }
 0x421   : > { %v7215_v21 = vpop.f32.mrb[248].mxu0  ;;  %5335 = vadd.xlane.f32.xlu1 %v5334_v40  ;;  %v3259_v48 = vadd.f32 %v3195_v47, %v12501_v8  ;;  %v5239_v12 = vmul.f32 %v10588_v24, %v3258_v35  ;;  %v12510_v47 = vld [vmem:[#allocation16_spill] sm:$0xff] }
 0x422   : > { %v3024_v51 = vadd.f32 %v7215_v21, %v10570_v54  ;;  %v3015_v53 = vpop.f32.mrb[249].mxu0  ;;  %v5349_v10 = vsel %vm688_vm0, %v5241_v6, 0.0  ;;  %v5242_v3 = vmul.f32 %v10588_v24, %v3261_v7 }
 0x423   : > { %v3016_v2 = vadd.f32 %v10570_v54, %v3015_v53  ;;  %v7216_v45 = vpop.f32.mrb[250].mxu0  ;;  %v5240_v0 = vmul.f32 %v10588_v24, %v3259_v48  ;;  %v5343_v39 = vsel %vm688_vm0, %v5239_v12, 0.0  ;;  %v12513_v12 = vld [vmem:[#allocation144_spill] sm:$0xff] }
 0x424   : > { %v3200_v30 = vmul.f32 %v3024_v51, %v12502_v23  ;;  %v3027_v57 = vadd.f32 %v7216_v45, %v10570_v54  ;;  %v3018_v4 = vpop.f32.mrb[251].mxu0  ;;  %5350 = vadd.xlane.f32.xlu0 %v5349_v10  ;;  %v5352_v11 = vsel %vm688_vm0, %v5242_v3, 0.0  ;;  %v12512_v51 = vld [vmem:[#allocation142_spill] sm:$0xff] }
 0x425   : > { %v3198_v37 = vmul.f32 %v3016_v2, %v12503_v58  ;;  %v3019_v13 = vadd.f32 %v10570_v54, %v3018_v4  ;;  %5353 = vadd.xlane.f32.xlu1 %v5352_v11  ;;  %v5346_v60 = vsel %vm688_vm0, %v5240_v0, 0.0  ;;  %v12515_v11 = vld [vmem:[#allocation73_spill] sm:$0xff]  ;;  %v12516_v58 = vld [vmem:[#allocation150_spill] sm:$0xff] }
 0x426   : > { %v3201_v29 = vmul.f32 %v3027_v57, %v12504_v20  ;;  %4342 = vmatmul.mubr.bf16.gmra.mrb[212].mxu1 %v12505_v19  ;;  %v3264_v32 = vadd.f32 %v3200_v30, %v12506_v1  ;;  %v12514_v57 = vld [vmem:[#allocation146_spill] sm:$0xff] }
 0x427   : > { %v3199_v50 = vmul.f32 %v3019_v13, %v12507_v36  ;;  %4351 = vmatprep.mubr.bf16.mxu1 %v12508_v55  ;;  %v3262_v16 = vadd.f32 %v3198_v37, %v12509_v59  ;;  %v12517_v13 = vld [vmem:[#allocation75_spill] sm:$0xff]  ;;  %v12519_v36 = vld [vmem:[#allocation100_spill] sm:$0xff] }
 0x428   : > { %5344 = vadd.xlane.f32.xlu0 %v5343_v39  ;;  %v5245_v22 = vmul.f32 %v10588_v24, %v3264_v32  ;;  %v3265_v18 = vadd.f32 %v3201_v29, %v12510_v47  ;;  %v12518_v29 = vld [vmem:[#allocation19_spill] sm:$0xff]  ;;  %v12520_v39 = vld [vmem:[#allocation105_spill] sm:$0xff] }
 0x429   : > { %v7219_v26 = vpop.f32.mrb[252].mxu0  ;;  %5347 = vadd.xlane.f32.xlu1 %v5346_v60  ;;  %v3263_v35 = vadd.f32 %v3199_v50, %v12511_v46  ;;  %v5243_v48 = vmul.f32 %v10588_v24, %v3262_v16  ;;  %v12521_v46 = vld [vmem:[#allocation152_spill] sm:$0xff] }
 0x42a   : > { %v3040_v40 = vadd.f32 %v7219_v26, %v10570_v54  ;;  %v3031_v6 = vpop.f32.mrb[253].mxu0  ;;  %v5361_v41 = vsel %vm688_vm0, %v5245_v22, 0.0  ;;  %v5246_v7 = vmul.f32 %v10588_v24, %v3265_v18 }
 0x42b   : > { %v3032_v21 = vadd.f32 %v10570_v54, %v3031_v6  ;;  %v7220_v8 = vpop.f32.mrb[254].mxu0  ;;  %v5244_v45 = vmul.f32 %v10588_v24, %v3263_v35  ;;  %v5355_v20 = vsel %vm688_vm0, %v5243_v48, 0.0 }
 0x42c   : > { %v3204_v53 = vmul.f32 %v3040_v40, %v12512_v51  ;;  %v3043_v10 = vadd.f32 %v7220_v8, %v10570_v54  ;;  %v3034_v3 = vpop.f32.mrb[255].mxu0  ;;  %5362 = vadd.xlane.f32.xlu0 %v5361_v41  ;;  %v5364_v2 = vsel %vm688_vm0, %v5246_v7, 0.0  ;;  %v12523_v51 = vld [vmem:[#allocation156_spill] sm:$0xff] }
 0x42d   : > { %v3202_v23 = vmul.f32 %v3032_v21, %v12513_v12  ;;  %v3035_v30 = vadd.f32 %v10570_v54, %v3034_v3  ;;  %5365 = vadd.xlane.f32.xlu1 %v5364_v2  ;;  %v5358_v1 = vsel %vm688_vm0, %v5244_v45, 0.0  ;;  %v12522_v21 = vld [vmem:[#allocation154_spill] sm:$0xff]  ;;  %v12525_v3 = vld [vmem:[#allocation104_spill] sm:$0xff] }
 0x42e   : > { %v3205_v4 = vmul.f32 %v3043_v10, %v12514_v57  ;;  %4352 = vmatmul.mubr.bf16.gmra.mrb[216].mxu1 %v12515_v11  ;;  %v3268_v0 = vadd.f32 %v3204_v53, %v10271_v33  ;;  %v12524_v10 = vld [vmem:[#allocation77_spill] sm:$0xff]  ;;  %v12526_v45 = vld [vmem:[#allocation160_spill] sm:$0xff] }
 0x42f   : > { %v3203_v37 = vmul.f32 %v3035_v30, %v12516_v58  ;;  %4361 = vmatprep.mubr.bf16.mxu1 %v12517_v13  ;;  %v3266_v19 = vadd.f32 %v3202_v23, %v12518_v29  ;;  %v12527_v23 = vld [vmem:[#allocation79_spill] sm:$0xff]  ;;  %v12528_v57 = vld [vmem:[#allocation108_spill] sm:$0xff] }
 0x430   : > { %5356 = vadd.xlane.f32.xlu0 %v5355_v20  ;;  %v5249_v32 = vmul.f32 %v10588_v24, %v3268_v0  ;;  %v3269_v50 = vadd.f32 %v3205_v4, %v12519_v36  ;;  %v12529_v58 = vld [vmem:[#allocation107_spill] sm:$0xff]  ;;  %v12530_v20 = vld [vmem:[#allocation109_spill] sm:$0xff] }
 0x431   : > { %v7223_v55 = vpop.f32.mrb[0].mxu0  ;;  %5359 = vadd.xlane.f32.xlu1 %v5358_v1  ;;  %v3267_v59 = vadd.f32 %v3203_v37, %v12520_v39  ;;  %v5247_v26 = vmul.f32 %v10588_v24, %v3266_v19 }
 0x432   : > { %v3056_v33 = vadd.f32 %v7223_v55, %v10570_v54  ;;  %v3047_v16 = vpop.f32.mrb[1].mxu0  ;;  %v5373_v60 = vsel %vm688_vm0, %v5249_v32, 0.0  ;;  %v5250_v22 = vmul.f32 %v10588_v24, %v3269_v50 }
 0x433   : > { %v3048_v47 = vadd.f32 %v10570_v54, %v3047_v16  ;;  %v7224_v18 = vpop.f32.mrb[2].mxu0  ;;  %v5248_v7 = vmul.f32 %v10588_v24, %v3267_v59  ;;  %v5367_v30 = vsel %vm688_vm0, %v5247_v26, 0.0  ;;  %v12531_v59 = vld [vmem:[#allocation162_spill] sm:$0xff] }
 0x434   : > { %v3208_v35 = vmul.f32 %v3056_v33, %v12521_v46  ;;  %v3059_v40 = vadd.f32 %v7224_v18, %v10570_v54  ;;  %v3050_v6 = vpop.f32.mrb[3].mxu0  ;;  %5374 = vadd.xlane.f32.xlu0 %v5373_v60  ;;  %v5376_v41 = vsel %vm688_vm0, %v5250_v22, 0.0  ;;  %v12532_v18 = vld [vmem:[#allocation164_spill] sm:$0xff] }
 0x435   : > { %v3206_v8 = vmul.f32 %v3048_v47, %v12522_v21  ;;  %v3051_v48 = vadd.f32 %v10570_v54, %v3050_v6  ;;  %5377 = vadd.xlane.f32.xlu1 %v5376_v41  ;;  %v5370_v11 = vsel %vm688_vm0, %v5248_v7, 0.0  ;;  %v12534_v6 = vld [vmem:[#allocation78_spill] sm:$0xff]  ;;  %v12535_v7 = vld [vmem:[#allocation169_spill] sm:$0xff] }
 0x436   : > { %v3209_v53 = vmul.f32 %v3059_v40, %v12523_v51  ;;  %4362 = vmatmul.mubr.bf16.gmra.mrb[220].mxu1 %v12524_v10  ;;  %v3272_v2 = vadd.f32 %v3208_v35, %v12525_v3  ;;  %v12533_v35 = vld [vmem:[#allocation165_spill] sm:$0xff]  ;;  %v12537_v51 = vld [vmem:[#allocation106_spill] sm:$0xff] }
 0x437   : > { %v3207_v12 = vmul.f32 %v3051_v48, %v12526_v45  ;;  %4371 = vmatprep.mubr.bf16.mxu1 %v12527_v23  ;;  %v3270_v4 = vadd.f32 %v3206_v8, %v12528_v57  ;;  %v12536_v8 = vld [vmem:[#allocation83_spill] sm:$0xff]  ;;  %v12539_v23 = vld [vmem:[#allocation18_spill] sm:$0xff] }
 0x438   : > { %5368 = vadd.xlane.f32.xlu0 %v5367_v30  ;;  %v5253_v0 = vmul.f32 %v10588_v24, %v3272_v2  ;;  %v3273_v37 = vadd.f32 %v3209_v53, %v12529_v58  ;;  %v12538_v2 = vld [vmem:[#allocation102_spill] sm:$0xff] }
 0x439   : > { %v7227_v13 = vpop.f32.mrb[4].mxu0  ;;  %5371 = vadd.xlane.f32.xlu1 %v5370_v11  ;;  %v3271_v29 = vadd.f32 %v3207_v12, %v12530_v20  ;;  %v5251_v39 = vmul.f32 %v10588_v24, %v3270_v4 }
 0x43a   : > { %v3072_v19 = vadd.f32 %v7227_v13, %v10570_v54  ;;  %v3063_v1 = vpop.f32.mrb[5].mxu0  ;;  %v5385_v32 = vsel %vm688_vm0, %v5253_v0, 0.0  ;;  %v5254_v36 = vmul.f32 %v10588_v24, %v3273_v37 }
 0x43b   : > { %v3064_v50 = vadd.f32 %v10570_v54, %v3063_v1  ;;  %v7228_v55 = vpop.f32.mrb[6].mxu0  ;;  %v5252_v47 = vmul.f32 %v10588_v24, %v3271_v29  ;;  %v5379_v48 = vsel %vm688_vm0, %v5251_v39, 0.0 }
 0x43c   : > { %v3212_v33 = vmul.f32 %v3072_v19, %v12531_v59  ;;  %v3075_v16 = vadd.f32 %v7228_v55, %v10570_v54  ;;  %v3066_v60 = vpop.f32.mrb[7].mxu0  ;;  %5386 = vadd.xlane.f32.xlu0 %v5385_v32  ;;  %v5388_v22 = vsel %vm688_vm0, %v5254_v36, 0.0  ;;  %v12540_v55 = vld [vmem:[#allocation82_spill] sm:$0xff]  ;;  %v12541_v59 = vld [vmem:[#allocation87_spill] sm:$0xff] }
 0x43d   : > { %v3210_v26 = vmul.f32 %v3064_v50, %v12532_v18  ;;  %v3067_v46 = vadd.f32 %v10570_v54, %v3066_v60  ;;  %5389 = vadd.xlane.f32.xlu1 %v5388_v22  ;;  %v5382_v10 = vsel %vm688_vm0, %v5252_v47, 0.0  ;;  %v12542_v22 = vld [vmem:[#allocation21_spill] sm:$0xff]  ;;  %v12543_v18 = vld [vmem:[#allocation115_spill] sm:$0xff] }
 0x43e   : > { %v3213_v40 = vmul.f32 %v3075_v16, %v12533_v35  ;;  %4372 = vmatmul.mubr.bf16.gmra.mrb[224].mxu1 %v12534_v6  ;;  %v3276_v41 = vadd.f32 %v3212_v33, %v10327_v31 }
 0x43f   : > { %v3211_v21 = vmul.f32 %v3067_v46, %v12535_v7  ;;  %4381 = vmatprep.mubr.bf16.mxu1 %v12536_v8  ;;  %v3274_v53 = vadd.f32 %v3210_v26, %v12537_v51 }
 0x440   : > { %5380 = vadd.xlane.f32.xlu0 %v5379_v48  ;;  %v5257_v3 = vmul.f32 %v10588_v24, %v3276_v41  ;;  %v3277_v45 = vadd.f32 %v3213_v40, %v12538_v2  ;;  %v12544_v41 = vld [vmem:[#allocation182_spill] sm:$0xff]  ;;  %v12546_v2 = vld [vmem:[#allocation184_spill] sm:$0xff] }
 0x441   : > { %v7231_v12 = vpop.f32.mrb[8].mxu0  ;;  %5383 = vadd.xlane.f32.xlu1 %v5382_v10  ;;  %v3275_v30 = vadd.f32 %v3211_v21, %v12539_v23  ;;  %v5255_v37 = vmul.f32 %v10588_v24, %v3274_v53  ;;  %v12545_v53 = vld [vmem:[#allocation183_spill] sm:$0xff]  ;;  %v12548_v23 = vld [vmem:[#allocation20_spill] sm:$0xff] }
 0x442   : > { %v3088_v31 = vadd.f32 %v7231_v12, %v10570_v54  ;;  %v3079_v57 = vpop.f32.mrb[9].mxu0  ;;  %v5397_v4 = vsel %vm688_vm0, %v5257_v3, 0.0  ;;  %v5258_v11 = vmul.f32 %v10588_v24, %v3277_v45  ;;  %v12547_v12 = vld [vmem:[#allocation86_spill] sm:$0xff] }
 0x443   : > { %v3080_v0 = vadd.f32 %v10570_v54, %v3079_v57  ;;  %v7232_v58 = vpop.f32.mrb[10].mxu0  ;;  %v5256_v1 = vmul.f32 %v10588_v24, %v3275_v30  ;;  %v5391_v33 = vsel %vm688_vm0, %v5255_v37, 0.0 }
 0x444   : > { %v3216_v13 = vmul.f32 %v3088_v31, %v12386_v5  ;;  %v3091_v20 = vadd.f32 %v7232_v58, %v10570_v54  ;;  %v3082_v29 = vpop.f32.mrb[11].mxu0  ;;  %5398 = vadd.xlane.f32.xlu0 %v5397_v4  ;;  %v5400_v19 = vsel %vm688_vm0, %v5258_v11, 0.0  ;;  %v12549_v31 = vld [vmem:[#allocation185_spill] sm:$0xff]  ;;  %v12550_v4 = vld [vmem:[#allocation91_spill] sm:$0xff] }
 0x445   : > { %v3214_v32 = vmul.f32 %v3080_v0, %v12385_v15  ;;  %v3083_v36 = vadd.f32 %v10570_v54, %v3082_v29  ;;  %5401 = vadd.xlane.f32.xlu1 %v5400_v19  ;;  %v5394_v15 = vsel %vm688_vm0, %v5256_v1, 0.0  ;;  %v12551_v0 = vld [vmem:[#allocation118_spill] sm:$0xff]  ;;  %v12553_v1 = vld [vmem:[#allocation119_spill] sm:$0xff] }
 0x446   : > { %v3217_v50 = vmul.f32 %v3091_v20, %v12387_v28  ;;  %4382 = vmatmul.mubr.bf16.gmra.mrb[228].mxu1 %v12540_v55  ;;  %v3280_v39 = vadd.f32 %v3216_v13, %v10355_v25  ;;  %v12552_v20 = vld [vmem:[#allocation117_spill] sm:$0xff] }
 0x447   : > { %v3215_v5 = vmul.f32 %v3083_v36, %v12389_v56  ;;  %4391 = vmatprep.mubr.bf16.mxu1 %v12541_v59  ;;  %v3278_v16 = vadd.f32 %v3214_v32, %v10349_v44 }
 0x448   : > { %5392 = vadd.xlane.f32.xlu0 %v5391_v33  ;;  %v5261_v60 = vmul.f32 %v10588_v24, %v3280_v39  ;;  %v3281_v47 = vadd.f32 %v3217_v50, %v12542_v22 }
 0x449   : > { %v7235_v28 = vpop.f32.mrb[12].mxu0  ;;  %5395 = vadd.xlane.f32.xlu1 %v5394_v15  ;;  %v3279_v26 = vadd.f32 %v3215_v5, %v12543_v18  ;;  %v5259_v6 = vmul.f32 %v10588_v24, %v3278_v16  ;;  %v12554_v16 = vld [vmem:[#allocation193_spill] sm:$0xff]  ;;  %v12555_v18 = vld [vmem:[#allocation191_spill] sm:$0xff] }
 0x44a   : > { %v3104_v25 = vadd.f32 %v7235_v28, %v10570_v54  ;;  %v3095_v56 = vpop.f32.mrb[13].mxu0  ;;  %v5409_v46 = vsel %vm688_vm0, %v5261_v60, 0.0  ;;  %v5262_v35 = vmul.f32 %v10588_v24, %v3281_v47 }
 0x44b   : > { %v3096_v44 = vadd.f32 %v10570_v54, %v3095_v56  ;;  %v7236_v40 = vpop.f32.mrb[14].mxu0  ;;  %v5260_v51 = vmul.f32 %v10588_v24, %v3279_v26  ;;  %v5403_v11 = vsel %vm688_vm0, %v5259_v6, 0.0  ;;  %v12556_v56 = vld [vmem:[#allocation194_spill] sm:$0xff]  ;;  %v12559_v6 = vld [vmem:[#allocation195_spill] sm:$0xff] }
 0x44c   : > { %v3220_v7 = vmul.f32 %v3104_v25, %v12544_v41  ;;  %v3107_v21 = vadd.f32 %v7236_v40, %v10570_v54  ;;  %v3098_v8 = vpop.f32.mrb[15].mxu0  ;;  %5410 = vadd.xlane.f32.xlu0 %v5409_v46  ;;  %v5412_v48 = vsel %vm688_vm0, %v5262_v35, 0.0  ;;  %v12557_v35 = vld [vmem:[#allocation90_spill] sm:$0xff] }
 0x44d   : > { %v3218_v10 = vmul.f32 %v3096_v44, %v12545_v53  ;;  %v3099_v3 = vadd.f32 %v10570_v54, %v3098_v8  ;;  %5413 = vadd.xlane.f32.xlu1 %v5412_v48  ;;  %v5406_v37 = vsel %vm688_vm0, %v5260_v51, 0.0  ;;  %v12558_v44 = vld [vmem:[#allocation128_spill] sm:$0xff]  ;;  %v12561_v8 = vld [vmem:[#allocation125_spill] sm:$0xff] }
 0x44e   : > { %v3221_v45 = vmul.f32 %v3107_v21, %v12546_v2  ;;  %4392 = vmatmul.mubr.bf16.gmra.mrb[232].mxu1 %v12547_v12  ;;  %v3284_v30 = vadd.f32 %v3220_v7, %v12548_v23  ;;  %v12560_v7 = vld [vmem:[#allocation95_spill] sm:$0xff] }
 0x44f   : > { %v3219_v57 = vmul.f32 %v3099_v3, %v12549_v31  ;;  %4401 = vmatprep.mubr.bf16.mxu1 %v12550_v4  ;;  %v3282_v58 = vadd.f32 %v3218_v10, %v12551_v0  ;;  %v12562_v10 = vld [vmem:[#allocation23_spill] sm:$0xff] }
 0x450   : > { %5404 = vadd.xlane.f32.xlu0 %v5403_v11  ;;  %v5265_v13 = vmul.f32 %v10588_v24, %v3284_v30  ;;  %v3285_v29 = vadd.f32 %v3221_v45, %v12552_v20  ;;  %v12563_v45 = vld [vmem:[#allocation127_spill] sm:$0xff] }
 0x451   : > { %v7239_v19 = vpop.f32.mrb[16].mxu0  ;;  %5407 = vadd.xlane.f32.xlu1 %v5406_v37  ;;  %v3283_v32 = vadd.f32 %v3219_v57, %v12553_v1  ;;  %v5263_v33 = vmul.f32 %v10588_v24, %v3282_v58  ;;  %v12564_v58 = vld [vmem:[#allocation201_spill] sm:$0xff]  ;;  %v12565_v1 = vld [vmem:[#allocation199_spill] sm:$0xff] }
 0x452   : > { %v3120_v36 = vadd.f32 %v7239_v19, %v10570_v54  ;;  %v3111_v50 = vpop.f32.mrb[17].mxu0  ;;  %v5421_v55 = vsel %vm688_vm0, %v5265_v13, 0.0  ;;  %v5266_v39 = vmul.f32 %v10588_v24, %v3285_v29 }
 0x453   : > { %v3112_v5 = vadd.f32 %v10570_v54, %v3111_v50  ;;  %v7240_v59 = vpop.f32.mrb[18].mxu0  ;;  %v5264_v28 = vmul.f32 %v10588_v24, %v3283_v32  ;;  %v5415_v21 = vsel %vm688_vm0, %v5263_v33, 0.0  ;;  %v12566_v50 = vld [vmem:[#allocation202_spill] sm:$0xff]  ;;  %v12569_v33 = vld [vmem:[#allocation203_spill] sm:$0xff] }
 0x454   : > { %v3224_v15 = vmul.f32 %v3120_v36, %v12554_v16  ;;  %v3123_v60 = vadd.f32 %v7240_v59, %v10570_v54  ;;  %v3114_v22 = vpop.f32.mrb[19].mxu0  ;;  %5422 = vadd.xlane.f32.xlu0 %v5421_v55  ;;  %v5424_v47 = vsel %vm688_vm0, %v5266_v39, 0.0  ;;  %v12567_v39 = vld [vmem:[#allocation94_spill] sm:$0xff] }
 0x455   : > { %v3222_v26 = vmul.f32 %v3112_v5, %v12555_v18  ;;  %v3115_v25 = vadd.f32 %v10570_v54, %v3114_v22  ;;  %5425 = vadd.xlane.f32.xlu1 %v5424_v47  ;;  %v5418_v51 = vsel %vm688_vm0, %v5264_v28, 0.0  ;;  %v12568_v5 = vld [vmem:[#allocation135_spill] sm:$0xff]  ;;  %v12571_v22 = vld [vmem:[#allocation22_spill] sm:$0xff] }
 0x456   : > { %v3225_v46 = vmul.f32 %v3123_v60, %v12556_v56  ;;  %4402 = vmatmul.mubr.bf16.gmra.mrb[236].mxu1 %v12557_v35  ;;  %v3288_v40 = vadd.f32 %v3224_v15, %v12558_v44  ;;  %v12570_v15 = vld [vmem:[#allocation98_spill] sm:$0xff] }
 0x457   : > { %v3223_v41 = vmul.f32 %v3115_v25, %v12559_v6  ;;  %4411 = vmatprep.mubr.bf16.mxu1 %v12560_v7  ;;  %v3286_v48 = vadd.f32 %v3222_v26, %v12561_v8  ;;  %v12572_v26 = vld [vmem:[#allocation129_spill] sm:$0xff] }
 0x458   : > { %5416 = vadd.xlane.f32.xlu0 %v5415_v21  ;;  %v5269_v53 = vmul.f32 %v10588_v24, %v3288_v40  ;;  %v3289_v3 = vadd.f32 %v3225_v46, %v12562_v10  ;;  %v12573_v46 = vld [vmem:[#allocation25_spill] sm:$0xff] }
 0x459   : > { %v7243_v2 = vpop.f32.mrb[20].mxu0  ;;  %5419 = vadd.xlane.f32.xlu1 %v5418_v51  ;;  %v3287_v12 = vadd.f32 %v3223_v41, %v12563_v45  ;;  %v5267_v0 = vmul.f32 %v10588_v24, %v3286_v48  ;;  %v12574_v48 = vld [vmem:[#allocation209_spill] sm:$0xff]  ;;  %v12575_v45 = vld [vmem:[#allocation207_spill] sm:$0xff] }
 0x45a   : > { %v3136_v23 = vadd.f32 %v7243_v2, %v10570_v54  ;;  %v3127_v30 = vpop.f32.mrb[21].mxu0  ;;  %v5433_v31 = vsel %vm688_vm0, %v5269_v53, 0.0  ;;  %v5270_v57 = vmul.f32 %v10588_v24, %v3289_v3 }
 0x45b   : > { %v3128_v4 = vadd.f32 %v10570_v54, %v3127_v30  ;;  %v7244_v11 = vpop.f32.mrb[22].mxu0  ;;  %v5268_v19 = vmul.f32 %v10588_v24, %v3287_v12  ;;  %v5427_v60 = vsel %vm688_vm0, %v5267_v0, 0.0 }
 0x45c   : > { %v3228_v37 = vmul.f32 %v3136_v23, %v12564_v58  ;;  %v3139_v13 = vadd.f32 %v7244_v11, %v10570_v54  ;;  %v3130_v20 = vpop.f32.mrb[23].mxu0  ;;  %5434 = vadd.xlane.f32.xlu0 %v5433_v31  ;;  %v5436_v29 = vsel %vm688_vm0, %v5270_v57, 0.0  ;;  %v12576_v31 = vld [vmem:[#allocation96_spill] sm:$0xff]  ;;  %v12577_v11 = vld [vmem:[#allocation103_spill] sm:$0xff] }
 0x45d   : > { %v3226_v32 = vmul.f32 %v3128_v4, %v12565_v1  ;;  %v3131_v36 = vadd.f32 %v10570_v54, %v3130_v20  ;;  %5437 = vadd.xlane.f32.xlu1 %v5436_v29  ;;  %v5430_v28 = vsel %vm688_vm0, %v5268_v19, 0.0  ;;  %v12578_v29 = vld [vmem:[#allocation137_spill] sm:$0xff] }
 0x45e   : > { %v3229_v55 = vmul.f32 %v3139_v13, %v12566_v50  ;;  %4412 = vmatmul.mubr.bf16.gmra.mrb[240].mxu1 %v12567_v39  ;;  %v3292_v59 = vadd.f32 %v3228_v37, %v12568_v5 }
 0x45f   : > { %v3227_v16 = vmul.f32 %v3131_v36, %v12569_v33  ;;  %4421 = vmatprep.mubr.bf16.mxu1 %v12570_v15  ;;  %v3290_v47 = vadd.f32 %v3226_v32, %v12571_v22 }
 0x460   : > { %5428 = vadd.xlane.f32.xlu0 %v5427_v60  ;;  %v5273_v18 = vmul.f32 %v10588_v24, %v3292_v59  ;;  %v3293_v25 = vadd.f32 %v3229_v55, %v12572_v26  ;;  %v12579_v60 = vld [vmem:[#allocation101_spill] sm:$0xff] }
 0x461   : > { %v7247_v56 = vpop.f32.mrb[24].mxu0  ;;  %5431 = vadd.xlane.f32.xlu1 %v5430_v28  ;;  %v3291_v35 = vadd.f32 %v3227_v16, %v12573_v46  ;;  %v5271_v8 = vmul.f32 %v10588_v24, %v3290_v47  ;;  %v12580_v47 = vld [vmem:[#allocation113_spill] sm:$0xff]  ;;  %v12581_v46 = vld [vmem:[#allocation111_spill] sm:$0xff] }
 0x462   : > { %v3152_v44 = vadd.f32 %v7247_v56, %v10570_v54  ;;  %v3143_v40 = vpop.f32.mrb[25].mxu0  ;;  %v5445_v6 = vsel %vm688_vm0, %v5273_v18, 0.0  ;;  %v5274_v41 = vmul.f32 %v10588_v24, %v3293_v25 }
 0x463   : > { %v3144_v7 = vadd.f32 %v10570_v54, %v3143_v40  ;;  %v7248_v21 = vpop.f32.mrb[26].mxu0  ;;  %v5272_v2 = vmul.f32 %v10588_v24, %v3291_v35  ;;  %v5439_v0 = vsel %vm688_vm0, %v5271_v8, 0.0  ;;  %v12582_v35 = vld [vmem:[#allocation123_spill] sm:$0xff]  ;;  %v12584_v40 = vld [vmem:[#allocation133_spill] sm:$0xff] }
 0x464   : > { %v3232_v51 = vmul.f32 %v3152_v44, %v12574_v48  ;;  %v3155_v53 = vadd.f32 %v7248_v21, %v10570_v54  ;;  %v3146_v10 = vpop.f32.mrb[27].mxu0  ;;  %5446 = vadd.xlane.f32.xlu0 %v5445_v6  ;;  %v5448_v3 = vsel %vm688_vm0, %v5274_v41, 0.0  ;;  %v12583_v44 = vld [vmem:[#allocation121_spill] sm:$0xff]  ;;  %v12585_v6 = vld [vmem:[#allocation131_spill] sm:$0xff]  ;;  %v12588_v21 = vld [vmem:[#allocation4_spill] sm:$0xff] }
 0x465   : > { %v3230_v12 = vmul.f32 %v3144_v7, %v12575_v45  ;;  %v3147_v23 = vadd.f32 %v10570_v54, %v3146_v10  ;;  %5449 = vadd.xlane.f32.xlu1 %v5448_v3  ;;  %v5442_v37 = vsel %vm688_vm0, %v5272_v2, 0.0  ;;  %v12586_v41 = vld [vmem:[#allocation143_spill] sm:$0xff]  ;;  %v12587_v7 = vld [vmem:[#allocation141_spill] sm:$0xff]  ;;  %v12589_v8 = vsub.s32 0, %v12588_v21 }
 0x466   : > { %v3233_v30 = vmul.f32 %v3155_v53, %v12434_v38  ;;  %4422 = vmatmul.mubr.bf16.gmra.mrb[244].mxu1 %v12576_v31  ;;  %v3296_v57 = vadd.f32 %v3232_v51, %v10467_v63  ;;  %v12590_v51 = vld [vmem:[#allocation153_spill] sm:$0xff]  ;;  %v12591_v53 = vsub.s32 1, %v12588_v21  ;;  %v12598_v21 = vld [vmem:[#allocation180_spill] sm:$0xff] }
 0x467   : > { %v3231_v4 = vmul.f32 %v3147_v23, %v12436_v49  ;;  %4431 = vmatprep.mubr.bf16.mxu1 %v12577_v11  ;;  %v3294_v58 = vadd.f32 %v3230_v12, %v10461_v42 }
 0x468   : > { %5440 = vadd.xlane.f32.xlu0 %v5439_v0  ;;  %v5277_v13 = vmul.f32 %v10588_v24, %v3296_v57  ;;  %v3297_v20 = vadd.f32 %v3233_v30, %v10458_v61  ;;  %v12592_v0 = vld [vmem:[#allocation151_spill] sm:$0xff] }
 0x469   : > { %v7251_v38 = vpop.f32.mrb[28].mxu0  ;;  %5443 = vadd.xlane.f32.xlu1 %v5442_v37  ;;  %v3295_v19 = vadd.f32 %v3231_v4, %v12578_v29  ;;  %v5275_v50 = vmul.f32 %v10588_v24, %v3294_v58 }
 0x46a   : > { %v3168_v63 = vadd.f32 %v7251_v38, %v10570_v54  ;;  %v3159_v49 = vpop.f32.mrb[29].mxu0  ;;  %v5457_v1 = vsel %vm688_vm0, %v5277_v13, 0.0  ;;  %v5278_v32 = vmul.f32 %v10588_v24, %v3297_v20  ;;  %v12593_v13 = vld [vmem:[#allocation163_spill] sm:$0xff] }
 0x46b   : > { %v3160_v42 = vadd.f32 %v10570_v54, %v3159_v49  ;;  %v7252_v36 = vpop.f32.mrb[30].mxu0  ;;  %v5276_v59 = vmul.f32 %v10588_v24, %v3295_v19  ;;  %v5451_v28 = vsel %vm688_vm0, %v5275_v50, 0.0 }
 0x46c   : > { %v3236_v55 = vmul.f32 %v3168_v63, %v9898_v43  ;;  %v3171_v61 = vadd.f32 %v7252_v36, %v10570_v54  ;;  %v3162_v39 = vpop.f32.mrb[31].mxu0  ;;  %5458 = vadd.xlane.f32.xlu0 %v5457_v1  ;;  %v5460_v5 = vsel %vm688_vm0, %v5278_v32, 0.0 }
 0x46d   : > { %v3234_v33 = vmul.f32 %v3160_v42, %v9893_v52  ;;  %v3163_v16 = vadd.f32 %v10570_v54, %v3162_v39  ;;  %5461 = vadd.xlane.f32.xlu1 %v5460_v5  ;;  %v5454_v52 = vsel %vm688_vm0, %v5276_v59, 0.0  ;;  %v12595_v59 = vld [vmem:[#allocation171_spill] sm:$0xff] }
 0x46e   : > { %v3237_v15 = vmul.f32 %v3171_v61, %v9902_v9  ;;  %4432 = vmatmul.mubr.bf16.gmra.mrb[248].mxu1 %v12579_v60  ;;  %v3300_v22 = vadd.f32 %v3236_v55, %v10495_v34  ;;  %v12594_v61 = vld [vmem:[#allocation161_spill] sm:$0xff] }
 0x46f   : > { %v3235_v43 = vmul.f32 %v3163_v16, %v9908_v27  ;;  %4441 = vmatprep.mubr.bf16.mxu1 %v12580_v47  ;;  %v3298_v18 = vadd.f32 %v3234_v33, %v10489_v62 }
 0x470   : > { %5452 = vadd.xlane.f32.xlu0 %v5451_v28  ;;  %v5281_v54 = vmul.f32 %v10588_v24, %v3300_v22  ;;  %v3301_v26 = vadd.f32 %v3237_v15, %v10486_v17 }
 0x471   : > { %5455 = vadd.xlane.f32.xlu1 %v5454_v52  ;;  %v3299_v9 = vadd.f32 %v3235_v43, %v10492_v14  ;;  %v5279_v25 = vmul.f32 %v10588_v24, %v3298_v18 }
 0x472   : > { %v5469_v34 = vsel %vm688_vm0, %v5281_v54, 0.0  ;;  %v5282_v27 = vmul.f32 %v10588_v24, %v3301_v26 }
 0x473   : > { %v5280_v62 = vmul.f32 %v10588_v24, %v3299_v9  ;;  %v5463_v17 = vsel %vm688_vm0, %v5279_v25, 0.0  ;;  %v3494_v24 = vld [vmem:[%s11857_s6] sm:$0x3]  ;;  %v12596_v9 = vld [vmem:[#allocation170_spill] sm:$0xff]  ;;  %v12597_v25 = vld [vmem:[#allocation181_spill] sm:$0xff] }
 0x474   : > { %5470 = vadd.xlane.f32.xlu0 %v5469_v34  ;;  %v5472_v56 = vsel %vm688_vm0, %v5282_v27, 0.0  ;;  %v10964_v48 = vrot.slane %v3494_v24, %v12589_v8  ;;  %v10969_v10 = vrot.slane %v3494_v24, %v12591_v53  ;;  %v12599_v53 = vld [vmem:[#allocation187_spill] sm:$0xff] }
 0x475   : > { %5473 = vadd.xlane.f32.xlu1 %v5472_v56  ;;  %v5466_v14 = vsel %vm688_vm0, %v5280_v62, 0.0 }
 0x476   : > { %4442 = vmatmul.mubr.bf16.gmra.mrb[252].mxu1 %v12581_v46 }
 0x477   : > { %4451 = vmatprep.mubr.bf16.mxu1 %v12582_v35 }
 0x478   : > { %5464 = vadd.xlane.f32.xlu0 %v5463_v17 }
 0x479   : > { %5467 = vadd.xlane.f32.xlu1 %v5466_v14 }
 0x47e   : > { %4452 = vmatmul.mubr.bf16.gmra.mrb[0].mxu1 %v12583_v44 }
 0x47f   : > { %4461 = vmatprep.mubr.bf16.mxu1 %v12584_v40 }
 0x486   : > { %4462 = vmatmul.mubr.bf16.gmra.mrb[4].mxu1 %v12585_v6 }
 0x487   : > { %4471 = vmatprep.mubr.bf16.mxu1 %v12586_v41 }
 0x48e   : > { %4472 = vmatmul.mubr.bf16.gmra.mrb[8].mxu1 %v12587_v7 }
 0x48f   : > { %4481 = vmatprep.mubr.bf16.mxu1 %v12590_v51 }
 0x491   : > { %v4213_v3 = vpop.f32.mrb[160].mxu1 }
 0x492   : > { %v7257_v2 = vadd.f32 %v4213_v3, %v10964_v48  ;;  %v4215_v45 = vpop.f32.mrb[161].mxu1 }
 0x493   : > { %v7258_v12 = vadd.f32 %v4215_v45, %v10969_v10  ;;  %v4217_v23 = vpop.f32.mrb[162].mxu1 }
 0x494   : > { %v7259_v30 = vadd.f32 %v4217_v23, %v10964_v48  ;;  %v4219_v31 = vpop.f32.mrb[163].mxu1  ;;  %v4532_v4 = vmax.f32 %v7257_v2, 0.0 }
 0x495   : > { %v7260_v57 = vadd.f32 %v4219_v31, %v10969_v10  ;;  %v4533_v58 = vmax.f32 %v7258_v12, 0.0 }
 0x496   : > { %v4534_v11 = vmax.f32 %v7259_v30, 0.0  ;;  %4482 = vmatmul.mubr.bf16.gmra.mrb[12].mxu1 %v12592_v0 }
 0x497   : > { %v4535_v37 = vmax.f32 %v7260_v57, 0.0  ;;  %4491 = vmatprep.mubr.bf16.mxu1 %v12593_v13 }
 0x498   : > { %v4660_v20 = vpack.c.bf16 %v4534_v11, %v4532_v4 }
 0x499   : > { %v4661_v38 = vpack.c.bf16 %v4535_v37, %v4533_v58  ;;  %v4223_v29 = vpop.f32.mrb[164].mxu1  ;;  %v12600_v37 = vld [vmem:[#allocation186_spill] sm:$0xff] }
 0x49a   : > { %v7261_v19 = vadd.f32 %v4223_v29, %v10964_v48  ;;  %v4225_v63 = vpop.f32.mrb[165].mxu1 }
 0x49b   : > { %v7262_v49 = vadd.f32 %v4225_v63, %v10969_v10  ;;  %v4227_v1 = vpop.f32.mrb[166].mxu1  ;;  %4891 = vmatprep.mubr.bf16.mxu0 %v4661_v38 }
 0x49c   : > { %v7263_v32 = vadd.f32 %v4227_v1, %v10964_v48  ;;  %v4229_v42 = vpop.f32.mrb[167].mxu1  ;;  %4892 = vmatmul.mubr.bf16.vlgmr.msra.gmra.mrb[32].mxu0 %v4660_v20  ;;  %v4536_v50 = vmax.f32 %v7261_v19, 0.0 }
 0x49d   : > { %v7264_v36 = vadd.f32 %v4229_v42, %v10969_v10  ;;  %v4537_v39 = vmax.f32 %v7262_v49, 0.0 }
 0x49e   : > { %v4538_v55 = vmax.f32 %v7263_v32, 0.0  ;;  %4492 = vmatmul.mubr.bf16.gmra.mrb[16].mxu1 %v12594_v61 }
 0x49f   : > { %v4539_v5 = vmax.f32 %v7264_v36, 0.0  ;;  %4501 = vmatprep.mubr.bf16.mxu1 %v12595_v59 }
 0x4a0   : > { %v4662_v33 = vpack.c.bf16 %v4538_v55, %v4536_v50 }
 0x4a1   : > { %v4663_v16 = vpack.c.bf16 %v4539_v5, %v4537_v39  ;;  %v4233_v15 = vpop.f32.mrb[168].mxu1 }
 0x4a2   : > { %v7265_v60 = vadd.f32 %v4233_v15, %v10964_v48  ;;  %v4235_v22 = vpop.f32.mrb[169].mxu1 }
 0x4a3   : > { %v7266_v43 = vadd.f32 %v4235_v22, %v10969_v10  ;;  %v4237_v47 = vpop.f32.mrb[170].mxu1  ;;  %4899 = vmatprep.mubr.bf16.mxu0 %v4663_v16 }
 0x4a4   : > { %v7267_v28 = vadd.f32 %v4237_v47, %v10964_v48  ;;  %v4239_v18 = vpop.f32.mrb[171].mxu1  ;;  %4900 = vmatmul.mubr.bf16.gmra.mrb[36].mxu0 %v4662_v33  ;;  %v4540_v54 = vmax.f32 %v7265_v60, 0.0 }
 0x4a5   : > { %v7268_v52 = vadd.f32 %v4239_v18, %v10969_v10  ;;  %v4541_v34 = vmax.f32 %v7266_v43, 0.0 }
 0x4a6   : > { %v4542_v26 = vmax.f32 %v7267_v28, 0.0  ;;  %4502 = vmatmul.mubr.bf16.gmra.mrb[20].mxu1 %v12596_v9 }
 0x4a7   : > { %v4543_v27 = vmax.f32 %v7268_v52, 0.0  ;;  %4511 = vmatprep.mubr.bf16.mxu1 %v12597_v25 }
 0x4a8   : > { %v4664_v56 = vpack.c.bf16 %v4542_v26, %v4540_v54 }
 0x4a9   : > { %v4665_v62 = vpack.c.bf16 %v4543_v27, %v4541_v34  ;;  %v4243_v46 = vpop.f32.mrb[172].mxu1 }
 0x4aa   : > { %v7269_v35 = vadd.f32 %v4243_v46, %v10964_v48  ;;  %v4245_v17 = vpop.f32.mrb[173].mxu1 }
 0x4ab   : > { %v7270_v14 = vadd.f32 %v4245_v17, %v10969_v10  ;;  %v4247_v44 = vpop.f32.mrb[174].mxu1  ;;  %4907 = vmatprep.mubr.bf16.mxu0 %v4665_v62 }
 0x4ac   : > { %v7271_v40 = vadd.f32 %v4247_v44, %v10964_v48  ;;  %v4249_v6 = vpop.f32.mrb[175].mxu1  ;;  %4908 = vmatmul.mubr.bf16.gmra.mrb[40].mxu0 %v4664_v56  ;;  %v4544_v24 = vmax.f32 %v7269_v35, 0.0 }
 0x4ad   : > { %v7272_v41 = vadd.f32 %v4249_v6, %v10969_v10  ;;  %v4545_v8 = vmax.f32 %v7270_v14, 0.0 }
 0x4ae   : > { %v4546_v7 = vmax.f32 %v7271_v40, 0.0  ;;  %4512 = vmatmul.mubr.bf16.gmra.mrb[24].mxu1 %v12598_v21 }
 0x4af   : > { %v4547_v51 = vmax.f32 %v7272_v41, 0.0  ;;  %4521 = vmatprep.mubr.bf16.mxu1 %v12599_v53 }
 0x4b0   : > { %v4666_v3 = vpack.c.bf16 %v4546_v7, %v4544_v24 }
 0x4b1   : > { %v4667_v2 = vpack.c.bf16 %v4547_v51, %v4545_v8  ;;  %v4253_v45 = vpop.f32.mrb[176].mxu1 }
 0x4b2   : > { %v7273_v12 = vadd.f32 %v4253_v45, %v10964_v48  ;;  %v4255_v23 = vpop.f32.mrb[177].mxu1 }
 0x4b3   : > { %v7274_v30 = vadd.f32 %v4255_v23, %v10969_v10  ;;  %v4257_v31 = vpop.f32.mrb[178].mxu1  ;;  %4915 = vmatprep.mubr.bf16.mxu0 %v4667_v2 }
 0x4b4   : > { %v7275_v57 = vadd.f32 %v4257_v31, %v10964_v48  ;;  %v4259_v4 = vpop.f32.mrb[179].mxu1  ;;  %4916 = vmatmul.mubr.bf16.gmra.mrb[44].mxu0 %v4666_v3  ;;  %v4548_v0 = vmax.f32 %v7273_v12, 0.0 }
 0x4b5   : > { %v7276_v11 = vadd.f32 %v4259_v4, %v10969_v10  ;;  %v4549_v13 = vmax.f32 %v7274_v30, 0.0 }
 0x4b6   : > { %v4550_v58 = vmax.f32 %v7275_v57, 0.0  ;;  %4522 = vmatmul.mubr.bf16.gmra.mrb[28].mxu1 %v12600_v37 }
 0x4b7   : > { %v4551_v20 = vmax.f32 %v7276_v11, 0.0 }
 0x4b8   : > { %v4668_v38 = vpack.c.bf16 %v4550_v58, %v4548_v0 }
 0x4b9   : > { %v4669_v29 = vpack.c.bf16 %v4551_v20, %v4549_v13  ;;  %v4263_v19 = vpop.f32.mrb[180].mxu1 }
 0x4ba   : > { %v7277_v63 = vadd.f32 %v4263_v19, %v10964_v48  ;;  %v4265_v49 = vpop.f32.mrb[181].mxu1 }
 0x4bb   : > { %v7278_v1 = vadd.f32 %v4265_v49, %v10969_v10  ;;  %v4267_v32 = vpop.f32.mrb[182].mxu1  ;;  %4923 = vmatprep.mubr.bf16.mxu0 %v4669_v29 }
 0x4bc   : > { %v7279_v42 = vadd.f32 %v4267_v32, %v10964_v48  ;;  %v4269_v36 = vpop.f32.mrb[183].mxu1  ;;  %4924 = vmatmul.mubr.bf16.gmra.mrb[48].mxu0 %v4668_v38  ;;  %v4552_v55 = vmax.f32 %v7277_v63, 0.0 }
 0x4bd   : > { %v7280_v50 = vadd.f32 %v4269_v36, %v10969_v10  ;;  %v4553_v39 = vmax.f32 %v7278_v1, 0.0 }
 0x4be   : > { %v4554_v61 = vmax.f32 %v7279_v42, 0.0 }
 0x4bf   : > { %v4555_v5 = vmax.f32 %v7280_v50, 0.0 }
 0x4c0   : > { %v4670_v59 = vpack.c.bf16 %v4554_v61, %v4552_v55 }
 0x4c1   : > { %v4671_v33 = vpack.c.bf16 %v4555_v5, %v4553_v39  ;;  %v4273_v16 = vpop.f32.mrb[184].mxu1 }
 0x4c2   : > { %v7281_v15 = vadd.f32 %v4273_v16, %v10964_v48  ;;  %v4275_v60 = vpop.f32.mrb[185].mxu1 }
 0x4c3   : > { %v7282_v22 = vadd.f32 %v4275_v60, %v10969_v10  ;;  %v4277_v43 = vpop.f32.mrb[186].mxu1  ;;  %4931 = vmatprep.mubr.bf16.mxu0 %v4671_v33 }
 0x4c4   : > { %v7283_v47 = vadd.f32 %v4277_v43, %v10964_v48  ;;  %v4279_v28 = vpop.f32.mrb[187].mxu1  ;;  %4932 = vmatmul.mubr.bf16.gmra.mrb[52].mxu0 %v4670_v59  ;;  %v4556_v52 = vmax.f32 %v7281_v15, 0.0 }
 0x4c5   : > { %v7284_v18 = vadd.f32 %v4279_v28, %v10969_v10  ;;  %v4557_v26 = vmax.f32 %v7282_v22, 0.0 }
 0x4c6   : > { %v4558_v54 = vmax.f32 %v7283_v47, 0.0 }
 0x4c7   : > { %v4559_v9 = vmax.f32 %v7284_v18, 0.0 }
 0x4c8   : > { %v4672_v34 = vpack.c.bf16 %v4558_v54, %v4556_v52 }
 0x4c9   : > { %v4673_v27 = vpack.c.bf16 %v4559_v9, %v4557_v26  ;;  %v4283_v25 = vpop.f32.mrb[188].mxu1 }
 0x4ca   : > { %v7285_v56 = vadd.f32 %v4283_v25, %v10964_v48  ;;  %v4285_v62 = vpop.f32.mrb[189].mxu1 }
 0x4cb   : > { %v7286_v46 = vadd.f32 %v4285_v62, %v10969_v10  ;;  %v4287_v35 = vpop.f32.mrb[190].mxu1  ;;  %4939 = vmatprep.mubr.bf16.mxu0 %v4673_v27 }
 0x4cc   : > { %v7287_v17 = vadd.f32 %v4287_v35, %v10964_v48  ;;  %v4289_v14 = vpop.f32.mrb[191].mxu1  ;;  %4940 = vmatmul.mubr.bf16.gmra.mrb[56].mxu0 %v4672_v34  ;;  %v4560_v40 = vmax.f32 %v7285_v56, 0.0 }
 0x4cd   : > { %v7288_v44 = vadd.f32 %v4289_v14, %v10969_v10  ;;  %v4561_v41 = vmax.f32 %v7286_v46, 0.0 }
 0x4ce   : > { %v4562_v6 = vmax.f32 %v7287_v17, 0.0 }
 0x4cf   : > { %v4563_v24 = vmax.f32 %v7288_v44, 0.0 }
 0x4d0   : > { %v4674_v7 = vpack.c.bf16 %v4562_v6, %v4560_v40 }
 0x4d1   : > { %v4675_v21 = vpack.c.bf16 %v4563_v24, %v4561_v41  ;;  %v4293_v8 = vpop.f32.mrb[192].mxu1 }
 0x4d2   : > { %v7289_v51 = vadd.f32 %v4293_v8, %v10964_v48  ;;  %v4295_v53 = vpop.f32.mrb[193].mxu1 }
 0x4d3   : > { %v7290_v3 = vadd.f32 %v4295_v53, %v10969_v10  ;;  %v4297_v2 = vpop.f32.mrb[194].mxu1  ;;  %4947 = vmatprep.mubr.bf16.mxu0 %v4675_v21 }
 0x4d4   : > { %v7291_v45 = vadd.f32 %v4297_v2, %v10964_v48  ;;  %v4299_v12 = vpop.f32.mrb[195].mxu1  ;;  %4948 = vmatmul.mubr.bf16.gmra.mrb[60].mxu0 %v4674_v7  ;;  %v4564_v30 = vmax.f32 %v7289_v51, 0.0 }
 0x4d5   : > { %v7292_v23 = vadd.f32 %v4299_v12, %v10969_v10  ;;  %v4565_v57 = vmax.f32 %v7290_v3, 0.0 }
 0x4d6   : > { %v4566_v31 = vmax.f32 %v7291_v45, 0.0 }
 0x4d7   : > { %v4567_v4 = vmax.f32 %v7292_v23, 0.0 }
 0x4d8   : > { %v4676_v11 = vpack.c.bf16 %v4566_v31, %v4564_v30 }
 0x4d9   : > { %v4677_v0 = vpack.c.bf16 %v4567_v4, %v4565_v57  ;;  %v4303_v58 = vpop.f32.mrb[196].mxu1 }
 0x4da   : > { %v7293_v37 = vadd.f32 %v4303_v58, %v10964_v48  ;;  %v4305_v13 = vpop.f32.mrb[197].mxu1 }
 0x4db   : > { %v7294_v20 = vadd.f32 %v4305_v13, %v10969_v10  ;;  %v4307_v38 = vpop.f32.mrb[198].mxu1  ;;  %4955 = vmatprep.mubr.bf16.mxu0 %v4677_v0 }
 0x4dc   : > { %v7295_v29 = vadd.f32 %v4307_v38, %v10964_v48  ;;  %v4309_v19 = vpop.f32.mrb[199].mxu1  ;;  %4956 = vmatmul.mubr.bf16.gmra.mrb[64].mxu0 %v4676_v11  ;;  %v4568_v49 = vmax.f32 %v7293_v37, 0.0 }
 0x4dd   : > { %v7296_v63 = vadd.f32 %v4309_v19, %v10969_v10  ;;  %v4569_v32 = vmax.f32 %v7294_v20, 0.0 }
 0x4de   : > { %v4570_v1 = vmax.f32 %v7295_v29, 0.0 }
 0x4df   : > { %v4571_v42 = vmax.f32 %v7296_v63, 0.0 }
 0x4e0   : > { %v4678_v36 = vpack.c.bf16 %v4570_v1, %v4568_v49 }
 0x4e1   : > { %v4679_v50 = vpack.c.bf16 %v4571_v42, %v4569_v32  ;;  %v4313_v55 = vpop.f32.mrb[200].mxu1 }
 0x4e2   : > { %v7297_v61 = vadd.f32 %v4313_v55, %v10964_v48  ;;  %v4315_v39 = vpop.f32.mrb[201].mxu1 }
 0x4e3   : > { %v7298_v5 = vadd.f32 %v4315_v39, %v10969_v10  ;;  %v4317_v59 = vpop.f32.mrb[202].mxu1  ;;  %4963 = vmatprep.mubr.bf16.mxu0 %v4679_v50 }
 0x4e4   : > { %v7299_v33 = vadd.f32 %v4317_v59, %v10964_v48  ;;  %v4319_v16 = vpop.f32.mrb[203].mxu1  ;;  %4964 = vmatmul.mubr.bf16.gmra.mrb[68].mxu0 %v4678_v36  ;;  %v4572_v60 = vmax.f32 %v7297_v61, 0.0 }
 0x4e5   : > { %v7300_v15 = vadd.f32 %v4319_v16, %v10969_v10  ;;  %v4573_v43 = vmax.f32 %v7298_v5, 0.0 }
 0x4e6   : > { %v4574_v22 = vmax.f32 %v7299_v33, 0.0 }
 0x4e7   : > { %v4575_v47 = vmax.f32 %v7300_v15, 0.0 }
 0x4e8   : > { %v4680_v28 = vpack.c.bf16 %v4574_v22, %v4572_v60 }
 0x4e9   : > { %v4681_v18 = vpack.c.bf16 %v4575_v47, %v4573_v43  ;;  %v4323_v52 = vpop.f32.mrb[204].mxu1 }
 0x4ea   : > { %v7301_v54 = vadd.f32 %v4323_v52, %v10964_v48  ;;  %v4325_v26 = vpop.f32.mrb[205].mxu1 }
 0x4eb   : > { %v7302_v9 = vadd.f32 %v4325_v26, %v10969_v10  ;;  %v4327_v34 = vpop.f32.mrb[206].mxu1  ;;  %4971 = vmatprep.mubr.bf16.mxu0 %v4681_v18 }
 0x4ec   : > { %v7303_v27 = vadd.f32 %v4327_v34, %v10964_v48  ;;  %v4329_v25 = vpop.f32.mrb[207].mxu1  ;;  %4972 = vmatmul.mubr.bf16.gmra.mrb[72].mxu0 %v4680_v28  ;;  %v4576_v62 = vmax.f32 %v7301_v54, 0.0 }
 0x4ed   : > { %v7304_v56 = vadd.f32 %v4329_v25, %v10969_v10  ;;  %v4577_v35 = vmax.f32 %v7302_v9, 0.0 }
 0x4ee   : > { %v4578_v46 = vmax.f32 %v7303_v27, 0.0 }
 0x4ef   : > { %v4579_v17 = vmax.f32 %v7304_v56, 0.0 }
 0x4f0   : > { %v4682_v14 = vpack.c.bf16 %v4578_v46, %v4576_v62 }
 0x4f1   : > { %v4683_v44 = vpack.c.bf16 %v4579_v17, %v4577_v35  ;;  %v4333_v40 = vpop.f32.mrb[208].mxu1 }
 0x4f2   : > { %v7305_v6 = vadd.f32 %v4333_v40, %v10964_v48  ;;  %v4335_v41 = vpop.f32.mrb[209].mxu1 }
 0x4f3   : > { %v7306_v24 = vadd.f32 %v4335_v41, %v10969_v10  ;;  %v4337_v7 = vpop.f32.mrb[210].mxu1  ;;  %4979 = vmatprep.mubr.bf16.mxu0 %v4683_v44 }
 0x4f4   : > { %v7307_v21 = vadd.f32 %v4337_v7, %v10964_v48  ;;  %v4339_v8 = vpop.f32.mrb[211].mxu1  ;;  %4980 = vmatmul.mubr.bf16.gmra.mrb[76].mxu0 %v4682_v14  ;;  %v4580_v53 = vmax.f32 %v7305_v6, 0.0 }
 0x4f5   : > { %v7308_v51 = vadd.f32 %v4339_v8, %v10969_v10  ;;  %v4581_v2 = vmax.f32 %v7306_v24, 0.0 }
 0x4f6   : > { %v4582_v3 = vmax.f32 %v7307_v21, 0.0 }
 0x4f7   : > { %v4583_v45 = vmax.f32 %v7308_v51, 0.0 }
 0x4f8   : > { %v4684_v12 = vpack.c.bf16 %v4582_v3, %v4580_v53 }
 0x4f9   : > { %v4685_v23 = vpack.c.bf16 %v4583_v45, %v4581_v2  ;;  %v4343_v30 = vpop.f32.mrb[212].mxu1 }
 0x4fa   : > { %v7309_v31 = vadd.f32 %v4343_v30, %v10964_v48  ;;  %v4345_v57 = vpop.f32.mrb[213].mxu1 }
 0x4fb   : > { %v7310_v4 = vadd.f32 %v4345_v57, %v10969_v10  ;;  %v4347_v11 = vpop.f32.mrb[214].mxu1  ;;  %4987 = vmatprep.mubr.bf16.mxu0 %v4685_v23 }
 0x4fc   : > { %v7311_v0 = vadd.f32 %v4347_v11, %v10964_v48  ;;  %v4349_v58 = vpop.f32.mrb[215].mxu1  ;;  %4988 = vmatmul.mubr.bf16.gmra.mrb[80].mxu0 %v4684_v12  ;;  %v4584_v13 = vmax.f32 %v7309_v31, 0.0 }
 0x4fd   : > { %v7312_v37 = vadd.f32 %v4349_v58, %v10969_v10  ;;  %v4585_v38 = vmax.f32 %v7310_v4, 0.0 }
 0x4fe   : > { %v4586_v20 = vmax.f32 %v7311_v0, 0.0 }
 0x4ff   : > { %v4587_v29 = vmax.f32 %v7312_v37, 0.0 }
 0x500   : > { %v4686_v19 = vpack.c.bf16 %v4586_v20, %v4584_v13 }
 0x501   : > { %v4687_v63 = vpack.c.bf16 %v4587_v29, %v4585_v38  ;;  %v4353_v49 = vpop.f32.mrb[216].mxu1 }
 0x502   : > { %v7313_v1 = vadd.f32 %v4353_v49, %v10964_v48  ;;  %v4355_v32 = vpop.f32.mrb[217].mxu1 }
 0x503   : > { %v7314_v42 = vadd.f32 %v4355_v32, %v10969_v10  ;;  %v4357_v36 = vpop.f32.mrb[218].mxu1  ;;  %4995 = vmatprep.mubr.bf16.mxu0 %v4687_v63 }
 0x504   : > { %v7315_v50 = vadd.f32 %v4357_v36, %v10964_v48  ;;  %v4359_v55 = vpop.f32.mrb[219].mxu1  ;;  %4996 = vmatmul.mubr.bf16.gmra.mrb[84].mxu0 %v4686_v19  ;;  %v4588_v39 = vmax.f32 %v7313_v1, 0.0 }
 0x505   : > { %v7316_v61 = vadd.f32 %v4359_v55, %v10969_v10  ;;  %v4589_v59 = vmax.f32 %v7314_v42, 0.0 }
 0x506   : > { %v4590_v5 = vmax.f32 %v7315_v50, 0.0 }
 0x507   : > { %v4591_v33 = vmax.f32 %v7316_v61, 0.0 }
 0x508   : > { %v4688_v16 = vpack.c.bf16 %v4590_v5, %v4588_v39 }
 0x509   : > { %v4689_v15 = vpack.c.bf16 %v4591_v33, %v4589_v59  ;;  %v4363_v60 = vpop.f32.mrb[220].mxu1 }
 0x50a   : > { %v7317_v22 = vadd.f32 %v4363_v60, %v10964_v48  ;;  %v4365_v43 = vpop.f32.mrb[221].mxu1 }
 0x50b   : > { %v7318_v47 = vadd.f32 %v4365_v43, %v10969_v10  ;;  %v4367_v28 = vpop.f32.mrb[222].mxu1  ;;  %5003 = vmatprep.mubr.bf16.mxu0 %v4689_v15 }
 0x50c   : > { %v7319_v18 = vadd.f32 %v4367_v28, %v10964_v48  ;;  %v4369_v52 = vpop.f32.mrb[223].mxu1  ;;  %5004 = vmatmul.mubr.bf16.gmra.mrb[88].mxu0 %v4688_v16  ;;  %v4592_v26 = vmax.f32 %v7317_v22, 0.0 }
 0x50d   : > { %v7320_v54 = vadd.f32 %v4369_v52, %v10969_v10  ;;  %v4593_v34 = vmax.f32 %v7318_v47, 0.0 }
 0x50e   : > { %v4594_v9 = vmax.f32 %v7319_v18, 0.0 }
 0x50f   : > { %v4595_v27 = vmax.f32 %v7320_v54, 0.0 }
 0x510   : > { %v4690_v25 = vpack.c.bf16 %v4594_v9, %v4592_v26 }
 0x511   : > { %v4691_v56 = vpack.c.bf16 %v4595_v27, %v4593_v34  ;;  %v4373_v62 = vpop.f32.mrb[224].mxu1 }
 0x512   : > { %v7321_v46 = vadd.f32 %v4373_v62, %v10964_v48  ;;  %v4375_v35 = vpop.f32.mrb[225].mxu1 }
 0x513   : > { %v7322_v17 = vadd.f32 %v4375_v35, %v10969_v10  ;;  %v4377_v14 = vpop.f32.mrb[226].mxu1  ;;  %5011 = vmatprep.mubr.bf16.mxu0 %v4691_v56 }
 0x514   : > { %v7323_v44 = vadd.f32 %v4377_v14, %v10964_v48  ;;  %v4379_v40 = vpop.f32.mrb[227].mxu1  ;;  %5012 = vmatmul.mubr.bf16.gmra.mrb[92].mxu0 %v4690_v25  ;;  %v4596_v41 = vmax.f32 %v7321_v46, 0.0 }
 0x515   : > { %v7324_v6 = vadd.f32 %v4379_v40, %v10969_v10  ;;  %v4597_v7 = vmax.f32 %v7322_v17, 0.0 }
 0x516   : > { %v4598_v24 = vmax.f32 %v7323_v44, 0.0 }
 0x517   : > { %v4599_v21 = vmax.f32 %v7324_v6, 0.0 }
 0x518   : > { %v4692_v8 = vpack.c.bf16 %v4598_v24, %v4596_v41 }
 0x519   : > { %v4693_v51 = vpack.c.bf16 %v4599_v21, %v4597_v7  ;;  %v4383_v53 = vpop.f32.mrb[228].mxu1 }
 0x51a   : > { %v7325_v3 = vadd.f32 %v4383_v53, %v10964_v48  ;;  %v4385_v2 = vpop.f32.mrb[229].mxu1 }
 0x51b   : > { %v7326_v45 = vadd.f32 %v4385_v2, %v10969_v10  ;;  %v4387_v12 = vpop.f32.mrb[230].mxu1  ;;  %5019 = vmatprep.mubr.bf16.mxu0 %v4693_v51 }
 0x51c   : > { %v7327_v23 = vadd.f32 %v4387_v12, %v10964_v48  ;;  %v4389_v30 = vpop.f32.mrb[231].mxu1  ;;  %5020 = vmatmul.mubr.bf16.gmra.mrb[96].mxu0 %v4692_v8  ;;  %v4600_v57 = vmax.f32 %v7325_v3, 0.0  ;;  %v11068_v12 = vpop.xlane.xlu0 %5284 }
 0x51d   : > { %v7328_v31 = vadd.f32 %v4389_v30, %v10969_v10  ;;  %v4601_v11 = vmax.f32 %v7326_v45, 0.0 }
 0x51e   : > { %v4602_v4 = vmax.f32 %v7327_v23, 0.0 }
 0x51f   : > { %v4603_v0 = vmax.f32 %v7328_v31, 0.0 }
 0x520   : > { %v4694_v58 = vpack.c.bf16 %v4602_v4, %v4600_v57 }
 0x521   : > { %v4695_v37 = vpack.c.bf16 %v4603_v0, %v4601_v11  ;;  %v4393_v13 = vpop.f32.mrb[232].mxu1  ;;  %v11070_v11 = vpop.xlane.xlu1 %5290 }
 0x522   : > { %v7329_v20 = vadd.f32 %v4393_v13, %v10964_v48  ;;  %v4395_v38 = vpop.f32.mrb[233].mxu1 }
 0x523   : > { %v7330_v29 = vadd.f32 %v4395_v38, %v10969_v10  ;;  %v4397_v19 = vpop.f32.mrb[234].mxu1  ;;  %5027 = vmatprep.mubr.bf16.mxu0 %v4695_v37 }
 0x524   : > { %v7331_v63 = vadd.f32 %v4397_v19, %v10964_v48  ;;  %v4399_v49 = vpop.f32.mrb[235].mxu1  ;;  %5028 = vmatmul.mubr.bf16.gmra.mrb[100].mxu0 %v4694_v58  ;;  %v4604_v32 = vmax.f32 %v7329_v20, 0.0 }
 0x525   : > { %v7332_v1 = vadd.f32 %v4399_v49, %v10969_v10  ;;  %v4605_v36 = vmax.f32 %v7330_v29, 0.0  ;;  %v11075_v29 = vpop.xlane.xlu0 %5287 }
 0x526   : > { %v4606_v42 = vmax.f32 %v7331_v63, 0.0 }
 0x527   : > { %v4607_v50 = vmax.f32 %v7332_v1, 0.0 }
 0x528   : > { %v4696_v55 = vpack.c.bf16 %v4606_v42, %v4604_v32  ;;  %v11078_v42 = vpop.xlane.xlu1 %5293 }
 0x529   : > { %v4697_v61 = vpack.c.bf16 %v4607_v50, %v4605_v36  ;;  %v4403_v39 = vpop.f32.mrb[236].mxu1 }
 0x52a   : > { %v7333_v5 = vadd.f32 %v4403_v39, %v10964_v48  ;;  %v4405_v59 = vpop.f32.mrb[237].mxu1 }
 0x52b   : > { %v7334_v33 = vadd.f32 %v4405_v59, %v10969_v10  ;;  %v4407_v16 = vpop.f32.mrb[238].mxu1  ;;  %5035 = vmatprep.mubr.bf16.mxu0 %v4697_v61 }
 0x52c   : > { %v7335_v15 = vadd.f32 %v4407_v16, %v10964_v48  ;;  %v4409_v60 = vpop.f32.mrb[239].mxu1  ;;  %5036 = vmatmul.mubr.bf16.gmra.mrb[104].mxu0 %v4696_v55  ;;  %v4608_v43 = vmax.f32 %v7333_v5, 0.0  ;;  %v11081_v5 = vpop.xlane.xlu0 %5302 }
 0x52d   : > { %v7336_v22 = vadd.f32 %v4409_v60, %v10969_v10  ;;  %v4609_v28 = vmax.f32 %v7334_v33, 0.0  ;;  %v11084_v16 = vpop.xlane.xlu1 %5305 }
 0x52e   : > { %v4610_v47 = vmax.f32 %v7335_v15, 0.0 }
 0x52f   : > { %v4611_v18 = vmax.f32 %v7336_v22, 0.0 }
 0x530   : > { %v4698_v52 = vpack.c.bf16 %v4610_v47, %v4608_v43 }
 0x531   : > { %v4699_v54 = vpack.c.bf16 %v4611_v18, %v4609_v28  ;;  %v4413_v26 = vpop.f32.mrb[240].mxu1 }
 0x532   : > { %v7337_v9 = vadd.f32 %v4413_v26, %v10964_v48  ;;  %v4415_v34 = vpop.f32.mrb[241].mxu1 }
 0x533   : > { %v7338_v27 = vadd.f32 %v4415_v34, %v10969_v10  ;;  %v4417_v25 = vpop.f32.mrb[242].mxu1  ;;  %5043 = vmatprep.mubr.bf16.mxu0 %v4699_v54  ;;  %v11088_v54 = vpop.xlane.xlu0 %5296 }
 0x534   : > { %v7339_v56 = vadd.f32 %v4417_v25, %v10964_v48  ;;  %v4419_v62 = vpop.f32.mrb[243].mxu1  ;;  %5044 = vmatmul.mubr.bf16.gmra.mrb[108].mxu0 %v4698_v52  ;;  %v4612_v35 = vmax.f32 %v7337_v9, 0.0  ;;  %v11090_v34 = vpop.xlane.xlu1 %5299 }
 0x535   : > { %v7340_v46 = vadd.f32 %v4419_v62, %v10969_v10  ;;  %v4613_v14 = vmax.f32 %v7338_v27, 0.0 }
 0x536   : > { %v4614_v17 = vmax.f32 %v7339_v56, 0.0 }
 0x537   : > { %v4615_v44 = vmax.f32 %v7340_v46, 0.0 }
 0x538   : > { %v4700_v40 = vpack.c.bf16 %v4614_v17, %v4612_v35 }
 0x539   : > { %v4701_v6 = vpack.c.bf16 %v4615_v44, %v4613_v14  ;;  %v4423_v41 = vpop.f32.mrb[244].mxu1 }
 0x53a   : > { %v7341_v24 = vadd.f32 %v4423_v41, %v10964_v48  ;;  %v4425_v7 = vpop.f32.mrb[245].mxu1 }
 0x53b   : > { %v7342_v21 = vadd.f32 %v4425_v7, %v10969_v10  ;;  %v4427_v8 = vpop.f32.mrb[246].mxu1  ;;  %5051 = vmatprep.mubr.bf16.mxu0 %v4701_v6 }
 0x53c   : > { %v7343_v51 = vadd.f32 %v4427_v8, %v10964_v48  ;;  %v4429_v53 = vpop.f32.mrb[247].mxu1  ;;  %5052 = vmatmul.mubr.bf16.gmra.mrb[112].mxu0 %v4700_v40  ;;  %v4616_v2 = vmax.f32 %v7341_v24, 0.0  ;;  %v11096_v40 = vpop.xlane.xlu0 %5314 }
 0x53d   : > { %v7344_v3 = vadd.f32 %v4429_v53, %v10969_v10  ;;  %v4617_v23 = vmax.f32 %v7342_v21, 0.0  ;;  %v11098_v24 = vpop.xlane.xlu1 %5317 }
 0x53e   : > { %v4618_v45 = vmax.f32 %v7343_v51, 0.0 }
 0x53f   : > { %v4619_v30 = vmax.f32 %v7344_v3, 0.0 }
 0x540   : > { %v4702_v31 = vpack.c.bf16 %v4618_v45, %v4616_v2 }
 0x541   : > { %v4703_v57 = vpack.c.bf16 %v4619_v30, %v4617_v23  ;;  %v4433_v4 = vpop.f32.mrb[248].mxu1  ;;  %v11103_v30 = vpop.xlane.xlu0 %5308 }
 0x542   : > { %v7345_v0 = vadd.f32 %v4433_v4, %v10964_v48  ;;  %v4435_v58 = vpop.f32.mrb[249].mxu1 }
 0x543   : > { %v7346_v37 = vadd.f32 %v4435_v58, %v10969_v10  ;;  %v4437_v13 = vpop.f32.mrb[250].mxu1  ;;  %5059 = vmatprep.mubr.bf16.mxu0 %v4703_v57  ;;  %v11106_v57 = vpop.xlane.xlu1 %5311 }
 0x544   : > { %v7347_v20 = vadd.f32 %v4437_v13, %v10964_v48  ;;  %v4439_v38 = vpop.f32.mrb[251].mxu1  ;;  %5060 = vmatmul.mubr.bf16.gmra.mrb[116].mxu0 %v4702_v31  ;;  %v4620_v63 = vmax.f32 %v7345_v0, 0.0 }
 0x545   : > { %v7348_v19 = vadd.f32 %v4439_v38, %v10969_v10  ;;  %v4621_v1 = vmax.f32 %v7346_v37, 0.0 }
 0x546   : > { %v4622_v49 = vmax.f32 %v7347_v20, 0.0 }
 0x547   : > { %v4623_v32 = vmax.f32 %v7348_v19, 0.0 }
 0x548   : > { %v4704_v36 = vpack.c.bf16 %v4622_v49, %v4620_v63  ;;  %v11109_v49 = vpop.xlane.xlu0 %5326 }
 0x549   : > { %v4705_v50 = vpack.c.bf16 %v4623_v32, %v4621_v1  ;;  %v4443_v55 = vpop.f32.mrb[252].mxu1 }
 0x54a   : > { %v7349_v61 = vadd.f32 %v4443_v55, %v10964_v48  ;;  %v4445_v39 = vpop.f32.mrb[253].mxu1 }
 0x54b   : > { %v7350_v59 = vadd.f32 %v4445_v39, %v10969_v10  ;;  %v4447_v33 = vpop.f32.mrb[254].mxu1  ;;  %5067 = vmatprep.mubr.bf16.mxu0 %v4705_v50 }
 0x54c   : > { %v7351_v15 = vadd.f32 %v4447_v33, %v10964_v48  ;;  %v4449_v60 = vpop.f32.mrb[255].mxu1  ;;  %5068 = vmatmul.mubr.bf16.gmra.mrb[120].mxu0 %v4704_v36  ;;  %v4624_v43 = vmax.f32 %v7349_v61, 0.0  ;;  %v11112_v36 = vpop.xlane.xlu1 %5329 }
 0x54d   : > { %v7352_v22 = vadd.f32 %v4449_v60, %v10969_v10  ;;  %v4625_v28 = vmax.f32 %v7350_v59, 0.0 }
 0x54e   : > { %v4626_v47 = vmax.f32 %v7351_v15, 0.0 }
 0x54f   : > { %v4627_v18 = vmax.f32 %v7352_v22, 0.0  ;;  %v11116_v22 = vpop.xlane.xlu0 %5320 }
 0x550   : > { %v4706_v52 = vpack.c.bf16 %v4626_v47, %v4624_v43 }
 0x551   : > { %v4707_v26 = vpack.c.bf16 %v4627_v18, %v4625_v28  ;;  %v4453_v9 = vpop.f32.mrb[0].mxu1  ;;  %v11118_v28 = vpop.xlane.xlu1 %5323 }
 0x552   : > { %v7353_v27 = vadd.f32 %v4453_v9, %v10964_v48  ;;  %v4455_v25 = vpop.f32.mrb[1].mxu1 }
 0x553   : > { %v7354_v56 = vadd.f32 %v4455_v25, %v10969_v10  ;;  %v4457_v62 = vpop.f32.mrb[2].mxu1  ;;  %5075 = vmatprep.mubr.bf16.mxu0 %v4707_v26 }
 0x554   : > { %v7355_v46 = vadd.f32 %v4457_v62, %v10964_v48  ;;  %v4459_v35 = vpop.f32.mrb[3].mxu1  ;;  %5076 = vmatmul.mubr.bf16.gmra.mrb[124].mxu0 %v4706_v52  ;;  %v4628_v14 = vmax.f32 %v7353_v27, 0.0  ;;  %v11127_v62 = vld [vmem:[%s11859_s8] ss:$0 sm:$0xff] }
 0x555   : > { %v7356_v17 = vadd.f32 %v4459_v35, %v10969_v10  ;;  %v4629_v6 = vmax.f32 %v7354_v56, 0.0 }
 0x556   : > { %v4630_v44 = vmax.f32 %v7355_v46, 0.0 }
 0x557   : > { %v4631_v41 = vmax.f32 %v7356_v17, 0.0  ;;  %v11129_v17 = vpop.xlane.xlu0 %5338 }
 0x558   : > { %v4708_v7 = vpack.c.bf16 %v4630_v44, %v4628_v14 }
 0x559   : > { %v4709_v21 = vpack.c.bf16 %v4631_v41, %v4629_v6  ;;  %v4463_v8 = vpop.f32.mrb[4].mxu1  ;;  %v11131_v41 = vpop.xlane.xlu1 %5341 }
 0x55a   : > { %v7357_v51 = vadd.f32 %v4463_v8, %v10964_v48  ;;  %v4465_v53 = vpop.f32.mrb[5].mxu1 }
 0x55b   : > { %v7358_v3 = vadd.f32 %v4465_v53, %v10969_v10  ;;  %v4467_v2 = vpop.f32.mrb[6].mxu1  ;;  %5083 = vmatprep.mubr.bf16.mxu0 %v4709_v21 }
 0x55c   : > { %v7359_v45 = vadd.f32 %v4467_v2, %v10964_v48  ;;  %v4469_v23 = vpop.f32.mrb[7].mxu1  ;;  %5084 = vmatmul.mubr.bf16.gmra.mrb[128].mxu0 %v4708_v7  ;;  %v4632_v4 = vmax.f32 %v7357_v51, 0.0  ;;  %v11137_v2 = vld [vmem:[%s11861_s10] ss:$0 sm:$0xff] }
 0x55d   : > { %v7360_v31 = vadd.f32 %v4469_v23, %v10969_v10  ;;  %v4633_v58 = vmax.f32 %v7358_v3, 0.0 }
 0x55e   : > { %v4634_v0 = vmax.f32 %v7359_v45, 0.0 }
 0x55f   : > { %v4635_v37 = vmax.f32 %v7360_v31, 0.0 }
 0x560   : > { %v4710_v13 = vpack.c.bf16 %v4634_v0, %v4632_v4 }
 0x561   : > { %v4711_v20 = vpack.c.bf16 %v4635_v37, %v4633_v58  ;;  %v4473_v38 = vpop.f32.mrb[8].mxu1 }
 0x562   : > { %v7361_v19 = vadd.f32 %v4473_v38, %v10964_v48  ;;  %v4475_v63 = vpop.f32.mrb[9].mxu1 }
 0x563   : > { %v7362_v1 = vadd.f32 %v4475_v63, %v10969_v10  ;;  %v4477_v32 = vpop.f32.mrb[10].mxu1  ;;  %5091 = vmatprep.mubr.bf16.mxu0 %v4711_v20 }
 0x564   : > { %v7363_v50 = vadd.f32 %v4477_v32, %v10964_v48  ;;  %v4479_v55 = vpop.f32.mrb[11].mxu1  ;;  %5092 = vmatmul.mubr.bf16.gmra.mrb[132].mxu0 %v4710_v13  ;;  %v4636_v39 = vmax.f32 %v7361_v19, 0.0 }
 0x565   : > { %v7364_v61 = vadd.f32 %v4479_v55, %v10969_v10  ;;  %v4637_v33 = vmax.f32 %v7362_v1, 0.0  ;;  %v11146_v55 = vpop.xlane.xlu0 %5332 }
 0x566   : > { %v4638_v59 = vmax.f32 %v7363_v50, 0.0 }
 0x567   : > { %v4639_v15 = vmax.f32 %v7364_v61, 0.0 }
 0x568   : > { %v4712_v60 = vpack.c.bf16 %v4638_v59, %v4636_v39 }
 0x569   : > { %v4713_v43 = vpack.c.bf16 %v4639_v15, %v4637_v33  ;;  %v4483_v47 = vpop.f32.mrb[12].mxu1  ;;  %v11148_v33 = vpop.xlane.xlu1 %5335 }
 0x56a   : > { %v7365_v18 = vadd.f32 %v4483_v47, %v10964_v48  ;;  %v4485_v52 = vpop.f32.mrb[13].mxu1 }
 0x56b   : > { %v7366_v26 = vadd.f32 %v4485_v52, %v10969_v10  ;;  %v4487_v9 = vpop.f32.mrb[14].mxu1  ;;  %5099 = vmatprep.mubr.bf16.mxu0 %v4713_v43 }
 0x56c   : > { %v7367_v27 = vadd.f32 %v4487_v9, %v10964_v48  ;;  %v4489_v25 = vpop.f32.mrb[15].mxu1  ;;  %5100 = vmatmul.mubr.bf16.gmra.mrb[136].mxu0 %v4712_v60  ;;  %v4640_v46 = vmax.f32 %v7365_v18, 0.0 }
 0x56d   : > { %v7368_v56 = vadd.f32 %v4489_v25, %v10969_v10  ;;  %v4641_v14 = vmax.f32 %v7366_v26, 0.0 }
 0x56e   : > { %v4642_v35 = vmax.f32 %v7367_v27, 0.0 }
 0x56f   : > { %v4643_v44 = vmax.f32 %v7368_v56, 0.0  ;;  %v4893_v6 = vpop.f32.mrb[32].mxu0 }
 0x570   : > { %v4714_v7 = vpack.c.bf16 %v4642_v35, %v4640_v46  ;;  %v4894_v21 = vadd.f32 %v11127_v62, %v4893_v6  ;;  %v4895_v8 = vpop.f32.mrb[33].mxu0 }
 0x571   : > { %v4715_v51 = vpack.c.bf16 %v4643_v44, %v4641_v14  ;;  %v4493_v53 = vpop.f32.mrb[16].mxu1  ;;  %v4896_v3 = vpop.f32.mrb[34].mxu0 }
 0x572   : > { %v5148_v45 = vmax.f32 %v4894_v21, 0.0  ;;  %v7369_v23 = vadd.f32 %v4493_v53, %v10964_v48  ;;  %v4897_v31 = vadd.f32 %v11127_v62, %v4896_v3  ;;  %v4495_v4 = vpop.f32.mrb[17].mxu1  ;;  %v4898_v0 = vpop.f32.mrb[35].mxu0 }
 0x573   : > { %v7370_v58 = vadd.f32 %v4495_v4, %v10969_v10  ;;  %v4497_v37 = vpop.f32.mrb[18].mxu1  ;;  %5107 = vmatprep.mubr.bf16.mxu0 %v4715_v51  ;;  %v11158_v3 = vpop.xlane.xlu0 %5350 }
 0x574   : > { %v5149_v13 = vmax.f32 %v4897_v31, 0.0  ;;  %v7371_v20 = vadd.f32 %v4497_v37, %v10964_v48  ;;  %v4499_v38 = vpop.f32.mrb[19].mxu1  ;;  %5108 = vmatmul.mubr.bf16.gmra.mrb[140].mxu0 %v4714_v7  ;;  %v5482_v19 = vmul.f32 %v11137_v2, %v5148_v45  ;;  %v4644_v1 = vmax.f32 %v7369_v23, 0.0  ;;  %v11160_v4 = vpop.xlane.xlu1 %5353 }
 0x575   : > { %v7372_v63 = vadd.f32 %v4499_v38, %v10969_v10  ;;  %v4645_v61 = vmax.f32 %v7370_v58, 0.0 }
 0x576   : > { %v4646_v32 = vmax.f32 %v7371_v20, 0.0  ;;  %5546 = vadd.xlane.f32.xlu0 %v5482_v19  ;;  %v5483_v50 = vmul.f32 %v11137_v2, %v5149_v13 }
 0x577   : > { %v4647_v39 = vmax.f32 %v7372_v63, 0.0  ;;  %v4901_v59 = vpop.f32.mrb[36].mxu0 }
 0x578   : > { %v4716_v15 = vpack.c.bf16 %v4646_v32, %v4644_v1  ;;  %v4902_v60 = vadd.f32 %v11127_v62, %v4901_v59  ;;  %v4903_v43 = vpop.f32.mrb[37].mxu0  ;;  %5548 = vadd.xlane.f32.xlu1 %v5483_v50 }
 0x579   : > { %v4717_v47 = vpack.c.bf16 %v4647_v39, %v4645_v61  ;;  %v4503_v18 = vpop.f32.mrb[20].mxu1  ;;  %v4904_v52 = vpop.f32.mrb[38].mxu0 }
 0x57a   : > { %v5150_v26 = vmax.f32 %v4902_v60, 0.0  ;;  %v7373_v9 = vadd.f32 %v4503_v18, %v10964_v48  ;;  %v4905_v27 = vadd.f32 %v11127_v62, %v4904_v52  ;;  %v4505_v25 = vpop.f32.mrb[21].mxu1  ;;  %v4906_v56 = vpop.f32.mrb[39].mxu0 }
 0x57b   : > { %v7374_v46 = vadd.f32 %v4505_v25, %v10969_v10  ;;  %v4507_v35 = vpop.f32.mrb[22].mxu1  ;;  %5115 = vmatprep.mubr.bf16.mxu0 %v4717_v47 }
 0x57c   : > { %v5151_v14 = vmax.f32 %v4905_v27, 0.0  ;;  %v7375_v44 = vadd.f32 %v4507_v35, %v10964_v48  ;;  %v4509_v6 = vpop.f32.mrb[23].mxu1  ;;  %5116 = vmatmul.mubr.bf16.gmra.mrb[144].mxu0 %v4716_v15  ;;  %v5484_v7 = vmul.f32 %v11137_v2, %v5150_v26  ;;  %v4648_v8 = vmax.f32 %v7373_v9, 0.0  ;;  %v11170_v9 = vpop.xlane.xlu0 %5344 }
 0x57d   : > { %v7376_v21 = vadd.f32 %v4509_v6, %v10969_v10  ;;  %v4649_v45 = vmax.f32 %v7374_v46, 0.0  ;;  %v11172_v46 = vpop.xlane.xlu1 %5347 }
 0x57e   : > { %v4650_v51 = vmax.f32 %v7375_v44, 0.0  ;;  %5550 = vadd.xlane.f32.xlu0 %v5484_v7  ;;  %v5485_v53 = vmul.f32 %v11137_v2, %v5151_v14 }
 0x57f   : > { %v4651_v23 = vmax.f32 %v7376_v21, 0.0  ;;  %v4909_v31 = vpop.f32.mrb[40].mxu0 }
 0x580   : > { %v4718_v0 = vpack.c.bf16 %v4650_v51, %v4648_v8  ;;  %v4910_v58 = vadd.f32 %v11127_v62, %v4909_v31  ;;  %v4911_v37 = vpop.f32.mrb[41].mxu0  ;;  %5552 = vadd.xlane.f32.xlu1 %v5485_v53 }
 0x581   : > { %v4719_v13 = vpack.c.bf16 %v4651_v23, %v4649_v45  ;;  %v4513_v20 = vpop.f32.mrb[24].mxu1  ;;  %v4912_v38 = vpop.f32.mrb[42].mxu0 }
 0x582   : > { %v5152_v19 = vmax.f32 %v4910_v58, 0.0  ;;  %v7377_v63 = vadd.f32 %v4513_v20, %v10964_v48  ;;  %v4913_v1 = vadd.f32 %v11127_v62, %v4912_v38  ;;  %v4515_v32 = vpop.f32.mrb[25].mxu1  ;;  %v4914_v50 = vpop.f32.mrb[43].mxu0 }
 0x583   : > { %v7378_v61 = vadd.f32 %v4515_v32, %v10969_v10  ;;  %v4517_v39 = vpop.f32.mrb[26].mxu1  ;;  %5123 = vmatprep.mubr.bf16.mxu0 %v4719_v13  ;;  %v11180_v38 = vpop.xlane.xlu0 %5362 }
 0x584   : > { %v5153_v59 = vmax.f32 %v4913_v1, 0.0  ;;  %v7379_v15 = vadd.f32 %v4517_v39, %v10964_v48  ;;  %v4519_v60 = vpop.f32.mrb[27].mxu1  ;;  %5124 = vmatmul.mubr.bf16.gmra.mrb[148].mxu0 %v4718_v0  ;;  %v5486_v43 = vmul.f32 %v11137_v2, %v5152_v19  ;;  %v4652_v18 = vmax.f32 %v7377_v63, 0.0  ;;  %v11184_v50 = vpop.xlane.xlu1 %5365 }
 0x585   : > { %v7380_v47 = vadd.f32 %v4519_v60, %v10969_v10  ;;  %v4653_v27 = vmax.f32 %v7378_v61, 0.0 }
 0x586   : > { %v4654_v52 = vmax.f32 %v7379_v15, 0.0  ;;  %5554 = vadd.xlane.f32.xlu0 %v5486_v43  ;;  %v5487_v26 = vmul.f32 %v11137_v2, %v5153_v59 }
 0x587   : > { %v4655_v25 = vmax.f32 %v7380_v47, 0.0  ;;  %v4917_v56 = vpop.f32.mrb[44].mxu0 }
 0x588   : > { %v4720_v35 = vpack.c.bf16 %v4654_v52, %v4652_v18  ;;  %v4918_v14 = vadd.f32 %v11127_v62, %v4917_v56  ;;  %v4919_v44 = vpop.f32.mrb[45].mxu0  ;;  %5556 = vadd.xlane.f32.xlu1 %v5487_v26  ;;  %v11188_v26 = vpop.xlane.xlu0 %5356 }
 0x589   : > { %v4721_v6 = vpack.c.bf16 %v4655_v25, %v4653_v27  ;;  %v4523_v7 = vpop.f32.mrb[28].mxu1  ;;  %v4920_v21 = vpop.f32.mrb[46].mxu0 }
 0x58a   : > { %v5154_v8 = vmax.f32 %v4918_v14, 0.0  ;;  %v7381_v51 = vadd.f32 %v4523_v7, %v10964_v48  ;;  %v4921_v53 = vadd.f32 %v11127_v62, %v4920_v21  ;;  %v4525_v45 = vpop.f32.mrb[29].mxu1  ;;  %v4922_v23 = vpop.f32.mrb[47].mxu0 }
 0x58b   : > { %v7382_v31 = vadd.f32 %v4525_v45, %v10969_v10  ;;  %v4527_v0 = vpop.f32.mrb[30].mxu1  ;;  %5131 = vmatprep.mubr.bf16.mxu0 %v4721_v6  ;;  %v11191_v56 = vpop.xlane.xlu1 %5359 }
 0x58c   : > { %v5155_v58 = vmax.f32 %v4921_v53, 0.0  ;;  %v7383_v37 = vadd.f32 %v4527_v0, %v10964_v48  ;;  %v4529_v13 = vpop.f32.mrb[31].mxu1  ;;  %5132 = vmatmul.mubr.bf16.gmra.mrb[152].mxu0 %v4720_v35  ;;  %v5488_v20 = vmul.f32 %v11137_v2, %v5154_v8  ;;  %v4656_v63 = vmax.f32 %v7381_v51, 0.0  ;;  %v11195_v7 = vpop.xlane.xlu0 %5374 }
 0x58d   : > { %v7384_v19 = vadd.f32 %v4529_v13, %v10969_v10  ;;  %v4657_v61 = vmax.f32 %v7382_v31, 0.0 }
 0x58e   : > { %v4658_v1 = vmax.f32 %v7383_v37, 0.0  ;;  %5558 = vadd.xlane.f32.xlu0 %v5488_v20  ;;  %v5489_v32 = vmul.f32 %v11137_v2, %v5155_v58 }
 0x58f   : > { %v4659_v39 = vmax.f32 %v7384_v19, 0.0  ;;  %v4925_v59 = vpop.f32.mrb[48].mxu0  ;;  %v11198_v45 = vpop.xlane.xlu1 %5377 }
 0x590   : > { %v4722_v15 = vpack.c.bf16 %v4658_v1, %v4656_v63  ;;  %v4926_v48 = vadd.f32 %v11127_v62, %v4925_v59  ;;  %v4927_v60 = vpop.f32.mrb[49].mxu0  ;;  %5560 = vadd.xlane.f32.xlu1 %v5489_v32  ;;  %v11202_v58 = vpop.xlane.xlu0 %5368 }
 0x591   : > { %v4723_v43 = vpack.c.bf16 %v4659_v39, %v4657_v61  ;;  %v4928_v47 = vpop.f32.mrb[50].mxu0 }
 0x592   : > { %v5156_v18 = vmax.f32 %v4926_v48, 0.0  ;;  %v4929_v10 = vadd.f32 %v11127_v62, %v4928_v47  ;;  %v4930_v52 = vpop.f32.mrb[51].mxu0 }
 0x593   : > { %5139 = vmatprep.mubr.bf16.mxu0 %v4723_v43  ;;  %v11205_v19 = vpop.xlane.xlu1 %5371 }
 0x594   : > { %v5157_v27 = vmax.f32 %v4929_v10, 0.0  ;;  %5140 = vmatmul.mubr.bf16.gmra.mrb[156].mxu0 %v4722_v15  ;;  %v5490_v25 = vmul.f32 %v11137_v2, %v5156_v18  ;;  %v11209_v15 = vpop.xlane.xlu0 %5386 }
 0x596   : > { %5562 = vadd.xlane.f32.xlu0 %v5490_v25  ;;  %v5491_v35 = vmul.f32 %v11137_v2, %v5157_v27 }
 0x597   : > { %v4933_v14 = vpop.f32.mrb[52].mxu0  ;;  %v11212_v60 = vpop.xlane.xlu1 %5389 }
 0x598   : > { %v4934_v44 = vadd.f32 %v11127_v62, %v4933_v14  ;;  %v4935_v6 = vpop.f32.mrb[53].mxu0  ;;  %5564 = vadd.xlane.f32.xlu1 %v5491_v35  ;;  %v11216_v35 = vpop.xlane.xlu0 %5380 }
 0x599   : > { %v4936_v21 = vpop.f32.mrb[54].mxu0 }
 0x59a   : > { %v5158_v8 = vmax.f32 %v4934_v44, 0.0  ;;  %v4937_v51 = vadd.f32 %v11127_v62, %v4936_v21  ;;  %v4938_v53 = vpop.f32.mrb[55].mxu0 }
 0x59b   : > { %v11219_v6 = vpop.xlane.xlu1 %5383 }
 0x59c   : > { %v5159_v23 = vmax.f32 %v4937_v51, 0.0  ;;  %v5492_v31 = vmul.f32 %v11137_v2, %v5158_v8 }
 0x59e   : > { %5566 = vadd.xlane.f32.xlu0 %v5492_v31  ;;  %v5493_v0 = vmul.f32 %v11137_v2, %v5159_v23  ;;  %v11223_v23 = vpop.xlane.xlu0 %5398 }
 0x59f   : > { %v4941_v37 = vpop.f32.mrb[56].mxu0 }
 0x5a0   : > { %v4942_v13 = vadd.f32 %v11127_v62, %v4941_v37  ;;  %v4943_v20 = vpop.f32.mrb[57].mxu0  ;;  %5568 = vadd.xlane.f32.xlu1 %v5493_v0 }
 0x5a1   : > { %v4944_v63 = vpop.f32.mrb[58].mxu0  ;;  %v11226_v20 = vpop.xlane.xlu1 %5401 }
 0x5a2   : > { %v5160_v1 = vmax.f32 %v4942_v13, 0.0  ;;  %v4945_v32 = vadd.f32 %v11127_v62, %v4944_v63  ;;  %v4946_v61 = vpop.f32.mrb[59].mxu0 }
 0x5a3   : > { %v11230_v61 = vpop.xlane.xlu0 %5392 }
 0x5a4   : > { %v5161_v39 = vmax.f32 %v4945_v32, 0.0  ;;  %v5494_v59 = vmul.f32 %v11137_v2, %v5160_v1 }
 0x5a6   : > { %5570 = vadd.xlane.f32.xlu0 %v5494_v59  ;;  %v5495_v48 = vmul.f32 %v11137_v2, %v5161_v39 }
 0x5a7   : > { %v4949_v43 = vpop.f32.mrb[60].mxu0 }
 0x5a8   : > { %v4950_v47 = vadd.f32 %v11127_v62, %v4949_v43  ;;  %v4951_v18 = vpop.f32.mrb[61].mxu0  ;;  %5572 = vadd.xlane.f32.xlu1 %v5495_v48  ;;  %v11233_v43 = vpop.xlane.xlu1 %5395 }
 0x5a9   : > { %v4952_v10 = vpop.f32.mrb[62].mxu0 }
 0x5aa   : > { %v5162_v52 = vmax.f32 %v4950_v47, 0.0  ;;  %v4953_v27 = vadd.f32 %v11127_v62, %v4952_v10  ;;  %v4954_v25 = vpop.f32.mrb[63].mxu0 }
 0x5ac   : > { %v5163_v14 = vmax.f32 %v4953_v27, 0.0  ;;  %v5496_v44 = vmul.f32 %v11137_v2, %v5162_v52 }
 0x5ae   : > { %5574 = vadd.xlane.f32.xlu0 %v5496_v44  ;;  %v5497_v21 = vmul.f32 %v11137_v2, %v5163_v14  ;;  %v11237_v14 = vpop.xlane.xlu0 %5410 }
 0x5af   : > { %v4957_v8 = vpop.f32.mrb[64].mxu0 }
 0x5b0   : > { %v4958_v51 = vadd.f32 %v11127_v62, %v4957_v8  ;;  %v4959_v53 = vpop.f32.mrb[65].mxu0  ;;  %5576 = vadd.xlane.f32.xlu1 %v5497_v21  ;;  %v11240_v21 = vpop.xlane.xlu1 %5413 }
 0x5b1   : > { %v4960_v31 = vpop.f32.mrb[66].mxu0 }
 0x5b2   : > { %v5164_v0 = vmax.f32 %v4958_v51, 0.0  ;;  %v4961_v37 = vadd.f32 %v11127_v62, %v4960_v31  ;;  %v4962_v13 = vpop.f32.mrb[67].mxu0 }
 0x5b4   : > { %v5165_v63 = vmax.f32 %v4961_v37, 0.0  ;;  %v5498_v1 = vmul.f32 %v11137_v2, %v5164_v0 }
 0x5b6   : > { %5578 = vadd.xlane.f32.xlu0 %v5498_v1  ;;  %v5499_v32 = vmul.f32 %v11137_v2, %v5165_v63  ;;  %v11244_v63 = vpop.xlane.xlu0 %5404 }
 0x5b7   : > { %v4965_v39 = vpop.f32.mrb[68].mxu0 }
 0x5b8   : > { %v4966_v59 = vadd.f32 %v11127_v62, %v4965_v39  ;;  %v4967_v48 = vpop.f32.mrb[69].mxu0  ;;  %5580 = vadd.xlane.f32.xlu1 %v5499_v32  ;;  %v11247_v39 = vpop.xlane.xlu1 %5407 }
 0x5b9   : > { %v4968_v47 = vpop.f32.mrb[70].mxu0 }
 0x5ba   : > { %v5166_v18 = vmax.f32 %v4966_v59, 0.0  ;;  %v4969_v10 = vadd.f32 %v11127_v62, %v4968_v47  ;;  %v4970_v52 = vpop.f32.mrb[71].mxu0 }
 0x5bc   : > { %v5167_v27 = vmax.f32 %v4969_v10, 0.0  ;;  %v5500_v25 = vmul.f32 %v11137_v2, %v5166_v18  ;;  %v11251_v10 = vpop.xlane.xlu0 %5422 }
 0x5bd   : > { %12601 = vst [vmem:[#allocation138_spill] sm:$0xff] %v11251_v10 }
 0x5be   : > { %5582 = vadd.xlane.f32.xlu0 %v5500_v25  ;;  %v5501_v44 = vmul.f32 %v11137_v2, %v5167_v27 }
 0x5bf   : > { %v4973_v8 = vpop.f32.mrb[72].mxu0 }
 0x5c0   : > { %v4974_v51 = vadd.f32 %v11127_v62, %v4973_v8  ;;  %v4975_v53 = vpop.f32.mrb[73].mxu0  ;;  %5584 = vadd.xlane.f32.xlu1 %v5501_v44  ;;  %v11254_v8 = vpop.xlane.xlu1 %5425 }
 0x5c1   : > { %v4976_v31 = vpop.f32.mrb[74].mxu0  ;;  %12602 = vst [vmem:[#allocation139_spill] sm:$0xff] %v11254_v8  ;;  %v11320_v8 = vstv %s5738_s13 }
 0x5c2   : > { %v5168_v0 = vmax.f32 %v4974_v51, 0.0  ;;  %v4977_v37 = vadd.f32 %v11127_v62, %v4976_v31  ;;  %v4978_v13 = vpop.f32.mrb[75].mxu0 }
 0x5c4   : > { %v5169_v1 = vmax.f32 %v4977_v37, 0.0  ;;  %v5502_v32 = vmul.f32 %v11137_v2, %v5168_v0  ;;  %v11258_v0 = vpop.xlane.xlu0 %5416 }
 0x5c5   : > { %12603 = vst [vmem:[#allocation24_spill] sm:$0xff] %v11258_v0 }
 0x5c6   : > { %5586 = vadd.xlane.f32.xlu0 %v5502_v32  ;;  %v5503_v59 = vmul.f32 %v11137_v2, %v5169_v1  ;;  %v11261_v32 = vpop.xlane.xlu1 %5419 }
 0x5c7   : > { %v4981_v48 = vpop.f32.mrb[76].mxu0  ;;  %12604 = vst [vmem:[#allocation27_spill] sm:$0xff] %v11261_v32 }
 0x5c8   : > { %v4982_v47 = vadd.f32 %v11127_v62, %v4981_v48  ;;  %v4983_v18 = vpop.f32.mrb[77].mxu0  ;;  %5588 = vadd.xlane.f32.xlu1 %v5503_v59 }
 0x5c9   : > { %v4984_v52 = vpop.f32.mrb[78].mxu0 }
 0x5ca   : > { %v5170_v27 = vmax.f32 %v4982_v47, 0.0  ;;  %v4985_v25 = vadd.f32 %v11127_v62, %v4984_v52  ;;  %v4986_v44 = vpop.f32.mrb[79].mxu0 }
 0x5cc   : > { %v5171_v51 = vmax.f32 %v4985_v25, 0.0  ;;  %v5504_v53 = vmul.f32 %v11137_v2, %v5170_v27  ;;  %v11265_v25 = vpop.xlane.xlu0 %5434 }
 0x5cd   : > { %12605 = vst [vmem:[#allocation145_spill] sm:$0xff] %v11265_v25 }
 0x5ce   : > { %5590 = vadd.xlane.f32.xlu0 %v5504_v53  ;;  %v5505_v31 = vmul.f32 %v11137_v2, %v5171_v51  ;;  %v11268_v51 = vpop.xlane.xlu1 %5437 }
 0x5cf   : > { %v4989_v37 = vpop.f32.mrb[80].mxu0  ;;  %12606 = vst [vmem:[#allocation147_spill] sm:$0xff] %v11268_v51 }
 0x5d0   : > { %v4990_v13 = vadd.f32 %v11127_v62, %v4989_v37  ;;  %v4991_v1 = vpop.f32.mrb[81].mxu0  ;;  %5592 = vadd.xlane.f32.xlu1 %v5505_v31 }
 0x5d1   : > { %v4992_v59 = vpop.f32.mrb[82].mxu0 }
 0x5d2   : > { %v5172_v48 = vmax.f32 %v4990_v13, 0.0  ;;  %v4993_v47 = vadd.f32 %v11127_v62, %v4992_v59  ;;  %v4994_v18 = vpop.f32.mrb[83].mxu0 }
 0x5d4   : > { %v5173_v52 = vmax.f32 %v4993_v47, 0.0  ;;  %v5506_v27 = vmul.f32 %v11137_v2, %v5172_v48  ;;  %v11272_v47 = vpop.xlane.xlu0 %5428 }
 0x5d5   : > { %12607 = vst [vmem:[#allocation148_spill] sm:$0xff] %v11272_v47 }
 0x5d6   : > { %5594 = vadd.xlane.f32.xlu0 %v5506_v27  ;;  %v5507_v44 = vmul.f32 %v11137_v2, %v5173_v52  ;;  %v11275_v27 = vpop.xlane.xlu1 %5431 }
 0x5d7   : > { %v4997_v53 = vpop.f32.mrb[84].mxu0  ;;  %12608 = vst [vmem:[#allocation149_spill] sm:$0xff] %v11275_v27 }
 0x5d8   : > { %v4998_v31 = vadd.f32 %v11127_v62, %v4997_v53  ;;  %v4999_v37 = vpop.f32.mrb[85].mxu0  ;;  %5596 = vadd.xlane.f32.xlu1 %v5507_v44  ;;  %v11279_v44 = vpop.xlane.xlu0 %5446 }
 0x5d9   : > { %v5000_v1 = vpop.f32.mrb[86].mxu0  ;;  %12609 = vst [vmem:[#allocation26_spill] sm:$0xff] %v11279_v44 }
 0x5da   : > { %v5174_v13 = vmax.f32 %v4998_v31, 0.0  ;;  %v5001_v59 = vadd.f32 %v11127_v62, %v5000_v1  ;;  %v5002_v18 = vpop.f32.mrb[87].mxu0 }
 0x5dc   : > { %v5175_v48 = vmax.f32 %v5001_v59, 0.0  ;;  %v5508_v25 = vmul.f32 %v11137_v2, %v5174_v13  ;;  %v11282_v59 = vpop.xlane.xlu1 %5449 }
 0x5dd   : > { %12610 = vst [vmem:[#allocation29_spill] sm:$0xff] %v11282_v59 }
 0x5de   : > { %5598 = vadd.xlane.f32.xlu0 %v5508_v25  ;;  %v5509_v52 = vmul.f32 %v11137_v2, %v5175_v48  ;;  %v11286_v48 = vpop.xlane.xlu0 %5440 }
 0x5df   : > { %v5005_v51 = vpop.f32.mrb[88].mxu0  ;;  %12611 = vst [vmem:[#allocation155_spill] sm:$0xff] %v11286_v48 }
 0x5e0   : > { %v5006_v53 = vadd.f32 %v11127_v62, %v5005_v51  ;;  %v5007_v37 = vpop.f32.mrb[89].mxu0  ;;  %5600 = vadd.xlane.f32.xlu1 %v5509_v52  ;;  %v11289_v44 = vpop.xlane.xlu1 %5443 }
 0x5e1   : > { %v5008_v31 = vpop.f32.mrb[90].mxu0  ;;  %12612 = vst [vmem:[#allocation157_spill] sm:$0xff] %v11289_v44 }
 0x5e2   : > { %v5176_v1 = vmax.f32 %v5006_v53, 0.0  ;;  %v5009_v18 = vadd.f32 %v11127_v62, %v5008_v31  ;;  %v5010_v47 = vpop.f32.mrb[91].mxu0 }
 0x5e4   : > { %v5177_v13 = vmax.f32 %v5009_v18, 0.0  ;;  %v5510_v27 = vmul.f32 %v11137_v2, %v5176_v1  ;;  %v11296_v48 = vpop.xlane.xlu1 %5461 }
 0x5e5   : > { %12614 = vst [vmem:[#allocation159_spill] sm:$0xff] %v11296_v48 }
 0x5e6   : > { %5602 = vadd.xlane.f32.xlu0 %v5510_v27  ;;  %v5511_v25 = vmul.f32 %v11137_v2, %v5177_v13  ;;  %v11293_v27 = vpop.xlane.xlu0 %5458 }
 0x5e7   : > { %v5013_v51 = vpop.f32.mrb[92].mxu0  ;;  %12613 = vst [vmem:[#allocation158_spill] sm:$0xff] %v11293_v27 }
 0x5e8   : > { %v5014_v52 = vadd.f32 %v11127_v62, %v5013_v51  ;;  %v5015_v37 = vpop.f32.mrb[93].mxu0  ;;  %5604 = vadd.xlane.f32.xlu1 %v5511_v25 }
 0x5e9   : > { %v5016_v53 = vpop.f32.mrb[94].mxu0 }
 0x5ea   : > { %v5178_v31 = vmax.f32 %v5014_v52, 0.0  ;;  %v5017_v47 = vadd.f32 %v11127_v62, %v5016_v53  ;;  %v5018_v59 = vpop.f32.mrb[95].mxu0 }
 0x5ec   : > { %v5179_v18 = vmax.f32 %v5017_v47, 0.0  ;;  %v5512_v1 = vmul.f32 %v11137_v2, %v5178_v31  ;;  %v11300_v47 = vpop.xlane.xlu0 %5452 }
 0x5ed   : > { %12615 = vst [vmem:[#allocation28_spill] sm:$0xff] %v11300_v47 }
 0x5ee   : > { %5606 = vadd.xlane.f32.xlu0 %v5512_v1  ;;  %v5513_v13 = vmul.f32 %v11137_v2, %v5179_v18  ;;  %v11303_v1 = vpop.xlane.xlu1 %5455 }
 0x5ef   : > { %v5021_v51 = vpop.f32.mrb[96].mxu0  ;;  %12616 = vst [vmem:[#allocation31_spill] sm:$0xff] %v11303_v1 }
 0x5f0   : > { %v5022_v25 = vadd.f32 %v11127_v62, %v5021_v51  ;;  %v5023_v37 = vpop.f32.mrb[97].mxu0  ;;  %5608 = vadd.xlane.f32.xlu1 %v5513_v13  ;;  %v11307_v13 = vpop.xlane.xlu0 %5470 }
 0x5f1   : > { %v5024_v44 = vpop.f32.mrb[98].mxu0  ;;  %12617 = vst [vmem:[#allocation166_spill] sm:$0xff] %v11307_v13 }
 0x5f2   : > { %v5180_v52 = vmax.f32 %v5022_v25, 0.0  ;;  %v5025_v53 = vadd.f32 %v11127_v62, %v5024_v44  ;;  %v5026_v59 = vpop.f32.mrb[99].mxu0 }
 0x5f4   : > { %v5181_v31 = vmax.f32 %v5025_v53, 0.0  ;;  %v5514_v27 = vmul.f32 %v11137_v2, %v5180_v52  ;;  %v11310_v53 = vpop.xlane.xlu1 %5473  ;;  %v11314_v1 = vpop.xlane.xlu0 %5464 }
 0x5f5   : > { %12618 = vst [vmem:[#allocation167_spill] sm:$0xff] %v11310_v53  ;;  %12619 = vst [vmem:[#allocation168_spill] sm:$0xff] %v11314_v1 }
 0x5f6   : > { %5610 = vadd.xlane.f32.xlu0 %v5514_v27  ;;  %v5515_v18 = vmul.f32 %v11137_v2, %v5181_v31 }
 0x5f7   : > { %v5029_v48 = vpop.f32.mrb[100].mxu0 }
 0x5f8   : > { %v5030_v51 = vadd.f32 %v11127_v62, %v5029_v48  ;;  %v5031_v37 = vpop.f32.mrb[101].mxu0  ;;  %5612 = vadd.xlane.f32.xlu1 %v5515_v18 }
 0x5f9   : > { %v5032_v25 = vpop.f32.mrb[102].mxu0 }
 0x5fa   : > { %v5182_v44 = vmax.f32 %v5030_v51, 0.0  ;;  %v5033_v59 = vadd.f32 %v11127_v62, %v5032_v25  ;;  %v5034_v47 = vpop.f32.mrb[103].mxu0  ;;  %v11317_v51 = vpop.xlane.xlu1 %5467 }
 0x5fb   : > { %12620 = vst [vmem:[#allocation30_spill] sm:$0xff] %v11317_v51 }
 0x5fc   : > { %v5516_v52 = vmul.f32 %v11137_v2, %v5182_v44  ;;  %v5183_v27 = vmax.f32 %v5033_v59, 0.0 }
 0x5fe   : > { %v5517_v31 = vmul.f32 %v11137_v2, %v5183_v27  ;;  %5614 = vadd.xlane.f32.xlu0 %v5516_v52 }
 0x5ff   : > { %v5037_v48 = vpop.f32.mrb[104].mxu0 }
 0x600   : > { %v5038_v18 = vadd.f32 %v11127_v62, %v5037_v48  ;;  %v5039_v37 = vpop.f32.mrb[105].mxu0  ;;  %5616 = vadd.xlane.f32.xlu1 %v5517_v31 }
 0x601   : > { %v5040_v25 = vpop.f32.mrb[106].mxu0 }
 0x602   : > { %v5184_v47 = vmax.f32 %v5038_v18, 0.0  ;;  %v5041_v53 = vadd.f32 %v11127_v62, %v5040_v25  ;;  %v5042_v13 = vpop.f32.mrb[107].mxu0 }
 0x603   : > { %v5547_v44 = vpop.xlane.xlu0 %5546 }
 0x604   : > { %v5518_v59 = vmul.f32 %v11137_v2, %v5184_v47  ;;  %v5185_v52 = vmax.f32 %v5041_v53, 0.0  ;;  %v5674_v27 = vadd.f32 %v5547_v44, %v11068_v12 }
 0x605   : > { %v5549_v1 = vpop.xlane.xlu1 %5548 }
 0x606   : > { %v5519_v48 = vmul.f32 %v11137_v2, %v5185_v52  ;;  %v5740_v31 = vadd.f32 %v11320_v8, %v5674_v27  ;;  %v5675_v37 = vadd.f32 %v5549_v1, %v11075_v29  ;;  %5618 = vadd.xlane.f32.xlu0 %v5518_v59 }
 0x607   : > { %v5045_v18 = vpop.f32.mrb[108].mxu0 }
 0x608   : > { %v5804_v51 = vsub.f32 0.0, %v5740_v31  ;;  %v5741_v13 = vadd.f32 %v11320_v8, %v5675_v37  ;;  %v5046_v25 = vadd.f32 %v11127_v62, %v5045_v18  ;;  %v5047_v10 = vpop.f32.mrb[109].mxu0  ;;  %5620 = vadd.xlane.f32.xlu1 %v5519_v48 }
 0x609   : > { %v5048_v47 = vpop.f32.mrb[110].mxu0 }
 0x60a   : > { %v5868_v53 = vmul.f32 1.442695, %v5804_v51  ;;  %v5805_v32 = vsub.f32 0.0, %v5741_v13  ;;  %v5186_v12 = vmax.f32 %v5046_v25, 0.0  ;;  %v5049_v44 = vadd.f32 %v11127_v62, %v5048_v47  ;;  %v5050_v52 = vpop.f32.mrb[111].mxu0 }
 0x60b   : > { %v5551_v0 = vpop.xlane.xlu0 %5550 }
 0x60c   : > { %7732 = vpow2.f32 %v5868_v53  ;;  %v5870_v27 = vmul.f32 1.442695, %v5805_v32  ;;  %v5520_v29 = vmul.f32 %v11137_v2, %v5186_v12  ;;  %v5187_v1 = vmax.f32 %v5049_v44, 0.0 }
 0x60d   : > { %v5676_v59 = vadd.f32 %v5551_v0, %v11070_v11  ;;  %v5553_v31 = vpop.xlane.xlu1 %5552 }
 0x60e   : > { %7734 = vpow2.f32 %v5870_v27  ;;  %v5521_v10 = vmul.f32 %v11137_v2, %v5187_v1  ;;  %v5677_v48 = vadd.f32 %v5553_v31, %v11078_v42  ;;  %5622 = vadd.xlane.f32.xlu0 %v5520_v29 }
 0x60f   : > { %v5742_v51 = vadd.f32 %v11320_v8, %v5676_v59  ;;  %v5053_v37 = vpop.f32.mrb[112].mxu0 }
 0x610   : > { %v5743_v18 = vadd.f32 %v11320_v8, %v5677_v48  ;;  %v5054_v13 = vadd.f32 %v11127_v62, %v5053_v37  ;;  %v5055_v32 = vpop.f32.mrb[113].mxu0  ;;  %5624 = vadd.xlane.f32.xlu1 %v5521_v10 }
 0x611   : > { %v5806_v25 = vsub.f32 0.0, %v5742_v51  ;;  %v5056_v47 = vpop.f32.mrb[114].mxu0 }
 0x612   : > { %v5807_v53 = vsub.f32 0.0, %v5743_v18  ;;  %v5188_v11 = vmax.f32 %v5054_v13, 0.0  ;;  %v5057_v0 = vadd.f32 %v11127_v62, %v5056_v47  ;;  %v5058_v12 = vpop.f32.mrb[115].mxu0 }
 0x613   : > { %v5872_v44 = vmul.f32 1.442695, %v5806_v25  ;;  %v5555_v52 = vpop.xlane.xlu0 %5554 }
 0x614   : > { %v5874_v42 = vmul.f32 1.442695, %v5807_v53  ;;  %v5522_v27 = vmul.f32 %v11137_v2, %v5188_v11  ;;  %v5189_v29 = vmax.f32 %v5057_v0, 0.0  ;;  %v5678_v1 = vadd.f32 %v5555_v52, %v11088_v54 }
 0x615   : > { %7736 = vpow2.f32 %v5872_v44  ;;  %v5557_v59 = vpop.xlane.xlu1 %5556 }
 0x616   : > { %v7733_v31 = vpop.eup %7732  ;;  %7738 = vpow2.f32 %v5874_v42  ;;  %v5523_v10 = vmul.f32 %v11137_v2, %v5189_v29  ;;  %v5744_v48 = vadd.f32 %v11320_v8, %v5678_v1  ;;  %v5679_v51 = vadd.f32 %v5557_v59, %v11090_v34  ;;  %5626 = vadd.xlane.f32.xlu0 %v5522_v27 }
 0x617   : > { %v5996_v37 = vadd.f32 1.0, %v7733_v31  ;;  %v5061_v18 = vpop.f32.mrb[116].mxu0 }
 0x618   : > { %v7735_v13 = vpop.eup %7734  ;;  %v5808_v32 = vsub.f32 0.0, %v5744_v48  ;;  %v5745_v25 = vadd.f32 %v11320_v8, %v5679_v51  ;;  %v5062_v54 = vadd.f32 %v11127_v62, %v5061_v18  ;;  %v5063_v47 = vpop.f32.mrb[117].mxu0  ;;  %5628 = vadd.xlane.f32.xlu1 %v5523_v10 }
 0x619   : > { %7740 = vrcp.f32 %v5996_v37  ;;  %v5997_v53 = vadd.f32 1.0, %v7735_v13  ;;  %v5064_v11 = vpop.f32.mrb[118].mxu0 }
 0x61a   : > { %v5876_v0 = vmul.f32 1.442695, %v5808_v32  ;;  %v5809_v12 = vsub.f32 0.0, %v5745_v25  ;;  %v5190_v44 = vmax.f32 %v5062_v54, 0.0  ;;  %v5065_v34 = vadd.f32 %v11127_v62, %v5064_v11  ;;  %v5066_v52 = vpop.f32.mrb[119].mxu0 }
 0x61b   : > { %7742 = vrcp.f32 %v5997_v53  ;;  %v5559_v42 = vpop.xlane.xlu0 %5558 }
 0x61c   : > { %7744 = vpow2.f32 %v5876_v0  ;;  %v5878_v27 = vmul.f32 1.442695, %v5809_v12  ;;  %v5524_v29 = vmul.f32 %v11137_v2, %v5190_v44  ;;  %v5191_v1 = vmax.f32 %v5065_v34, 0.0 }
 0x61d   : > { %v5680_v59 = vadd.f32 %v5559_v42, %v11081_v5  ;;  %v5561_v31 = vpop.xlane.xlu1 %5560 }
 0x61e   : > { %7746 = vpow2.f32 %v5878_v27  ;;  %v5525_v10 = vmul.f32 %v11137_v2, %v5191_v1  ;;  %v5681_v48 = vadd.f32 %v5561_v31, %v11084_v16  ;;  %5630 = vadd.xlane.f32.xlu0 %v5524_v29 }
 0x61f   : > { %v7737_v51 = vpop.eup %7736  ;;  %v5746_v37 = vadd.f32 %v11320_v8, %v5680_v59  ;;  %v5069_v18 = vpop.f32.mrb[120].mxu0 }
 0x620   : > { %v7739_v13 = vpop.eup %7738  ;;  %v5998_v32 = vadd.f32 1.0, %v7737_v51  ;;  %v5747_v25 = vadd.f32 %v11320_v8, %v5681_v48  ;;  %v5070_v54 = vadd.f32 %v11127_v62, %v5069_v18  ;;  %v5071_v47 = vpop.f32.mrb[121].mxu0  ;;  %5632 = vadd.xlane.f32.xlu1 %v5525_v10 }
 0x621   : > { %v5999_v5 = vadd.f32 1.0, %v7739_v13  ;;  %v5810_v53 = vsub.f32 0.0, %v5746_v37  ;;  %v5072_v11 = vpop.f32.mrb[122].mxu0 }
 0x622   : > { %7748 = vrcp.f32 %v5998_v32  ;;  %v5811_v0 = vsub.f32 0.0, %v5747_v25  ;;  %v5192_v16 = vmax.f32 %v5070_v54, 0.0  ;;  %v5073_v12 = vadd.f32 %v11127_v62, %v5072_v11  ;;  %v5074_v44 = vpop.f32.mrb[123].mxu0 }
 0x623   : > { %v7741_v34 = vpop.eup %7740  ;;  %7750 = vrcp.f32 %v5999_v5  ;;  %v5880_v52 = vmul.f32 1.442695, %v5810_v53  ;;  %v5563_v42 = vpop.xlane.xlu0 %5562 }
 0x624   : > { %6125 = vst.msk [vmem:[%s11355_s23] sm:$0xff] %vm6124_vm1, %v7741_v34  ;;  %v5882_v27 = vmul.f32 1.442695, %v5811_v0  ;;  %v5526_v29 = vmul.f32 %v11137_v2, %v5192_v16  ;;  %v5193_v1 = vmax.f32 %v5073_v12, 0.0  ;;  %v5682_v59 = vadd.f32 %v5563_v42, %v11103_v30 }
 0x625   : > { %v7743_v31 = vpop.eup %7742  ;;  %7752 = vpow2.f32 %v5880_v52  ;;  %v5565_v10 = vpop.xlane.xlu1 %5564 }
 0x626   : > { %v7745_v48 = vpop.eup %7744  ;;  %6126 = vst.msk [vmem:[%s11355_s23 + $0x8] sm:$0xff] %vm6124_vm1, %v7743_v31  ;;  %7754 = vpow2.f32 %v5882_v27  ;;  %v5527_v51 = vmul.f32 %v11137_v2, %v5193_v1  ;;  %v5748_v37 = vadd.f32 %v11320_v8, %v5682_v59  ;;  %v5683_v18 = vadd.f32 %v5565_v10, %v11106_v57  ;;  %5634 = vadd.xlane.f32.xlu0 %v5526_v29 }
 0x627   : > { %v6000_v13 = vadd.f32 1.0, %v7745_v48  ;;  %v5077_v32 = vpop.f32.mrb[124].mxu0 }
 0x628   : > { %v7747_v25 = vpop.eup %7746  ;;  %v5812_v54 = vsub.f32 0.0, %v5748_v37  ;;  %v5749_v30 = vadd.f32 %v11320_v8, %v5683_v18  ;;  %v5078_v47 = vadd.f32 %v11127_v62, %v5077_v32  ;;  %v5079_v5 = vpop.f32.mrb[125].mxu0  ;;  %5636 = vadd.xlane.f32.xlu1 %v5527_v51 }
 0x629   : > { %7756 = vrcp.f32 %v6000_v13  ;;  %v6001_v53 = vadd.f32 1.0, %v7747_v25  ;;  %v5080_v11 = vpop.f32.mrb[126].mxu0 }
 0x62a   : > { %v5884_v0 = vmul.f32 1.442695, %v5812_v54  ;;  %v5813_v16 = vsub.f32 0.0, %v5749_v30  ;;  %v5194_v12 = vmax.f32 %v5078_v47, 0.0  ;;  %v5081_v57 = vadd.f32 %v11127_v62, %v5080_v11  ;;  %v5082_v44 = vpop.f32.mrb[127].mxu0 }
 0x62b   : > { %7758 = vrcp.f32 %v6001_v53  ;;  %v5567_v34 = vpop.xlane.xlu0 %5566  ;;  %v11383_v53 = vld [vmem:[%s11859_s8] ss:$0 sm:$0xff] }
 0x62c   : > { %v7749_v52 = vpop.eup %7748  ;;  %7760 = vpow2.f32 %v5884_v0  ;;  %v5886_v42 = vmul.f32 1.442695, %v5813_v16  ;;  %v5528_v27 = vmul.f32 %v11137_v2, %v5194_v12  ;;  %v5195_v29 = vmax.f32 %v5081_v57, 0.0  ;;  %v11391_v44 = vld [vmem:[%s11861_s10] ss:$0 sm:$0xff] }
 0x62d   : > { %v7751_v1 = vpop.eup %7750  ;;  %6127 = vst.msk [vmem:[%s11355_s23 + $0x10] sm:$0xff] %vm6124_vm1, %v7749_v52  ;;  %v5684_v59 = vadd.f32 %v5567_v34, %v11096_v40  ;;  %v5569_v31 = vpop.xlane.xlu1 %5568 }
 0x62e   : > { %6128 = vst.msk [vmem:[%s11355_s23 + $0x18] sm:$0xff] %vm6124_vm1, %v7751_v1  ;;  %7762 = vpow2.f32 %v5886_v42  ;;  %v5529_v10 = vmul.f32 %v11137_v2, %v5195_v29  ;;  %v5685_v48 = vadd.f32 %v5569_v31, %v11098_v24  ;;  %5638 = vadd.xlane.f32.xlu0 %v5528_v27 }
 0x62f   : > { %v7753_v51 = vpop.eup %7752  ;;  %v5750_v37 = vadd.f32 %v11320_v8, %v5684_v59  ;;  %v5085_v18 = vpop.f32.mrb[128].mxu0 }
 0x630   : > { %v7755_v13 = vpop.eup %7754  ;;  %v6002_v32 = vadd.f32 1.0, %v7753_v51  ;;  %v5751_v25 = vadd.f32 %v11320_v8, %v5685_v48  ;;  %v5086_v54 = vadd.f32 %v11127_v62, %v5085_v18  ;;  %v5087_v40 = vpop.f32.mrb[129].mxu0  ;;  %5640 = vadd.xlane.f32.xlu1 %v5529_v10 }
 0x631   : > { %v6003_v30 = vadd.f32 1.0, %v7755_v13  ;;  %v5814_v47 = vsub.f32 0.0, %v5750_v37  ;;  %v5088_v5 = vpop.f32.mrb[130].mxu0 }
 0x632   : > { %7764 = vrcp.f32 %v6002_v32  ;;  %v5815_v2 = vsub.f32 0.0, %v5751_v25  ;;  %v5196_v24 = vmax.f32 %v5086_v54, 0.0  ;;  %v5089_v11 = vadd.f32 %v11383_v53, %v5088_v5  ;;  %v5090_v0 = vpop.f32.mrb[131].mxu0 }
 0x633   : > { %v7757_v16 = vpop.eup %7756  ;;  %7766 = vrcp.f32 %v6003_v30  ;;  %v5888_v62 = vmul.f32 1.442695, %v5814_v47  ;;  %v5571_v12 = vpop.xlane.xlu0 %5570 }
 0x634   : > { %6129 = vst.msk [vmem:[%s11355_s23 + $0x20] sm:$0xff] %vm6124_vm1, %v7757_v16  ;;  %v5890_v57 = vmul.f32 1.442695, %v5815_v2  ;;  %v5530_v34 = vmul.f32 %v11391_v44, %v5196_v24  ;;  %v5197_v52 = vmax.f32 %v5089_v11, 0.0  ;;  %v5686_v42 = vadd.f32 %v5571_v12, %v11116_v22 }
 0x635   : > { %v7759_v27 = vpop.eup %7758  ;;  %7768 = vpow2.f32 %v5888_v62  ;;  %v5573_v29 = vpop.xlane.xlu1 %5572 }
 0x636   : > { %v7761_v1 = vpop.eup %7760  ;;  %6130 = vst.msk [vmem:[%s11355_s23 + $0x28] sm:$0xff] %vm6124_vm1, %v7759_v27  ;;  %7770 = vpow2.f32 %v5890_v57  ;;  %v5531_v59 = vmul.f32 %v11391_v44, %v5197_v52  ;;  %v5752_v31 = vadd.f32 %v11320_v8, %v5686_v42  ;;  %v5687_v10 = vadd.f32 %v5573_v29, %v11118_v28  ;;  %5642 = vadd.xlane.f32.xlu0 %v5530_v34 }
 0x637   : > { %v6004_v48 = vadd.f32 1.0, %v7761_v1  ;;  %v5093_v51 = vpop.f32.mrb[132].mxu0 }
 0x638   : > { %v7763_v37 = vpop.eup %7762  ;;  %v5816_v18 = vsub.f32 0.0, %v5752_v31  ;;  %v5753_v22 = vadd.f32 %v11320_v8, %v5687_v10  ;;  %v5094_v13 = vadd.f32 %v11383_v53, %v5093_v51  ;;  %v5095_v32 = vpop.f32.mrb[133].mxu0  ;;  %5644 = vadd.xlane.f32.xlu1 %v5531_v59 }
 0x639   : > { %7772 = vrcp.f32 %v6004_v48  ;;  %v6005_v25 = vadd.f32 1.0, %v7763_v37  ;;  %v5096_v54 = vpop.f32.mrb[134].mxu0 }
 0x63a   : > { %v5892_v40 = vmul.f32 1.442695, %v5816_v18  ;;  %v5817_v30 = vsub.f32 0.0, %v5753_v22  ;;  %v5198_v47 = vmax.f32 %v5094_v13, 0.0  ;;  %v5097_v28 = vadd.f32 %v11383_v53, %v5096_v54  ;;  %v5098_v5 = vpop.f32.mrb[135].mxu0 }
 0x63b   : > { %7774 = vrcp.f32 %v6005_v25  ;;  %v5575_v2 = vpop.xlane.xlu0 %5574 }
 0x63c   : > { %v7765_v24 = vpop.eup %7764  ;;  %7776 = vpow2.f32 %v5892_v40  ;;  %v5894_v11 = vmul.f32 1.442695, %v5817_v30  ;;  %v5532_v0 = vmul.f32 %v11391_v44, %v5198_v47  ;;  %v5199_v16 = vmax.f32 %v5097_v28, 0.0 }
 0x63d   : > { %v7767_v62 = vpop.eup %7766  ;;  %6131 = vst.msk [vmem:[%s11355_s23 + $0x30] sm:$0xff] %vm6124_vm1, %v7765_v24  ;;  %v5688_v12 = vadd.f32 %v5575_v2, %v11109_v49  ;;  %v5577_v57 = vpop.xlane.xlu1 %5576 }
 0x63e   : > { %6132 = vst.msk [vmem:[%s11355_s23 + $0x38] sm:$0xff] %vm6124_vm1, %v7767_v62  ;;  %7778 = vpow2.f32 %v5894_v11  ;;  %v5533_v34 = vmul.f32 %v11391_v44, %v5199_v16  ;;  %v5689_v52 = vadd.f32 %v5577_v57, %v11112_v36  ;;  %5646 = vadd.xlane.f32.xlu0 %v5532_v0 }
 0x63f   : > { %v7769_v42 = vpop.eup %7768  ;;  %v5754_v27 = vadd.f32 %v11320_v8, %v5688_v12  ;;  %v5101_v29 = vpop.f32.mrb[136].mxu0 }
 0x640   : > { %v7771_v1 = vpop.eup %7770  ;;  %v6006_v59 = vadd.f32 1.0, %v7769_v42  ;;  %v5755_v31 = vadd.f32 %v11320_v8, %v5689_v52  ;;  %v5102_v49 = vadd.f32 %v11383_v53, %v5101_v29  ;;  %v5103_v10 = vpop.f32.mrb[137].mxu0  ;;  %5648 = vadd.xlane.f32.xlu1 %v5533_v34 }
 0x641   : > { %v6007_v48 = vadd.f32 1.0, %v7771_v1  ;;  %v5818_v51 = vsub.f32 0.0, %v5754_v27  ;;  %v5104_v37 = vpop.f32.mrb[138].mxu0 }
 0x642   : > { %7780 = vrcp.f32 %v6006_v59  ;;  %v5819_v18 = vsub.f32 0.0, %v5755_v31  ;;  %v5200_v36 = vmax.f32 %v5102_v49, 0.0  ;;  %v5105_v22 = vadd.f32 %v11383_v53, %v5104_v37  ;;  %v5106_v13 = vpop.f32.mrb[139].mxu0 }
 0x643   : > { %v7773_v32 = vpop.eup %7772  ;;  %7782 = vrcp.f32 %v6007_v48  ;;  %v5896_v25 = vmul.f32 1.442695, %v5818_v51  ;;  %v5579_v54 = vpop.xlane.xlu0 %5578 }
 0x644   : > { %6133 = vst.msk [vmem:[%s11355_s23 + $0x40] sm:$0xff] %vm6124_vm1, %v7773_v32  ;;  %v5898_v40 = vmul.f32 1.442695, %v5819_v18  ;;  %v5534_v30 = vmul.f32 %v11391_v44, %v5200_v36  ;;  %v5201_v47 = vmax.f32 %v5105_v22, 0.0  ;;  %v5690_v28 = vadd.f32 %v5579_v54, %v11146_v55 }
 0x645   : > { %v7775_v5 = vpop.eup %7774  ;;  %7784 = vpow2.f32 %v5896_v25  ;;  %v5581_v2 = vpop.xlane.xlu1 %5580 }
 0x646   : > { %v7777_v24 = vpop.eup %7776  ;;  %6134 = vst.msk [vmem:[%s11355_s23 + $0x48] sm:$0xff] %vm6124_vm1, %v7775_v5  ;;  %7786 = vpow2.f32 %v5898_v40  ;;  %v5535_v11 = vmul.f32 %v11391_v44, %v5201_v47  ;;  %v5756_v0 = vadd.f32 %v11320_v8, %v5690_v28  ;;  %v5691_v16 = vadd.f32 %v5581_v2, %v11148_v33  ;;  %5650 = vadd.xlane.f32.xlu0 %v5534_v30 }
 0x647   : > { %v6008_v62 = vadd.f32 1.0, %v7777_v24  ;;  %v5109_v12 = vpop.f32.mrb[140].mxu0 }
 0x648   : > { %v7779_v57 = vpop.eup %7778  ;;  %v5820_v34 = vsub.f32 0.0, %v5756_v0  ;;  %v5757_v55 = vadd.f32 %v11320_v8, %v5691_v16  ;;  %v5110_v52 = vadd.f32 %v11383_v53, %v5109_v12  ;;  %v5111_v42 = vpop.f32.mrb[141].mxu0  ;;  %5652 = vadd.xlane.f32.xlu1 %v5535_v11 }
 0x649   : > { %7788 = vrcp.f32 %v6008_v62  ;;  %v6009_v27 = vadd.f32 1.0, %v7779_v57  ;;  %v5112_v29 = vpop.f32.mrb[142].mxu0 }
 0x64a   : > { %v5900_v1 = vmul.f32 1.442695, %v5820_v34  ;;  %v5821_v59 = vsub.f32 0.0, %v5757_v55  ;;  %v5202_v31 = vmax.f32 %v5110_v52, 0.0  ;;  %v5113_v33 = vadd.f32 %v11383_v53, %v5112_v29  ;;  %v5114_v49 = vpop.f32.mrb[143].mxu0 }
 0x64b   : > { %7790 = vrcp.f32 %v6009_v27  ;;  %v5583_v10 = vpop.xlane.xlu0 %5582 }
 0x64c   : > { %v7781_v48 = vpop.eup %7780  ;;  %7792 = vpow2.f32 %v5900_v1  ;;  %v5902_v51 = vmul.f32 1.442695, %v5821_v59  ;;  %v5536_v37 = vmul.f32 %v11391_v44, %v5202_v31  ;;  %v5203_v18 = vmax.f32 %v5113_v33, 0.0 }
 0x64d   : > { %v7783_v36 = vpop.eup %7782  ;;  %6135 = vst.msk [vmem:[%s11355_s23 + $0x50] sm:$0xff] %vm6124_vm1, %v7781_v48  ;;  %v5692_v22 = vadd.f32 %v5583_v10, %v11129_v17  ;;  %v5585_v13 = vpop.xlane.xlu1 %5584 }
 0x64e   : > { %6136 = vst.msk [vmem:[%s11355_s23 + $0x58] sm:$0xff] %vm6124_vm1, %v7783_v36  ;;  %7794 = vpow2.f32 %v5902_v51  ;;  %v5537_v32 = vmul.f32 %v11391_v44, %v5203_v18  ;;  %v5693_v25 = vadd.f32 %v5585_v13, %v11131_v41  ;;  %5654 = vadd.xlane.f32.xlu0 %v5536_v37 }
 0x64f   : > { %v7785_v54 = vpop.eup %7784  ;;  %v5758_v40 = vadd.f32 %v11320_v8, %v5692_v22  ;;  %v5117_v30 = vpop.f32.mrb[144].mxu0 }
 0x650   : > { %v7787_v47 = vpop.eup %7786  ;;  %v6010_v28 = vadd.f32 1.0, %v7785_v54  ;;  %v5759_v5 = vadd.f32 %v11320_v8, %v5693_v25  ;;  %v5118_v17 = vadd.f32 %v11383_v53, %v5117_v30  ;;  %v5119_v2 = vpop.f32.mrb[145].mxu0  ;;  %5656 = vadd.xlane.f32.xlu1 %v5537_v32 }
 0x651   : > { %v6011_v24 = vadd.f32 1.0, %v7787_v47  ;;  %v5822_v11 = vsub.f32 0.0, %v5758_v40  ;;  %v5120_v0 = vpop.f32.mrb[146].mxu0 }
 0x652   : > { %7796 = vrcp.f32 %v6010_v28  ;;  %v5823_v16 = vsub.f32 0.0, %v5759_v5  ;;  %v5204_v41 = vmax.f32 %v5118_v17, 0.0  ;;  %v5121_v62 = vadd.f32 %v11383_v53, %v5120_v0  ;;  %v5122_v12 = vpop.f32.mrb[147].mxu0 }
 0x653   : > { %v7789_v57 = vpop.eup %7788  ;;  %7798 = vrcp.f32 %v6011_v24  ;;  %v5904_v34 = vmul.f32 1.442695, %v5822_v11  ;;  %v5587_v55 = vpop.xlane.xlu0 %5586 }
 0x654   : > { %6137 = vst.msk [vmem:[%s11355_s23 + $0x60] sm:$0xff] %vm6124_vm1, %v7789_v57  ;;  %v5906_v52 = vmul.f32 1.442695, %v5823_v16  ;;  %v5538_v42 = vmul.f32 %v11391_v44, %v5204_v41  ;;  %v5205_v27 = vmax.f32 %v5121_v62, 0.0  ;;  %v5694_v29 = vadd.f32 %v5587_v55, %v11170_v9 }
 0x655   : > { %v7791_v1 = vpop.eup %7790  ;;  %7800 = vpow2.f32 %v5904_v34  ;;  %v5589_v59 = vpop.xlane.xlu1 %5588 }
 0x656   : > { %v7793_v31 = vpop.eup %7792  ;;  %6138 = vst.msk [vmem:[%s11355_s23 + $0x68] sm:$0xff] %vm6124_vm1, %v7791_v1  ;;  %7802 = vpow2.f32 %v5906_v52  ;;  %v5539_v33 = vmul.f32 %v11391_v44, %v5205_v27  ;;  %v5760_v49 = vadd.f32 %v11320_v8, %v5694_v29  ;;  %v5695_v10 = vadd.f32 %v5589_v59, %v11172_v46  ;;  %5658 = vadd.xlane.f32.xlu0 %v5538_v42 }
 0x657   : > { %v6012_v48 = vadd.f32 1.0, %v7793_v31  ;;  %v5125_v51 = vpop.f32.mrb[148].mxu0 }
 0x658   : > { %v7795_v37 = vpop.eup %7794  ;;  %v5824_v18 = vsub.f32 0.0, %v5760_v49  ;;  %v5761_v9 = vadd.f32 %v11320_v8, %v5695_v10  ;;  %v5126_v36 = vadd.f32 %v11383_v53, %v5125_v51  ;;  %v5127_v22 = vpop.f32.mrb[149].mxu0  ;;  %5660 = vadd.xlane.f32.xlu1 %v5539_v33 }
 0x659   : > { %7804 = vrcp.f32 %v6012_v48  ;;  %v6013_v13 = vadd.f32 1.0, %v7795_v37  ;;  %v5128_v32 = vpop.f32.mrb[150].mxu0 }
 0x65a   : > { %v5908_v25 = vmul.f32 1.442695, %v5824_v18  ;;  %v5825_v54 = vsub.f32 0.0, %v5761_v9  ;;  %v5206_v40 = vmax.f32 %v5126_v36, 0.0  ;;  %v5129_v46 = vadd.f32 %v11383_v53, %v5128_v32  ;;  %v5130_v30 = vpop.f32.mrb[151].mxu0 }
 0x65b   : > { %7806 = vrcp.f32 %v6013_v13  ;;  %v5591_v47 = vpop.xlane.xlu0 %5590 }
 0x65c   : > { %v7797_v28 = vpop.eup %7796  ;;  %7808 = vpow2.f32 %v5908_v25  ;;  %v5910_v5 = vmul.f32 1.442695, %v5825_v54  ;;  %v5540_v17 = vmul.f32 %v11391_v44, %v5206_v40  ;;  %v5207_v2 = vmax.f32 %v5129_v46, 0.0 }
 0x65d   : > { %v7799_v24 = vpop.eup %7798  ;;  %6139 = vst.msk [vmem:[%s11355_s23 + $0x70] sm:$0xff] %vm6124_vm1, %v7797_v28  ;;  %v5696_v11 = vadd.f32 %v5591_v47, %v11158_v3  ;;  %v5593_v0 = vpop.xlane.xlu1 %5592 }
 0x65e   : > { %6140 = vst.msk [vmem:[%s11355_s23 + $0x78] sm:$0xff] %vm6124_vm1, %v7799_v24  ;;  %7810 = vpow2.f32 %v5910_v5  ;;  %v5541_v16 = vmul.f32 %v11391_v44, %v5207_v2  ;;  %v5697_v41 = vadd.f32 %v5593_v0, %v11160_v4  ;;  %5662 = vadd.xlane.f32.xlu0 %v5540_v17 }
 0x65f   : > { %v7801_v62 = vpop.eup %7800  ;;  %v5762_v12 = vadd.f32 %v11320_v8, %v5696_v11  ;;  %v5133_v57 = vpop.f32.mrb[152].mxu0 }
 0x660   : > { %v7803_v34 = vpop.eup %7802  ;;  %v6014_v55 = vadd.f32 1.0, %v7801_v62  ;;  %v5763_v52 = vadd.f32 %v11320_v8, %v5697_v41  ;;  %v5134_v3 = vadd.f32 %v11383_v53, %v5133_v57  ;;  %v5135_v42 = vpop.f32.mrb[153].mxu0  ;;  %5664 = vadd.xlane.f32.xlu1 %v5541_v16 }
 0x661   : > { %v6015_v27 = vadd.f32 1.0, %v7803_v34  ;;  %v5826_v29 = vsub.f32 0.0, %v5762_v12  ;;  %v5136_v1 = vpop.f32.mrb[154].mxu0 }
 0x662   : > { %7812 = vrcp.f32 %v6014_v55  ;;  %v5827_v59 = vsub.f32 0.0, %v5763_v52  ;;  %v5208_v4 = vmax.f32 %v5134_v3, 0.0  ;;  %v5137_v31 = vadd.f32 %v11383_v53, %v5136_v1  ;;  %v5138_v33 = vpop.f32.mrb[155].mxu0 }
 0x663   : > { %v7805_v49 = vpop.eup %7804  ;;  %7814 = vrcp.f32 %v6015_v27  ;;  %v5912_v10 = vmul.f32 1.442695, %v5826_v29  ;;  %v5595_v48 = vpop.xlane.xlu0 %5594 }
 0x664   : > { %6141 = vst.msk [vmem:[%s11355_s23 + $0x80] sm:$0xff] %vm6124_vm1, %v7805_v49  ;;  %v5914_v51 = vmul.f32 1.442695, %v5827_v59  ;;  %v5542_v37 = vmul.f32 %v11391_v44, %v5208_v4  ;;  %v5209_v18 = vmax.f32 %v5137_v31, 0.0  ;;  %v5698_v9 = vadd.f32 %v5595_v48, %v11188_v26 }
 0x665   : > { %v7807_v36 = vpop.eup %7806  ;;  %7816 = vpow2.f32 %v5912_v10  ;;  %v5597_v22 = vpop.xlane.xlu1 %5596 }
 0x666   : > { %v7809_v13 = vpop.eup %7808  ;;  %6142 = vst.msk [vmem:[%s11355_s23 + $0x88] sm:$0xff] %vm6124_vm1, %v7807_v36  ;;  %7818 = vpow2.f32 %v5914_v51  ;;  %v5543_v32 = vmul.f32 %v11391_v44, %v5209_v18  ;;  %v5764_v25 = vadd.f32 %v11320_v8, %v5698_v9  ;;  %v5699_v54 = vadd.f32 %v5597_v22, %v11191_v56  ;;  %5666 = vadd.xlane.f32.xlu0 %v5542_v37 }
 0x667   : > { %v6016_v40 = vadd.f32 1.0, %v7809_v13  ;;  %v5141_v46 = vpop.f32.mrb[156].mxu0 }
 0x668   : > { %v7811_v30 = vpop.eup %7810  ;;  %v5828_v47 = vsub.f32 0.0, %v5764_v25  ;;  %v5765_v26 = vadd.f32 %v11320_v8, %v5699_v54  ;;  %v5142_v28 = vadd.f32 %v11383_v53, %v5141_v46  ;;  %v5143_v5 = vpop.f32.mrb[157].mxu0  ;;  %5668 = vadd.xlane.f32.xlu1 %v5543_v32 }
 0x669   : > { %7820 = vrcp.f32 %v6016_v40  ;;  %v6017_v17 = vadd.f32 1.0, %v7811_v30  ;;  %v5144_v2 = vpop.f32.mrb[158].mxu0 }
 0x66a   : > { %v5916_v24 = vmul.f32 1.442695, %v5828_v47  ;;  %v5829_v11 = vsub.f32 0.0, %v5765_v26  ;;  %v5210_v0 = vmax.f32 %v5142_v28, 0.0  ;;  %v5145_v56 = vadd.f32 %v11383_v53, %v5144_v2  ;;  %v5146_v16 = vpop.f32.mrb[159].mxu0 }
 0x66b   : > { %7822 = vrcp.f32 %v6017_v17  ;;  %v5599_v41 = vpop.xlane.xlu0 %5598 }
 0x66c   : > { %v7813_v62 = vpop.eup %7812  ;;  %7824 = vpow2.f32 %v5916_v24  ;;  %v5918_v12 = vmul.f32 1.442695, %v5829_v11  ;;  %v5544_v57 = vmul.f32 %v11391_v44, %v5210_v0  ;;  %v5211_v34 = vmax.f32 %v5145_v56, 0.0 }
 0x66d   : > { %v7815_v55 = vpop.eup %7814  ;;  %6143 = vst.msk [vmem:[%s11355_s23 + $0x90] sm:$0xff] %vm6124_vm1, %v7813_v62  ;;  %v5700_v52 = vadd.f32 %v5599_v41, %v11180_v38  ;;  %v5601_v3 = vpop.xlane.xlu1 %5600 }
 0x66e   : > { %6144 = vst.msk [vmem:[%s11355_s23 + $0x98] sm:$0xff] %vm6124_vm1, %v7815_v55  ;;  %7826 = vpow2.f32 %v5918_v12  ;;  %v5545_v53 = vmul.f32 %v11391_v44, %v5211_v34  ;;  %v5701_v42 = vadd.f32 %v5601_v3, %v11184_v50  ;;  %5670 = vadd.xlane.f32.xlu0 %v5544_v57 }
 0x66f   : > { %v7817_v27 = vpop.eup %7816  ;;  %v5766_v29 = vadd.f32 %v11320_v8, %v5700_v52 }
 0x670   : > { %v7819_v1 = vpop.eup %7818  ;;  %v6018_v59 = vadd.f32 1.0, %v7817_v27  ;;  %v5767_v4 = vadd.f32 %v11320_v8, %v5701_v42  ;;  %5672 = vadd.xlane.f32.xlu1 %v5545_v53 }
 0x671   : > { %v6019_v38 = vadd.f32 1.0, %v7819_v1  ;;  %v5830_v31 = vsub.f32 0.0, %v5766_v29 }
 0x672   : > { %7828 = vrcp.f32 %v6018_v59  ;;  %v5831_v33 = vsub.f32 0.0, %v5767_v4 }
 0x673   : > { %v7821_v49 = vpop.eup %7820  ;;  %7830 = vrcp.f32 %v6019_v38  ;;  %v5920_v44 = vmul.f32 1.442695, %v5830_v31  ;;  %v5603_v10 = vpop.xlane.xlu0 %5602 }
 0x674   : > { %6145 = vst.msk [vmem:[%s11355_s23 + $0xa0] sm:$0xff] %vm6124_vm1, %v7821_v49  ;;  %v5922_v50 = vmul.f32 1.442695, %v5831_v33  ;;  %v5702_v48 = vadd.f32 %v5603_v10, %v11202_v58 }
 0x675   : > { %v7823_v51 = vpop.eup %7822  ;;  %7832 = vpow2.f32 %v5920_v44  ;;  %v5605_v37 = vpop.xlane.xlu1 %5604 }
 0x676   : > { %v7825_v18 = vpop.eup %7824  ;;  %6146 = vst.msk [vmem:[%s11355_s23 + $0xa8] sm:$0xff] %vm6124_vm1, %v7823_v51  ;;  %7834 = vpow2.f32 %v5922_v50  ;;  %v5768_v9 = vadd.f32 %v11320_v8, %v5702_v48  ;;  %v5703_v36 = vadd.f32 %v5605_v37, %v11205_v19 }
 0x677   : > { %v6020_v22 = vadd.f32 1.0, %v7825_v18 }
 0x678   : > { %v7827_v13 = vpop.eup %7826  ;;  %v5832_v32 = vsub.f32 0.0, %v5768_v9  ;;  %v5769_v25 = vadd.f32 %v11320_v8, %v5703_v36 }
 0x679   : > { %7836 = vrcp.f32 %v6020_v22  ;;  %v6021_v58 = vadd.f32 1.0, %v7827_v13 }
 0x67a   : > { %v5924_v54 = vmul.f32 1.442695, %v5832_v32  ;;  %v5833_v40 = vsub.f32 0.0, %v5769_v25 }
 0x67b   : > { %7838 = vrcp.f32 %v6021_v58  ;;  %v5607_v46 = vpop.xlane.xlu0 %5606 }
 0x67c   : > { %v7829_v30 = vpop.eup %7828  ;;  %7840 = vpow2.f32 %v5924_v54  ;;  %v5926_v47 = vmul.f32 1.442695, %v5833_v40  ;;  %v5704_v26 = vadd.f32 %v5607_v46, %v11195_v7 }
 0x67d   : > { %v7831_v28 = vpop.eup %7830  ;;  %6147 = vst.msk [vmem:[%s11355_s23 + $0xb0] sm:$0xff] %vm6124_vm1, %v7829_v30  ;;  %v5609_v19 = vpop.xlane.xlu1 %5608 }
 0x67e   : > { %6148 = vst.msk [vmem:[%s11355_s23 + $0xb8] sm:$0xff] %vm6124_vm1, %v7831_v28  ;;  %7842 = vpow2.f32 %v5926_v47  ;;  %v5770_v5 = vadd.f32 %v11320_v8, %v5704_v26  ;;  %v5705_v17 = vadd.f32 %v5609_v19, %v11198_v45 }
 0x67f   : > { %v7833_v2 = vpop.eup %7832 }
 0x680   : > { %v7835_v24 = vpop.eup %7834  ;;  %v6022_v11 = vadd.f32 1.0, %v7833_v2  ;;  %v5834_v0 = vsub.f32 0.0, %v5770_v5  ;;  %v5771_v56 = vadd.f32 %v11320_v8, %v5705_v17 }
 0x681   : > { %v6023_v7 = vadd.f32 1.0, %v7835_v24 }
 0x682   : > { %7844 = vrcp.f32 %v6022_v11  ;;  %v5928_v16 = vmul.f32 1.442695, %v5834_v0  ;;  %v5835_v41 = vsub.f32 0.0, %v5771_v56 }
 0x683   : > { %v7837_v62 = vpop.eup %7836  ;;  %7846 = vrcp.f32 %v6023_v7  ;;  %v5611_v12 = vpop.xlane.xlu0 %5610 }
 0x684   : > { %6149 = vst.msk [vmem:[%s11355_s23 + $0xc0] sm:$0xff] %vm6124_vm1, %v7837_v62  ;;  %7848 = vpow2.f32 %v5928_v16  ;;  %v5930_v57 = vmul.f32 1.442695, %v5835_v41  ;;  %v5706_v45 = vadd.f32 %v5611_v12, %v11216_v35 }
 0x685   : > { %v7839_v34 = vpop.eup %7838  ;;  %v5613_v55 = vpop.xlane.xlu1 %5612 }
 0x686   : > { %v7841_v52 = vpop.eup %7840  ;;  %6150 = vst.msk [vmem:[%s11355_s23 + $0xc8] sm:$0xff] %vm6124_vm1, %v7839_v34  ;;  %7850 = vpow2.f32 %v5930_v57  ;;  %v5772_v3 = vadd.f32 %v11320_v8, %v5706_v45  ;;  %v5707_v53 = vadd.f32 %v5613_v55, %v11219_v6 }
 0x687   : > { %v6024_v42 = vadd.f32 1.0, %v7841_v52 }
 0x688   : > { %v7843_v27 = vpop.eup %7842  ;;  %v5836_v29 = vsub.f32 0.0, %v5772_v3  ;;  %v5773_v1 = vadd.f32 %v11320_v8, %v5707_v53 }
 0x689   : > { %7852 = vrcp.f32 %v6024_v42  ;;  %v6025_v59 = vadd.f32 1.0, %v7843_v27 }
 0x68a   : > { %v5932_v35 = vmul.f32 1.442695, %v5836_v29  ;;  %v5837_v4 = vsub.f32 0.0, %v5773_v1 }
 0x68b   : > { %7854 = vrcp.f32 %v6025_v59  ;;  %v5615_v38 = vpop.xlane.xlu0 %5614 }
 0x68c   : > { %v7845_v31 = vpop.eup %7844  ;;  %7856 = vpow2.f32 %v5932_v35  ;;  %v5934_v33 = vmul.f32 1.442695, %v5837_v4  ;;  %v5708_v49 = vadd.f32 %v5615_v38, %v11209_v15 }
 0x68d   : > { %v7847_v44 = vpop.eup %7846  ;;  %6151 = vst.msk [vmem:[%s11355_s23 + $0xd0] sm:$0xff] %vm6124_vm1, %v7845_v31  ;;  %v5617_v6 = vpop.xlane.xlu1 %5616 }
 0x68e   : > { %v7849_v10 = vpop.eup %7848  ;;  %6152 = vst.msk [vmem:[%s11355_s23 + $0xd8] sm:$0xff] %vm6124_vm1, %v7847_v44  ;;  %7858 = vpow2.f32 %v5934_v33  ;;  %v5774_v50 = vadd.f32 %v11320_v8, %v5708_v49  ;;  %v5709_v48 = vadd.f32 %v5617_v6, %v11212_v60 }
 0x68f   : > { %v6026_v51 = vadd.f32 1.0, %v7849_v10 }
 0x690   : > { %v7851_v37 = vpop.eup %7850  ;;  %v5838_v18 = vsub.f32 0.0, %v5774_v50  ;;  %v5775_v9 = vadd.f32 %v11320_v8, %v5709_v48 }
 0x691   : > { %7860 = vrcp.f32 %v6026_v51  ;;  %v6027_v15 = vadd.f32 1.0, %v7851_v37 }
 0x692   : > { %v5936_v36 = vmul.f32 1.442695, %v5838_v18  ;;  %v5839_v22 = vsub.f32 0.0, %v5775_v9 }
 0x693   : > { %v7853_v13 = vpop.eup %7852  ;;  %7862 = vrcp.f32 %v6027_v15  ;;  %v5619_v32 = vpop.xlane.xlu0 %5618 }
 0x694   : > { %6153 = vst.msk [vmem:[%s11355_s23 + $0xe0] sm:$0xff] %vm6124_vm1, %v7853_v13  ;;  %7864 = vpow2.f32 %v5936_v36  ;;  %v5938_v25 = vmul.f32 1.442695, %v5839_v22  ;;  %v5710_v58 = vadd.f32 %v5619_v32, %v11230_v61 }
 0x695   : > { %v7855_v60 = vpop.eup %7854  ;;  %v5621_v54 = vpop.xlane.xlu1 %5620 }
 0x696   : > { %v7857_v40 = vpop.eup %7856  ;;  %6154 = vst.msk [vmem:[%s11355_s23 + $0xe8] sm:$0xff] %vm6124_vm1, %v7855_v60  ;;  %7866 = vpow2.f32 %v5938_v25  ;;  %v5776_v46 = vadd.f32 %v11320_v8, %v5710_v58  ;;  %v5711_v30 = vadd.f32 %v5621_v54, %v11233_v43  ;;  %v12621_v54 = vld [vmem:[#allocation24_spill] sm:$0xff] }
 0x697   : > { %v6028_v47 = vadd.f32 1.0, %v7857_v40 }
 0x698   : > { %v7859_v26 = vpop.eup %7858  ;;  %v5840_v28 = vsub.f32 0.0, %v5776_v46  ;;  %v5777_v19 = vadd.f32 %v11320_v8, %v5711_v30 }
 0x699   : > { %7868 = vrcp.f32 %v6028_v47  ;;  %v6029_v5 = vadd.f32 1.0, %v7859_v26  ;;  %v12622_v26 = vld [vmem:[#allocation27_spill] sm:$0xff] }
 0x69a   : > { %v5940_v61 = vmul.f32 1.442695, %v5840_v28  ;;  %v5841_v17 = vsub.f32 0.0, %v5777_v19 }
 0x69b   : > { %v7861_v2 = vpop.eup %7860  ;;  %7870 = vrcp.f32 %v6029_v5  ;;  %v5623_v24 = vpop.xlane.xlu0 %5622 }
 0x69c   : > { %6155 = vst.msk [vmem:[%s11355_s23 + $0xf0] sm:$0xff] %vm6124_vm1, %v7861_v2  ;;  %7872 = vpow2.f32 %v5940_v61  ;;  %v5942_v11 = vmul.f32 1.442695, %v5841_v17  ;;  %v5712_v0 = vadd.f32 %v5623_v24, %v11223_v23 }
 0x69d   : > { %v7863_v43 = vpop.eup %7862  ;;  %v5625_v56 = vpop.xlane.xlu1 %5624 }
 0x69e   : > { %v7865_v7 = vpop.eup %7864  ;;  %6156 = vst.msk [vmem:[%s11355_s23 + $0xf8] sm:$0xff] %vm6124_vm1, %v7863_v43  ;;  %7874 = vpow2.f32 %v5942_v11  ;;  %v5778_v16 = vadd.f32 %v11320_v8, %v5712_v0  ;;  %v5713_v41 = vadd.f32 %v5625_v56, %v11226_v20 }
 0x69f   : > { %v6030_v62 = vadd.f32 1.0, %v7865_v7  ;;  %v12623_v7 = vld [vmem:[#allocation138_spill] sm:$0xff] }
 0x6a0   : > { %v7867_v12 = vpop.eup %7866  ;;  %v5842_v57 = vsub.f32 0.0, %v5778_v16  ;;  %v5779_v45 = vadd.f32 %v11320_v8, %v5713_v41 }
 0x6a1   : > { %7876 = vrcp.f32 %v6030_v62  ;;  %v6031_v34 = vadd.f32 1.0, %v7867_v12 }
 0x6a2   : > { %v5944_v23 = vmul.f32 1.442695, %v5842_v57  ;;  %v5843_v55 = vsub.f32 0.0, %v5779_v45  ;;  %v12624_v45 = vld [vmem:[#allocation139_spill] sm:$0xff] }
 0x6a3   : > { %v7869_v52 = vpop.eup %7868  ;;  %7878 = vrcp.f32 %v6031_v34  ;;  %v5627_v3 = vpop.xlane.xlu0 %5626 }
 0x6a4   : > { %6157 = vst.msk [vmem:[%s11355_s23 + $0x100] sm:$0xff] %vm6124_vm1, %v7869_v52  ;;  %7880 = vpow2.f32 %v5944_v23  ;;  %v5946_v53 = vmul.f32 1.442695, %v5843_v55  ;;  %v5714_v42 = vadd.f32 %v5627_v3, %v11244_v63 }
 0x6a5   : > { %v7871_v20 = vpop.eup %7870  ;;  %v5629_v27 = vpop.xlane.xlu1 %5628 }
 0x6a6   : > { %v7873_v29 = vpop.eup %7872  ;;  %6158 = vst.msk [vmem:[%s11355_s23 + $0x108] sm:$0xff] %vm6124_vm1, %v7871_v20  ;;  %7882 = vpow2.f32 %v5946_v53  ;;  %v5780_v1 = vadd.f32 %v11320_v8, %v5714_v42  ;;  %v5715_v59 = vadd.f32 %v5629_v27, %v11247_v39 }
 0x6a7   : > { %v6032_v35 = vadd.f32 1.0, %v7873_v29 }
 0x6a8   : > { %v7875_v4 = vpop.eup %7874  ;;  %v5844_v38 = vsub.f32 0.0, %v5780_v1  ;;  %v5781_v31 = vadd.f32 %v11320_v8, %v5715_v59  ;;  %v12625_v59 = vld [vmem:[#allocation148_spill] sm:$0xff] }
 0x6a9   : > { %7884 = vrcp.f32 %v6032_v35  ;;  %v6033_v33 = vadd.f32 1.0, %v7875_v4 }
 0x6aa   : > { %v5948_v63 = vmul.f32 1.442695, %v5844_v38  ;;  %v5845_v49 = vsub.f32 0.0, %v5781_v31 }
 0x6ab   : > { %v7877_v44 = vpop.eup %7876  ;;  %7886 = vrcp.f32 %v6033_v33  ;;  %v5631_v6 = vpop.xlane.xlu0 %5630 }
 0x6ac   : > { %6159 = vst.msk [vmem:[%s11355_s23 + $0x110] sm:$0xff] %vm6124_vm1, %v7877_v44  ;;  %7888 = vpow2.f32 %v5948_v63  ;;  %v5950_v10 = vmul.f32 1.442695, %v5845_v49  ;;  %v5716_v50 = vadd.f32 %v5631_v6, %v11237_v14  ;;  %v12626_v63 = vld [vmem:[#allocation149_spill] sm:$0xff] }
 0x6ad   : > { %v7879_v39 = vpop.eup %7878  ;;  %v5633_v48 = vpop.xlane.xlu1 %5632 }
 0x6ae   : > { %v7881_v51 = vpop.eup %7880  ;;  %6160 = vst.msk [vmem:[%s11355_s23 + $0x118] sm:$0xff] %vm6124_vm1, %v7879_v39  ;;  %7890 = vpow2.f32 %v5950_v10  ;;  %v5782_v37 = vadd.f32 %v11320_v8, %v5716_v50  ;;  %v5717_v18 = vadd.f32 %v5633_v48, %v11240_v21 }
 0x6af   : > { %v6034_v9 = vadd.f32 1.0, %v7881_v51 }
 0x6b0   : > { %v7883_v15 = vpop.eup %7882  ;;  %v5846_v36 = vsub.f32 0.0, %v5782_v37  ;;  %v5783_v22 = vadd.f32 %v11320_v8, %v5717_v18 }
 0x6b1   : > { %7892 = vrcp.f32 %v6034_v9  ;;  %v6035_v13 = vadd.f32 1.0, %v7883_v15  ;;  %v12627_v15 = vld [vmem:[#allocation145_spill] sm:$0xff] }
 0x6b2   : > { %v5952_v14 = vmul.f32 1.442695, %v5846_v36  ;;  %v5847_v32 = vsub.f32 0.0, %v5783_v22 }
 0x6b3   : > { %v7885_v25 = vpop.eup %7884  ;;  %7894 = vrcp.f32 %v6035_v13  ;;  %v5635_v58 = vpop.xlane.xlu0 %5634 }
 0x6b4   : > { %6161 = vst.msk [vmem:[%s11355_s23 + $0x120] sm:$0xff] %vm6124_vm1, %v7885_v25  ;;  %7896 = vpow2.f32 %v5952_v14  ;;  %v5954_v60 = vmul.f32 1.442695, %v5847_v32  ;;  %v5718_v40 = vadd.f32 %v5635_v58, %v12621_v54  ;;  %v12628_v25 = vld [vmem:[#allocation147_spill] sm:$0xff] }
 0x6b5   : > { %v7887_v21 = vpop.eup %7886  ;;  %v5637_v46 = vpop.xlane.xlu1 %5636 }
 0x6b6   : > { %v7889_v30 = vpop.eup %7888  ;;  %6162 = vst.msk [vmem:[%s11355_s23 + $0x128] sm:$0xff] %vm6124_vm1, %v7887_v21  ;;  %7898 = vpow2.f32 %v5954_v60  ;;  %v5784_v47 = vadd.f32 %v11320_v8, %v5718_v40  ;;  %v5719_v28 = vadd.f32 %v5637_v46, %v12622_v26 }
 0x6b7   : > { %v6036_v19 = vadd.f32 1.0, %v7889_v30 }
 0x6b8   : > { %v7891_v5 = vpop.eup %7890  ;;  %v5848_v61 = vsub.f32 0.0, %v5784_v47  ;;  %v5785_v17 = vadd.f32 %v11320_v8, %v5719_v28 }
 0x6b9   : > { %7900 = vrcp.f32 %v6036_v19  ;;  %v6037_v2 = vadd.f32 1.0, %v7891_v5  ;;  %v12629_v5 = vld [vmem:[#allocation155_spill] sm:$0xff] }
 0x6ba   : > { %v5956_v24 = vmul.f32 1.442695, %v5848_v61  ;;  %v5849_v11 = vsub.f32 0.0, %v5785_v17 }
 0x6bb   : > { %v7893_v0 = vpop.eup %7892  ;;  %7902 = vrcp.f32 %v6037_v2  ;;  %v5639_v43 = vpop.xlane.xlu0 %5638 }
 0x6bc   : > { %6163 = vst.msk [vmem:[%s11355_s23 + $0x130] sm:$0xff] %vm6124_vm1, %v7893_v0  ;;  %7904 = vpow2.f32 %v5956_v24  ;;  %v5958_v56 = vmul.f32 1.442695, %v5849_v11  ;;  %v5720_v16 = vadd.f32 %v5639_v43, %v12623_v7  ;;  %v12630_v0 = vld [vmem:[#allocation157_spill] sm:$0xff] }
 0x6bd   : > { %v7895_v41 = vpop.eup %7894  ;;  %v5641_v62 = vpop.xlane.xlu1 %5640 }
 0x6be   : > { %v7897_v12 = vpop.eup %7896  ;;  %6164 = vst.msk [vmem:[%s11355_s23 + $0x138] sm:$0xff] %vm6124_vm1, %v7895_v41  ;;  %7906 = vpow2.f32 %v5958_v56  ;;  %v5786_v57 = vadd.f32 %v11320_v8, %v5720_v16  ;;  %v5721_v34 = vadd.f32 %v5641_v62, %v12624_v45 }
 0x6bf   : > { %v6038_v23 = vadd.f32 1.0, %v7897_v12 }
 0x6c0   : > { %v7899_v55 = vpop.eup %7898  ;;  %v5850_v52 = vsub.f32 0.0, %v5786_v57  ;;  %v5787_v3 = vadd.f32 %v11320_v8, %v5721_v34 }
 0x6c1   : > { %7908 = vrcp.f32 %v6038_v23  ;;  %v6039_v53 = vadd.f32 1.0, %v7899_v55  ;;  %v12631_v55 = vld [vmem:[#allocation26_spill] sm:$0xff] }
 0x6c2   : > { %v5960_v42 = vmul.f32 1.442695, %v5850_v52  ;;  %v5851_v20 = vsub.f32 0.0, %v5787_v3 }
 0x6c3   : > { %v7901_v27 = vpop.eup %7900  ;;  %7910 = vrcp.f32 %v6039_v53  ;;  %v5643_v29 = vpop.xlane.xlu0 %5642 }
 0x6c4   : > { %6165 = vst.msk [vmem:[%s11355_s23 + $0x140] sm:$0xff] %vm6124_vm1, %v7901_v27  ;;  %7912 = vpow2.f32 %v5960_v42  ;;  %v5962_v1 = vmul.f32 1.442695, %v5851_v20  ;;  %v5722_v35 = vadd.f32 %v5643_v29, %v12625_v59  ;;  %v12632_v27 = vld [vmem:[#allocation29_spill] sm:$0xff] }
 0x6c5   : > { %v7903_v4 = vpop.eup %7902  ;;  %v5645_v38 = vpop.xlane.xlu1 %5644 }
 0x6c6   : > { %v7905_v31 = vpop.eup %7904  ;;  %6166 = vst.msk [vmem:[%s11355_s23 + $0x148] sm:$0xff] %vm6124_vm1, %v7903_v4  ;;  %7914 = vpow2.f32 %v5962_v1  ;;  %v5788_v33 = vadd.f32 %v11320_v8, %v5722_v35  ;;  %v5723_v49 = vadd.f32 %v5645_v38, %v12626_v63 }
 0x6c7   : > { %v6040_v44 = vadd.f32 1.0, %v7905_v31 }
 0x6c8   : > { %v7907_v6 = vpop.eup %7906  ;;  %v5852_v10 = vsub.f32 0.0, %v5788_v33  ;;  %v5789_v50 = vadd.f32 %v11320_v8, %v5723_v49 }
 0x6c9   : > { %7916 = vrcp.f32 %v6040_v44  ;;  %v6041_v39 = vadd.f32 1.0, %v7907_v6  ;;  %v12633_v6 = vld [vmem:[#allocation28_spill] sm:$0xff] }
 0x6ca   : > { %v5964_v48 = vmul.f32 1.442695, %v5852_v10  ;;  %v5853_v51 = vsub.f32 0.0, %v5789_v50 }
 0x6cb   : > { %v7909_v37 = vpop.eup %7908  ;;  %7918 = vrcp.f32 %v6041_v39  ;;  %v5647_v18 = vpop.xlane.xlu0 %5646 }
 0x6cc   : > { %6167 = vst.msk [vmem:[%s11355_s23 + $0x150] sm:$0xff] %vm6124_vm1, %v7909_v37  ;;  %7920 = vpow2.f32 %v5964_v48  ;;  %v5966_v9 = vmul.f32 1.442695, %v5853_v51  ;;  %v5724_v36 = vadd.f32 %v5647_v18, %v12627_v15  ;;  %v12634_v37 = vld [vmem:[#allocation31_spill] sm:$0xff] }
 0x6cd   : > { %v7911_v22 = vpop.eup %7910  ;;  %v5649_v13 = vpop.xlane.xlu1 %5648 }
 0x6ce   : > { %v7913_v14 = vpop.eup %7912  ;;  %6168 = vst.msk [vmem:[%s11355_s23 + $0x158] sm:$0xff] %vm6124_vm1, %v7911_v22  ;;  %7922 = vpow2.f32 %v5966_v9  ;;  %v5790_v32 = vadd.f32 %v11320_v8, %v5724_v36  ;;  %v5725_v58 = vadd.f32 %v5649_v13, %v12628_v25 }
 0x6cf   : > { %v6042_v60 = vadd.f32 1.0, %v7913_v14 }
 0x6d0   : > { %v7915_v54 = vpop.eup %7914  ;;  %v5854_v40 = vsub.f32 0.0, %v5790_v32  ;;  %v5791_v21 = vadd.f32 %v11320_v8, %v5725_v58 }
 0x6d1   : > { %7924 = vrcp.f32 %v6042_v60  ;;  %v6043_v46 = vadd.f32 1.0, %v7915_v54  ;;  %v12635_v54 = vld [vmem:[#allocation158_spill] sm:$0xff] }
 0x6d2   : > { %v5968_v30 = vmul.f32 1.442695, %v5854_v40  ;;  %v5855_v47 = vsub.f32 0.0, %v5791_v21 }
 0x6d3   : > { %v7917_v26 = vpop.eup %7916  ;;  %7926 = vrcp.f32 %v6043_v46  ;;  %v5651_v28 = vpop.xlane.xlu0 %5650 }
 0x6d4   : > { %6169 = vst.msk [vmem:[%s11355_s23 + $0x160] sm:$0xff] %vm6124_vm1, %v7917_v26  ;;  %7928 = vpow2.f32 %v5968_v30  ;;  %v5970_v19 = vmul.f32 1.442695, %v5855_v47  ;;  %v5726_v61 = vadd.f32 %v5651_v28, %v12629_v5  ;;  %v12636_v26 = vld [vmem:[#allocation159_spill] sm:$0xff] }
 0x6d5   : > { %v7919_v17 = vpop.eup %7918  ;;  %v5653_v2 = vpop.xlane.xlu1 %5652 }
 0x6d6   : > { %v7921_v24 = vpop.eup %7920  ;;  %6170 = vst.msk [vmem:[%s11355_s23 + $0x168] sm:$0xff] %vm6124_vm1, %v7919_v17  ;;  %7930 = vpow2.f32 %v5970_v19  ;;  %v5792_v11 = vadd.f32 %v11320_v8, %v5726_v61  ;;  %v5727_v43 = vadd.f32 %v5653_v2, %v12630_v0 }
 0x6d7   : > { %v6044_v56 = vadd.f32 1.0, %v7921_v24 }
 0x6d8   : > { %v7923_v7 = vpop.eup %7922  ;;  %v5856_v16 = vsub.f32 0.0, %v5792_v11  ;;  %v5793_v41 = vadd.f32 %v11320_v8, %v5727_v43 }
 0x6d9   : > { %7932 = vrcp.f32 %v6044_v56  ;;  %v6045_v62 = vadd.f32 1.0, %v7923_v7  ;;  %v12637_v7 = vld [vmem:[#allocation168_spill] sm:$0xff] }
 0x6da   : > { %v5972_v12 = vmul.f32 1.442695, %v5856_v16  ;;  %v5857_v57 = vsub.f32 0.0, %v5793_v41 }
 0x6db   : > { %v7925_v45 = vpop.eup %7924  ;;  %7934 = vrcp.f32 %v6045_v62  ;;  %v5655_v34 = vpop.xlane.xlu0 %5654 }
 0x6dc   : > { %6171 = vst.msk [vmem:[%s11355_s23 + $0x170] sm:$0xff] %vm6124_vm1, %v7925_v45  ;;  %7936 = vpow2.f32 %v5972_v12  ;;  %v5974_v23 = vmul.f32 1.442695, %v5857_v57  ;;  %v5728_v52 = vadd.f32 %v5655_v34, %v12631_v55  ;;  %v12638_v45 = vld [vmem:[#allocation30_spill] sm:$0xff] }
 0x6dd   : > { %v7927_v3 = vpop.eup %7926  ;;  %v5657_v53 = vpop.xlane.xlu1 %5656 }
 0x6de   : > { %v7929_v42 = vpop.eup %7928  ;;  %6172 = vst.msk [vmem:[%s11355_s23 + $0x178] sm:$0xff] %vm6124_vm1, %v7927_v3  ;;  %7938 = vpow2.f32 %v5974_v23  ;;  %v5794_v20 = vadd.f32 %v11320_v8, %v5728_v52  ;;  %v5729_v29 = vadd.f32 %v5657_v53, %v12632_v27 }
 0x6df   : > { %v6046_v1 = vadd.f32 1.0, %v7929_v42 }
 0x6e0   : > { %v7931_v59 = vpop.eup %7930  ;;  %v5858_v35 = vsub.f32 0.0, %v5794_v20  ;;  %v5795_v4 = vadd.f32 %v11320_v8, %v5729_v29 }
 0x6e1   : > { %7940 = vrcp.f32 %v6046_v1  ;;  %v6047_v38 = vadd.f32 1.0, %v7931_v59  ;;  %v12639_v59 = vld [vmem:[#allocation166_spill] sm:$0xff] }
 0x6e2   : > { %v5976_v31 = vmul.f32 1.442695, %v5858_v35  ;;  %v5859_v33 = vsub.f32 0.0, %v5795_v4 }
 0x6e3   : > { %v7933_v63 = vpop.eup %7932  ;;  %7942 = vrcp.f32 %v6047_v38  ;;  %v5659_v49 = vpop.xlane.xlu0 %5658 }
 0x6e4   : > { %6173 = vst.msk [vmem:[%s11355_s23 + $0x180] sm:$0xff] %vm6124_vm1, %v7933_v63  ;;  %7944 = vpow2.f32 %v5976_v31  ;;  %v5978_v44 = vmul.f32 1.442695, %v5859_v33  ;;  %v5730_v10 = vadd.f32 %v5659_v49, %v12633_v6  ;;  %v12640_v63 = vld [vmem:[#allocation167_spill] sm:$0xff] }
 0x6e5   : > { %v7935_v50 = vpop.eup %7934  ;;  %v5661_v39 = vpop.xlane.xlu1 %5660 }
 0x6e6   : > { %v7937_v48 = vpop.eup %7936  ;;  %6174 = vst.msk [vmem:[%s11355_s23 + $0x188] sm:$0xff] %vm6124_vm1, %v7935_v50  ;;  %7946 = vpow2.f32 %v5978_v44  ;;  %v5796_v51 = vadd.f32 %v11320_v8, %v5730_v10  ;;  %v5731_v18 = vadd.f32 %v5661_v39, %v12634_v37 }
 0x6e7   : > { %v6048_v9 = vadd.f32 1.0, %v7937_v48 }
 0x6e8   : > { %v7939_v15 = vpop.eup %7938  ;;  %v5860_v36 = vsub.f32 0.0, %v5796_v51  ;;  %v5797_v22 = vadd.f32 %v11320_v8, %v5731_v18 }
 0x6e9   : > { %7948 = vrcp.f32 %v6048_v9  ;;  %v6049_v13 = vadd.f32 1.0, %v7939_v15 }
 0x6ea   : > { %v5980_v14 = vmul.f32 1.442695, %v5860_v36  ;;  %v5861_v32 = vsub.f32 0.0, %v5797_v22 }
 0x6eb   : > { %v7941_v25 = vpop.eup %7940  ;;  %7950 = vrcp.f32 %v6049_v13  ;;  %v5663_v58 = vpop.xlane.xlu0 %5662 }
 0x6ec   : > { %6175 = vst.msk [vmem:[%s11355_s23 + $0x190] sm:$0xff] %vm6124_vm1, %v7941_v25  ;;  %7952 = vpow2.f32 %v5980_v14  ;;  %v5982_v60 = vmul.f32 1.442695, %v5861_v32  ;;  %v5732_v40 = vadd.f32 %v5663_v58, %v12635_v54 }
 0x6ed   : > { %v7943_v21 = vpop.eup %7942  ;;  %v5665_v46 = vpop.xlane.xlu1 %5664 }
 0x6ee   : > { %v7945_v30 = vpop.eup %7944  ;;  %6176 = vst.msk [vmem:[%s11355_s23 + $0x198] sm:$0xff] %vm6124_vm1, %v7943_v21  ;;  %7954 = vpow2.f32 %v5982_v60  ;;  %v5798_v47 = vadd.f32 %v11320_v8, %v5732_v40  ;;  %v5733_v28 = vadd.f32 %v5665_v46, %v12636_v26 }
 0x6ef   : > { %v6050_v19 = vadd.f32 1.0, %v7945_v30 }
 0x6f0   : > { %v7947_v5 = vpop.eup %7946  ;;  %v5862_v61 = vsub.f32 0.0, %v5798_v47  ;;  %v5799_v17 = vadd.f32 %v11320_v8, %v5733_v28 }
 0x6f1   : > { %7956 = vrcp.f32 %v6050_v19  ;;  %v6051_v2 = vadd.f32 1.0, %v7947_v5 }
 0x6f2   : > { %v5984_v24 = vmul.f32 1.442695, %v5862_v61  ;;  %v5863_v11 = vsub.f32 0.0, %v5799_v17 }
 0x6f3   : > { %v7949_v0 = vpop.eup %7948  ;;  %7958 = vrcp.f32 %v6051_v2  ;;  %v5667_v43 = vpop.xlane.xlu0 %5666 }
 0x6f4   : > { %6177 = vst.msk [vmem:[%s11355_s23 + $0x1a0] sm:$0xff] %vm6124_vm1, %v7949_v0  ;;  %7960 = vpow2.f32 %v5984_v24  ;;  %v5986_v56 = vmul.f32 1.442695, %v5863_v11  ;;  %v5734_v16 = vadd.f32 %v5667_v43, %v12637_v7 }
 0x6f5   : > { %v7951_v41 = vpop.eup %7950  ;;  %v5669_v62 = vpop.xlane.xlu1 %5668 }
 0x6f6   : > { %v7953_v12 = vpop.eup %7952  ;;  %6178 = vst.msk [vmem:[%s11355_s23 + $0x1a8] sm:$0xff] %vm6124_vm1, %v7951_v41  ;;  %7962 = vpow2.f32 %v5986_v56  ;;  %v5800_v57 = vadd.f32 %v11320_v8, %v5734_v16  ;;  %v5735_v34 = vadd.f32 %v5669_v62, %v12638_v45 }
 0x6f7   : > { %v6052_v23 = vadd.f32 1.0, %v7953_v12 }
 0x6f8   : > { %v7955_v55 = vpop.eup %7954  ;;  %v5864_v52 = vsub.f32 0.0, %v5800_v57  ;;  %v5801_v3 = vadd.f32 %v11320_v8, %v5735_v34 }
 0x6f9   : > { %7964 = vrcp.f32 %v6052_v23  ;;  %v6053_v53 = vadd.f32 1.0, %v7955_v55 }
 0x6fa   : > { %v5988_v42 = vmul.f32 1.442695, %v5864_v52  ;;  %v5865_v20 = vsub.f32 0.0, %v5801_v3 }
 0x6fb   : > { %v7957_v27 = vpop.eup %7956  ;;  %7966 = vrcp.f32 %v6053_v53  ;;  %v5671_v29 = vpop.xlane.xlu0 %5670 }
 0x6fc   : > { %6179 = vst.msk [vmem:[%s11355_s23 + $0x1b0] sm:$0xff] %vm6124_vm1, %v7957_v27  ;;  %7968 = vpow2.f32 %v5988_v42  ;;  %v5990_v1 = vmul.f32 1.442695, %v5865_v20  ;;  %v5736_v35 = vadd.f32 %v5671_v29, %v12639_v59 }
 0x6fd   : > { %v7959_v4 = vpop.eup %7958  ;;  %v5673_v38 = vpop.xlane.xlu1 %5672 }
 0x6fe   : > { %v7961_v31 = vpop.eup %7960  ;;  %6180 = vst.msk [vmem:[%s11355_s23 + $0x1b8] sm:$0xff] %vm6124_vm1, %v7959_v4  ;;  %7970 = vpow2.f32 %v5990_v1  ;;  %v5802_v33 = vadd.f32 %v11320_v8, %v5736_v35  ;;  %v5737_v49 = vadd.f32 %v5673_v38, %v12640_v63 }
 0x6ff   : > { %v6054_v44 = vadd.f32 1.0, %v7961_v31 }
 0x700   : > { %v7963_v6 = vpop.eup %7962  ;;  %v5866_v10 = vsub.f32 0.0, %v5802_v33  ;;  %v5803_v50 = vadd.f32 %v11320_v8, %v5737_v49 }
 0x701   : > { %7972 = vrcp.f32 %v6054_v44  ;;  %v6055_v39 = vadd.f32 1.0, %v7963_v6 }
 0x702   : > { %v5992_v48 = vmul.f32 1.442695, %v5866_v10  ;;  %v5867_v51 = vsub.f32 0.0, %v5803_v50 }
 0x703   : > { %v7965_v37 = vpop.eup %7964  ;;  %7974 = vrcp.f32 %v6055_v39 }
 0x704   : > { %6181 = vst.msk [vmem:[%s11355_s23 + $0x1c0] sm:$0xff] %vm6124_vm1, %v7965_v37  ;;  %7976 = vpow2.f32 %v5992_v48  ;;  %v5994_v18 = vmul.f32 1.442695, %v5867_v51 }
 0x705   : > { %v7967_v9 = vpop.eup %7966 }
 0x706   : > { %v7969_v15 = vpop.eup %7968  ;;  %6182 = vst.msk [vmem:[%s11355_s23 + $0x1c8] sm:$0xff] %vm6124_vm1, %v7967_v9  ;;  %7978 = vpow2.f32 %v5994_v18 }
 0x707   : > { %v6056_v36 = vadd.f32 1.0, %v7969_v15 }
 0x708   : > { %v7971_v8 = vpop.eup %7970 }
 0x709   : > { %7980 = vrcp.f32 %v6056_v36  ;;  %v6057_v22 = vadd.f32 1.0, %v7971_v8 }
 0x70b   : > { %v7973_v13 = vpop.eup %7972  ;;  %7982 = vrcp.f32 %v6057_v22 }
 0x70c   : > { %6183 = vst.msk [vmem:[%s11355_s23 + $0x1d0] sm:$0xff] %vm6124_vm1, %v7973_v13 }
 0x70d   : > { %v7975_v14 = vpop.eup %7974 }
 0x70e   : > { %v7977_v32 = vpop.eup %7976  ;;  %6184 = vst.msk [vmem:[%s11355_s23 + $0x1d8] sm:$0xff] %vm6124_vm1, %v7975_v14 }
 0x70f   : > { %v6058_v25 = vadd.f32 1.0, %v7977_v32 }
 0x710   : > { %v7979_v58 = vpop.eup %7978 }
 0x711   : > { %7984 = vrcp.f32 %v6058_v25  ;;  %v6059_v60 = vadd.f32 1.0, %v7979_v58 }
 0x713   : > { %v7981_v54 = vpop.eup %7980  ;;  %7986 = vrcp.f32 %v6059_v60 }
 0x714   : > { %6185 = vst.msk [vmem:[%s11355_s23 + $0x1e0] sm:$0xff] %vm6124_vm1, %v7981_v54 }
 0x715   : > { %v7983_v40 = vpop.eup %7982 }
 0x716   : > { %6186 = vst.msk [vmem:[%s11355_s23 + $0x1e8] sm:$0xff] %vm6124_vm1, %v7983_v40 }
 0x718   : > { %6195 = sbr.rel (!%p8237_p4) target bundleno = 1895 (0x767), region = 72 }
 0x71b   : > { %v7985_v21 = vpop.eup %7984 }
 0x71c   : > { %6187 = vst.msk [vmem:[%s11355_s23 + $0x1f0] sm:$0xff] %vm6124_vm1, %v7985_v21 }
 0x71d   : > { %v7987_v46 = vpop.eup %7986 }
 0x71e   : > { %6188 = vst.msk [vmem:[%s11355_s23 + $0x1f8] sm:$0xff] %vm6124_vm1, %v7987_v46 }
 0x71f   : > { %s12650_s21 = smov (!%p6198_p8, %s6197_s21), 64 }
 0x720   : > { %s6929_s13 = sshll.u32 %s12650_s21, 7 }
 0x721   : > { %p6932_p9 = scmp.eq.s32.totalorder %s6929_s13, 0 }
 0x722   : > { %s11658_s14 = sshrl.u32 (!%p6932_p9), %s12650_s21, 6 }
 0x723   : > { %6206 = sbr.rel (%p6932_p9) target bundleno = 1895 (0x767), region = 76  ;;  %p6933_p10 = scmp.le.s32.totalorder (!%p6932_p9), %s11658_s14, 0 }
 0x72a   : > { %6612 = sbr.rel (%p6933_p10) target bundleno = 1874 (0x752), region = 154  ;;  %s12641_s11 = smov (!%p6933_p10), %s11652_s28 }
 0x72b   : > { %s12642_s30 = smov (!%p6933_p10), %s11355_s23  ;;  %s11667_s15 = smov (!%p6933_p10), 0  }
 0x72c   : > { %s11669_s18 = smov (!%p6933_p10), 0  }
 0x731 LB: >> { %v6394_v30 = vld [vmem:[%s8117_s30] sm:$0xff]  ;;  %v6396_v47 = vld [vmem:[%s8117_s30 + $0x8] sm:$0xff]  ;;  %v6398_v26 = vld [vmem:[%s8117_s30 + $0x10] sm:$0xff]  ;;  %s6522_s16 = sadd.s32 1, %s8121_s15  ;;  %s6388_s18 = sadd.s32 1, %s8125_s18   ;;  %s8125_s18 = sphi %s11669_s18, %s6388_s18   ;;  %s8121_s15 = sphi %s11667_s15, %s12645_s15   ;;  %s8117_s30 = sphi %s12642_s30, %s12644_s30   ;;  %s8113_s11 = sphi %s12641_s11, %s12643_s11  }
 0x732   : >> { %6395 = vst [vmem:[%s8113_s11] sm:$0xff] %v6394_v30  ;;  %6397 = vst [vmem:[%s8113_s11 + $0x8] sm:$0xff] %v6396_v47  ;;  %v6400_v28 = vld [vmem:[%s8117_s30 + $0x18] sm:$0xff]  ;;  %v6402_v19 = vld [vmem:[%s8117_s30 + $0x20] sm:$0xff]  ;;  %p6523_p11 = scmp.ge.s32.totalorder %s6522_s16, %s11658_s14  ;;  %p6387_p12 = scmp.ge.s32.totalorder %s6388_s18, %s11658_s14 }
 0x733   : >> { %6399 = vst [vmem:[%s8113_s11 + $0x10] sm:$0xff] %v6398_v26  ;;  %v6404_v5 = vld [vmem:[%s8117_s30 + $0x28] sm:$0xff]  ;;  %6401 = vst [vmem:[%s8113_s11 + $0x18] sm:$0xff] %v6400_v28  ;;  %v6406_v61 = vld [vmem:[%s8117_s30 + $0x30] sm:$0xff] }
 0x734   : >> { %6403 = vst [vmem:[%s8113_s11 + $0x20] sm:$0xff] %v6402_v19  ;;  %6405 = vst [vmem:[%s8113_s11 + $0x28] sm:$0xff] %v6404_v5  ;;  %v6408_v17 = vld [vmem:[%s8117_s30 + $0x38] sm:$0xff]  ;;  %v6410_v2 = vld [vmem:[%s8117_s30 + $0x40] sm:$0xff]  ;;  %s12652_s16 = smov (%p6523_p11, %s6522_s16), 0 }
 0x735   : >> { %6407 = vst [vmem:[%s8113_s11 + $0x30] sm:$0xff] %v6406_v61  ;;  %6409 = vst [vmem:[%s8113_s11 + $0x38] sm:$0xff] %v6408_v17  ;;  %v6412_v24 = vld [vmem:[%s8117_s30 + $0x48] sm:$0xff]  ;;  %v6414_v11 = vld [vmem:[%s8117_s30 + $0x50] sm:$0xff]  ;;  %s6934_s17 = sshll.u32 %s12652_s16, 9  ;;  %s12645_s15 = smov %s12652_s16 }
 0x736   : >> { %6411 = vst [vmem:[%s8113_s11 + $0x40] sm:$0xff] %v6410_v2  ;;  %v6416_v0 = vld [vmem:[%s8117_s30 + $0x58] sm:$0xff]  ;;  %6413 = vst [vmem:[%s8113_s11 + $0x48] sm:$0xff] %v6412_v24  ;;  %v6418_v43 = vld [vmem:[%s8117_s30 + $0x60] sm:$0xff]  ;;  %s11725_s19 = scalar_lea.vmem %s11355_s23, %s6934_s17 [#allocation3]   ;;  %s11728_s20 = scalar_lea.vmem %s11652_s28, %s6934_s17  }
 0x737   : >> { %6415 = vst [vmem:[%s8113_s11 + $0x50] sm:$0xff] %v6414_v11  ;;  %6417 = vst [vmem:[%s8113_s11 + $0x58] sm:$0xff] %v6416_v0  ;;  %v6420_v56 = vld [vmem:[%s8117_s30 + $0x68] sm:$0xff]  ;;  %v6422_v7 = vld [vmem:[%s8117_s30 + $0x70] sm:$0xff] }
 0x738   : >> { %6419 = vst [vmem:[%s8113_s11 + $0x60] sm:$0xff] %v6418_v43  ;;  %6421 = vst [vmem:[%s8113_s11 + $0x68] sm:$0xff] %v6420_v56  ;;  %v6424_v16 = vld [vmem:[%s8117_s30 + $0x78] sm:$0xff]  ;;  %v6426_v41 = vld [vmem:[%s8117_s30 + $0x80] sm:$0xff] }
 0x739   : >> { %6423 = vst [vmem:[%s8113_s11 + $0x70] sm:$0xff] %v6422_v7  ;;  %v6428_v62 = vld [vmem:[%s8117_s30 + $0x88] sm:$0xff]  ;;  %6425 = vst [vmem:[%s8113_s11 + $0x78] sm:$0xff] %v6424_v16  ;;  %v6430_v12 = vld [vmem:[%s8117_s30 + $0x90] sm:$0xff] }
 0x73a   : >> { %6427 = vst [vmem:[%s8113_s11 + $0x80] sm:$0xff] %v6426_v41  ;;  %6429 = vst [vmem:[%s8113_s11 + $0x88] sm:$0xff] %v6428_v62  ;;  %v6432_v57 = vld [vmem:[%s8117_s30 + $0x98] sm:$0xff]  ;;  %v6434_v45 = vld [vmem:[%s8117_s30 + $0xa0] sm:$0xff] }
 0x73b   : >> { %6431 = vst [vmem:[%s8113_s11 + $0x90] sm:$0xff] %v6430_v12  ;;  %6433 = vst [vmem:[%s8113_s11 + $0x98] sm:$0xff] %v6432_v57  ;;  %v6436_v34 = vld [vmem:[%s8117_s30 + $0xa8] sm:$0xff]  ;;  %v6438_v23 = vld [vmem:[%s8117_s30 + $0xb0] sm:$0xff] }
 0x73c   : >> { %6435 = vst [vmem:[%s8113_s11 + $0xa0] sm:$0xff] %v6434_v45  ;;  %v6440_v55 = vld [vmem:[%s8117_s30 + $0xb8] sm:$0xff]  ;;  %6437 = vst [vmem:[%s8113_s11 + $0xa8] sm:$0xff] %v6436_v34  ;;  %v6442_v52 = vld [vmem:[%s8117_s30 + $0xc0] sm:$0xff] }
 0x73d   : >> { %6439 = vst [vmem:[%s8113_s11 + $0xb0] sm:$0xff] %v6438_v23  ;;  %6441 = vst [vmem:[%s8113_s11 + $0xb8] sm:$0xff] %v6440_v55  ;;  %v6444_v3 = vld [vmem:[%s8117_s30 + $0xc8] sm:$0xff]  ;;  %v6446_v53 = vld [vmem:[%s8117_s30 + $0xd0] sm:$0xff] }
 0x73e   : >> { %6443 = vst [vmem:[%s8113_s11 + $0xc0] sm:$0xff] %v6442_v52  ;;  %6445 = vst [vmem:[%s8113_s11 + $0xc8] sm:$0xff] %v6444_v3  ;;  %v6448_v42 = vld [vmem:[%s8117_s30 + $0xd8] sm:$0xff]  ;;  %v6450_v20 = vld [vmem:[%s8117_s30 + $0xe0] sm:$0xff] }
 0x73f   : >> { %6447 = vst [vmem:[%s8113_s11 + $0xd0] sm:$0xff] %v6446_v53  ;;  %v6452_v27 = vld [vmem:[%s8117_s30 + $0xe8] sm:$0xff]  ;;  %6449 = vst [vmem:[%s8113_s11 + $0xd8] sm:$0xff] %v6448_v42  ;;  %v6454_v29 = vld [vmem:[%s8117_s30 + $0xf0] sm:$0xff] }
 0x740   : >> { %6451 = vst [vmem:[%s8113_s11 + $0xe0] sm:$0xff] %v6450_v20  ;;  %6453 = vst [vmem:[%s8113_s11 + $0xe8] sm:$0xff] %v6452_v27  ;;  %v6456_v1 = vld [vmem:[%s8117_s30 + $0xf8] sm:$0xff]  ;;  %v6458_v59 = vld [vmem:[%s8117_s30 + $0x100] sm:$0xff] }
 0x741   : >> { %6455 = vst [vmem:[%s8113_s11 + $0xf0] sm:$0xff] %v6454_v29  ;;  %6457 = vst [vmem:[%s8113_s11 + $0xf8] sm:$0xff] %v6456_v1  ;;  %v6460_v35 = vld [vmem:[%s8117_s30 + $0x108] sm:$0xff]  ;;  %v6462_v4 = vld [vmem:[%s8117_s30 + $0x110] sm:$0xff] }
 0x742   : >> { %6459 = vst [vmem:[%s8113_s11 + $0x100] sm:$0xff] %v6458_v59  ;;  %v6464_v38 = vld [vmem:[%s8117_s30 + $0x118] sm:$0xff]  ;;  %6461 = vst [vmem:[%s8113_s11 + $0x108] sm:$0xff] %v6460_v35  ;;  %v6466_v31 = vld [vmem:[%s8117_s30 + $0x120] sm:$0xff] }
 0x743   : >> { %6463 = vst [vmem:[%s8113_s11 + $0x110] sm:$0xff] %v6462_v4  ;;  %6465 = vst [vmem:[%s8113_s11 + $0x118] sm:$0xff] %v6464_v38  ;;  %v6468_v33 = vld [vmem:[%s8117_s30 + $0x128] sm:$0xff]  ;;  %v6470_v63 = vld [vmem:[%s8117_s30 + $0x130] sm:$0xff] }
 0x744   : >> { %6467 = vst [vmem:[%s8113_s11 + $0x120] sm:$0xff] %v6466_v31  ;;  %6469 = vst [vmem:[%s8113_s11 + $0x128] sm:$0xff] %v6468_v33  ;;  %v6472_v49 = vld [vmem:[%s8117_s30 + $0x138] sm:$0xff]  ;;  %v6474_v44 = vld [vmem:[%s8117_s30 + $0x140] sm:$0xff] }
 0x745   : >> { %6471 = vst [vmem:[%s8113_s11 + $0x130] sm:$0xff] %v6470_v63  ;;  %v6476_v6 = vld [vmem:[%s8117_s30 + $0x148] sm:$0xff]  ;;  %6473 = vst [vmem:[%s8113_s11 + $0x138] sm:$0xff] %v6472_v49  ;;  %v6478_v10 = vld [vmem:[%s8117_s30 + $0x150] sm:$0xff] }
 0x746   : >> { %6475 = vst [vmem:[%s8113_s11 + $0x140] sm:$0xff] %v6474_v44  ;;  %6477 = vst [vmem:[%s8113_s11 + $0x148] sm:$0xff] %v6476_v6  ;;  %v6480_v50 = vld [vmem:[%s8117_s30 + $0x158] sm:$0xff]  ;;  %v6482_v39 = vld [vmem:[%s8117_s30 + $0x160] sm:$0xff] }
 0x747   : >> { %6479 = vst [vmem:[%s8113_s11 + $0x150] sm:$0xff] %v6478_v10  ;;  %6481 = vst [vmem:[%s8113_s11 + $0x158] sm:$0xff] %v6480_v50  ;;  %v6484_v48 = vld [vmem:[%s8117_s30 + $0x168] sm:$0xff]  ;;  %v6486_v51 = vld [vmem:[%s8117_s30 + $0x170] sm:$0xff] }
 0x748   : >> { %6483 = vst [vmem:[%s8113_s11 + $0x160] sm:$0xff] %v6482_v39  ;;  %v6488_v37 = vld [vmem:[%s8117_s30 + $0x178] sm:$0xff]  ;;  %6485 = vst [vmem:[%s8113_s11 + $0x168] sm:$0xff] %v6484_v48  ;;  %v6490_v18 = vld [vmem:[%s8117_s30 + $0x180] sm:$0xff] }
 0x749   : >> { %6487 = vst [vmem:[%s8113_s11 + $0x170] sm:$0xff] %v6486_v51  ;;  %6489 = vst [vmem:[%s8113_s11 + $0x178] sm:$0xff] %v6488_v37  ;;  %v6492_v9 = vld [vmem:[%s8117_s30 + $0x188] sm:$0xff]  ;;  %v6494_v15 = vld [vmem:[%s8117_s30 + $0x190] sm:$0xff] }
 0x74a   : >> { %6491 = vst [vmem:[%s8113_s11 + $0x180] sm:$0xff] %v6490_v18  ;;  %6493 = vst [vmem:[%s8113_s11 + $0x188] sm:$0xff] %v6492_v9  ;;  %v6496_v36 = vld [vmem:[%s8117_s30 + $0x198] sm:$0xff]  ;;  %v6498_v8 = vld [vmem:[%s8117_s30 + $0x1a0] sm:$0xff] }
 0x74b   : >> { %6495 = vst [vmem:[%s8113_s11 + $0x190] sm:$0xff] %v6494_v15  ;;  %v6500_v22 = vld [vmem:[%s8117_s30 + $0x1a8] sm:$0xff]  ;;  %6497 = vst [vmem:[%s8113_s11 + $0x198] sm:$0xff] %v6496_v36  ;;  %v6502_v13 = vld [vmem:[%s8117_s30 + $0x1b0] sm:$0xff]  ;;  %6390 = sbr.rel (!%p6387_p12) target bundleno = 1841 (0x731), region = 160 }
 0x74c   : >> { %6499 = vst [vmem:[%s8113_s11 + $0x1a0] sm:$0xff] %v6498_v8  ;;  %6501 = vst [vmem:[%s8113_s11 + $0x1a8] sm:$0xff] %v6500_v22  ;;  %v6504_v14 = vld [vmem:[%s8117_s30 + $0x1b8] sm:$0xff]  ;;  %v6506_v32 = vld [vmem:[%s8117_s30 + $0x1c0] sm:$0xff] }
 0x74d   : >> { %6503 = vst [vmem:[%s8113_s11 + $0x1b0] sm:$0xff] %v6502_v13  ;;  %6505 = vst [vmem:[%s8113_s11 + $0x1b8] sm:$0xff] %v6504_v14  ;;  %v6508_v25 = vld [vmem:[%s8117_s30 + $0x1c8] sm:$0xff]  ;;  %v6510_v58 = vld [vmem:[%s8117_s30 + $0x1d0] sm:$0xff] }
 0x74e   : >> { %6507 = vst [vmem:[%s8113_s11 + $0x1c0] sm:$0xff] %v6506_v32  ;;  %v6512_v60 = vld [vmem:[%s8117_s30 + $0x1d8] sm:$0xff]  ;;  %6509 = vst [vmem:[%s8113_s11 + $0x1c8] sm:$0xff] %v6508_v25  ;;  %v6514_v54 = vld [vmem:[%s8117_s30 + $0x1e0] sm:$0xff] }
 0x74f   : >> { %6511 = vst [vmem:[%s8113_s11 + $0x1d0] sm:$0xff] %v6510_v58  ;;  %6513 = vst [vmem:[%s8113_s11 + $0x1d8] sm:$0xff] %v6512_v60  ;;  %v6516_v40 = vld [vmem:[%s8117_s30 + $0x1e8] sm:$0xff]  ;;  %v6518_v21 = vld [vmem:[%s8117_s30 + $0x1f0] sm:$0xff] }
 0x750   : >> { %6515 = vst [vmem:[%s8113_s11 + $0x1e0] sm:$0xff] %v6514_v54  ;;  %6517 = vst [vmem:[%s8113_s11 + $0x1e8] sm:$0xff] %v6516_v40  ;;  %v6520_v46 = vld [vmem:[%s8117_s30 + $0x1f8] sm:$0xff]  ;;  %s12644_s30 = smov %s11725_s19 }
 0x751   : >> { %6519 = vst [vmem:[%s8113_s11 + $0x1f0] sm:$0xff] %v6518_v21  ;;  %6521 = vst [vmem:[%s8113_s11 + $0x1f8] sm:$0xff] %v6520_v46  ;;  %s12643_s11 = smov %s11728_s20 }
 0x752 PF: > { %s11833_s22 = sand.u32 63, %s12650_s21   ;;  %s6945_s25 = sshll.u32 %s11658_s14, 9 }
 0x753   : > { %s6533_s27 = scalar_lea.vmem %s11355_s23, %s6945_s25 [#allocation3]   ;;  %s6535_s13 = scalar_lea.vmem %s11652_s28, %s6945_s25  }
 0x754   : > { %p6939_p13 = scmp.le.s32.totalorder %s11833_s22, 0 }
 0x755   : > { %s8127_s17 = smov (!%p6939_p13), %s6535_s13   ;;  %s8131_s19 = smov (!%p6939_p13), %s6533_s27  }
 0x756   : > { %6626 = sbr.rel (%p6939_p13) target bundleno = 1895 (0x767), region = 165  ;;  %s8135_s20 = smov (!%p6939_p13), 0  }
 0x757   : > { %s8139_s16 = smov (!%p6939_p13), 0  }
 0x75d LB: >> { %v6545_v30 = vld [vmem:[%s8133_s19] sm:$0xff]  ;;  %s6547_s21 = sadd.s32 1, %s8137_s20  ;;  %s6539_s16 = sadd.s32 1, %s8141_s16   ;;  %s8141_s16 = sphi %s8139_s16, %s6539_s16   ;;  %s8137_s20 = sphi %s8135_s20, %s8136_s20   ;;  %s8133_s19 = sphi %s8131_s19, %s6552_s19   ;;  %s8129_s17 = sphi %s8127_s17, %s6553_s17  }
 0x75e   : >> { %6546 = vst [vmem:[%s8129_s17] sm:$0xff] %v6545_v30  ;;  %p6548_p0 = scmp.ge.s32.totalorder %s6547_s21, %s11833_s22  ;;  %p6538_p1 = scmp.ge.s32.totalorder %s6539_s16, %s11833_s22 }
 0x760   : >> { %s12654_s21 = smov (%p6548_p0, %s6547_s21), 0  ;;  %6541 = sbr.rel (!%p6538_p1) target bundleno = 1885 (0x75d), region = 171 }
 0x761   : >> { %s6940_s23 = sshll.u32 %s12654_s21, 3  ;;  %s8136_s20 = smov %s12654_s21  }
 0x762   : >> { %s6552_s19 = scalar_lea.vmem %s6533_s27, %s6940_s23 [#allocation3]   ;;  %s6553_s17 = scalar_lea.vmem %s6535_s13, %s6940_s23  }
 0x767 PF: > { %p20_p2 = scmp.ge.s32.totalorder %s8227_s26, 4   ;;  %s12646_s23 = smov %s8105_s24 }
 0x768   : > { %s12647_s24 = smov %s8235_s29  ;;  %s12648_s25 = smov %s8227_s26 }
 0x769   :  { %22 = sbr.rel (!%p20_p2) target bundleno = 4 (0x4), region = 182 }

</bundles_post_ra>
